<compile_context>
chip_gen: v6e
topology: v6e:2x2x1
jax: 0.10.0
libtpu: 0.0.40
codegen_flags: <defaults>
</compile_context>

<pallas_src>
import functools

import jax
import jax.numpy as jnp
from jax import lax
from jax.experimental import pallas as pl
from jax.experimental.pallas import tpu as pltpu

EPS = 1e-5  # torch.nn.LayerNorm default


def _layernorm_f32(x, gamma, beta):
    x = x.astype(jnp.float32)
    mean = jnp.mean(x, axis=-1, keepdims=True)
    xc = x - mean
    var = jnp.mean(xc * xc, axis=-1, keepdims=True)
    return xc * lax.rsqrt(var + EPS) * gamma + beta


# ---------------------------------------------------------------------------
# Fused kernel: phase 1 (j < n1_tiles) builds h1 tile-by-tile; phase 2
# (j >= n1_tiles) streams W2 column tiles and accumulates the (B, 1) output.
# ---------------------------------------------------------------------------
def _make_fused_kernel(n1_tiles, n2_tiles, tn):
    del n2_tiles, tn  # only n1_tiles (the phase boundary) is needed in-body

    def kernel(x_ref, g1_ref, b1g_ref, w1_ref, b1_ref,
               g2_ref, b2g_ref, w2_ref, b2_ref, w3_ref, b3_ref,
               o_ref, ln1_sc, h1_sc, ln2_sc):
        j = pl.program_id(0)

        # ---- step 0: hoisted LN1(x) (cast to bf16 for the MXU) + out init ----
        @pl.when(j == 0)
        def _():
            ln = _layernorm_f32(x_ref[...], g1_ref[...], b1g_ref[...])
            ln1_sc[...] = ln.astype(jnp.bfloat16)
            o_ref[...] = jnp.broadcast_to(b3_ref[...], o_ref.shape)

        # ---- phase 1: h1 tile = relu(LN1(x) @ W1[:, tile] + b1) --------------
        @pl.when(j < n1_tiles)
        def _():
            y = jnp.dot(ln1_sc[...], w1_ref[...],
                        preferred_element_type=jnp.float32) + b1_ref[...]
            h1_sc[j] = jnp.maximum(y, 0.0)          # f32 scratch, tile j

        # ---- phase boundary: hoisted LN2(h1) ---------------------------------
        @pl.when(j == n1_tiles)
        def _():
            h1 = jnp.concatenate([h1_sc[t] for t in range(n1_tiles)], axis=-1)
            ln = _layernorm_f32(h1, g2_ref[...], b2g_ref[...])
            ln2_sc[...] = ln.astype(jnp.bfloat16)

        # ---- phase 2: accumulate (relu(LN2(h1) @ W2 tile + b2)) . W3 tile ----
        @pl.when(j >= n1_tiles)
        def _():
            h2 = jnp.maximum(
                jnp.dot(ln2_sc[...], w2_ref[...],
                        preferred_element_type=jnp.float32) + b2_ref[...],
                0.0)
            partial = jnp.sum(h2 * w3_ref[...], axis=-1, keepdims=True)  # (B,1)
            o_ref[...] += partial

    return kernel


def guardrail_core(x, p, *, tn=1024):
    B, D = x.shape
    N1 = p["w1"].shape[1]
    H, N2 = p["w2"].shape
    assert N1 == H and N1 % tn == 0 and N2 % tn == 0
    n1_tiles = N1 // tn
    n2_tiles = N2 // tn
    grid = (n1_tiles + n2_tiles,)

    kernel = _make_fused_kernel(n1_tiles, n2_tiles, tn)

    fixed = lambda j: (0, 0)
    # Phase 1 tiles W1/b1; during phase 2 the index is clamped (no re-DMA).
    w1_map = lambda j: (0, jnp.minimum(j, n1_tiles - 1))
    # Phase 2 tiles W2/b2/W3^T; during phase 1 index stays 0 (free prefetch).
    w2_map = lambda j: (0, jnp.maximum(j - n1_tiles, 0))

    return pl.pallas_call(
        kernel,
        out_shape=jax.ShapeDtypeStruct((B, 1), jnp.float32),
        grid_spec=pltpu.PrefetchScalarGridSpec(
            num_scalar_prefetch=0,
            grid=grid,
            in_specs=[
                pl.BlockSpec((B, D), fixed),       # x
                pl.BlockSpec((1, D), fixed),       # LN1 gamma
                pl.BlockSpec((1, D), fixed),       # LN1 beta
                pl.BlockSpec((D, tn), w1_map),     # W1 column tile (bf16)
                pl.BlockSpec((1, tn), w1_map),     # b1 tile
                pl.BlockSpec((1, H), fixed),       # LN2 gamma
                pl.BlockSpec((1, H), fixed),       # LN2 beta
                pl.BlockSpec((H, tn), w2_map),     # W2 column tile (bf16)
                pl.BlockSpec((1, tn), w2_map),     # b2 tile
                pl.BlockSpec((1, tn), w2_map),     # W3^T tile
                pl.BlockSpec((1, 1), fixed),       # b3 scalar
            ],
            out_specs=pl.BlockSpec((B, 1), fixed),
            scratch_shapes=[
                pltpu.VMEM((B, D), jnp.bfloat16),            # hoisted LN1(x)
                pltpu.VMEM((n1_tiles, B, tn), jnp.float32),  # h1 tiles
                pltpu.VMEM((B, H), jnp.bfloat16),            # hoisted LN2(h1)
            ]),
        compiler_params=pltpu.CompilerParams(
            dimension_semantics=("arbitrary",),
            vmem_limit_bytes=32 * 1024 * 1024),
    )(x, p["ln1_g"], p["ln1_b"], p["w1"], p["b1"],
      p["ln2_g"], p["ln2_b"], p["w2"], p["b2"], p["w3_t"], p["b3"])


# ---------------------------------------------------------------------------
# Module wrapper
# ---------------------------------------------------------------------------
def init_params(key, dim=768, hidden=3072):
    ks = jax.random.split(key, 6)
    s1 = 1.0 / jnp.sqrt(dim)
    s2 = 1.0 / jnp.sqrt(hidden)
    return {
        # LayerNorm(dim): default init gamma=1, beta=0
        "ln1_g": jnp.ones((1, dim), jnp.float32),
        "ln1_b": jnp.zeros((1, dim), jnp.float32),
        # Linear(dim, hidden) stored (in, out); streamed in bf16
        "w1": jax.random.uniform(ks[0], (dim, hidden), jnp.float32, -s1, s1
                                 ).astype(jnp.bfloat16),
        "b1": jax.random.uniform(ks[1], (1, hidden), jnp.float32, -s1, s1),
        # LayerNorm(hidden)
        "ln2_g": jnp.ones((1, hidden), jnp.float32),
        "ln2_b": jnp.zeros((1, hidden), jnp.float32),
        # Linear(hidden, hidden); streamed in bf16
        "w2": jax.random.uniform(ks[2], (hidden, hidden), jnp.float32, -s2, s2
                                 ).astype(jnp.bfloat16),
        "b2": jax.random.uniform(ks[3], (1, hidden), jnp.float32, -s2, s2),
        # Linear(hidden, 1) -- stored transposed as (1, hidden), kept f32 (12 KiB)
        "w3_t": jax.random.uniform(ks[4], (1, hidden), jnp.float32, -s2, s2),
        "b3": jax.random.uniform(ks[5], (1, 1), jnp.float32, -s2, s2),
        # unused in forward, kept for parity with the PyTorch module
        "scale_factor": jnp.asarray(10.0, jnp.float32),
    }


@functools.partial(jax.jit, static_argnames=("tn",))
def _guardrails_jit(params, query_input, tn=1024):
    # Drop params unused by forward so jit doesn't complain about dead inputs.
    p = {k: v for k, v in params.items() if k != "scale_factor"}
    return guardrail_core(query_input, p, tn=tn)


def guardrail_forward(params, query_input, item_input=None, *, tn=1024):
    """Matches CosineNormalizerScalerOffset.forward (eval mode).

    The output pytree is assembled OUTSIDE jit so q_emb is the exact input
    object and p_emb passes through untouched, mirroring GuardrailOutput.
    """
    guardrails = _guardrails_jit(params, query_input, tn=tn)
    return {"q_emb": query_input, "p_emb": item_input, "guardrails": guardrails}


def reference_forward(params, x):
    # Same numerics as the kernel: bf16 weights + bf16 MXU inputs, f32 accumulate.
    ln1 = _layernorm_f32(x, params["ln1_g"], params["ln1_b"]).astype(jnp.bfloat16)
    h1 = jnp.maximum(jnp.dot(ln1, params["w1"],
                             preferred_element_type=jnp.float32)
                     + params["b1"], 0.0)
    ln2 = _layernorm_f32(h1, params["ln2_g"], params["ln2_b"]).astype(jnp.bfloat16)
    h2 = jnp.maximum(jnp.dot(ln2, params["w2"],
                             preferred_element_type=jnp.float32)
                     + params["b2"], 0.0)
    return h2 @ params["w3_t"].T + params["b3"]


if __name__ == "__main__":
    B, DIM, HIDDEN = 8, 768, 3072
    key = jax.random.PRNGKey(0)
    pkey, xkey = jax.random.split(key)
    params = init_params(pkey, dim=DIM, hidden=HIDDEN)
    x = jax.random.normal(xkey, (B, DIM), jnp.float32)

    out = guardrail_forward(params, x)
    guardrails = jax.block_until_ready(out["guardrails"])
    assert guardrails.shape == (B, 1)
    assert out["q_emb"] is x and out["p_emb"] is None

    ref = reference_forward(params, x)
    assert jnp.allclose(guardrails, ref, rtol=2e-3, atol=2e-3), (
        "mismatch vs reference")

    print("KERNEL_OK")
</pallas_src>

<mosaic_0001>
module attributes {stable_mosaic.version = 11 : i64} {
  func.func @kernel(%arg0: i32, %arg1: memref<8x768xf32, #tpu.memory_space<vmem>>, %arg2: memref<1x768xf32, #tpu.memory_space<vmem>>, %arg3: memref<1x768xf32, #tpu.memory_space<vmem>>, %arg4: memref<768x1024xbf16, #tpu.memory_space<vmem>>, %arg5: memref<1x1024xf32, #tpu.memory_space<vmem>>, %arg6: memref<1x3072xf32, #tpu.memory_space<vmem>>, %arg7: memref<1x3072xf32, #tpu.memory_space<vmem>>, %arg8: memref<3072x1024xbf16, #tpu.memory_space<vmem>>, %arg9: memref<1x1024xf32, #tpu.memory_space<vmem>>, %arg10: memref<1x1024xf32, #tpu.memory_space<vmem>>, %arg11: memref<1x1xf32, #tpu.memory_space<vmem>>, %arg12: memref<8x1xf32, #tpu.memory_space<vmem>>, %arg13: memref<8x768xbf16, #tpu.memory_space<vmem>>, %arg14: memref<3x8x1024xf32, #tpu.memory_space<vmem>>, %arg15: memref<8x3072xbf16, #tpu.memory_space<vmem>>) attributes {dimension_semantics = [#tpu.dimension_semantics<arbitrary>], iteration_bounds = array<i64: 6>, scalar_prefetch = 0 : i64, scratch_operands = 3 : i64, tpu.core_type = #tpu.core_type<tc>, window_params = [{pipeline_mode = #tpu.pipeline_mode<synchronous>, transform_indices = @transform_0, window_bounds = array<i64: 8, 768>}, {pipeline_mode = #tpu.pipeline_mode<synchronous>, transform_indices = @transform_1, window_bounds = array<i64: 1, 768>}, {pipeline_mode = #tpu.pipeline_mode<synchronous>, transform_indices = @transform_2, window_bounds = array<i64: 1, 768>}, {transform_indices = @transform_3, window_bounds = array<i64: 768, 1024>}, {transform_indices = @transform_4, window_bounds = array<i64: 1, 1024>}, {pipeline_mode = #tpu.pipeline_mode<synchronous>, transform_indices = @transform_5, window_bounds = array<i64: 1, 3072>}, {pipeline_mode = #tpu.pipeline_mode<synchronous>, transform_indices = @transform_6, window_bounds = array<i64: 1, 3072>}, {transform_indices = @transform_7, window_bounds = array<i64: 3072, 1024>}, {transform_indices = @transform_8, window_bounds = array<i64: 1, 1024>}, {transform_indices = @transform_9, window_bounds = array<i64: 1, 1024>}, {pipeline_mode = #tpu.pipeline_mode<synchronous>, transform_indices = @transform_10, window_bounds = array<i64: 1, 1>}, {pipeline_mode = #tpu.pipeline_mode<synchronous>, transform_indices = @transform_11, window_bounds = array<i64: 8, 1>}]} {
    %c0_i32 = arith.constant 0 : i32
    %0 = arith.cmpi eq, %arg0, %c0_i32 : i32
    %1 = arith.extui %0 : i1 to i32
    %c0_i32_0 = arith.constant 0 : i32
    %2 = arith.cmpi ne, %1, %c0_i32_0 : i32
    scf.if %2 {
      %c0 = arith.constant 0 : index
      %c0_6 = arith.constant 0 : index
      %12 = vector.load %arg1[%c0, %c0_6] : memref<8x768xf32, #tpu.memory_space<vmem>>, vector<8x768xf32>
      %c0_7 = arith.constant 0 : index
      %c0_8 = arith.constant 0 : index
      %13 = vector.load %arg2[%c0_7, %c0_8] : memref<1x768xf32, #tpu.memory_space<vmem>>, vector<1x768xf32>
      %c0_9 = arith.constant 0 : index
      %c0_10 = arith.constant 0 : index
      %14 = vector.load %arg3[%c0_9, %c0_10] : memref<1x768xf32, #tpu.memory_space<vmem>>, vector<1x768xf32>
      %cst = arith.constant dense<0.000000e+00> : vector<8xf32>
      %15 = vector.multi_reduction <add>, %12, %cst [1] : vector<8x768xf32> to vector<8xf32>
      %16 = vector.shape_cast %15 : vector<8xf32> to vector<8x1xf32>
      %cst_11 = arith.constant 7.680000e+02 : f32
      %17 = vector.broadcast %cst_11 : f32 to vector<8x1xf32>
      %18 = arith.divf %16, %17 : vector<8x1xf32>
      %19 = vector.broadcast %18 : vector<8x1xf32> to vector<8x768xf32>
      %20 = arith.subf %12, %19 : vector<8x768xf32>
      %21 = arith.mulf %20, %20 : vector<8x768xf32>
      %cst_12 = arith.constant dense<0.000000e+00> : vector<8xf32>
      %22 = vector.multi_reduction <add>, %21, %cst_12 [1] : vector<8x768xf32> to vector<8xf32>
      %23 = vector.shape_cast %22 : vector<8xf32> to vector<8x1xf32>
      %cst_13 = arith.constant 7.680000e+02 : f32
      %24 = vector.broadcast %cst_13 : f32 to vector<8x1xf32>
      %25 = arith.divf %23, %24 : vector<8x1xf32>
      %cst_14 = arith.constant 9.99999974E-6 : f32
      %26 = vector.broadcast %cst_14 : f32 to vector<8x1xf32>
      %27 = arith.addf %25, %26 : vector<8x1xf32>
      %28 = math.rsqrt %27 : vector<8x1xf32>
      %29 = vector.broadcast %28 : vector<8x1xf32> to vector<8x768xf32>
      %30 = arith.mulf %20, %29 : vector<8x768xf32>
      %31 = vector.broadcast %13 : vector<1x768xf32> to vector<8x768xf32>
      %32 = arith.mulf %30, %31 : vector<8x768xf32>
      %33 = vector.broadcast %14 : vector<1x768xf32> to vector<8x768xf32>
      %34 = arith.addf %32, %33 : vector<8x768xf32>
      %35 = arith.truncf %34 : vector<8x768xf32> to vector<8x768xbf16>
      %c0_15 = arith.constant 0 : index
      %c0_16 = arith.constant 0 : index
      %36 = vector.load %arg13[%c0_15, %c0_16] : memref<8x768xbf16, #tpu.memory_space<vmem>>, vector<8x768xbf16>
      tpu.vector_store %arg13[%c0_15, %c0_16], %35 {strides = array<i32>} : memref<8x768xbf16, #tpu.memory_space<vmem>>, vector<8x768xbf16>,
      %c0_17 = arith.constant 0 : index
      %c0_18 = arith.constant 0 : index
      %37 = vector.load %arg11[%c0_17, %c0_18] : memref<1x1xf32, #tpu.memory_space<vmem>>, vector<1x1xf32>
      %38 = vector.shape_cast %37 : vector<1x1xf32> to vector<1x1xf32>
      %39 = vector.broadcast %38 : vector<1x1xf32> to vector<8x1xf32>
      %c0_19 = arith.constant 0 : index
      %c0_20 = arith.constant 0 : index
      %40 = vector.load %arg12[%c0_19, %c0_20] : memref<8x1xf32, #tpu.memory_space<vmem>>, vector<8x1xf32>
      tpu.vector_store %arg12[%c0_19, %c0_20], %39 {strides = array<i32>} : memref<8x1xf32, #tpu.memory_space<vmem>>, vector<8x1xf32>,
    } else {
    }
    %c3_i32 = arith.constant 3 : i32
    %3 = arith.cmpi slt, %arg0, %c3_i32 : i32
    %4 = arith.extui %3 : i1 to i32
    %c0_i32_1 = arith.constant 0 : i32
    %5 = arith.cmpi ne, %4, %c0_i32_1 : i32
    scf.if %5 {
      %c0 = arith.constant 0 : index
      %c0_6 = arith.constant 0 : index
      %12 = vector.load %arg13[%c0, %c0_6] : memref<8x768xbf16, #tpu.memory_space<vmem>>, vector<8x768xbf16>
      %c0_7 = arith.constant 0 : index
      %c0_8 = arith.constant 0 : index
      %13 = vector.load %arg4[%c0_7, %c0_8] : memref<768x1024xbf16, #tpu.memory_space<vmem>>, vector<768x1024xbf16>
      %cst = arith.constant dense<0.000000e+00> : vector<8x1024xf32>
      %14 = tpu.matmul %12, %13, %cst {dimension_numbers = #tpu.dot_dimension_numbers<[1], [0], [0], [1], [0, 0, 1, 1], [], []>} : vector<8x768xbf16>, vector<768x1024xbf16>, vector<8x1024xf32> -> vector<8x1024xf32>
      %c0_9 = arith.constant 0 : index
      %c0_10 = arith.constant 0 : index
      %15 = vector.load %arg5[%c0_9, %c0_10] : memref<1x1024xf32, #tpu.memory_space<vmem>>, vector<1x1024xf32>
      %16 = vector.broadcast %15 : vector<1x1024xf32> to vector<8x1024xf32>
      %17 = arith.addf %14, %16 : vector<8x1024xf32>
      %cst_11 = arith.constant 0.000000e+00 : f32
      %18 = vector.broadcast %cst_11 : f32 to vector<8x1024xf32>
      %19 = arith.maximumf %17, %18 : vector<8x1024xf32>
      %20 = arith.index_cast %arg0 : i32 to index
      %c0_12 = arith.constant 0 : index
      %c0_13 = arith.constant 0 : index
      %21 = vector.load %arg14[%20, %c0_12, %c0_13] : memref<3x8x1024xf32, #tpu.memory_space<vmem>>, vector<1x8x1024xf32>
      %22 = vector.shape_cast %21 : vector<1x8x1024xf32> to vector<8x1024xf32>
      %23 = vector.shape_cast %19 : vector<8x1024xf32> to vector<1x8x1024xf32>
      tpu.vector_store %arg14[%20, %c0_12, %c0_13], %23 {strides = array<i32>} : memref<3x8x1024xf32, #tpu.memory_space<vmem>>, vector<1x8x1024xf32>,
    } else {
    }
    %c3_i32_2 = arith.constant 3 : i32
    %6 = arith.cmpi eq, %arg0, %c3_i32_2 : i32
    %7 = arith.extui %6 : i1 to i32
    %c0_i32_3 = arith.constant 0 : i32
    %8 = arith.cmpi ne, %7, %c0_i32_3 : i32
    scf.if %8 {
      %c0 = arith.constant 0 : index
      %c0_6 = arith.constant 0 : index
      %c0_7 = arith.constant 0 : index
      %12 = vector.load %arg14[%c0, %c0_6, %c0_7] : memref<3x8x1024xf32, #tpu.memory_space<vmem>>, vector<1x8x1024xf32>
      %13 = vector.shape_cast %12 : vector<1x8x1024xf32> to vector<8x1024xf32>
      %c1 = arith.constant 1 : index
      %c0_8 = arith.constant 0 : index
      %c0_9 = arith.constant 0 : index
      %14 = vector.load %arg14[%c1, %c0_8, %c0_9] : memref<3x8x1024xf32, #tpu.memory_space<vmem>>, vector<1x8x1024xf32>
      %15 = vector.shape_cast %14 : vector<1x8x1024xf32> to vector<8x1024xf32>
      %c2 = arith.constant 2 : index
      %c0_10 = arith.constant 0 : index
      %c0_11 = arith.constant 0 : index
      %16 = vector.load %arg14[%c2, %c0_10, %c0_11] : memref<3x8x1024xf32, #tpu.memory_space<vmem>>, vector<1x8x1024xf32>
      %17 = vector.shape_cast %16 : vector<1x8x1024xf32> to vector<8x1024xf32>
      %18 = tpu.concatenate %13, %15, %17 in 1 : vector<8x1024xf32>, vector<8x1024xf32>, vector<8x1024xf32> -> vector<8x3072xf32>
      %c0_12 = arith.constant 0 : index
      %c0_13 = arith.constant 0 : index
      %19 = vector.load %arg6[%c0_12, %c0_13] : memref<1x3072xf32, #tpu.memory_space<vmem>>, vector<1x3072xf32>
      %c0_14 = arith.constant 0 : index
      %c0_15 = arith.constant 0 : index
      %20 = vector.load %arg7[%c0_14, %c0_15] : memref<1x3072xf32, #tpu.memory_space<vmem>>, vector<1x3072xf32>
      %cst = arith.constant dense<0.000000e+00> : vector<8xf32>
      %21 = vector.multi_reduction <add>, %18, %cst [1] : vector<8x3072xf32> to vector<8xf32>
      %22 = vector.shape_cast %21 : vector<8xf32> to vector<8x1xf32>
      %cst_16 = arith.constant 3.072000e+03 : f32
      %23 = vector.broadcast %cst_16 : f32 to vector<8x1xf32>
      %24 = arith.divf %22, %23 : vector<8x1xf32>
      %25 = vector.broadcast %24 : vector<8x1xf32> to vector<8x3072xf32>
      %26 = arith.subf %18, %25 : vector<8x3072xf32>
      %27 = arith.mulf %26, %26 : vector<8x3072xf32>
      %cst_17 = arith.constant dense<0.000000e+00> : vector<8xf32>
      %28 = vector.multi_reduction <add>, %27, %cst_17 [1] : vector<8x3072xf32> to vector<8xf32>
      %29 = vector.shape_cast %28 : vector<8xf32> to vector<8x1xf32>
      %cst_18 = arith.constant 3.072000e+03 : f32
      %30 = vector.broadcast %cst_18 : f32 to vector<8x1xf32>
      %31 = arith.divf %29, %30 : vector<8x1xf32>
      %cst_19 = arith.constant 9.99999974E-6 : f32
      %32 = vector.broadcast %cst_19 : f32 to vector<8x1xf32>
      %33 = arith.addf %31, %32 : vector<8x1xf32>
      %34 = math.rsqrt %33 : vector<8x1xf32>
      %35 = vector.broadcast %34 : vector<8x1xf32> to vector<8x3072xf32>
      %36 = arith.mulf %26, %35 : vector<8x3072xf32>
      %37 = vector.broadcast %19 : vector<1x3072xf32> to vector<8x3072xf32>
      %38 = arith.mulf %36, %37 : vector<8x3072xf32>
      %39 = vector.broadcast %20 : vector<1x3072xf32> to vector<8x3072xf32>
      %40 = arith.addf %38, %39 : vector<8x3072xf32>
      %41 = arith.truncf %40 : vector<8x3072xf32> to vector<8x3072xbf16>
      %c0_20 = arith.constant 0 : index
      %c0_21 = arith.constant 0 : index
      %42 = vector.load %arg15[%c0_20, %c0_21] : memref<8x3072xbf16, #tpu.memory_space<vmem>>, vector<8x3072xbf16>
      tpu.vector_store %arg15[%c0_20, %c0_21], %41 {strides = array<i32>} : memref<8x3072xbf16, #tpu.memory_space<vmem>>, vector<8x3072xbf16>,
    } else {
    }
    %c3_i32_4 = arith.constant 3 : i32
    %9 = arith.cmpi sge, %arg0, %c3_i32_4 : i32
    %10 = arith.extui %9 : i1 to i32
    %c0_i32_5 = arith.constant 0 : i32
    %11 = arith.cmpi ne, %10, %c0_i32_5 : i32
    scf.if %11 {
      %c0 = arith.constant 0 : index
      %c0_6 = arith.constant 0 : index
      %12 = vector.load %arg15[%c0, %c0_6] : memref<8x3072xbf16, #tpu.memory_space<vmem>>, vector<8x3072xbf16>
      %c0_7 = arith.constant 0 : index
      %c0_8 = arith.constant 0 : index
      %13 = vector.load %arg8[%c0_7, %c0_8] : memref<3072x1024xbf16, #tpu.memory_space<vmem>>, vector<3072x1024xbf16>
      %cst = arith.constant dense<0.000000e+00> : vector<8x1024xf32>
      %14 = tpu.matmul %12, %13, %cst {dimension_numbers = #tpu.dot_dimension_numbers<[1], [0], [0], [1], [0, 0, 1, 1], [], []>} : vector<8x3072xbf16>, vector<3072x1024xbf16>, vector<8x1024xf32> -> vector<8x1024xf32>
      %c0_9 = arith.constant 0 : index
      %c0_10 = arith.constant 0 : index
      %15 = vector.load %arg9[%c0_9, %c0_10] : memref<1x1024xf32, #tpu.memory_space<vmem>>, vector<1x1024xf32>
      %16 = vector.broadcast %15 : vector<1x1024xf32> to vector<8x1024xf32>
      %17 = arith.addf %14, %16 : vector<8x1024xf32>
      %cst_11 = arith.constant 0.000000e+00 : f32
      %18 = vector.broadcast %cst_11 : f32 to vector<8x1024xf32>
      %19 = arith.maximumf %17, %18 : vector<8x1024xf32>
      %c0_12 = arith.constant 0 : index
      %c0_13 = arith.constant 0 : index
      %20 = vector.load %arg10[%c0_12, %c0_13] : memref<1x1024xf32, #tpu.memory_space<vmem>>, vector<1x1024xf32>
      %21 = vector.broadcast %20 : vector<1x1024xf32> to vector<8x1024xf32>
      %22 = arith.mulf %19, %21 : vector<8x1024xf32>
      %cst_14 = arith.constant dense<0.000000e+00> : vector<8xf32>
      %23 = vector.multi_reduction <add>, %22, %cst_14 [1] : vector<8x1024xf32> to vector<8xf32>
      %24 = vector.shape_cast %23 : vector<8xf32> to vector<8x1xf32>
      %c0_15 = arith.constant 0 : index
      %c0_16 = arith.constant 0 : index
      %25 = vector.load %arg12[%c0_15, %c0_16] : memref<8x1xf32, #tpu.memory_space<vmem>>, vector<8x1xf32>
      %26 = arith.addf %25, %24 : vector<8x1xf32>
      %c0_17 = arith.constant 0 : index
      %c0_18 = arith.constant 0 : index
      %27 = vector.load %arg12[%c0_17, %c0_18] : memref<8x1xf32, #tpu.memory_space<vmem>>, vector<8x1xf32>
      tpu.vector_store %arg12[%c0_17, %c0_18], %26 {strides = array<i32>} : memref<8x1xf32, #tpu.memory_space<vmem>>, vector<8x1xf32>,
    } else {
    }
    return
  }
  func.func @transform_0(%arg0: i32) -> (i32, i32) {
    %c0_i32 = arith.constant 0 : i32
    %c0_i32_0 = arith.constant 0 : i32
    %c0_i32_1 = arith.constant 0 : i32
    return %c0_i32, %c0_i32_0 : i32, i32
  }
  func.func @transform_1(%arg0: i32) -> (i32, i32) {
    %c0_i32 = arith.constant 0 : i32
    %c0_i32_0 = arith.constant 0 : i32
    %c0_i32_1 = arith.constant 0 : i32
    return %c0_i32, %c0_i32_0 : i32, i32
  }
  func.func @transform_2(%arg0: i32) -> (i32, i32) {
    %c0_i32 = arith.constant 0 : i32
    %c0_i32_0 = arith.constant 0 : i32
    %c0_i32_1 = arith.constant 0 : i32
    return %c0_i32, %c0_i32_0 : i32, i32
  }
  func.func @transform_3(%arg0: i32) -> (i32, i32) {
    %c2_i32 = arith.constant 2 : i32
    %0 = arith.minsi %arg0, %c2_i32 : i32
    %c0_i32 = arith.constant 0 : i32
    %c0_i32_0 = arith.constant 0 : i32
    return %c0_i32, %0 : i32, i32
  }
  func.func @transform_4(%arg0: i32) -> (i32, i32) {
    %c2_i32 = arith.constant 2 : i32
    %0 = arith.minsi %arg0, %c2_i32 : i32
    %c0_i32 = arith.constant 0 : i32
    %c0_i32_0 = arith.constant 0 : i32
    return %c0_i32, %0 : i32, i32
  }
  func.func @transform_5(%arg0: i32) -> (i32, i32) {
    %c0_i32 = arith.constant 0 : i32
    %c0_i32_0 = arith.constant 0 : i32
    %c0_i32_1 = arith.constant 0 : i32
    return %c0_i32, %c0_i32_0 : i32, i32
  }
  func.func @transform_6(%arg0: i32) -> (i32, i32) {
    %c0_i32 = arith.constant 0 : i32
    %c0_i32_0 = arith.constant 0 : i32
    %c0_i32_1 = arith.constant 0 : i32
    return %c0_i32, %c0_i32_0 : i32, i32
  }
  func.func @transform_7(%arg0: i32) -> (i32, i32) {
    %c3_i32 = arith.constant 3 : i32
    %0 = arith.subi %arg0, %c3_i32 : i32
    %c0_i32 = arith.constant 0 : i32
    %1 = arith.maxsi %0, %c0_i32 : i32
    %c0_i32_0 = arith.constant 0 : i32
    %c0_i32_1 = arith.constant 0 : i32
    return %c0_i32_0, %1 : i32, i32
  }
  func.func @transform_8(%arg0: i32) -> (i32, i32) {
    %c3_i32 = arith.constant 3 : i32
    %0 = arith.subi %arg0, %c3_i32 : i32
    %c0_i32 = arith.constant 0 : i32
    %1 = arith.maxsi %0, %c0_i32 : i32
    %c0_i32_0 = arith.constant 0 : i32
    %c0_i32_1 = arith.constant 0 : i32
    return %c0_i32_0, %1 : i32, i32
  }
  func.func @transform_9(%arg0: i32) -> (i32, i32) {
    %c3_i32 = arith.constant 3 : i32
    %0 = arith.subi %arg0, %c3_i32 : i32
    %c0_i32 = arith.constant 0 : i32
    %1 = arith.maxsi %0, %c0_i32 : i32
    %c0_i32_0 = arith.constant 0 : i32
    %c0_i32_1 = arith.constant 0 : i32
    return %c0_i32_0, %1 : i32, i32
  }
  func.func @transform_10(%arg0: i32) -> (i32, i32) {
    %c0_i32 = arith.constant 0 : i32
    %c0_i32_0 = arith.constant 0 : i32
    %c0_i32_1 = arith.constant 0 : i32
    return %c0_i32, %c0_i32_0 : i32, i32
  }
  func.func @transform_11(%arg0: i32) -> (i32, i32) {
    %c0_i32 = arith.constant 0 : i32
    %c0_i32_0 = arith.constant 0 : i32
    %c0_i32_1 = arith.constant 0 : i32
    return %c0_i32, %c0_i32_0 : i32, i32
  }
}

</mosaic_0001>

<bundles_post_ra>
// kernel: _guardrails_jit.1
= control target key start
LH: loop header
LB: loop body
LE: loop exit
PB: predicated region body
PF: predicated region fallthrough
CT: control target
= control target key end

     0   :  { %s21736_s0 = inlined_call_operand.hbm [shape: f32[8,768], index: 0, kind: input, shape index: {}]   ;;  %s21737_s1 = inlined_call_operand.hbm [shape: f32[1,768], index: 1, kind: input, shape index: {}]   ;;  %s21738_s2 = inlined_call_operand.hbm [shape: f32[1,768], index: 2, kind: input, shape index: {}]   ;;  %s21739_s3 = inlined_call_operand.hbm [shape: bf16[768,3072], index: 3, kind: input, shape index: {}]   ;;  %s21740_s4 = inlined_call_operand.hbm [shape: f32[1,3072], index: 4, kind: input, shape index: {}]   ;;  %s21741_s5 = inlined_call_operand.hbm [shape: f32[1,3072], index: 5, kind: input, shape index: {}]   ;;  %s21742_s6 = inlined_call_operand.hbm [shape: f32[1,3072], index: 6, kind: input, shape index: {}]   ;;  %s21743_s7 = inlined_call_operand.hbm [shape: bf16[3072,3072], index: 7, kind: input, shape index: {}]   ;;  %s21744_s8 = inlined_call_operand.hbm [shape: f32[1,3072], index: 8, kind: input, shape index: {}]   ;;  %s21745_s9 = inlined_call_operand.hbm [shape: f32[1,3072], index: 9, kind: input, shape index: {}]   ;;  %s21746_s10 = inlined_call_operand.<no memory space> [shape: f32[1,1], index: 10, kind: input, shape index: {}]   ;;  %s21747_s11 = inlined_call_operand.vmem [shape: f32[8,1], index: 11, kind: output, shape index: {}]  }
   0x1   :  { %21779 = sst [smem:[#allocation36_spill]] %s21737_s1  ;;  %v16_v0 = vstv %s21746_s10 }
   0x2   :  { %21780 = sst [smem:[#allocation37_spill]] %s21739_s3  ;;  %17 = vst [vmem:[#allocation5] sm:$0x1] %v16_v0 }
   0x3   :  { %21781 = sst [smem:[#allocation38_spill]] %s21741_s5 }
   0x4   :  { %21782 = sst [smem:[#allocation39_spill]] %s21747_s11 }
   0x5   :  { %18 = vsyncpa [#allocation7], 0 }
   0x6   :  { %19 = vsyncpa [#allocation9], 0 }
   0x7   :  { %20 = vsyncpa [#allocation12], 0 }
   0x8   :  { %22 = vsyncpa [#allocation12 + $0x1], 0 }
   0x9   :  { %23 = vsyncpa [#allocation15], 0 }
   0xa   :  { %24 = vsyncpa [#allocation18], 0 }
   0xb   :  { %26 = vsyncpa [#allocation18 + $0x1], 0 }
   0xc   :  { %27 = vsyncpa [#allocation21], 0 }
   0xd   :  { %29 = vsyncpa [#allocation21 + $0x1], 0  ;;  %s18486_s19 = smov 0   ;;  %s18488_s20 = smov 0  }
   0xe   :  { %s18490_s21 = smov 0   ;;  %s18492_s22 = smov 0  }
   0xf   :  { %s18494_s23 = smov 0   ;;  %s18496_s10 = smov 0  }
  0x10   :  { %s18498_s24 = smov 0  }
  0x11 LB: > { %21783 = sst [smem:[#allocation28_spill]] %s18388_s20  ;;  %s18410_s25 = smov [#allocation8]   ;;  %s18408_s24 = sphi %s18498_s24, %s21868_s24   ;;  %s18404_s10 = sphi %s18496_s10, %s21875_s10   ;;  %s18400_s23 = sphi %s18494_s23, %s21874_s23   ;;  %s18396_s22 = sphi %s18492_s22, %s21872_s22   ;;  %s18392_s21 = sphi %s18490_s21, %s21871_s21   ;;  %s18388_s20 = sphi %s18488_s20, %s21870_s20   ;;  %s18384_s19 = sphi %s18486_s19, %s21869_s19  }
  0x12   : > { %21784 = sst [smem:[#allocation29_spill]] %s18392_s21  ;;  %s367_s26 = sshll.u32 %s18410_s25, 4  ;;  %s368_s26 = int_to_ptr.vmem [resolvable:$true] %s367_s26 }
  0x13   : > { %21785 = sst [smem:[#allocation30_spill]] %s18400_s23  ;;  %s18522_s27 = sadd.s32 4294967295, %s18408_s24  }
  0x14   : > { %p15852_p0 = scmp.ge.s32.totalorder %s18408_s24, 1  ;;  %p21748_p1 = scmp.eq.s32.totalorder %s18522_s27, 0 }
  0x15   : > { %p343_p2 = scmp.lt.s32.totalorder %s18408_s24, 7  ;;  %s18411_s29 = smov [#allocation14]  }
  0x16   : > { %s389_s30 = sshll.u32 %s18411_s29, 4  ;;  %s18071_s14 = scalar_lea.vmem %s368_s26, 96  ;;  %s390_s30 = int_to_ptr.vmem [resolvable:$true] %s389_s30 }
  0x17   : > { %p18528_p4 = pnand %p15852_p0, %p343_p2  ;;  %p18072_p8 = scmp.ne.s32.totalorder %s368_s26, %s18071_s14 }
  0x18   : > { %p18079_p11 = scmp.lt.s32.totalorder %s368_s26, %s368_s26  ;;  %p18080_p12 = scmp.lt.s32.totalorder %s18071_s14, %s18071_s14 }
  0x19   : > { %s21786_s28 = scalar_select %p18528_p4, 1, 0 }
  0x1a   : > { %p17913_p5 = pneg %p18528_p4  ;;  %p18081_p13 = por %p18080_p12, %p18079_p11 }
  0x1c   : > { %p18536_p6 = pnand %p17913_p5, %p21748_p1 }
  0x1e   : > { %s21787_s12 = scalar_select %p18536_p6, 1, 0 }
  0x1f   : > { %p18542_p7 = pneg %p18536_p6 }
  0x21   : > { %s21788_s13 = scalar_select %p18542_p7, 1, 0 }
  0x22   : > { %p18074_p9 = pnand %p18072_p8, %p18542_p7 }
  0x24   : > { %p18075_p10 = pneg %p18074_p9 }
  0x26   : > { %p18082_p0 = pnand %p18081_p13, %p18075_p10 }
  0x28   : > { %18085 = shalt.err (!%p18082_p0)
}
  0x29   : > { %s21789_s1 = sld [smem:[#allocation36_spill]]  ;;  %s18097_s17 = scalar_lea.vmem %s390_s30, 384 }
  0x2a   : > { %p18098_p2 = scmp.ne.s32.totalorder %s390_s30, %s18097_s17  ;;  %p18105_p1 = scmp.lt.s32.totalorder %s390_s30, %s390_s30 }
  0x2b   : > { %p18106_p8 = scmp.lt.s32.totalorder %s18097_s17, %s18097_s17 }
  0x2c   : > { %p18100_p5 = pnand %p18098_p2, %p18542_p7 }
  0x2d   : > { %p18107_p9 = por %p18106_p8, %p18105_p1 }
  0x2e   : > { %p18101_p3 = pneg %p18100_p5 }
  0x2f   : > { %17919 = dma.hbm_to_vmem [thread:$0]  (!%p18536_p6), %s21789_s1, 96, %s368_s26, [#allocation9]  }
  0x30   : > { %p18108_p4 = pnand %p18107_p9, %p18101_p3 }
  0x32   : > { %18111 = shalt.err (!%p18108_p4)
}
  0x33   : > { %s21790_s5 = sld [smem:[#allocation38_spill]]  ;;  %s18561_s26 = sadd.s32 1, %s18408_s24  }
  0x34   : > { %21791 = sst [smem:[#allocation31_spill]] %s18561_s26  ;;  %p102_p1 = scmp.lt.s32.totalorder %s18408_s24, 2 }
  0x35   : > { %p104_p3 = scmp.lt.s32.totalorder %s18561_s26, 2  ;;  %s109_s29 = sadd.s32 1, %s18404_s10 }
  0x36   : > { %s18567_s14 = scalar_select %p102_p1, %s18408_s24, 2 }
  0x37   : > { %s105_s15 = scalar_select %p104_p3, %s18561_s26, 2 }
  0x38   : > { %p116_p4 = scmp.ne.s32.totalorder %s18404_s10, %s18400_s23  ;;  %p21756_p10 = scmp.eq.s32.totalorder %s18408_s24, 0 }
  0x39   : > { %17925 = dma.hbm_to_vmem [thread:$0]  (!%p18536_p6), %s21790_s5, 384, %s390_s30, [#allocation15]  }
  0x3a   : > { %s106_s16 = ssub.s32 %s18567_s14, %s105_s15  ;;  %p122_p11 = scmp.ne.s32.totalorder %s18400_s23, %s18396_s22 }
  0x3b   : > { %p107_p12 = scmp.eq.s32.totalorder %s106_s16, 0  ;;  %p118_p13 = por %p21756_p10, %p116_p4 }
  0x3c   : > { %p21792_p0 = scmp.eq.s32.totalorder %s18522_s27, 0  ;;  %p21755_p5 = scmp.lt.s32.totalorder %s18408_s24, 6 }
  0x3d   : > { %s18586_s17 = scalar_select %p107_p12, %s18404_s10, %s109_s29  }
  0x3e   : > { %p18580_p2 = por %p21792_p0, %p122_p11  ;;  %s21751_s25 = sand.u32 1, %s18404_s10  }
  0x3f   : > { %21795 = sst [smem:[#allocation33_spill]] %s18586_s17  ;;  %s17879_s1 = smul.u32 3072, %s21751_s25 }
  0x40   : > { %s21793_s30 = scalar_select %p18580_p2, 1, 0 }
  0x41   : > { %s17858_s5 = sshll.u32 %s18567_s14, 9  ;;  %p18595_p8 = pnand %p21755_p5, %p118_p13 }
  0x42   : > { %21794 = sst [smem:[#allocation32_spill]] %s21793_s30  ;;  %s418_s29 = scalar_lea.vmem [#allocation11], %s17879_s1 }
  0x43   : > { %s21796_s15 = scalar_select %p18595_p8, 1, 0 }
  0x44   : > { %s21797_s3 = sld [smem:[#allocation37_spill]]  ;;  %s427_s18 = sshll.u32 %s418_s29, 4  ;;  %s18604_s18 = int_to_ptr.vmem [resolvable:$true] %s427_s18 }
  0x45   : > { %s21798_s25 = sand.u32 1, %s18408_s24   ;;  %p21769_p1 = pneg %p18595_p8 }
  0x46   : > { %s18608_s17 = scalar_lea.sflag [#allocation12], %s21798_s25 }
  0x4a   : > { %s18602_s11 = scalar_lea.hbm %s21797_s3, %s17858_s5  ;;  %s18117_s16 = scalar_lea.hbm %s21797_s3, 147456 }
  0x4b   : > { %s18112_s30 = scalar_lea.hbm %s18602_s11, 49152  ;;  %p18118_p11 = scmp.lt.s32.totalorder %s18602_s11, %s21797_s3 }
  0x4c   : > { %p18113_p9 = scmp.ne.s32.totalorder %s18602_s11, %s18112_s30  ;;  %p18119_p12 = scmp.lt.s32.totalorder %s18117_s16, %s18112_s30 }
  0x4e   : > { %p18115_p3 = pnand %p21769_p1, %p18113_p9  ;;  %p18120_p13 = por %p18119_p12, %p18118_p11 }
  0x50   : > { %p18116_p4 = pneg %p18115_p3 }
  0x52   : > { %p18121_p0 = pnand %p18120_p13, %p18116_p4 }
  0x54   : > { %18124 = shalt.err (!%p18121_p0)
}
  0x55   : > { %s18125_s25 = scalar_lea.vmem %s18604_s18, 49152  ;;  %s18412_s29 = smov [#allocation11]  }
  0x56   : > { %p18126_p5 = scmp.ne.s32.totalorder %s18604_s18, %s18125_s25  ;;  %s18130_s5 = sshll.u32 %s18412_s29, 4  ;;  %s18131_s5 = int_to_ptr.vmem [resolvable:$false] %s18130_s5 }
  0x57   : > { %s18132_s22 = scalar_lea.vmem %s18131_s5, 98304  ;;  %p18133_p10 = scmp.lt.s32.totalorder %s18604_s18, %s18131_s5 }
  0x58   : > { %p18128_p9 = pnand %p18126_p5, %p21769_p1  ;;  %p18134_p2 = scmp.lt.s32.totalorder %s18132_s22, %s18125_s25 }
  0x5a   : > { %p18129_p3 = pneg %p18128_p9  ;;  %p18135_p6 = por %p18134_p2, %p18133_p10 }
  0x5c   : > { %p18136_p11 = pnand %p18135_p6, %p18129_p3 }
  0x5e   : > { %18139 = shalt.err (!%p18136_p11)
}
  0x5f   : > { %s21760_s23 = smov 1536   ;;  %s21761_s30 = smov 512  }
  0x60   : > { %s21762_s16 = smov 32   ;;  %s15846_s1 = sadd.s32 4294967293, %s18408_s24 }
  0x61   : > { %17932 = dma.hbm_to_vmem [thread:$0]  (!%p18595_p8), %s18602_s11, 49152, %s18604_s18, %s18608_s17, %s21760_s23, %s21761_s30, %s21762_s16  }
  0x62   : > { %s15847_s25 = sadd.s32 4294967293, %s18561_s26  ;;  %p205_p6 = scmp.gt.s32.totalorder %s15846_s1, 0 }
  0x63   : > { %p208_p10 = scmp.gt.s32.totalorder %s15847_s25, 0  ;;  %s213_s29 = sadd.s32 1, %s18392_s21 }
  0x64   : > { %p220_p2 = scmp.ne.s32.totalorder %s18392_s21, %s18388_s20  ;;  %s21877_s1 = smov (!%p205_p6, %s15846_s1), 0 }
  0x65   : > { %s21879_s25 = smov (!%p208_p10, %s15847_s25), 0  ;;  %p21799_p5 = scmp.eq.s32.totalorder %s18408_s24, 0 }
  0x66   : > { %p226_p12 = scmp.ne.s32.totalorder %s18388_s20, %s18384_s19  ;;  %s210_s5 = ssub.s32 %s21877_s1, %s21879_s25 }
  0x67   : > { %p222_p4 = por %p220_p2, %p21799_p5  ;;  %p211_p13 = scmp.eq.s32.totalorder %s210_s5, 0 }
  0x68   : > { %p21800_p0 = scmp.eq.s32.totalorder %s18522_s27, 0  ;;  %s18657_s18 = sand.u32 1, %s18392_s21  }
  0x69   : > { %s17860_s22 = sshll.u32 %s21877_s1, 9  ;;  %s17880_s30 = smul.u32 12288, %s18657_s18 }
  0x6a   : > { %p18652_p9 = por %p226_p12, %p21800_p0  ;;  %s18667_s26 = scalar_lea.hbm %s21743_s7, %s17860_s22 }
  0x6b   : > { %s18661_s23 = scalar_select %p211_p13, %s18392_s21, %s213_s29  }
  0x6c   : > { %s21801_s11 = scalar_select %p18652_p9, 1, 0 }
  0x6d   : > { %21803 = sst [smem:[#allocation35_spill]] %s18661_s23  ;;  %p21804_p3 = scmp.lt.s32.totalorder %s18408_s24, 6 }
  0x6e   : > { %21802 = sst [smem:[#allocation34_spill]] %s21801_s11  ;;  %s18416_s25 = smov [#allocation6]  }
  0x6f   : > { %p18671_p11 = pnand %p21804_p3, %p222_p4  ;;  %s356_s5 = sshll.u32 %s18416_s25, 4  ;;  %s18677_s5 = int_to_ptr.vmem [resolvable:$true] %s356_s5 }
  0x70   : > { %s462_s11 = scalar_lea.vmem [#allocation17], %s17880_s30  ;;  %s21806_s3 = sand.u32 1, %s18408_s24  }
  0x71   : > { %s21805_s19 = scalar_select %p18671_p11, 1, 0 }
  0x72   : > { %s472_s29 = sshll.u32 %s462_s11, 4  ;;  %s18681_s16 = scalar_lea.sflag [#allocation18], %s21806_s3  ;;  %s18675_s29 = int_to_ptr.vmem [resolvable:$true] %s472_s29 }
  0x73   : > { %s18140_s22 = scalar_lea.hbm %s18667_s26, 196608  ;;  %p18687_p10 = pneg %p18671_p11 }
  0x74   : > { %p18141_p6 = scmp.ne.s32.totalorder %s18667_s26, %s18140_s22  ;;  %s18145_s25 = scalar_lea.hbm %s21743_s7, 589824 }
  0x75   : > { %s21807_s23 = scalar_select %p18687_p10, 1, 0 }
  0x76   : > { %p18143_p2 = pnand %p18687_p10, %p18141_p6  ;;  %p18146_p4 = scmp.lt.s32.totalorder %s18667_s26, %s21743_s7 }
  0x77   : > { %p18147_p12 = scmp.lt.s32.totalorder %s18145_s25, %s18140_s22 }
  0x78   : > { %p18144_p5 = pneg %p18143_p2 }
  0x79   : > { %p18148_p13 = por %p18147_p12, %p18146_p4 }
  0x7b   : > { %p18149_p0 = pnand %p18148_p13, %p18144_p5 }
  0x7d   : > { %18152 = shalt.err (!%p18149_p0)
}
  0x7e   : > { %s18153_s24 = scalar_lea.vmem %s18675_s29, 196608  ;;  %s18417_s3 = smov [#allocation17]  }
  0x7f   : > { %p18154_p3 = scmp.ne.s32.totalorder %s18675_s29, %s18153_s24  ;;  %s18158_s30 = sshll.u32 %s18417_s3, 4  ;;  %s18159_s30 = int_to_ptr.vmem [resolvable:$false] %s18158_s30 }
  0x80   : > { %s18160_s11 = scalar_lea.vmem %s18159_s30, 393216  ;;  %p18161_p1 = scmp.lt.s32.totalorder %s18675_s29, %s18159_s30 }
  0x81   : > { %p18156_p6 = pnand %p18154_p3, %p18687_p10  ;;  %p18162_p9 = scmp.lt.s32.totalorder %s18160_s11, %s18153_s24 }
  0x83   : > { %p18157_p2 = pneg %p18156_p6  ;;  %p18163_p8 = por %p18162_p9, %p18161_p1 }
  0x85   : > { %p18164_p7 = pnand %p18163_p8, %p18157_p2 }
  0x87   : > { %18167 = shalt.err (!%p18164_p7)
}
  0x88   : > { %s21808_s20 = smov 32   ;;  %s21809_s21 = smov 512  }
  0x89   : > { %s21810_s22 = smov 1536   ;;  %s18179_s25 = scalar_lea.vmem %s18677_s5, 768 }
  0x8a   : > { %17938 = dma.hbm_to_vmem [thread:$0]  (!%p18671_p11), %s18667_s26, 196608, %s18675_s29, %s18681_s16, %s21810_s22, %s21809_s21, %s21808_s20  }
  0x8b   : > { %p18180_p5 = scmp.ne.s32.totalorder %s18677_s5, %s18179_s25  ;;  %p21811_p4 = scmp.ne.s32.totalorder %s21788_s13, 0 }
  0x8c   : > { %p18187_p7 = scmp.lt.s32.totalorder %s18677_s5, %s18677_s5  ;;  %p18188_p8 = scmp.lt.s32.totalorder %s18179_s25, %s18179_s25 }
  0x8d   : > { %p18182_p12 = pnand %p18180_p5, %p21811_p4 }
  0x8e   : > { %p18189_p9 = por %p18188_p8, %p18187_p7 }
  0x8f   : > { %p18183_p1 = pneg %p18182_p12 }
  0x91   : > { %p18190_p13 = pnand %p18189_p9, %p18183_p1 }
  0x93   : > { %18193 = shalt.err (!%p18190_p13)
}
  0x94   : > { %p21812_p0 = scmp.ne.s32.totalorder %s21787_s12, 0  ;;  %s18418_s26 = smov [#allocation10]  }
  0x95   : > { %s378_s29 = sshll.u32 %s18418_s26, 4  ;;  %s18419_s30 = smov [#allocation16]   ;;  %s379_s29 = int_to_ptr.vmem [resolvable:$true] %s378_s29 }
  0x96   : > { %17916 = dma.hbm_to_vmem [thread:$0]  (!%p21812_p0), %s21736_s0, 768, %s18677_s5, [#allocation7]  }
  0x97   : > { %s400_s11 = sshll.u32 %s18419_s30, 4  ;;  %s18205_s20 = scalar_lea.vmem %s379_s29, 96  ;;  %s401_s11 = int_to_ptr.vmem [resolvable:$true] %s400_s11 }
  0x98   : > { %p18206_p3 = scmp.ne.s32.totalorder %s379_s29, %s18205_s20  ;;  %p18213_p5 = scmp.lt.s32.totalorder %s379_s29, %s379_s29 }
  0x99   : > { %p18214_p12 = scmp.lt.s32.totalorder %s18205_s20, %s18205_s20 }
  0x9a   : > { %p18208_p6 = pnand %p18206_p3, %p21811_p4 }
  0x9b   : > { %p18215_p1 = por %p18214_p12, %p18213_p5 }
  0x9c   : > { %p18209_p2 = pneg %p18208_p6 }
  0x9e   : > { %p18216_p7 = pnand %p18215_p1, %p18209_p2 }
  0xa0   : > { %18219 = shalt.err (!%p18216_p7)
}
  0xa1   : > { %17922 = dma.hbm_to_vmem [thread:$0]  (!%p21812_p0), %s21738_s2, 96, %s379_s29, [#allocation9]  }
  0xa2   : > { %s18231_s22 = scalar_lea.vmem %s401_s11, 384  ;;  %p18239_p11 = scmp.lt.s32.totalorder %s401_s11, %s401_s11 }
  0xa3   : > { %p18232_p8 = scmp.ne.s32.totalorder %s401_s11, %s18231_s22  ;;  %p18240_p3 = scmp.lt.s32.totalorder %s18231_s22, %s18231_s22 }
  0xa5   : > { %p18234_p9 = pnand %p18232_p8, %p21811_p4  ;;  %p18241_p6 = por %p18240_p3, %p18239_p11 }
  0xa7   : > { %p18235_p13 = pneg %p18234_p9 }
  0xa9   : > { %p18242_p10 = pnand %p18241_p6, %p18235_p13 }
  0xab   : > { %18245 = shalt.err (!%p18242_p10)
}
  0xac   : > { %17928 = dma.hbm_to_vmem [thread:$0]  (!%p21812_p0), %s21742_s6, 384, %s401_s11, [#allocation15]  }
  0xad   : > { %s21813_s3 = sand.u32 1, %s18404_s10   ;;  %s17859_s13 = sshll.u32 %s18567_s14, 7 }
  0xae   : > { %s15861_s26 = sshll.u32 %s21813_s3, 3  ;;  %s18745_s20 = scalar_lea.hbm %s21740_s4, %s17859_s13 }
  0xaf   : > { %s441_s12 = scalar_lea.vmem [#allocation13], %s15861_s26  ;;  %s15867_s5 = sshll.u32 %s18657_s18, 3 }
  0xb0   : > { %s451_s21 = sshll.u32 %s441_s12, 4  ;;  %s18246_s22 = scalar_lea.hbm %s18745_s20, 128  ;;  %s452_s21 = int_to_ptr.vmem [resolvable:$true] %s451_s21 }
  0xb1   : > { %p18247_p11 = scmp.ne.s32.totalorder %s18745_s20, %s18246_s22  ;;  %p21814_p10 = scmp.ne.s32.totalorder %s21796_s15, 0 }
  0xb2   : > { %s18251_s25 = scalar_lea.hbm %s21740_s4, 384  ;;  %p18252_p5 = scmp.lt.s32.totalorder %s18745_s20, %s21740_s4 }
  0xb3   : > { %p21815_p4 = pneg %p21814_p10  ;;  %p18253_p12 = scmp.lt.s32.totalorder %s18251_s25, %s18246_s22 }
  0xb5   : > { %p18249_p0 = pnand %p18247_p11, %p21815_p4  ;;  %p18254_p1 = por %p18253_p12, %p18252_p5 }
  0xb7   : > { %p18250_p2 = pneg %p18249_p0 }
  0xb9   : > { %p18255_p7 = pnand %p18254_p1, %p18250_p2 }
  0xbb   : > { %18258 = shalt.err (!%p18255_p7)
}
  0xbc   : > { %s18259_s26 = scalar_lea.vmem %s452_s21, 128  ;;  %p21816_p9 = pmov %p21815_p4 }
  0xbd   : > { %p18260_p8 = scmp.ne.s32.totalorder %s452_s21, %s18259_s26  ;;  %s18420_s13 = smov [#allocation13]  }
  0xbe   : > { %s18264_s29 = sshll.u32 %s18420_s13, 4  ;;  %s18265_s29 = int_to_ptr.vmem [resolvable:$false] %s18264_s29 }
  0xbf   : > { %p18262_p13 = pnand %p18260_p8, %p21816_p9  ;;  %s18266_s30 = scalar_lea.vmem %s18265_s29, 256 }
  0xc0   : > { %p18267_p6 = scmp.lt.s32.totalorder %s452_s21, %s18265_s29  ;;  %p18268_p11 = scmp.lt.s32.totalorder %s18266_s30, %s18259_s26 }
  0xc1   : > { %p18263_p3 = pneg %p18262_p13 }
  0xc2   : > { %p18269_p4 = por %p18268_p11, %p18267_p6 }
  0xc4   : > { %p18270_p0 = pnand %p18269_p4, %p18263_p3 }
  0xc6   : > { %18273 = shalt.err (!%p18270_p0)
}
  0xc7   : > { %17935 = dma.hbm_to_vmem [thread:$0]  (!%p21814_p10), %s18745_s20, 128, %s452_s21, %s18608_s17  }
  0xc8   : > { %s17861_s12 = sshll.u32 %s21877_s1, 7  ;;  %s486_s22 = scalar_lea.vmem [#allocation19], %s15867_s5 }
  0xc9   : > { %s497_s11 = sshll.u32 %s486_s22, 4  ;;  %s495_s24 = scalar_lea.hbm %s21744_s8, %s17861_s12  ;;  %s498_s11 = int_to_ptr.vmem [resolvable:$true] %s497_s11 }
  0xca   : > { %s18274_s3 = scalar_lea.hbm %s495_s24, 128  ;;  %p21817_p5 = scmp.ne.s32.totalorder %s21807_s23, 0 }
  0xcb   : > { %p18275_p2 = scmp.ne.s32.totalorder %s495_s24, %s18274_s3  ;;  %s18279_s13 = scalar_lea.hbm %s21744_s8, 384 }
  0xcc   : > { %p18280_p10 = scmp.lt.s32.totalorder %s495_s24, %s21744_s8  ;;  %p18281_p7 = scmp.lt.s32.totalorder %s18279_s13, %s18274_s3 }
  0xcd   : > { %p18277_p12 = pnand %p18275_p2, %p21817_p5 }
  0xce   : > { %p18282_p8 = por %p18281_p7, %p18280_p10 }
  0xcf   : > { %p18278_p1 = pneg %p18277_p12 }
  0xd1   : > { %p18283_p9 = pnand %p18282_p8, %p18278_p1 }
  0xd3   : > { %18286 = shalt.err (!%p18283_p9)
}
  0xd4   : > { %s18287_s21 = scalar_lea.vmem %s498_s11, 128  ;;  %s18421_s29 = smov [#allocation19]  }
  0xd5   : > { %p18288_p13 = scmp.ne.s32.totalorder %s498_s11, %s18287_s21  ;;  %s18292_s30 = sshll.u32 %s18421_s29, 4  ;;  %s18293_s30 = int_to_ptr.vmem [resolvable:$false] %s18292_s30 }
  0xd6   : > { %s18294_s22 = scalar_lea.vmem %s18293_s30, 256  ;;  %p18295_p11 = scmp.lt.s32.totalorder %s498_s11, %s18293_s30 }
  0xd7   : > { %p18290_p3 = pnand %p18288_p13, %p21817_p5  ;;  %p18296_p4 = scmp.lt.s32.totalorder %s18294_s22, %s18287_s21 }
  0xd9   : > { %p18291_p6 = pneg %p18290_p3  ;;  %p18297_p0 = por %p18296_p4, %p18295_p11 }
  0xdb   : > { %p18298_p2 = pnand %p18297_p0, %p18291_p6 }
  0xdd   : > { %18301 = shalt.err (!%p18298_p2)
}
  0xde   : > { %p21818_p12 = scmp.ne.s32.totalorder %s21805_s19, 0  ;;  %s18793_s3 = scalar_lea.hbm %s21745_s9, %s17861_s12 }
  0xdf   : > { %s508_s15 = scalar_lea.vmem [#allocation20], %s15867_s5  ;;  %s505_s13 = scalar_lea.sflag [#allocation21], %s18657_s18 }
  0xe0   : > { %17941 = dma.hbm_to_vmem [thread:$0]  (!%p21818_p12), %s495_s24, 128, %s498_s11, %s18681_s16  }
  0xe1   : > { %s519_s26 = sshll.u32 %s508_s15, 4  ;;  %s18302_s17 = scalar_lea.hbm %s18793_s3, 128  ;;  %s520_s26 = int_to_ptr.vmem [resolvable:$true] %s519_s26 }
  0xe2   : > { %p18303_p1 = scmp.ne.s32.totalorder %s18793_s3, %s18302_s17  ;;  %s18307_s11 = scalar_lea.hbm %s21745_s9, 384 }
  0xe3   : > { %p18308_p8 = scmp.lt.s32.totalorder %s18793_s3, %s21745_s9  ;;  %p18309_p9 = scmp.lt.s32.totalorder %s18307_s11, %s18302_s17 }
  0xe4   : > { %p18305_p10 = pnand %p18303_p1, %p21817_p5 }
  0xe5   : > { %p18310_p13 = por %p18309_p9, %p18308_p8 }
  0xe6   : > { %p18306_p7 = pneg %p18305_p10 }
  0xe8   : > { %p18311_p3 = pnand %p18310_p13, %p18306_p7 }
  0xea   : > { %18314 = shalt.err (!%p18311_p3)
}
  0xeb   : > { %s18315_s5 = scalar_lea.vmem %s520_s26, 128  ;;  %s18422_s18 = smov [#allocation20]  }
  0xec   : > { %p18316_p6 = scmp.ne.s32.totalorder %s520_s26, %s18315_s5  ;;  %s18320_s20 = sshll.u32 %s18422_s18, 4  ;;  %s18321_s20 = int_to_ptr.vmem [resolvable:$false] %s18320_s20 }
  0xed   : > { %s18322_s21 = scalar_lea.vmem %s18321_s20, 256  ;;  %p18323_p0 = scmp.lt.s32.totalorder %s520_s26, %s18321_s20 }
  0xee   : > { %p18318_p11 = pnand %p18316_p6, %p21817_p5  ;;  %p18324_p2 = scmp.lt.s32.totalorder %s18322_s21, %s18315_s5 }
  0xf0   : > { %p18319_p4 = pneg %p18318_p11  ;;  %p18325_p1 = por %p18324_p2, %p18323_p0 }
  0xf2   : > { %p18326_p10 = pnand %p18325_p1, %p18319_p4 }
  0xf4   : > { %18329 = shalt.err (!%p18326_p10)
}
  0xf5   : > { %17944 = dma.hbm_to_vmem [thread:$0]  (!%p21818_p12), %s18793_s3, 128, %s520_s26, %s505_s13  }
  0xf6   : > { %p21819_p7 = scmp.ne.s32.totalorder %s21786_s28, 0 }
  0xf7   : > { %p21820_p8 = scmp.eq.s32.totalorder (!%p21819_p7), %s18522_s27, 0 }
  0xf8   : > { %528 = sbr.rel (%p21819_p7) target bundleno = 3556 (0xde4), region = 64 }
  0xfd   : > { %18359 = dma.done.wait (%p21820_p8), [#allocation7], 768   ;;  %p21821_p5 = pmov %p21820_p8 }
  0xff   : > { %18361 = vsyncadd (%p21821_p5), [#allocation7], 4294966528  ;;  %p21822_p9 = pmov %p21821_p5 }
 0x100   : > { %p21823_p13 = pmov %p21821_p5 }
 0x101   : > { %18363 = dma.done.wait (%p21822_p9), [#allocation9], 192  }
 0x102   : > { %18365 = vsyncadd (%p21823_p13), [#allocation9], 4294967104  ;;  %s21824_s23 = sld [smem:[#allocation30_spill]]  ;;  %s542_s29 = sand.u32 1, %s18522_s27  }
 0x103   : > { %s21825_s19 = sld [smem:[#allocation32_spill]]  ;;  %s543_s28 = scalar_lea.sflag [#allocation12], %s542_s29 }
 0x108   : > { %s544_s30 = sand.u32 1, %s21824_s23  }
 0x109   : > { %s17881_s22 = smul.u32 3072, %s544_s30  ;;  %p21826_p12 = scmp.ne.s32.totalorder %s21825_s19, 0 }
 0x10b   : > { %s18826_s14 = scalar_lea.vmem [#allocation11], %s17881_s22 }
 0x10c   : > { %18367 = dma.done.wait (%p21826_p12), %s543_s28, 49280  }
 0x10d   : > { %18369 = vsyncadd (%p21826_p12), %s543_s28, 4294918016  ;;  %s18832_s25 = sshll.u32 %s544_s30, 3  ;;  %p21827_p3 = pmov %p21821_p5 }
 0x10e   : > { %s555_s3 = scalar_lea.vmem [#allocation13], %s18832_s25 }
 0x10f   : > { %18371 = dma.done.wait (%p21827_p3), [#allocation15], 768   ;;  %p21828_p6 = pmov %p21827_p3 }
 0x110   : > { %s21829_s15 = sld [smem:[#allocation28_spill]]  ;;  %s569_s16 = scalar_lea.sflag [#allocation18], %s542_s29 }
 0x111   : > { %18373 = vsyncadd (%p21828_p6), [#allocation15], 4294966528  ;;  %s21830_s26 = sld [smem:[#allocation34_spill]] }
 0x116   : > { %s570_s13 = sand.u32 1, %s21829_s15  }
 0x117   : > { %s17882_s17 = smul.u32 12288, %s570_s13  ;;  %p21831_p11 = scmp.ne.s32.totalorder %s21830_s26, 0 }
 0x119   : > { %s18840_s1 = scalar_lea.vmem [#allocation17], %s17882_s17 }
 0x11a   : > { %18375 = dma.done.wait (%p21831_p11), %s569_s16, 196736  }
 0x11b   : > { %18377 = vsyncadd (%p21831_p11), %s569_s16, 4294770560  ;;  %s15882_s11 = sshll.u32 %s570_s13, 3  ;;  %s587_s12 = scalar_lea.sflag [#allocation21], %s570_s13 }
 0x11c   : > { %s18846_s24 = scalar_lea.vmem [#allocation19], %s15882_s11  ;;  %s18848_s5 = scalar_lea.vmem [#allocation20], %s15882_s11 }
 0x11d   : > { %18379 = dma.done.wait (%p21831_p11), %s587_s12, 128  }
 0x11e   : > { %18381 = vsyncadd (%p21831_p11), %s587_s12, 4294967168  ;;  %p21832_p4 = scmp.ne.s32.totalorder %s18522_s27, 0 }
 0x11f   : > { %s21833_s21 = sld [smem:[#allocation39_spill]] (!%p21832_p4) }
 0x120   : > { %665 = sbr.rel (%p21832_p4) target bundleno = 624 (0x270), region = 108 }
 0x125   : > { %v666_v1 = vld [vmem:[#allocation6] sm:$0xff]  ;;  %v667_v2 = vld [vmem:[#allocation6 + $0x8] sm:$0xff]  ;;  %v668_v3 = vld [vmem:[#allocation6 + $0x10] sm:$0xff]  ;;  %vm819_vm0 = vcmask 7168   ;;  %v712_v35 = vlaneseq }
 0x126   : > { %v674_v4 = vadd.f32 %v667_v2, %v666_v1  ;;  %v669_v5 = vld [vmem:[#allocation6 + $0x18] sm:$0xff]  ;;  %v670_v7 = vld [vmem:[#allocation6 + $0x20] sm:$0xff]  ;;  %v671_v9 = vld [vmem:[#allocation6 + $0x28] sm:$0xff] }
 0x127   : > { %v15888_v31 = vld [vmem:[#allocation5] ss:$0 sm:$0xff]  ;;  %v713_v36 = vshrl.u32 %v712_v35, 7  ;;  %v672_v39 = vld [vmem:[#allocation8] sm:$0x3f] }
 0x128   : > { %v675_v6 = vadd.f32 %v674_v4, %v668_v3  ;;  %820 = vst.msk [vmem:[%s21833_s21] sm:$0xff] %vm819_vm0, %v15888_v31  ;;  %v673_v44 = vld [vmem:[#allocation10] sm:$0x3f] }
 0x129   : > { %v714_v37 = vsub.s32 0, %v713_v36  ;;  %v718_v38 = vsub.s32 1, %v713_v36  ;;  %v722_v40 = vsub.s32 2, %v713_v36  ;;  %v726_v41 = vsub.s32 3, %v713_v36 }
 0x12a   : > { %v676_v8 = vadd.f32 %v675_v6, %v669_v5  ;;  %v730_v42 = vsub.s32 4, %v713_v36  ;;  %v734_v43 = vsub.s32 5, %v713_v36 }
 0x12b   : > { %v715_v45 = vrot.slane %v672_v39, %v714_v37  ;;  %v719_v46 = vrot.slane %v672_v39, %v718_v38  ;;  %v723_v47 = vrot.slane %v672_v39, %v722_v40  ;;  %v727_v48 = vrot.slane %v672_v39, %v726_v41 }
 0x12c   : > { %v677_v10 = vadd.f32 %v676_v8, %v670_v7  ;;  %v731_v49 = vrot.slane %v672_v39, %v730_v42  ;;  %v735_v50 = vrot.slane %v672_v39, %v734_v43  ;;  %v752_v52 = vrot.slane %v673_v44, %v714_v37 }
 0x12d   : > { %v756_v53 = vrot.slane %v673_v44, %v718_v38  ;;  %v760_v54 = vrot.slane %v673_v44, %v722_v40  ;;  %v764_v55 = vrot.slane %v673_v44, %v726_v41  ;;  %v768_v60 = vrot.slane %v673_v44, %v730_v42 }
 0x12e   : > { %v678_v11 = vadd.f32 %v677_v10, %v671_v9  ;;  %v772_v61 = vrot.slane %v673_v44, %v734_v43 }
 0x130   : > { %679 = vadd.xlane.f32.xlu0 %v678_v11 }
 0x1b9   : > { %v680_v12 = vpop.xlane.xlu0 %679 }
 0x1ba   : > { %v682_v13 = vmul.f32 0.0013020834, %v680_v12 }
 0x1bc   : > { %v683_v14 = vsub.f32 %v666_v1, %v682_v13  ;;  %v684_v15 = vsub.f32 %v667_v2, %v682_v13  ;;  %v685_v16 = vsub.f32 %v668_v3, %v682_v13  ;;  %v686_v17 = vsub.f32 %v669_v5, %v682_v13 }
 0x1bd   : > { %v687_v20 = vsub.f32 %v670_v7, %v682_v13  ;;  %v688_v23 = vsub.f32 %v671_v9, %v682_v13 }
 0x1be   : > { %v689_v18 = vmul.f32 %v683_v14, %v683_v14  ;;  %v690_v19 = vmul.f32 %v684_v15, %v684_v15  ;;  %v691_v21 = vmul.f32 %v685_v16, %v685_v16  ;;  %v692_v24 = vmul.f32 %v686_v17, %v686_v17 }
 0x1bf   : > { %v693_v26 = vmul.f32 %v687_v20, %v687_v20  ;;  %v694_v28 = vmul.f32 %v688_v23, %v688_v23 }
 0x1c0   : > { %v695_v22 = vadd.f32 %v690_v19, %v689_v18 }
 0x1c2   : > { %v696_v25 = vadd.f32 %v695_v22, %v691_v21 }
 0x1c4   : > { %v697_v27 = vadd.f32 %v696_v25, %v692_v24 }
 0x1c6   : > { %v698_v29 = vadd.f32 %v697_v27, %v693_v26 }
 0x1c8   : > { %v699_v30 = vadd.f32 %v698_v29, %v694_v28 }
 0x1ca   : > { %700 = vadd.xlane.f32.xlu0 %v699_v30 }
 0x253   : > { %v701_v32 = vpop.xlane.xlu0 %700 }
 0x254   : > { %v702_v33 = vmul.f32 0.0013020834, %v701_v32 }
 0x256   : > { %v703_v34 = vadd.f32 1e-05, %v702_v33 }
 0x258   : > { %18020 = vrsqrt.f32 %v703_v34 }
 0x265   : > { %v18021_v51 = vpop.eup %18020 }
 0x266   : > { %v705_v56 = vmul.f32 %v18021_v51, %v683_v14  ;;  %v706_v57 = vmul.f32 %v18021_v51, %v684_v15  ;;  %v707_v58 = vmul.f32 %v18021_v51, %v685_v16  ;;  %v708_v59 = vmul.f32 %v18021_v51, %v686_v17 }
 0x267   : > { %v709_v62 = vmul.f32 %v18021_v51, %v687_v20  ;;  %v710_v63 = vmul.f32 %v18021_v51, %v688_v23 }
 0x268   : > { %v742_v0 = vmul.f32 %v715_v45, %v705_v56  ;;  %v743_v1 = vmul.f32 %v719_v46, %v706_v57  ;;  %v744_v2 = vmul.f32 %v723_v47, %v707_v58  ;;  %v745_v3 = vmul.f32 %v727_v48, %v708_v59 }
 0x269   : > { %v746_v4 = vmul.f32 %v731_v49, %v709_v62  ;;  %v747_v5 = vmul.f32 %v735_v50, %v710_v63 }
 0x26a   : > { %v779_v6 = vadd.f32 %v752_v52, %v742_v0  ;;  %v780_v7 = vadd.f32 %v756_v53, %v743_v1  ;;  %v781_v8 = vadd.f32 %v760_v54, %v744_v2  ;;  %v782_v9 = vadd.f32 %v764_v55, %v745_v3 }
 0x26b   : > { %v783_v10 = vadd.f32 %v768_v60, %v746_v4  ;;  %v784_v11 = vadd.f32 %v772_v61, %v747_v5 }
 0x26c   : > { %v17863_v12 = vpack.c.bf16 %v780_v7, %v779_v6  ;;  %v17864_v13 = vpack.c.bf16 %v782_v9, %v781_v8 }
 0x26d   : > { %v17865_v14 = vpack.c.bf16 %v784_v11, %v783_v10 }
 0x26e   : > { %809 = vst [vmem:[#allocation2 + $0x10] sm:$0xff] %v17863_v12  ;;  %810 = vst [vmem:[#allocation2] sm:$0xff] %v17864_v13 }
 0x26f   : > { %811 = vst [vmem:[#allocation2 + $0x8] sm:$0xff] %v17865_v14 }
 0x270 PF: > { %p15889_p0 = scmp.ge.s32.totalorder %s18522_s27, 3 }
 0x271   : > { %s17866_s23 = sshll.u32 (!%p15889_p0), %s18522_s27, 6 }
 0x272   : > { %824 = sbr.rel (%p15889_p0) target bundleno = 1223 (0x4c7), region = 112  ;;  %s19277_s19 = scalar_lea.vmem (!%p15889_p0), [#allocation3], %s17866_s23 }
 0x277   : > { %v884_v15 = vld [vmem:[%s18826_s14 + $0x1c0] sm:$0xff]  ;;  %v18890_v5 = vld [vmem:[#allocation2] sm:$0xff] }
 0x278   : > { %v888_v16 = vld [vmem:[%s18826_s14 + $0x1e0] sm:$0xff]  ;;  %v18900_v10 = vcombine.high %v18890_v5, %v18890_v5 }
 0x279   : > { %v1012_v17 = vld [vmem:[%s18826_s14 + $0x5c0] sm:$0xff]  ;;  %v15953_v18 = vcombine.high %v884_v15, %v888_v16  ;;  %v15952_v20 = vcombine.low %v884_v15, %v888_v16 }
 0x27a   : > { %v1016_v19 = vld [vmem:[%s18826_s14 + $0x5e0] sm:$0xff]  ;;  %3268 = vmatprep.mubr.bf16.mxu1 %v18900_v10 }
 0x27b   : > { %v876_v21 = vld [vmem:[%s18826_s14 + $0x180] sm:$0xff]  ;;  %v16081_v23 = vcombine.high %v1012_v17, %v1016_v19  ;;  %v16080_v24 = vcombine.low %v1012_v17, %v1016_v19  ;;  %3195 = vmatprep.subr.bf16.mxu0 %v15953_v18 }
 0x27c   : > { %v880_v22 = vld [vmem:[%s18826_s14 + $0x1a0] sm:$0xff]  ;;  %3196 = vmatpush1.bf16.msra.mxu0 %v15952_v20 }
 0x27d   : > { %v15945_v25 = vcombine.high %v876_v21, %v880_v22  ;;  %v1004_v26 = vld [vmem:[%s18826_s14 + $0x580] sm:$0xff]  ;;  %3236 = vmatprep.subr.bf16.mxu1 %v16081_v23  ;;  %v15944_v33 = vcombine.low %v876_v21, %v880_v22 }
 0x27e   : > { %v1008_v27 = vld [vmem:[%s18826_s14 + $0x5a0] sm:$0xff]  ;;  %3237 = vmatpush1.bf16.msra.mxu1 %v16080_v24 }
 0x27f   : > { %v868_v28 = vld [vmem:[%s18826_s14 + $0x140] sm:$0xff]  ;;  %v16073_v29 = vcombine.high %v1004_v26, %v1008_v27  ;;  %3197 = vmatprep.subr.bf16.mxu0 %v15945_v25  ;;  %v16072_v34 = vcombine.low %v1004_v26, %v1008_v27 }
 0x280   : > { %v872_v30 = vld [vmem:[%s18826_s14 + $0x160] sm:$0xff]  ;;  %3198 = vmatpush1.bf16.msra.mxu0 %v15944_v33 }
 0x281   : > { %v996_v31 = vld [vmem:[%s18826_s14 + $0x540] sm:$0xff]  ;;  %v15937_v35 = vcombine.high %v868_v28, %v872_v30  ;;  %3238 = vmatprep.subr.bf16.mxu1 %v16073_v29  ;;  %v15936_v41 = vcombine.low %v868_v28, %v872_v30 }
 0x282   : > { %v1000_v32 = vld [vmem:[%s18826_s14 + $0x560] sm:$0xff]  ;;  %3239 = vmatpush1.bf16.msra.mxu1 %v16072_v34 }
 0x283   : > { %v16065_v36 = vcombine.high %v996_v31, %v1000_v32  ;;  %v860_v37 = vld [vmem:[%s18826_s14 + $0x100] sm:$0xff]  ;;  %3199 = vmatprep.subr.bf16.mxu0 %v15937_v35  ;;  %v16064_v42 = vcombine.low %v996_v31, %v1000_v32 }
 0x284   : > { %v864_v38 = vld [vmem:[%s18826_s14 + $0x120] sm:$0xff]  ;;  %3200 = vmatpush1.bf16.msra.mxu0 %v15936_v41 }
 0x285   : > { %v988_v39 = vld [vmem:[%s18826_s14 + $0x500] sm:$0xff]  ;;  %v15929_v43 = vcombine.high %v860_v37, %v864_v38  ;;  %3240 = vmatprep.subr.bf16.mxu1 %v16065_v36  ;;  %v15928_v49 = vcombine.low %v860_v37, %v864_v38 }
 0x286   : > { %v992_v40 = vld [vmem:[%s18826_s14 + $0x520] sm:$0xff]  ;;  %3241 = vmatpush1.bf16.msra.mxu1 %v16064_v42 }
 0x287   : > { %v16057_v44 = vcombine.high %v988_v39, %v992_v40  ;;  %v852_v45 = vld [vmem:[%s18826_s14 + $0xc0] sm:$0xff]  ;;  %3201 = vmatprep.subr.bf16.mxu0 %v15929_v43  ;;  %v16056_v50 = vcombine.low %v988_v39, %v992_v40 }
 0x288   : > { %v856_v46 = vld [vmem:[%s18826_s14 + $0xe0] sm:$0xff]  ;;  %3202 = vmatpush1.bf16.msra.mxu0 %v15928_v49 }
 0x289   : > { %v980_v47 = vld [vmem:[%s18826_s14 + $0x4c0] sm:$0xff]  ;;  %v15921_v51 = vcombine.high %v852_v45, %v856_v46  ;;  %3242 = vmatprep.subr.bf16.mxu1 %v16057_v44  ;;  %v15920_v57 = vcombine.low %v852_v45, %v856_v46 }
 0x28a   : > { %v984_v48 = vld [vmem:[%s18826_s14 + $0x4e0] sm:$0xff]  ;;  %3243 = vmatpush1.bf16.msra.mxu1 %v16056_v50 }
 0x28b   : > { %v16049_v52 = vcombine.high %v980_v47, %v984_v48  ;;  %v844_v53 = vld [vmem:[%s18826_s14 + $0x80] sm:$0xff]  ;;  %3203 = vmatprep.subr.bf16.mxu0 %v15921_v51  ;;  %v16048_v58 = vcombine.low %v980_v47, %v984_v48 }
 0x28c   : > { %v848_v54 = vld [vmem:[%s18826_s14 + $0xa0] sm:$0xff]  ;;  %3204 = vmatpush1.bf16.msra.mxu0 %v15920_v57 }
 0x28d   : > { %v972_v55 = vld [vmem:[%s18826_s14 + $0x480] sm:$0xff]  ;;  %v15913_v59 = vcombine.high %v844_v53, %v848_v54  ;;  %3244 = vmatprep.subr.bf16.mxu1 %v16049_v52  ;;  %v15912_v1 = vcombine.low %v844_v53, %v848_v54 }
 0x28e   : > { %v976_v56 = vld [vmem:[%s18826_s14 + $0x4a0] sm:$0xff]  ;;  %3245 = vmatpush1.bf16.msra.mxu1 %v16048_v58 }
 0x28f   : > { %v16041_v60 = vcombine.high %v972_v55, %v976_v56  ;;  %v836_v61 = vld [vmem:[%s18826_s14 + $0x40] sm:$0xff]  ;;  %3205 = vmatprep.subr.bf16.mxu0 %v15913_v59  ;;  %v16040_v2 = vcombine.low %v972_v55, %v976_v56 }
 0x290   : > { %v840_v62 = vld [vmem:[%s18826_s14 + $0x60] sm:$0xff]  ;;  %3206 = vmatpush1.bf16.msra.mxu0 %v15912_v1 }
 0x291   : > { %v964_v63 = vld [vmem:[%s18826_s14 + $0x440] sm:$0xff]  ;;  %v15905_v3 = vcombine.high %v836_v61, %v840_v62  ;;  %3246 = vmatprep.subr.bf16.mxu1 %v16041_v60  ;;  %v15904_v13 = vcombine.low %v836_v61, %v840_v62 }
 0x292   : > { %v968_v0 = vld [vmem:[%s18826_s14 + $0x460] sm:$0xff]  ;;  %3247 = vmatpush1.bf16.msra.mxu1 %v16040_v2 }
 0x293   : > { %v18888_v4 = vld [vmem:[#allocation2 + $0x10] sm:$0xff]  ;;  %v16033_v6 = vcombine.high %v964_v63, %v968_v0  ;;  %3207 = vmatprep.subr.bf16.mxu0 %v15905_v3  ;;  %v16032_v14 = vcombine.low %v964_v63, %v968_v0 }
 0x294   : > { %v828_v7 = vld [vmem:[%s18826_s14] sm:$0xff]  ;;  %v18896_v9 = vcombine.high %v18888_v4, %v18888_v4  ;;  %3208 = vmatpush1.bf16.msra.mxu0 %v15904_v13 }
 0x295   : > { %v832_v8 = vld [vmem:[%s18826_s14 + $0x20] sm:$0xff]  ;;  %3248 = vmatprep.subr.bf16.mxu1 %v16033_v6 }
 0x296   : > { %v956_v11 = vld [vmem:[%s18826_s14 + $0x400] sm:$0xff]  ;;  %3227 = vmatprep.mubr.bf16.mxu0 %v18896_v9  ;;  %v15897_v15 = vcombine.high %v828_v7, %v832_v8  ;;  %v15896_v21 = vcombine.low %v828_v7, %v832_v8  ;;  %3249 = vmatpush1.bf16.msra.mxu1 %v16032_v14 }
 0x297   : > { %v960_v12 = vld [vmem:[%s18826_s14 + $0x420] sm:$0xff] }
 0x298   : > { %v16025_v16 = vcombine.high %v956_v11, %v960_v12  ;;  %v948_v17 = vld [vmem:[%s18826_s14 + $0x3c0] sm:$0xff]  ;;  %3209 = vmatprep.subr.bf16.mxu0 %v15897_v15  ;;  %v16024_v22 = vcombine.low %v956_v11, %v960_v12 }
 0x299   : > { %v952_v18 = vld [vmem:[%s18826_s14 + $0x3e0] sm:$0xff]  ;;  %3210 = vmatpush1.bf16.msra.mxu0 %v15896_v21 }
 0x29a   : > { %v1076_v19 = vld [vmem:[%s18826_s14 + $0x7c0] sm:$0xff]  ;;  %v16017_v23 = vcombine.high %v948_v17, %v952_v18  ;;  %3250 = vmatprep.subr.bf16.mxu1 %v16025_v16  ;;  %v16016_v29 = vcombine.low %v948_v17, %v952_v18 }
 0x29b   : > { %v1080_v20 = vld [vmem:[%s18826_s14 + $0x7e0] sm:$0xff]  ;;  %3251 = vmatpush1.bf16.msra.mxu1 %v16024_v22 }
 0x29c   : > { %v16145_v24 = vcombine.high %v1076_v19, %v1080_v20  ;;  %v940_v25 = vld [vmem:[%s18826_s14 + $0x380] sm:$0xff]  ;;  %3211 = vmatprep.subr.bf16.mxu0 %v16017_v23  ;;  %v16144_v30 = vcombine.low %v1076_v19, %v1080_v20  ;;  %v885_v23 = vld [vmem:[%s18826_s14 + $0x1c8] sm:$0xff] }
 0x29d   : > { %v944_v26 = vld [vmem:[%s18826_s14 + $0x3a0] sm:$0xff]  ;;  %3212 = vmatpush2.bf16.msra.mxu0 %v16016_v29 }
 0x29e   : > { %v1068_v27 = vld [vmem:[%s18826_s14 + $0x780] sm:$0xff]  ;;  %v16009_v31 = vcombine.high %v940_v25, %v944_v26  ;;  %3252 = vmatprep.subr.bf16.mxu1 %v16145_v24  ;;  %v16008_v37 = vcombine.low %v940_v25, %v944_v26  ;;  %v889_v24 = vld [vmem:[%s18826_s14 + $0x1e8] sm:$0xff] }
 0x29f   : > { %v1072_v28 = vld [vmem:[%s18826_s14 + $0x7a0] sm:$0xff]  ;;  %3253 = vmatpush2.bf16.msra.mxu1 %v16144_v30 }
 0x2a0   : > { %v16137_v32 = vcombine.high %v1068_v27, %v1072_v28  ;;  %v932_v33 = vld [vmem:[%s18826_s14 + $0x340] sm:$0xff]  ;;  %3213 = vmatprep.subr.bf16.mxu0 %v16009_v31  ;;  %v16136_v38 = vcombine.low %v1068_v27, %v1072_v28  ;;  %v15955_v28 = vcombine.high %v885_v23, %v889_v24  ;;  %v18946_v31 = vcombine.low %v18888_v4, %v18888_v4 }
 0x2a1   : > { %v936_v34 = vld [vmem:[%s18826_s14 + $0x360] sm:$0xff]  ;;  %3214 = vmatpush2.bf16.msra.mxu0 %v16008_v37  ;;  %v15954_v37 = vcombine.low %v885_v23, %v889_v24 }
 0x2a2   : > { %v1060_v35 = vld [vmem:[%s18826_s14 + $0x740] sm:$0xff]  ;;  %v16001_v39 = vcombine.high %v932_v33, %v936_v34  ;;  %3254 = vmatprep.subr.bf16.mxu1 %v16137_v32  ;;  %v16000_v45 = vcombine.low %v932_v33, %v936_v34  ;;  %v877_v32 = vld [vmem:[%s18826_s14 + $0x188] sm:$0xff]  ;;  %v18950_v34 = vld [vmem:[#allocation2 + $0x8] sm:$0xff] }
 0x2a3   : > { %v1064_v36 = vld [vmem:[%s18826_s14 + $0x760] sm:$0xff]  ;;  %3255 = vmatpush2.bf16.msra.mxu1 %v16136_v38  ;;  %v881_v33 = vld [vmem:[%s18826_s14 + $0x1a8] sm:$0xff] }
 0x2a4   : > { %v16129_v40 = vcombine.high %v1060_v35, %v1064_v36  ;;  %v924_v41 = vld [vmem:[%s18826_s14 + $0x300] sm:$0xff]  ;;  %3215 = vmatprep.subr.bf16.mxu0 %v16001_v39  ;;  %v16128_v46 = vcombine.low %v1060_v35, %v1064_v36  ;;  %v18954_v35 = vcombine.low %v18890_v5, %v18890_v5  ;;  %v15947_v39 = vcombine.high %v877_v32, %v881_v33  ;;  %v869_v5 = vld [vmem:[%s18826_s14 + $0x148] sm:$0xff] }
 0x2a5   : > { %v928_v42 = vld [vmem:[%s18826_s14 + $0x320] sm:$0xff]  ;;  %3216 = vmatpush2.bf16.msra.mxu0 %v16000_v45 }
 0x2a6   : > { %v1052_v43 = vld [vmem:[%s18826_s14 + $0x700] sm:$0xff]  ;;  %v15993_v47 = vcombine.high %v924_v41, %v928_v42  ;;  %3256 = vmatprep.subr.bf16.mxu1 %v16129_v40  ;;  %v15992_v53 = vcombine.low %v924_v41, %v928_v42  ;;  %v18960_v41 = vcombine.high %v18950_v34, %v18950_v34  ;;  %v873_v42 = vld [vmem:[%s18826_s14 + $0x168] sm:$0xff] }
 0x2a7   : > { %v1056_v44 = vld [vmem:[%s18826_s14 + $0x720] sm:$0xff]  ;;  %3257 = vmatpush2.bf16.msra.mxu1 %v16128_v46  ;;  %v15939_v46 = vcombine.high %v869_v5, %v873_v42 }
 0x2a8   : > { %v16121_v48 = vcombine.high %v1052_v43, %v1056_v44  ;;  %v916_v49 = vld [vmem:[%s18826_s14 + $0x2c0] sm:$0xff]  ;;  %3217 = vmatprep.subr.bf16.mxu0 %v15993_v47  ;;  %v16120_v54 = vcombine.low %v1052_v43, %v1056_v44  ;;  %v15946_v44 = vcombine.low %v877_v32, %v881_v33 }
 0x2a9   : > { %v920_v50 = vld [vmem:[%s18826_s14 + $0x2e0] sm:$0xff]  ;;  %3218 = vmatpush2.bf16.msra.mxu0 %v15992_v53 }
 0x2aa   : > { %v1044_v51 = vld [vmem:[%s18826_s14 + $0x6c0] sm:$0xff]  ;;  %v15985_v55 = vcombine.high %v916_v49, %v920_v50  ;;  %3258 = vmatprep.subr.bf16.mxu1 %v16121_v48  ;;  %v15984_v61 = vcombine.low %v916_v49, %v920_v50  ;;  %v861_v49 = vld [vmem:[%s18826_s14 + $0x108] sm:$0xff] }
 0x2ab   : > { %v1048_v52 = vld [vmem:[%s18826_s14 + $0x6e0] sm:$0xff]  ;;  %3259 = vmatpush2.bf16.msra.mxu1 %v16120_v54  ;;  %v865_v50 = vld [vmem:[%s18826_s14 + $0x128] sm:$0xff] }
 0x2ac   : > { %v16113_v56 = vcombine.high %v1044_v51, %v1048_v52  ;;  %v908_v57 = vld [vmem:[%s18826_s14 + $0x280] sm:$0xff]  ;;  %3219 = vmatprep.subr.bf16.mxu0 %v15985_v55  ;;  %v16112_v62 = vcombine.low %v1044_v51, %v1048_v52  ;;  %v15938_v52 = vcombine.low %v869_v5, %v873_v42  ;;  %v15931_v54 = vcombine.high %v861_v49, %v865_v50 }
 0x2ad   : > { %v912_v58 = vld [vmem:[%s18826_s14 + $0x2a0] sm:$0xff]  ;;  %3220 = vmatpush2.bf16.msra.mxu0 %v15984_v61 }
 0x2ae   : > { %v1036_v59 = vld [vmem:[%s18826_s14 + $0x680] sm:$0xff]  ;;  %v15977_v63 = vcombine.high %v908_v57, %v912_v58  ;;  %3260 = vmatprep.subr.bf16.mxu1 %v16113_v56  ;;  %v15976_v7 = vcombine.low %v908_v57, %v912_v58  ;;  %v853_v57 = vld [vmem:[%s18826_s14 + $0xc8] sm:$0xff] }
 0x2af   : > { %v1040_v60 = vld [vmem:[%s18826_s14 + $0x6a0] sm:$0xff]  ;;  %3261 = vmatpush2.bf16.msra.mxu1 %v16112_v62  ;;  %v857_v58 = vld [vmem:[%s18826_s14 + $0xe8] sm:$0xff] }
 0x2b0   : > { %v16105_v0 = vcombine.high %v1036_v59, %v1040_v60  ;;  %v900_v1 = vld [vmem:[%s18826_s14 + $0x240] sm:$0xff]  ;;  %3221 = vmatprep.subr.bf16.mxu0 %v15977_v63  ;;  %v16104_v8 = vcombine.low %v1036_v59, %v1040_v60  ;;  %v15930_v60 = vcombine.low %v861_v49, %v865_v50  ;;  %v15923_v62 = vcombine.high %v853_v57, %v857_v58 }
 0x2b1   : > { %v904_v2 = vld [vmem:[%s18826_s14 + $0x260] sm:$0xff]  ;;  %3222 = vmatpush2.bf16.msra.mxu0 %v15976_v7 }
 0x2b2   : > { %v1028_v3 = vld [vmem:[%s18826_s14 + $0x640] sm:$0xff]  ;;  %v15969_v11 = vcombine.high %v900_v1, %v904_v2  ;;  %3262 = vmatprep.subr.bf16.mxu1 %v16105_v0  ;;  %v15968_v17 = vcombine.low %v900_v1, %v904_v2  ;;  %v845_v1 = vld [vmem:[%s18826_s14 + $0x88] sm:$0xff] }
 0x2b3   : > { %v1032_v6 = vld [vmem:[%s18826_s14 + $0x660] sm:$0xff]  ;;  %3263 = vmatpush2.bf16.msra.mxu1 %v16104_v8  ;;  %v849_v2 = vld [vmem:[%s18826_s14 + $0xa8] sm:$0xff] }
 0x2b4   : > { %v16097_v12 = vcombine.high %v1028_v3, %v1032_v6  ;;  %v892_v13 = vld [vmem:[%s18826_s14 + $0x200] sm:$0xff]  ;;  %3223 = vmatprep.subr.bf16.mxu0 %v15969_v11  ;;  %v16096_v18 = vcombine.low %v1028_v3, %v1032_v6  ;;  %v15922_v6 = vcombine.low %v853_v57, %v857_v58  ;;  %v15915_v8 = vcombine.high %v845_v1, %v849_v2 }
 0x2b5   : > { %v896_v14 = vld [vmem:[%s18826_s14 + $0x220] sm:$0xff]  ;;  %3224 = vmatpush2.bf16.msra.mxu0 %v15968_v17 }
 0x2b6   : > { %v1020_v15 = vld [vmem:[%s18826_s14 + $0x600] sm:$0xff]  ;;  %v15961_v19 = vcombine.high %v892_v13, %v896_v14  ;;  %3264 = vmatprep.subr.bf16.mxu1 %v16097_v12  ;;  %v15960_v25 = vcombine.low %v892_v13, %v896_v14  ;;  %v837_v13 = vld [vmem:[%s18826_s14 + $0x48] sm:$0xff] }
 0x2b7   : > { %v1024_v16 = vld [vmem:[%s18826_s14 + $0x620] sm:$0xff]  ;;  %3265 = vmatpush2.bf16.msra.mxu1 %v16096_v18  ;;  %v841_v14 = vld [vmem:[%s18826_s14 + $0x68] sm:$0xff] }
 0x2b8   : > { %v16089_v20 = vcombine.high %v1020_v15, %v1024_v16  ;;  %v1140_v21 = vld [vmem:[%s18826_s14 + $0x9c0] sm:$0xff]  ;;  %3225 = vmatprep.subr.bf16.mxu0 %v15961_v19  ;;  %v16088_v26 = vcombine.low %v1020_v15, %v1024_v16  ;;  %v15914_v16 = vcombine.low %v845_v1, %v849_v2  ;;  %v15907_v18 = vcombine.high %v837_v13, %v841_v14 }
 0x2b9   : > { %v1144_v22 = vld [vmem:[%s18826_s14 + $0x9e0] sm:$0xff]  ;;  %3226 = vmatpush2.bf16.msra.mxu0 %v15960_v25  ;;  %v15906_v24 = vcombine.low %v837_v13, %v841_v14 }
 0x2ba   : > { %v16209_v27 = vcombine.high %v1140_v21, %v1144_v22  ;;  %3266 = vmatprep.subr.bf16.mxu1 %v16089_v20  ;;  %v1132_v29 = vld [vmem:[%s18826_s14 + $0x980] sm:$0xff]  ;;  %v16208_v36 = vcombine.low %v1140_v21, %v1144_v22  ;;  %v829_v21 = vld [vmem:[%s18826_s14 + $0x8] sm:$0xff] }
 0x2bb   : > { %v1136_v30 = vld [vmem:[%s18826_s14 + $0x9a0] sm:$0xff]  ;;  %3267 = vmatpush2.bf16.msra.mxu1 %v16088_v26  ;;  %v833_v22 = vld [vmem:[%s18826_s14 + $0x28] sm:$0xff] }
 0x2bc   : > { %3277 = vmatprep.subr.bf16.mxu0 %v16209_v27  ;;  %v16201_v38 = vcombine.high %v1132_v29, %v1136_v30  ;;  %3318 = vmatprep.subr.bf16.mxu1 %v15955_v28  ;;  %v1124_v4 = vld [vmem:[%s18826_s14 + $0x940] sm:$0xff]  ;;  %v16200_v43 = vcombine.low %v1132_v29, %v1136_v30  ;;  %v15899_v26 = vcombine.high %v829_v21, %v833_v22  ;;  %v949_v29 = vld [vmem:[%s18826_s14 + $0x3c8] sm:$0xff] }
 0x2bd   : > { %v1128_v40 = vld [vmem:[%s18826_s14 + $0x960] sm:$0xff]  ;;  %3228 = vmatmul.mubr.bf16.vlgmr.msra.gmra.mxu0 %v18946_v31  ;;  %v953_v30 = vld [vmem:[%s18826_s14 + $0x3e8] sm:$0xff]  ;;  %v15898_v33 = vcombine.low %v829_v21, %v833_v22 }
 0x2be   : > { %3269 = vmatmul.mubr.bf16.vlgmr.msra.gmra.mxu1 %v18954_v35  ;;  %3278 = vmatpush1.bf16.msra.mxu0 %v16208_v36  ;;  %v16193_v45 = vcombine.high %v1124_v4, %v1128_v40  ;;  %v1116_v47 = vld [vmem:[%s18826_s14 + $0x900] sm:$0xff]  ;;  %v16192_v51 = vcombine.low %v1124_v4, %v1128_v40  ;;  %v941_v4 = vld [vmem:[%s18826_s14 + $0x388] sm:$0xff]  ;;  %v16018_v42 = vcombine.low %v949_v29, %v953_v30 }
 0x2bf   : > { %3319 = vmatpush1.bf16.msra.mxu1 %v15954_v37  ;;  %3279 = vmatprep.subr.bf16.mxu0 %v16201_v38  ;;  %v1120_v48 = vld [vmem:[%s18826_s14 + $0x920] sm:$0xff]  ;;  %v16019_v37 = vcombine.high %v949_v29, %v953_v30  ;;  %v945_v40 = vld [vmem:[%s18826_s14 + $0x3a8] sm:$0xff] }
 0x2c0   : > { %3320 = vmatprep.subr.bf16.mxu1 %v15947_v39  ;;  %3309 = vmatprep.mubr.bf16.mxu0 %v18960_v41  ;;  %v16185_v53 = vcombine.high %v1116_v47, %v1120_v48  ;;  %v1108_v55 = vld [vmem:[%s18826_s14 + $0x8c0] sm:$0xff]  ;;  %v16184_v59 = vcombine.low %v1116_v47, %v1120_v48  ;;  %v933_v47 = vld [vmem:[%s18826_s14 + $0x348] sm:$0xff]  ;;  %v16010_v50 = vcombine.low %v941_v4, %v945_v40 }
 0x2c1   : > { %3350 = vmatprep.mubr.bf16.mxu1 %v18896_v9  ;;  %v1112_v56 = vld [vmem:[%s18826_s14 + $0x8e0] sm:$0xff]  ;;  %v937_v48 = vld [vmem:[%s18826_s14 + $0x368] sm:$0xff] }
 0x2c2   : > { %3280 = vmatpush1.bf16.msra.mxu0 %v16200_v43  ;;  %v16177_v61 = vcombine.high %v1108_v55, %v1112_v56  ;;  %v1100_v63 = vld [vmem:[%s18826_s14 + $0x880] sm:$0xff]  ;;  %v16176_v3 = vcombine.low %v1108_v55, %v1112_v56  ;;  %v925_v55 = vld [vmem:[%s18826_s14 + $0x308] sm:$0xff]  ;;  %v16002_v58 = vcombine.low %v933_v47, %v937_v48 }
 0x2c3   : > { %3321 = vmatpush1.bf16.msra.mxu1 %v15946_v44  ;;  %3281 = vmatprep.subr.bf16.mxu0 %v16193_v45  ;;  %v1104_v0 = vld [vmem:[%s18826_s14 + $0x8a0] sm:$0xff]  ;;  %v16011_v44 = vcombine.high %v941_v4, %v945_v40  ;;  %v929_v56 = vld [vmem:[%s18826_s14 + $0x328] sm:$0xff] }
 0x2c4   : > { %3322 = vmatprep.subr.bf16.mxu1 %v15939_v46  ;;  %v16169_v7 = vcombine.high %v1100_v63, %v1104_v0  ;;  %v1092_v11 = vld [vmem:[%s18826_s14 + $0x840] sm:$0xff]  ;;  %v16168_v15 = vcombine.low %v1100_v63, %v1104_v0  ;;  %v917_v63 = vld [vmem:[%s18826_s14 + $0x2c8] sm:$0xff]  ;;  %v15994_v2 = vcombine.low %v925_v55, %v929_v56 }
 0x2c5   : > { %v1096_v12 = vld [vmem:[%s18826_s14 + $0x860] sm:$0xff]  ;;  %v921_v0 = vld [vmem:[%s18826_s14 + $0x2e8] sm:$0xff] }
 0x2c6   : > { %3282 = vmatpush1.bf16.msra.mxu0 %v16192_v51  ;;  %v16161_v17 = vcombine.high %v1092_v11, %v1096_v12  ;;  %v1084_v19 = vld [vmem:[%s18826_s14 + $0x800] sm:$0xff]  ;;  %v16160_v23 = vcombine.low %v1092_v11, %v1096_v12  ;;  %v909_v11 = vld [vmem:[%s18826_s14 + $0x288] sm:$0xff]  ;;  %v15986_v14 = vcombine.low %v917_v63, %v921_v0 }
 0x2c7   : > { %3323 = vmatpush1.bf16.msra.mxu1 %v15938_v52  ;;  %3283 = vmatprep.subr.bf16.mxu0 %v16185_v53  ;;  %v1088_v20 = vld [vmem:[%s18826_s14 + $0x820] sm:$0xff]  ;;  %v16003_v52 = vcombine.high %v933_v47, %v937_v48  ;;  %v913_v12 = vld [vmem:[%s18826_s14 + $0x2a8] sm:$0xff] }
 0x2c8   : > { %3324 = vmatprep.subr.bf16.mxu1 %v15931_v54  ;;  %v16153_v25 = vcombine.high %v1084_v19, %v1088_v20  ;;  %v1204_v27 = vld [vmem:[%s18826_s14 + $0xbc0] sm:$0xff]  ;;  %v16152_v32 = vcombine.low %v1084_v19, %v1088_v20  ;;  %v901_v19 = vld [vmem:[%s18826_s14 + $0x248] sm:$0xff]  ;;  %v15978_v22 = vcombine.low %v909_v11, %v913_v12 }
 0x2c9   : > { %v1208_v28 = vld [vmem:[%s18826_s14 + $0xbe0] sm:$0xff]  ;;  %v905_v20 = vld [vmem:[%s18826_s14 + $0x268] sm:$0xff] }
 0x2ca   : > { %3284 = vmatpush1.bf16.msra.mxu0 %v16184_v59  ;;  %v16273_v36 = vcombine.high %v1204_v27, %v1208_v28  ;;  %v1196_v38 = vld [vmem:[%s18826_s14 + $0xb80] sm:$0xff]  ;;  %v16272_v5 = vcombine.low %v1204_v27, %v1208_v28  ;;  %v893_v27 = vld [vmem:[%s18826_s14 + $0x208] sm:$0xff]  ;;  %v15970_v30 = vcombine.low %v901_v19, %v905_v20 }
 0x2cb   : > { %3325 = vmatpush1.bf16.msra.mxu1 %v15930_v60  ;;  %3285 = vmatprep.subr.bf16.mxu0 %v16177_v61  ;;  %v1200_v39 = vld [vmem:[%s18826_s14 + $0xba0] sm:$0xff]  ;;  %v15995_v60 = vcombine.high %v925_v55, %v929_v56  ;;  %v897_v28 = vld [vmem:[%s18826_s14 + $0x228] sm:$0xff] }
 0x2cc   : > { %3326 = vmatprep.subr.bf16.mxu1 %v15923_v62  ;;  %v16265_v43 = vcombine.high %v1196_v38, %v1200_v39  ;;  %v1188_v45 = vld [vmem:[%s18826_s14 + $0xb40] sm:$0xff]  ;;  %v16264_v49 = vcombine.low %v1196_v38, %v1200_v39  ;;  %v1141_v38 = vld [vmem:[%s18826_s14 + $0x9c8] sm:$0xff]  ;;  %v15962_v40 = vcombine.low %v893_v27, %v897_v28 }
 0x2cd   : > { %v1192_v46 = vld [vmem:[%s18826_s14 + $0xb60] sm:$0xff]  ;;  %v1145_v39 = vld [vmem:[%s18826_s14 + $0x9e8] sm:$0xff] }
 0x2ce   : > { %3286 = vmatpush1.bf16.msra.mxu0 %v16176_v3  ;;  %v16257_v51 = vcombine.high %v1188_v45, %v1192_v46  ;;  %v1180_v53 = vld [vmem:[%s18826_s14 + $0xb00] sm:$0xff]  ;;  %v16256_v57 = vcombine.low %v1188_v45, %v1192_v46  ;;  %v19028_v45 = vcombine.low %v18950_v34, %v18950_v34  ;;  %v1133_v46 = vld [vmem:[%s18826_s14 + $0x988] sm:$0xff] }
 0x2cf   : > { %3327 = vmatpush1.bf16.msra.mxu1 %v15922_v6  ;;  %3287 = vmatprep.subr.bf16.mxu0 %v16169_v7  ;;  %v1184_v54 = vld [vmem:[%s18826_s14 + $0xb20] sm:$0xff]  ;;  %v15987_v6 = vcombine.high %v917_v63, %v921_v0  ;;  %v1137_v47 = vld [vmem:[%s18826_s14 + $0x9a8] sm:$0xff] }
 0x2d0   : > { %3328 = vmatprep.subr.bf16.mxu1 %v15915_v8  ;;  %v16249_v59 = vcombine.high %v1180_v53, %v1184_v54  ;;  %v1172_v61 = vld [vmem:[%s18826_s14 + $0xac0] sm:$0xff]  ;;  %v16248_v1 = vcombine.low %v1180_v53, %v1184_v54  ;;  %v1001_v53 = vld [vmem:[%s18826_s14 + $0x568] sm:$0xff]  ;;  %v16202_v56 = vcombine.low %v1133_v46, %v1137_v47 }
 0x2d1   : > { %v1176_v62 = vld [vmem:[%s18826_s14 + $0xae0] sm:$0xff]  ;;  %v1125_v34 = vld [vmem:[%s18826_s14 + $0x948] sm:$0xff] }
 0x2d2   : > { %3288 = vmatpush1.bf16.msra.mxu0 %v16168_v15  ;;  %v16241_v3 = vcombine.high %v1172_v61, %v1176_v62  ;;  %v1164_v7 = vld [vmem:[%s18826_s14 + $0xa80] sm:$0xff]  ;;  %v16240_v13 = vcombine.low %v1172_v61, %v1176_v62  ;;  %v1129_v54 = vld [vmem:[%s18826_s14 + $0x968] sm:$0xff] }
 0x2d3   : > { %3329 = vmatpush1.bf16.msra.mxu1 %v15914_v16  ;;  %3289 = vmatprep.subr.bf16.mxu0 %v16161_v17  ;;  %v1168_v8 = vld [vmem:[%s18826_s14 + $0xaa0] sm:$0xff]  ;;  %v15979_v16 = vcombine.high %v909_v11, %v913_v12  ;;  %v1117_v61 = vld [vmem:[%s18826_s14 + $0x908] sm:$0xff]  ;;  %v16194_v0 = vcombine.low %v1125_v34, %v1129_v54 }
 0x2d4   : > { %3330 = vmatprep.subr.bf16.mxu1 %v15907_v18  ;;  %v16233_v15 = vcombine.high %v1164_v7, %v1168_v8  ;;  %v1156_v17 = vld [vmem:[%s18826_s14 + $0xa40] sm:$0xff]  ;;  %v16232_v21 = vcombine.low %v1164_v7, %v1168_v8  ;;  %v1121_v62 = vld [vmem:[%s18826_s14 + $0x928] sm:$0xff] }
 0x2d5   : > { %v1160_v18 = vld [vmem:[%s18826_s14 + $0xa60] sm:$0xff]  ;;  %v1109_v7 = vld [vmem:[%s18826_s14 + $0x8c8] sm:$0xff]  ;;  %v16186_v12 = vcombine.low %v1117_v61, %v1121_v62 }
 0x2d6   : > { %3290 = vmatpush1.bf16.msra.mxu0 %v16160_v23  ;;  %v16225_v23 = vcombine.high %v1156_v17, %v1160_v18  ;;  %v16224_v29 = vcombine.low %v1156_v17, %v1160_v18  ;;  %v1113_v8 = vld [vmem:[%s18826_s14 + $0x8e8] sm:$0xff] }
 0x2d7   : > { %3331 = vmatpush1.bf16.msra.mxu1 %v15906_v24  ;;  %3291 = vmatprep.subr.bf16.mxu0 %v16153_v25  ;;  %v15971_v24 = vcombine.high %v901_v19, %v905_v20  ;;  %v1148_v25 = vld [vmem:[%s18826_s14 + $0xa00] sm:$0xff]  ;;  %v1101_v17 = vld [vmem:[%s18826_s14 + $0x888] sm:$0xff]  ;;  %v16178_v20 = vcombine.low %v1109_v7, %v1113_v8 }
 0x2d8   : > { %3332 = vmatprep.subr.bf16.mxu1 %v15899_v26  ;;  %v1152_v26 = vld [vmem:[%s18826_s14 + $0xa20] sm:$0xff]  ;;  %v1105_v18 = vld [vmem:[%s18826_s14 + $0x8a8] sm:$0xff] }
 0x2d9   : > { %v16216_v4 = vcombine.low %v1148_v25, %v1152_v26 }
 0x2da   : > { %3292 = vmatpush1.bf16.msra.mxu0 %v16152_v32  ;;  %v16217_v32 = vcombine.high %v1148_v25, %v1152_v26  ;;  %v1093_v25 = vld [vmem:[%s18826_s14 + $0x848] sm:$0xff] }
 0x2db   : > { %3333 = vmatpush1.bf16.msra.mxu1 %v15898_v33  ;;  %3293 = vmatprep.subr.bf16.mxu0 %v16273_v36  ;;  %v15963_v33 = vcombine.high %v893_v27, %v897_v28  ;;  %v1013_v36 = vld [vmem:[%s18826_s14 + $0x5c8] sm:$0xff]  ;;  %v16170_v28 = vcombine.low %v1101_v17, %v1105_v18 }
 0x2dc   : > { %3334 = vmatprep.subr.bf16.mxu1 %v16019_v37  ;;  %v1017_v37 = vld [vmem:[%s18826_s14 + $0x5e8] sm:$0xff] }
 0x2dd   : > { %v16082_v48 = vcombine.low %v1013_v36, %v1017_v37  ;;  %v1097_v26 = vld [vmem:[%s18826_s14 + $0x868] sm:$0xff] }
 0x2de   : > { %3294 = vmatpush2.bf16.msra.mxu0 %v16272_v5  ;;  %v16083_v5 = vcombine.high %v1013_v36, %v1017_v37  ;;  %v1085_v36 = vld [vmem:[%s18826_s14 + $0x808] sm:$0xff] }
 0x2df   : > { %3335 = vmatpush2.bf16.msra.mxu1 %v16018_v42  ;;  %3295 = vmatprep.subr.bf16.mxu0 %v16265_v43  ;;  %v16211_v42 = vcombine.high %v1141_v38, %v1145_v39  ;;  %v1005_v43 = vld [vmem:[%s18826_s14 + $0x588] sm:$0xff] }
 0x2e0   : > { %3336 = vmatprep.subr.bf16.mxu1 %v16011_v44  ;;  %v1009_v44 = vld [vmem:[%s18826_s14 + $0x5a8] sm:$0xff] }
 0x2e1   : > { %v16074_v55 = vcombine.low %v1005_v43, %v1009_v44  ;;  %v1089_v37 = vld [vmem:[%s18826_s14 + $0x828] sm:$0xff] }
 0x2e2   : > { %3296 = vmatpush2.bf16.msra.mxu0 %v16264_v49  ;;  %v16210_v49 = vcombine.low %v1141_v38, %v1145_v39  ;;  %v16162_v39 = vcombine.low %v1093_v25, %v1097_v26 }
 0x2e3   : > { %3337 = vmatpush2.bf16.msra.mxu1 %v16010_v50  ;;  %3297 = vmatprep.subr.bf16.mxu0 %v16257_v51  ;;  %v16075_v50 = vcombine.high %v1005_v43, %v1009_v44  ;;  %v16203_v51 = vcombine.high %v1133_v46, %v1137_v47  ;;  %v1205_v43 = vld [vmem:[%s18826_s14 + $0xbc8] sm:$0xff]  ;;  %v16154_v47 = vcombine.low %v1085_v36, %v1089_v37 }
 0x2e4   : > { %3338 = vmatprep.subr.bf16.mxu1 %v16003_v52  ;;  %v997_v52 = vld [vmem:[%s18826_s14 + $0x548] sm:$0xff] }
 0x2e5   : > { %v16066_v63 = vcombine.low %v997_v52, %v1001_v53  ;;  %v1209_v44 = vld [vmem:[%s18826_s14 + $0xbe8] sm:$0xff] }
 0x2e6   : > { %3298 = vmatpush2.bf16.msra.mxu0 %v16256_v57  ;;  %v16067_v57 = vcombine.high %v997_v52, %v1001_v53  ;;  %v1197_v52 = vld [vmem:[%s18826_s14 + $0xb88] sm:$0xff] }
 0x2e7   : > { %3339 = vmatpush2.bf16.msra.mxu1 %v16002_v58  ;;  %3299 = vmatprep.subr.bf16.mxu0 %v16249_v59  ;;  %v16195_v58 = vcombine.high %v1125_v34, %v1129_v54  ;;  %v989_v59 = vld [vmem:[%s18826_s14 + $0x508] sm:$0xff]  ;;  %v16274_v54 = vcombine.low %v1205_v43, %v1209_v44 }
 0x2e8   : > { %3340 = vmatprep.subr.bf16.mxu1 %v15995_v60  ;;  %v993_v60 = vld [vmem:[%s18826_s14 + $0x528] sm:$0xff] }
 0x2e9   : > { %v16058_v11 = vcombine.low %v989_v59, %v993_v60  ;;  %v1201_v53 = vld [vmem:[%s18826_s14 + $0xba8] sm:$0xff] }
 0x2ea   : > { %3300 = vmatpush2.bf16.msra.mxu0 %v16248_v1  ;;  %v16059_v1 = vcombine.high %v989_v59, %v993_v60  ;;  %v1189_v59 = vld [vmem:[%s18826_s14 + $0xb48] sm:$0xff] }
 0x2eb   : > { %3341 = vmatpush2.bf16.msra.mxu1 %v15994_v2  ;;  %3301 = vmatprep.subr.bf16.mxu0 %v16241_v3  ;;  %v16187_v2 = vcombine.high %v1117_v61, %v1121_v62  ;;  %v981_v3 = vld [vmem:[%s18826_s14 + $0x4c8] sm:$0xff]  ;;  %v16266_v62 = vcombine.low %v1197_v52, %v1201_v53 }
 0x2ec   : > { %3342 = vmatprep.subr.bf16.mxu1 %v15987_v6  ;;  %v985_v6 = vld [vmem:[%s18826_s14 + $0x4e8] sm:$0xff] }
 0x2ed   : > { %v16050_v19 = vcombine.low %v981_v3, %v985_v6  ;;  %v1193_v60 = vld [vmem:[%s18826_s14 + $0xb68] sm:$0xff] }
 0x2ee   : > { %3302 = vmatpush2.bf16.msra.mxu0 %v16240_v13  ;;  %v16051_v13 = vcombine.high %v981_v3, %v985_v6  ;;  %v1181_v3 = vld [vmem:[%s18826_s14 + $0xb08] sm:$0xff] }
 0x2ef   : > { %3343 = vmatpush2.bf16.msra.mxu1 %v15986_v14  ;;  %3303 = vmatprep.subr.bf16.mxu0 %v16233_v15  ;;  %v16179_v14 = vcombine.high %v1109_v7, %v1113_v8  ;;  %v973_v15 = vld [vmem:[%s18826_s14 + $0x488] sm:$0xff]  ;;  %v16258_v8 = vcombine.low %v1189_v59, %v1193_v60 }
 0x2f0   : > { %3344 = vmatprep.subr.bf16.mxu1 %v15979_v16  ;;  %v977_v16 = vld [vmem:[%s18826_s14 + $0x4a8] sm:$0xff] }
 0x2f1   : > { %v16042_v27 = vcombine.low %v973_v15, %v977_v16  ;;  %v1185_v6 = vld [vmem:[%s18826_s14 + $0xb28] sm:$0xff] }
 0x2f2   : > { %3304 = vmatpush2.bf16.msra.mxu0 %v16232_v21  ;;  %v16043_v21 = vcombine.high %v973_v15, %v977_v16  ;;  %v1173_v15 = vld [vmem:[%s18826_s14 + $0xac8] sm:$0xff] }
 0x2f3   : > { %3345 = vmatpush2.bf16.msra.mxu1 %v15978_v22  ;;  %3305 = vmatprep.subr.bf16.mxu0 %v16225_v23  ;;  %v16171_v22 = vcombine.high %v1101_v17, %v1105_v18  ;;  %v965_v23 = vld [vmem:[%s18826_s14 + $0x448] sm:$0xff]  ;;  %v16250_v18 = vcombine.low %v1181_v3, %v1185_v6 }
 0x2f4   : > { %3346 = vmatprep.subr.bf16.mxu1 %v15971_v24  ;;  %v969_v24 = vld [vmem:[%s18826_s14 + $0x468] sm:$0xff] }
 0x2f5   : > { %v16034_v38 = vcombine.low %v965_v23, %v969_v24  ;;  %v1177_v16 = vld [vmem:[%s18826_s14 + $0xae8] sm:$0xff] }
 0x2f6   : > { %3306 = vmatpush2.bf16.msra.mxu0 %v16224_v29  ;;  %v16035_v29 = vcombine.high %v965_v23, %v969_v24  ;;  %v1165_v23 = vld [vmem:[%s18826_s14 + $0xa88] sm:$0xff] }
 0x2f7   : > { %3347 = vmatpush2.bf16.msra.mxu1 %v15970_v30  ;;  %3307 = vmatprep.subr.bf16.mxu0 %v16217_v32  ;;  %v16163_v30 = vcombine.high %v1093_v25, %v1097_v26  ;;  %v957_v32 = vld [vmem:[%s18826_s14 + $0x408] sm:$0xff]  ;;  %v16242_v26 = vcombine.low %v1173_v15, %v1177_v16 }
 0x2f8   : > { %3348 = vmatprep.subr.bf16.mxu1 %v15963_v33  ;;  %v961_v33 = vld [vmem:[%s18826_s14 + $0x428] sm:$0xff] }
 0x2f9   : > { %v16026_v46 = vcombine.low %v957_v32, %v961_v33  ;;  %v1169_v24 = vld [vmem:[%s18826_s14 + $0xaa8] sm:$0xff] }
 0x2fa   : > { %3308 = vmatpush2.bf16.msra.mxu0 %v16216_v4  ;;  %v16027_v4 = vcombine.high %v957_v32, %v961_v33  ;;  %v1157_v32 = vld [vmem:[%s18826_s14 + $0xa48] sm:$0xff] }
 0x2fb   : > { %3349 = vmatpush2.bf16.msra.mxu1 %v15962_v40  ;;  %3359 = vmatprep.subr.bf16.mxu0 %v16083_v5  ;;  %v16155_v40 = vcombine.high %v1085_v36, %v1089_v37  ;;  %v1077_v5 = vld [vmem:[%s18826_s14 + $0x7c8] sm:$0xff]  ;;  %v16234_v37 = vcombine.low %v1165_v23, %v1169_v24 }
 0x2fc   : > { %3400 = vmatprep.subr.bf16.mxu1 %v16211_v42  ;;  %v1081_v42 = vld [vmem:[%s18826_s14 + $0x7e8] sm:$0xff] }
 0x2fd   : > { %3310 = vmatmul.mubr.bf16.vlgmr.msra.gmra.mxu0 %v19028_v45  ;;  %v16146_v34 = vcombine.low %v1077_v5, %v1081_v42  ;;  %v1161_v33 = vld [vmem:[%s18826_s14 + $0xa68] sm:$0xff] }
 0x2fe   : > { %3351 = vmatmul.mubr.bf16.vlgmr.msra.gmra.mxu1 %v18946_v31  ;;  %3360 = vmatpush1.bf16.msra.mxu0 %v16082_v48  ;;  %v16147_v48 = vcombine.high %v1077_v5, %v1081_v42  ;;  %v1149_v5 = vld [vmem:[%s18826_s14 + $0xa08] sm:$0xff] }
 0x2ff   : > { %3401 = vmatpush1.bf16.msra.mxu1 %v16210_v49  ;;  %3361 = vmatprep.subr.bf16.mxu0 %v16075_v50  ;;  %v16275_v49 = vcombine.high %v1205_v43, %v1209_v44  ;;  %v1069_v50 = vld [vmem:[%s18826_s14 + $0x788] sm:$0xff]  ;;  %v16226_v44 = vcombine.low %v1157_v32, %v1161_v33 }
 0x300   : > { %3402 = vmatprep.subr.bf16.mxu1 %v16203_v51  ;;  %3391 = vmatprep.mubr.bf16.mxu0 %v18900_v10  ;;  %v1073_v51 = vld [vmem:[%s18826_s14 + $0x7a8] sm:$0xff] }
 0x301   : > { %3432 = vmatprep.mubr.bf16.mxu1 %v18960_v41  ;;  %v16138_v61 = vcombine.low %v1069_v50, %v1073_v51  ;;  %v1153_v42 = vld [vmem:[%s18826_s14 + $0xa28] sm:$0xff] }
 0x302   : > { %3362 = vmatpush1.bf16.msra.mxu0 %v16074_v55  ;;  %v16139_v55 = vcombine.high %v1069_v50, %v1073_v51  ;;  %v1014_v50 = vld [vmem:[%s18826_s14 + $0x5d0] sm:$0xff] }
 0x303   : > { %3403 = vmatpush1.bf16.msra.mxu1 %v16202_v56  ;;  %3363 = vmatprep.subr.bf16.mxu0 %v16067_v57  ;;  %v16267_v56 = vcombine.high %v1197_v52, %v1201_v53  ;;  %v1061_v57 = vld [vmem:[%s18826_s14 + $0x748] sm:$0xff]  ;;  %v1018_v51 = vld [vmem:[%s18826_s14 + $0x5f0] sm:$0xff]  ;;  %v16218_v53 = vcombine.low %v1149_v5, %v1153_v42 }
 0x304   : > { %3404 = vmatprep.subr.bf16.mxu1 %v16195_v58  ;;  %v1065_v58 = vld [vmem:[%s18826_s14 + $0x768] sm:$0xff] }
 0x305   : > { %v16130_v7 = vcombine.low %v1061_v57, %v1065_v58 }
 0x306   : > { %3364 = vmatpush1.bf16.msra.mxu0 %v16066_v63  ;;  %v16131_v63 = vcombine.high %v1061_v57, %v1065_v58  ;;  %v1006_v57 = vld [vmem:[%s18826_s14 + $0x590] sm:$0xff] }
 0x307   : > { %3405 = vmatpush1.bf16.msra.mxu1 %v16194_v0  ;;  %3365 = vmatprep.subr.bf16.mxu0 %v16059_v1  ;;  %v16259_v0 = vcombine.high %v1189_v59, %v1193_v60  ;;  %v1053_v1 = vld [vmem:[%s18826_s14 + $0x708] sm:$0xff]  ;;  %v1010_v58 = vld [vmem:[%s18826_s14 + $0x5b0] sm:$0xff]  ;;  %v16084_v60 = vcombine.low %v1014_v50, %v1018_v51 }
 0x308   : > { %3406 = vmatprep.subr.bf16.mxu1 %v16187_v2  ;;  %v1057_v2 = vld [vmem:[%s18826_s14 + $0x728] sm:$0xff] }
 0x309   : > { %v16122_v17 = vcombine.low %v1053_v1, %v1057_v2 }
 0x30a   : > { %3366 = vmatpush1.bf16.msra.mxu0 %v16058_v11  ;;  %v16123_v11 = vcombine.high %v1053_v1, %v1057_v2  ;;  %v998_v1 = vld [vmem:[%s18826_s14 + $0x550] sm:$0xff] }
 0x30b   : > { %3407 = vmatpush1.bf16.msra.mxu1 %v16186_v12  ;;  %3367 = vmatprep.subr.bf16.mxu0 %v16051_v13  ;;  %v16251_v12 = vcombine.high %v1181_v3, %v1185_v6  ;;  %v1045_v13 = vld [vmem:[%s18826_s14 + $0x6c8] sm:$0xff]  ;;  %v1002_v2 = vld [vmem:[%s18826_s14 + $0x570] sm:$0xff]  ;;  %v16076_v6 = vcombine.low %v1006_v57, %v1010_v58 }
 0x30c   : > { %3408 = vmatprep.subr.bf16.mxu1 %v16179_v14  ;;  %v1049_v14 = vld [vmem:[%s18826_s14 + $0x6e8] sm:$0xff] }
 0x30d   : > { %v16114_v25 = vcombine.low %v1045_v13, %v1049_v14 }
 0x30e   : > { %3368 = vmatpush1.bf16.msra.mxu0 %v16050_v19  ;;  %v16115_v19 = vcombine.high %v1045_v13, %v1049_v14  ;;  %v990_v13 = vld [vmem:[%s18826_s14 + $0x510] sm:$0xff] }
 0x30f   : > { %3409 = vmatpush1.bf16.msra.mxu1 %v16178_v20  ;;  %3369 = vmatprep.subr.bf16.mxu0 %v16043_v21  ;;  %v16243_v20 = vcombine.high %v1173_v15, %v1177_v16  ;;  %v1037_v21 = vld [vmem:[%s18826_s14 + $0x688] sm:$0xff]  ;;  %v994_v14 = vld [vmem:[%s18826_s14 + $0x530] sm:$0xff]  ;;  %v16068_v16 = vcombine.low %v998_v1, %v1002_v2 }
 0x310   : > { %3410 = vmatprep.subr.bf16.mxu1 %v16171_v22  ;;  %v1041_v22 = vld [vmem:[%s18826_s14 + $0x6a8] sm:$0xff] }
 0x311   : > { %v16106_v36 = vcombine.low %v1037_v21, %v1041_v22 }
 0x312   : > { %3370 = vmatpush1.bf16.msra.mxu0 %v16042_v27  ;;  %v16107_v27 = vcombine.high %v1037_v21, %v1041_v22  ;;  %v982_v21 = vld [vmem:[%s18826_s14 + $0x4d0] sm:$0xff] }
 0x313   : > { %3411 = vmatpush1.bf16.msra.mxu1 %v16170_v28  ;;  %3371 = vmatprep.subr.bf16.mxu0 %v16035_v29  ;;  %v16235_v28 = vcombine.high %v1165_v23, %v1169_v24  ;;  %v1029_v29 = vld [vmem:[%s18826_s14 + $0x648] sm:$0xff]  ;;  %v986_v22 = vld [vmem:[%s18826_s14 + $0x4f0] sm:$0xff]  ;;  %v16060_v24 = vcombine.low %v990_v13, %v994_v14 }
 0x314   : > { %3412 = vmatprep.subr.bf16.mxu1 %v16163_v30  ;;  %v1033_v30 = vld [vmem:[%s18826_s14 + $0x668] sm:$0xff] }
 0x315   : > { %v16098_v43 = vcombine.low %v1029_v29, %v1033_v30 }
 0x316   : > { %3372 = vmatpush1.bf16.msra.mxu0 %v16034_v38  ;;  %v16099_v38 = vcombine.high %v1029_v29, %v1033_v30  ;;  %v974_v29 = vld [vmem:[%s18826_s14 + $0x490] sm:$0xff] }
 0x317   : > { %3413 = vmatpush1.bf16.msra.mxu1 %v16162_v39  ;;  %3373 = vmatprep.subr.bf16.mxu0 %v16027_v4  ;;  %v16227_v39 = vcombine.high %v1157_v32, %v1161_v33  ;;  %v1021_v4 = vld [vmem:[%s18826_s14 + $0x608] sm:$0xff]  ;;  %v978_v30 = vld [vmem:[%s18826_s14 + $0x4b0] sm:$0xff]  ;;  %v16052_v33 = vcombine.low %v982_v21, %v986_v22 }
 0x318   : > { %3414 = vmatprep.subr.bf16.mxu1 %v16155_v40  ;;  %v1025_v40 = vld [vmem:[%s18826_s14 + $0x628] sm:$0xff] }
 0x319   : > { %v16090_v52 = vcombine.low %v1021_v4, %v1025_v40 }
 0x31a   : > { %3374 = vmatpush1.bf16.msra.mxu0 %v16026_v46  ;;  %v16091_v46 = vcombine.high %v1021_v4, %v1025_v40  ;;  %v966_v4 = vld [vmem:[%s18826_s14 + $0x450] sm:$0xff] }
 0x31b   : > { %3415 = vmatpush1.bf16.msra.mxu1 %v16154_v47  ;;  %3375 = vmatprep.subr.bf16.mxu0 %v16147_v48  ;;  %v16219_v47 = vcombine.high %v1149_v5, %v1153_v42  ;;  %v886_v48 = vld [vmem:[%s18826_s14 + $0x1d0] sm:$0xff]  ;;  %v16044_v42 = vcombine.low %v974_v29, %v978_v30 }
 0x31c   : > { %3416 = vmatprep.subr.bf16.mxu1 %v16275_v49  ;;  %v890_v49 = vld [vmem:[%s18826_s14 + $0x1f0] sm:$0xff] }
 0x31d   : > { %v15956_v59 = vcombine.low %v886_v48, %v890_v49  ;;  %v970_v40 = vld [vmem:[%s18826_s14 + $0x470] sm:$0xff] }
 0x31e   : > { %3376 = vmatpush2.bf16.msra.mxu0 %v16146_v34  ;;  %v15957_v34 = vcombine.high %v886_v48, %v890_v49  ;;  %v958_v48 = vld [vmem:[%s18826_s14 + $0x410] sm:$0xff] }
 0x31f   : > { %3417 = vmatpush2.bf16.msra.mxu1 %v16274_v54  ;;  %3377 = vmatprep.subr.bf16.mxu0 %v16139_v55  ;;  %v16085_v54 = vcombine.high %v1014_v50, %v1018_v51  ;;  %v878_v55 = vld [vmem:[%s18826_s14 + $0x190] sm:$0xff]  ;;  %v16036_v51 = vcombine.low %v966_v4, %v970_v40 }
 0x320   : > { %3418 = vmatprep.subr.bf16.mxu1 %v16267_v56  ;;  %v882_v56 = vld [vmem:[%s18826_s14 + $0x1b0] sm:$0xff] }
 0x321   : > { %v15948_v3 = vcombine.low %v878_v55, %v882_v56  ;;  %v962_v49 = vld [vmem:[%s18826_s14 + $0x430] sm:$0xff] }
 0x322   : > { %3378 = vmatpush2.bf16.msra.mxu0 %v16138_v61  ;;  %v15949_v61 = vcombine.high %v878_v55, %v882_v56  ;;  %v1078_v55 = vld [vmem:[%s18826_s14 + $0x7d0] sm:$0xff] }
 0x323   : > { %3419 = vmatpush2.bf16.msra.mxu1 %v16266_v62  ;;  %3379 = vmatprep.subr.bf16.mxu0 %v16131_v63  ;;  %v16077_v62 = vcombine.high %v1006_v57, %v1010_v58  ;;  %v870_v63 = vld [vmem:[%s18826_s14 + $0x150] sm:$0xff]  ;;  %v16028_v58 = vcombine.low %v958_v48, %v962_v49 }
 0x324   : > { %3420 = vmatprep.subr.bf16.mxu1 %v16259_v0  ;;  %v874_v0 = vld [vmem:[%s18826_s14 + $0x170] sm:$0xff] }
 0x325   : > { %v15940_v15 = vcombine.low %v870_v63, %v874_v0  ;;  %v1082_v56 = vld [vmem:[%s18826_s14 + $0x7f0] sm:$0xff] }
 0x326   : > { %3380 = vmatpush2.bf16.msra.mxu0 %v16130_v7  ;;  %v15941_v7 = vcombine.high %v870_v63, %v874_v0  ;;  %v1070_v63 = vld [vmem:[%s18826_s14 + $0x790] sm:$0xff] }
 0x327   : > { %3421 = vmatpush2.bf16.msra.mxu1 %v16258_v8  ;;  %3381 = vmatprep.subr.bf16.mxu0 %v16123_v11  ;;  %v16069_v8 = vcombine.high %v998_v1, %v1002_v2  ;;  %v862_v11 = vld [vmem:[%s18826_s14 + $0x110] sm:$0xff]  ;;  %v16148_v2 = vcombine.low %v1078_v55, %v1082_v56 }
 0x328   : > { %3422 = vmatprep.subr.bf16.mxu1 %v16251_v12  ;;  %v866_v12 = vld [vmem:[%s18826_s14 + $0x130] sm:$0xff] }
 0x329   : > { %v15932_v23 = vcombine.low %v862_v11, %v866_v12  ;;  %v1074_v0 = vld [vmem:[%s18826_s14 + $0x7b0] sm:$0xff] }
 0x32a   : > { %3382 = vmatpush2.bf16.msra.mxu0 %v16122_v17  ;;  %v15933_v17 = vcombine.high %v862_v11, %v866_v12  ;;  %v1062_v11 = vld [vmem:[%s18826_s14 + $0x750] sm:$0xff] }
 0x32b   : > { %3423 = vmatpush2.bf16.msra.mxu1 %v16250_v18  ;;  %3383 = vmatprep.subr.bf16.mxu0 %v16115_v19  ;;  %v16061_v18 = vcombine.high %v990_v13, %v994_v14  ;;  %v854_v19 = vld [vmem:[%s18826_s14 + $0xd0] sm:$0xff]  ;;  %v16140_v14 = vcombine.low %v1070_v63, %v1074_v0 }
 0x32c   : > { %3424 = vmatprep.subr.bf16.mxu1 %v16243_v20  ;;  %v858_v20 = vld [vmem:[%s18826_s14 + $0xf0] sm:$0xff] }
 0x32d   : > { %v15924_v32 = vcombine.low %v854_v19, %v858_v20  ;;  %v1066_v12 = vld [vmem:[%s18826_s14 + $0x770] sm:$0xff] }
 0x32e   : > { %3384 = vmatpush2.bf16.msra.mxu0 %v16114_v25  ;;  %v15925_v25 = vcombine.high %v854_v19, %v858_v20  ;;  %v1054_v19 = vld [vmem:[%s18826_s14 + $0x710] sm:$0xff] }
 0x32f   : > { %3425 = vmatpush2.bf16.msra.mxu1 %v16242_v26  ;;  %3385 = vmatprep.subr.bf16.mxu0 %v16107_v27  ;;  %v16053_v26 = vcombine.high %v982_v21, %v986_v22  ;;  %v846_v27 = vld [vmem:[%s18826_s14 + $0x90] sm:$0xff]  ;;  %v16132_v22 = vcombine.low %v1062_v11, %v1066_v12 }
 0x330   : > { %3426 = vmatprep.subr.bf16.mxu1 %v16235_v28  ;;  %v850_v28 = vld [vmem:[%s18826_s14 + $0xb0] sm:$0xff] }
 0x331   : > { %v15916_v5 = vcombine.low %v846_v27, %v850_v28  ;;  %v1058_v20 = vld [vmem:[%s18826_s14 + $0x730] sm:$0xff] }
 0x332   : > { %3386 = vmatpush2.bf16.msra.mxu0 %v16106_v36  ;;  %v15917_v36 = vcombine.high %v846_v27, %v850_v28  ;;  %v1046_v27 = vld [vmem:[%s18826_s14 + $0x6d0] sm:$0xff] }
 0x333   : > { %3427 = vmatpush2.bf16.msra.mxu1 %v16234_v37  ;;  %3387 = vmatprep.subr.bf16.mxu0 %v16099_v38  ;;  %v16045_v37 = vcombine.high %v974_v29, %v978_v30  ;;  %v838_v38 = vld [vmem:[%s18826_s14 + $0x50] sm:$0xff]  ;;  %v16124_v30 = vcombine.low %v1054_v19, %v1058_v20 }
 0x334   : > { %3428 = vmatprep.subr.bf16.mxu1 %v16227_v39  ;;  %v842_v39 = vld [vmem:[%s18826_s14 + $0x70] sm:$0xff] }
 0x335   : > { %v15908_v50 = vcombine.low %v838_v38, %v842_v39  ;;  %v1050_v28 = vld [vmem:[%s18826_s14 + $0x6f0] sm:$0xff] }
 0x336   : > { %3388 = vmatpush2.bf16.msra.mxu0 %v16098_v43  ;;  %v15909_v43 = vcombine.high %v838_v38, %v842_v39  ;;  %v1038_v38 = vld [vmem:[%s18826_s14 + $0x690] sm:$0xff] }
 0x337   : > { %3429 = vmatpush2.bf16.msra.mxu1 %v16226_v44  ;;  %3389 = vmatprep.subr.bf16.mxu0 %v16091_v46  ;;  %v16037_v44 = vcombine.high %v966_v4, %v970_v40  ;;  %v830_v46 = vld [vmem:[%s18826_s14 + $0x10] sm:$0xff]  ;;  %v16116_v40 = vcombine.low %v1046_v27, %v1050_v28 }
 0x338   : > { %3430 = vmatprep.subr.bf16.mxu1 %v16219_v47  ;;  %v834_v47 = vld [vmem:[%s18826_s14 + $0x30] sm:$0xff] }
 0x339   : > { %v15900_v57 = vcombine.low %v830_v46, %v834_v47  ;;  %v1042_v39 = vld [vmem:[%s18826_s14 + $0x6b0] sm:$0xff] }
 0x33a   : > { %3390 = vmatpush2.bf16.msra.mxu0 %v16090_v52  ;;  %v15901_v52 = vcombine.high %v830_v46, %v834_v47  ;;  %v1030_v46 = vld [vmem:[%s18826_s14 + $0x650] sm:$0xff] }
 0x33b   : > { %3431 = vmatpush2.bf16.msra.mxu1 %v16218_v53  ;;  %3441 = vmatprep.subr.bf16.mxu0 %v15957_v34  ;;  %v16029_v53 = vcombine.high %v958_v48, %v962_v49  ;;  %v950_v34 = vld [vmem:[%s18826_s14 + $0x3d0] sm:$0xff]  ;;  %v16108_v49 = vcombine.low %v1038_v38, %v1042_v39 }
 0x33c   : > { %3482 = vmatprep.subr.bf16.mxu1 %v16085_v54  ;;  %v954_v54 = vld [vmem:[%s18826_s14 + $0x3f0] sm:$0xff] }
 0x33d   : > { %3392 = vmatmul.mubr.bf16.vlgmr.msra.gmra.mxu0 %v18954_v35  ;;  %v16020_v1 = vcombine.low %v950_v34, %v954_v54  ;;  %v1034_v47 = vld [vmem:[%s18826_s14 + $0x670] sm:$0xff] }
 0x33e   : > { %3433 = vmatmul.mubr.bf16.vlgmr.msra.gmra.mxu1 %v19028_v45  ;;  %3442 = vmatpush1.bf16.msra.mxu0 %v15956_v59  ;;  %v16021_v59 = vcombine.high %v950_v34, %v954_v54  ;;  %v1022_v34 = vld [vmem:[%s18826_s14 + $0x610] sm:$0xff] }
 0x33f   : > { %3483 = vmatpush1.bf16.msra.mxu1 %v16084_v60  ;;  %3443 = vmatprep.subr.bf16.mxu0 %v15949_v61  ;;  %v16149_v60 = vcombine.high %v1078_v55, %v1082_v56  ;;  %v942_v61 = vld [vmem:[%s18826_s14 + $0x390] sm:$0xff]  ;;  %v16100_v56 = vcombine.low %v1030_v46, %v1034_v47 }
 0x340   : > { %3484 = vmatprep.subr.bf16.mxu1 %v16077_v62  ;;  %3473 = vmatprep.mubr.bf16.mxu0 %v18896_v9  ;;  %v946_v62 = vld [vmem:[%s18826_s14 + $0x3b0] sm:$0xff] }
 0x341   : > { %3514 = vmatprep.mubr.bf16.mxu1 %v18900_v10  ;;  %v16012_v13 = vcombine.low %v942_v61, %v946_v62  ;;  %v1026_v54 = vld [vmem:[%s18826_s14 + $0x630] sm:$0xff] }
 0x342   : > { %3444 = vmatpush1.bf16.msra.mxu0 %v15948_v3  ;;  %v16013_v3 = vcombine.high %v942_v61, %v946_v62  ;;  %v887_v61 = vld [vmem:[%s18826_s14 + $0x1d8] sm:$0xff] }
 0x343   : > { %3485 = vmatpush1.bf16.msra.mxu1 %v16076_v6  ;;  %3445 = vmatprep.subr.bf16.mxu0 %v15941_v7  ;;  %v16141_v6 = vcombine.high %v1070_v63, %v1074_v0  ;;  %v934_v7 = vld [vmem:[%s18826_s14 + $0x350] sm:$0xff]  ;;  %v891_v62 = vld [vmem:[%s18826_s14 + $0x1f8] sm:$0xff]  ;;  %v16092_v0 = vcombine.low %v1022_v34, %v1026_v54 }
 0x344   : > { %3486 = vmatprep.subr.bf16.mxu1 %v16069_v8  ;;  %v938_v8 = vld [vmem:[%s18826_s14 + $0x370] sm:$0xff] }
 0x345   : > { %v16004_v21 = vcombine.low %v934_v7, %v938_v8 }
 0x346   : > { %3446 = vmatpush1.bf16.msra.mxu0 %v15940_v15  ;;  %v16005_v15 = vcombine.high %v934_v7, %v938_v8  ;;  %v879_v7 = vld [vmem:[%s18826_s14 + $0x198] sm:$0xff] }
 0x347   : > { %3487 = vmatpush1.bf16.msra.mxu1 %v16068_v16  ;;  %3447 = vmatprep.subr.bf16.mxu0 %v15933_v17  ;;  %v16133_v16 = vcombine.high %v1062_v11, %v1066_v12  ;;  %v926_v17 = vld [vmem:[%s18826_s14 + $0x310] sm:$0xff]  ;;  %v883_v8 = vld [vmem:[%s18826_s14 + $0x1b8] sm:$0xff]  ;;  %v15958_v12 = vcombine.low %v887_v61, %v891_v62 }
 0x348   : > { %3488 = vmatprep.subr.bf16.mxu1 %v16061_v18  ;;  %v930_v18 = vld [vmem:[%s18826_s14 + $0x330] sm:$0xff] }
 0x349   : > { %v15996_v29 = vcombine.low %v926_v17, %v930_v18 }
 0x34a   : > { %3448 = vmatpush1.bf16.msra.mxu0 %v15932_v23  ;;  %v15997_v23 = vcombine.high %v926_v17, %v930_v18  ;;  %v871_v18 = vld [vmem:[%s18826_s14 + $0x158] sm:$0xff] }
 0x34b   : > { %3489 = vmatpush1.bf16.msra.mxu1 %v16060_v24  ;;  %3449 = vmatprep.subr.bf16.mxu0 %v15925_v25  ;;  %v16125_v24 = vcombine.high %v1054_v19, %v1058_v20  ;;  %v918_v25 = vld [vmem:[%s18826_s14 + $0x2d0] sm:$0xff]  ;;  %v875_v19 = vld [vmem:[%s18826_s14 + $0x178] sm:$0xff] }
 0x34c   : > { %3490 = vmatprep.subr.bf16.mxu1 %v16053_v26  ;;  %v922_v26 = vld [vmem:[%s18826_s14 + $0x2f0] sm:$0xff] }
 0x34d   : > { %v15988_v4 = vcombine.low %v918_v25, %v922_v26 }
 0x34e   : > { %3450 = vmatpush1.bf16.msra.mxu0 %v15924_v32  ;;  %v15989_v32 = vcombine.high %v918_v25, %v922_v26  ;;  %v15943_v26 = vcombine.high %v871_v18, %v875_v19 }
 0x34f   : > { %3491 = vmatpush1.bf16.msra.mxu1 %v16052_v33  ;;  %3451 = vmatprep.subr.bf16.mxu0 %v15917_v36  ;;  %v16117_v33 = vcombine.high %v1046_v27, %v1050_v28  ;;  %v910_v36 = vld [vmem:[%s18826_s14 + $0x290] sm:$0xff] }
 0x350   : > { %3492 = vmatprep.subr.bf16.mxu1 %v16045_v37  ;;  %v914_v37 = vld [vmem:[%s18826_s14 + $0x2b0] sm:$0xff] }
 0x351   : > { %v15980_v48 = vcombine.low %v910_v36, %v914_v37  ;;  %v1118_v27 = vld [vmem:[%s18826_s14 + $0x910] sm:$0xff] }
 0x352   : > { %3452 = vmatpush1.bf16.msra.mxu0 %v15916_v5  ;;  %v15981_v5 = vcombine.high %v910_v36, %v914_v37  ;;  %v1122_v28 = vld [vmem:[%s18826_s14 + $0x930] sm:$0xff] }
 0x353   : > { %3493 = vmatpush1.bf16.msra.mxu1 %v16044_v42  ;;  %3453 = vmatprep.subr.bf16.mxu0 %v15909_v43  ;;  %v16109_v42 = vcombine.high %v1038_v38, %v1042_v39  ;;  %v902_v43 = vld [vmem:[%s18826_s14 + $0x250] sm:$0xff]  ;;  %v15942_v38 = vcombine.low %v871_v18, %v875_v19  ;;  %v16189_v39 = vcombine.high %v1118_v27, %v1122_v28 }
 0x354   : > { %3494 = vmatprep.subr.bf16.mxu1 %v16037_v44  ;;  %v906_v44 = vld [vmem:[%s18826_s14 + $0x270] sm:$0xff] }
 0x355   : > { %v15972_v55 = vcombine.low %v902_v43, %v906_v44 }
 0x356   : > { %3454 = vmatpush1.bf16.msra.mxu0 %v15908_v50  ;;  %v15973_v50 = vcombine.high %v902_v43, %v906_v44  ;;  %v855_v43 = vld [vmem:[%s18826_s14 + $0xd8] sm:$0xff] }
 0x357   : > { %3495 = vmatpush1.bf16.msra.mxu1 %v16036_v51  ;;  %3455 = vmatprep.subr.bf16.mxu0 %v15901_v52  ;;  %v16101_v51 = vcombine.high %v1030_v46, %v1034_v47  ;;  %v894_v52 = vld [vmem:[%s18826_s14 + $0x210] sm:$0xff]  ;;  %v859_v44 = vld [vmem:[%s18826_s14 + $0xf8] sm:$0xff] }
 0x358   : > { %3496 = vmatprep.subr.bf16.mxu1 %v16029_v53  ;;  %v898_v53 = vld [vmem:[%s18826_s14 + $0x230] sm:$0xff] }
 0x359   : > { %v15964_v63 = vcombine.low %v894_v52, %v898_v53 }
 0x35a   : > { %3456 = vmatpush1.bf16.msra.mxu0 %v15900_v57  ;;  %v15965_v57 = vcombine.high %v894_v52, %v898_v53  ;;  %v851_v52 = vld [vmem:[%s18826_s14 + $0xb8] sm:$0xff] }
 0x35b   : > { %3497 = vmatpush1.bf16.msra.mxu1 %v16028_v58  ;;  %3457 = vmatprep.subr.bf16.mxu0 %v16021_v59  ;;  %v16093_v58 = vcombine.high %v1022_v34, %v1026_v54  ;;  %v1142_v59 = vld [vmem:[%s18826_s14 + $0x9d0] sm:$0xff]  ;;  %v15926_v34 = vcombine.low %v855_v43, %v859_v44 }
 0x35c   : > { %3498 = vmatprep.subr.bf16.mxu1 %v16149_v60  ;;  %v1146_v60 = vld [vmem:[%s18826_s14 + $0x9f0] sm:$0xff] }
 0x35d   : > { %v16212_v11 = vcombine.low %v1142_v59, %v1146_v60 }
 0x35e   : > { %3458 = vmatpush2.bf16.msra.mxu0 %v16020_v1  ;;  %v16213_v1 = vcombine.high %v1142_v59, %v1146_v60  ;;  %v843_v59 = vld [vmem:[%s18826_s14 + $0x78] sm:$0xff] }
 0x35f   : > { %3499 = vmatpush2.bf16.msra.mxu1 %v16148_v2  ;;  %3459 = vmatprep.subr.bf16.mxu0 %v16013_v3  ;;  %v15959_v2 = vcombine.high %v887_v61, %v891_v62  ;;  %v1134_v3 = vld [vmem:[%s18826_s14 + $0x990] sm:$0xff] }
 0x360   : > { %3500 = vmatprep.subr.bf16.mxu1 %v16141_v6  ;;  %v1138_v6 = vld [vmem:[%s18826_s14 + $0x9b0] sm:$0xff] }
 0x362   : > { %3460 = vmatpush2.bf16.msra.mxu0 %v16012_v13  ;;  %v16205_v13 = vcombine.high %v1134_v3, %v1138_v6 }
 0x363   : > { %3501 = vmatpush2.bf16.msra.mxu1 %v16140_v14  ;;  %3461 = vmatprep.subr.bf16.mxu0 %v16005_v15  ;;  %v15951_v14 = vcombine.high %v879_v7, %v883_v8  ;;  %v1126_v15 = vld [vmem:[%s18826_s14 + $0x950] sm:$0xff] }
 0x364   : > { %3502 = vmatprep.subr.bf16.mxu1 %v16133_v16  ;;  %v1130_v16 = vld [vmem:[%s18826_s14 + $0x970] sm:$0xff] }
 0x365   : > { %v16196_v36 = vcombine.low %v1126_v15, %v1130_v16 }
 0x366   : > { %3462 = vmatpush2.bf16.msra.mxu0 %v16004_v21  ;;  %v16204_v21 = vcombine.low %v1134_v3, %v1138_v6  ;;  %v835_v3 = vld [vmem:[%s18826_s14 + $0x38] sm:$0xff] }
 0x367   : > { %3503 = vmatpush2.bf16.msra.mxu1 %v16132_v22  ;;  %3463 = vmatprep.subr.bf16.mxu0 %v15997_v23  ;;  %v15950_v23 = vcombine.low %v879_v7, %v883_v8 }
 0x368   : > { %3504 = vmatprep.subr.bf16.mxu1 %v16125_v24  ;;  %v16197_v24 = vcombine.high %v1126_v15, %v1130_v16  ;;  %v955_v15 = vld [vmem:[%s18826_s14 + $0x3f8] sm:$0xff] }
 0x36a   : > { %3464 = vmatpush2.bf16.msra.mxu0 %v15996_v29 }
 0x36b   : > { %3505 = vmatpush2.bf16.msra.mxu1 %v16124_v30  ;;  %3465 = vmatprep.subr.bf16.mxu0 %v15989_v32  ;;  %v863_v30 = vld [vmem:[%s18826_s14 + $0x118] sm:$0xff] }
 0x36c   : > { %3506 = vmatprep.subr.bf16.mxu1 %v16117_v33  ;;  %v867_v32 = vld [vmem:[%s18826_s14 + $0x138] sm:$0xff] }
 0x36d   : > { %v15934_v46 = vcombine.low %v863_v30, %v867_v32 }
 0x36e   : > { %3466 = vmatpush2.bf16.msra.mxu0 %v15988_v4 }
 0x36f   : > { %3507 = vmatpush2.bf16.msra.mxu1 %v16116_v40  ;;  %3467 = vmatprep.subr.bf16.mxu0 %v15981_v5  ;;  %v15935_v40 = vcombine.high %v863_v30, %v867_v32  ;;  %v1110_v5 = vld [vmem:[%s18826_s14 + $0x8d0] sm:$0xff] }
 0x370   : > { %3508 = vmatprep.subr.bf16.mxu1 %v16109_v42  ;;  %v1114_v42 = vld [vmem:[%s18826_s14 + $0x8f0] sm:$0xff] }
 0x371   : > { %v16181_v47 = vcombine.high %v1110_v5, %v1114_v42  ;;  %v16180_v53 = vcombine.low %v1110_v5, %v1114_v42  ;;  %v1182_v42 = vld [vmem:[%s18826_s14 + $0xb10] sm:$0xff] }
 0x372   : > { %3468 = vmatpush2.bf16.msra.mxu0 %v15980_v48  ;;  %v15927_v48 = vcombine.high %v855_v43, %v859_v44  ;;  %v1186_v43 = vld [vmem:[%s18826_s14 + $0xb30] sm:$0xff]  ;;  %v927_v44 = vld [vmem:[%s18826_s14 + $0x318] sm:$0xff] }
 0x373   : > { %3509 = vmatpush2.bf16.msra.mxu1 %v16108_v49  ;;  %3469 = vmatprep.subr.bf16.mxu0 %v15973_v50  ;;  %v1102_v49 = vld [vmem:[%s18826_s14 + $0x890] sm:$0xff] }
 0x374   : > { %3510 = vmatprep.subr.bf16.mxu1 %v16101_v51  ;;  %v1106_v50 = vld [vmem:[%s18826_s14 + $0x8b0] sm:$0xff]  ;;  %v847_v51 = vld [vmem:[%s18826_s14 + $0x98] sm:$0xff] }
 0x375   : > { %v16173_v54 = vcombine.high %v1102_v49, %v1106_v50  ;;  %v16172_v60 = vcombine.low %v1102_v49, %v1106_v50  ;;  %v15918_v61 = vcombine.low %v847_v51, %v851_v52  ;;  %v1174_v50 = vld [vmem:[%s18826_s14 + $0xad0] sm:$0xff] }
 0x376   : > { %3470 = vmatpush2.bf16.msra.mxu0 %v15972_v55  ;;  %v15919_v55 = vcombine.high %v847_v51, %v851_v52  ;;  %v1178_v51 = vld [vmem:[%s18826_s14 + $0xaf0] sm:$0xff]  ;;  %v919_v52 = vld [vmem:[%s18826_s14 + $0x2d8] sm:$0xff] }
 0x377   : > { %3511 = vmatpush2.bf16.msra.mxu1 %v16100_v56  ;;  %3471 = vmatprep.subr.bf16.mxu0 %v15965_v57  ;;  %v1094_v56 = vld [vmem:[%s18826_s14 + $0x850] sm:$0xff] }
 0x378   : > { %3512 = vmatprep.subr.bf16.mxu1 %v16093_v58  ;;  %v1098_v57 = vld [vmem:[%s18826_s14 + $0x870] sm:$0xff]  ;;  %v839_v58 = vld [vmem:[%s18826_s14 + $0x58] sm:$0xff] }
 0x379   : > { %v16165_v62 = vcombine.high %v1094_v56, %v1098_v57  ;;  %v16164_v6 = vcombine.low %v1094_v56, %v1098_v57  ;;  %v15910_v7 = vcombine.low %v839_v58, %v843_v59  ;;  %v1214_v56 = vlaneseq }
 0x37a   : > { %3472 = vmatpush2.bf16.msra.mxu0 %v15964_v63  ;;  %v15911_v63 = vcombine.high %v839_v58, %v843_v59  ;;  %v1166_v58 = vld [vmem:[%s18826_s14 + $0xa90] sm:$0xff] }
 0x37b   : > { %3513 = vmatpush2.bf16.msra.mxu1 %v16092_v0  ;;  %3523 = vmatprep.subr.bf16.mxu0 %v16213_v1  ;;  %v1086_v0 = vld [vmem:[%s18826_s14 + $0x810] sm:$0xff] }
 0x37c   : > { %3564 = vmatprep.subr.bf16.mxu1 %v15959_v2  ;;  %v1090_v1 = vld [vmem:[%s18826_s14 + $0x830] sm:$0xff]  ;;  %v831_v2 = vld [vmem:[%s18826_s14 + $0x18] sm:$0xff] }
 0x37d   : > { %v19170_v17 = vpop.f32.mrf.mxu0  ;;  %3474 = vmatmul.mubr.bf16.vlgmr.msra.gmra.mxu0 %v18946_v31  ;;  %v16157_v8 = vcombine.high %v1086_v0, %v1090_v1  ;;  %v16156_v16 = vcombine.low %v1086_v0, %v1090_v1  ;;  %v15902_v18 = vcombine.low %v831_v2, %v835_v3  ;;  %v1170_v59 = vld [vmem:[%s18826_s14 + $0xab0] sm:$0xff]  ;;  %v19228_v1 = vshrl.u32 %v1214_v56, 7 }
 0x37e   : > { %v19175_v20 = vpop.f32.mrf.mxu1  ;;  %3515 = vmatmul.mubr.bf16.vlgmr.msra.gmra.mxu1 %v18954_v35  ;;  %3524 = vmatpush1.bf16.msra.mxu0 %v16212_v11  ;;  %v15903_v11 = vcombine.high %v831_v2, %v835_v3  ;;  %v16237_v0 = vcombine.high %v1166_v58, %v1170_v59  ;;  %v1158_v3 = vld [vmem:[%s18826_s14 + $0xa50] sm:$0xff] }
 0x37f   : > { %3565 = vmatpush1.bf16.msra.mxu1 %v15958_v12  ;;  %v19178_v22 = vpop.f32.mrf.mxu0  ;;  %3525 = vmatprep.subr.bf16.mxu0 %v16205_v13  ;;  %v1206_v12 = vld [vmem:[%s18826_s14 + $0xbd0] sm:$0xff] }
 0x380   : > { %v19180_v25 = vpop.f32.mrf.mxu1  ;;  %3566 = vmatprep.subr.bf16.mxu1 %v15951_v14  ;;  %3555 = vmatprep.mubr.bf16.mxu0 %v18960_v41  ;;  %v1210_v13 = vld [vmem:[%s18826_s14 + $0xbf0] sm:$0xff]  ;;  %v951_v14 = vld [vmem:[%s18826_s14 + $0x3d8] sm:$0xff] }
 0x381   : > { %v3233_v29 = vpop.f32.mrf.mxu0  ;;  %3596 = vmatprep.mubr.bf16.mxu1 %v18896_v9  ;;  %v16188_v9 = vcombine.low %v1118_v27, %v1122_v28  ;;  %v16277_v19 = vcombine.high %v1206_v12, %v1210_v13  ;;  %v947_v27 = vld [vmem:[%s18826_s14 + $0x3b8] sm:$0xff]  ;;  %v16276_v28 = vcombine.low %v1206_v12, %v1210_v13 }
 0x382   : > { %v3274_v33 = vpop.f32.mrf.mxu1  ;;  %3526 = vmatpush1.bf16.msra.mxu0 %v16204_v21  ;;  %v16023_v21 = vcombine.high %v951_v14, %v955_v15  ;;  %v16022_v29 = vcombine.low %v951_v14, %v955_v15  ;;  %v1216_v14 = vsub.s32 0, %v19228_v1 }
 0x383   : > { %3567 = vmatpush1.bf16.msra.mxu1 %v15950_v23  ;;  %v3234_v37 = vpop.f32.mrf.mxu0  ;;  %3527 = vmatprep.subr.bf16.mxu0 %v16197_v24  ;;  %v1198_v23 = vld [vmem:[%s18826_s14 + $0xb90] sm:$0xff] }
 0x384   : > { %v3275_v4 = vpop.f32.mrf.mxu1  ;;  %3568 = vmatprep.subr.bf16.mxu1 %v15943_v26  ;;  %v1202_v24 = vld [vmem:[%s18826_s14 + $0xbb0] sm:$0xff]  ;;  %v943_v26 = vld [vmem:[%s18826_s14 + $0x398] sm:$0xff] }
 0x385   : > { %v16269_v30 = vcombine.high %v1198_v23, %v1202_v24  ;;  %v16015_v32 = vcombine.high %v943_v26, %v947_v27  ;;  %v1190_v33 = vld [vmem:[%s18826_s14 + $0xb50] sm:$0xff]  ;;  %v935_v37 = vld [vmem:[%s18826_s14 + $0x358] sm:$0xff]  ;;  %v16014_v4 = vcombine.low %v943_v26, %v947_v27 }
 0x386   : > { %3528 = vmatpush1.bf16.msra.mxu0 %v16196_v36  ;;  %v1194_v36 = vld [vmem:[%s18826_s14 + $0xb70] sm:$0xff] }
 0x387   : > { %3569 = vmatpush1.bf16.msra.mxu1 %v15942_v38  ;;  %3529 = vmatprep.subr.bf16.mxu0 %v16189_v39  ;;  %v939_v38 = vld [vmem:[%s18826_s14 + $0x378] sm:$0xff]  ;;  %v16268_v39 = vcombine.low %v1198_v23, %v1202_v24  ;;  %v1220_v24 = vsub.s32 1, %v19228_v1 }
 0x388   : > { %3570 = vmatprep.subr.bf16.mxu1 %v15935_v40  ;;  %v16261_v40 = vcombine.high %v1190_v33, %v1194_v36  ;;  %v16007_v5 = vcombine.high %v935_v37, %v939_v38  ;;  %v899_v23 = vld [vmem:[%s18826_s14 + $0x238] sm:$0xff] }
 0x38a   : > { %3530 = vmatpush1.bf16.msra.mxu0 %v16188_v9  ;;  %v931_v9 = vld [vmem:[%s18826_s14 + $0x338] sm:$0xff] }
 0x38b   : > { %3571 = vmatpush1.bf16.msra.mxu1 %v15934_v46  ;;  %3531 = vmatprep.subr.bf16.mxu0 %v16181_v47  ;;  %v16260_v46 = vcombine.low %v1190_v33, %v1194_v36  ;;  %v16006_v47 = vcombine.low %v935_v37, %v939_v38  ;;  %v15999_v49 = vcombine.high %v927_v44, %v931_v9  ;;  %v1019_v33 = vld [vmem:[%s18826_s14 + $0x5f8] sm:$0xff] }
 0x38c   : > { %3572 = vmatprep.subr.bf16.mxu1 %v15927_v48  ;;  %v16253_v48 = vcombine.high %v1182_v42, %v1186_v43  ;;  %v1143_v36 = vld [vmem:[%s18826_s14 + $0x9d8] sm:$0xff] }
 0x38d   : > { %v1147_v37 = vld [vmem:[%s18826_s14 + $0x9f8] sm:$0xff] }
 0x38e   : > { %3532 = vmatpush1.bf16.msra.mxu0 %v16180_v53  ;;  %v923_v53 = vld [vmem:[%s18826_s14 + $0x2f8] sm:$0xff] }
 0x38f   : > { %3573 = vmatpush1.bf16.msra.mxu1 %v15926_v34  ;;  %3533 = vmatprep.subr.bf16.mxu0 %v16173_v54  ;;  %v16252_v34 = vcombine.low %v1182_v42, %v1186_v43  ;;  %v15998_v54 = vcombine.low %v927_v44, %v931_v9  ;;  %v15991_v57 = vcombine.high %v919_v52, %v923_v53  ;;  %v1007_v43 = vld [vmem:[%s18826_s14 + $0x598] sm:$0xff] }
 0x390   : > { %3574 = vmatprep.subr.bf16.mxu1 %v15919_v55  ;;  %v16245_v55 = vcombine.high %v1174_v50, %v1178_v51  ;;  %v16215_v42 = vcombine.high %v1143_v36, %v1147_v37  ;;  %v1011_v44 = vld [vmem:[%s18826_s14 + $0x5b8] sm:$0xff] }
 0x391   : > { %v1135_v9 = vld [vmem:[%s18826_s14 + $0x998] sm:$0xff] }
 0x392   : > { %3534 = vmatpush1.bf16.msra.mxu0 %v16172_v60  ;;  %v911_v60 = vld [vmem:[%s18826_s14 + $0x298] sm:$0xff] }
 0x393   : > { %3575 = vmatpush1.bf16.msra.mxu1 %v15918_v61  ;;  %3535 = vmatprep.subr.bf16.mxu0 %v16165_v62  ;;  %v915_v61 = vld [vmem:[%s18826_s14 + $0x2b8] sm:$0xff]  ;;  %v16244_v62 = vcombine.low %v1174_v50, %v1178_v51  ;;  %v16079_v50 = vcombine.high %v1007_v43, %v1011_v44 }
 0x394   : > { %3576 = vmatprep.subr.bf16.mxu1 %v15911_v63  ;;  %v15990_v63 = vcombine.low %v919_v52, %v923_v53  ;;  %v15983_v2 = vcombine.high %v911_v60, %v915_v61  ;;  %v15982_v12 = vcombine.low %v911_v60, %v915_v61  ;;  %v999_v52 = vld [vmem:[%s18826_s14 + $0x558] sm:$0xff] }
 0x395   : > { %v1003_v53 = vld [vmem:[%s18826_s14 + $0x578] sm:$0xff] }
 0x396   : > { %3536 = vmatpush1.bf16.msra.mxu0 %v16164_v6  ;;  %v1162_v6 = vld [vmem:[%s18826_s14 + $0xa70] sm:$0xff]  ;;  %v16071_v60 = vcombine.high %v999_v52, %v1003_v53 }
 0x397   : > { %3577 = vmatpush1.bf16.msra.mxu1 %v15910_v7  ;;  %3537 = vmatprep.subr.bf16.mxu0 %v16157_v8  ;;  %v903_v7 = vld [vmem:[%s18826_s14 + $0x258] sm:$0xff]  ;;  %v16229_v13 = vcombine.high %v1158_v3, %v1162_v6  ;;  %v16228_v26 = vcombine.low %v1158_v3, %v1162_v6 }
 0x398   : > { %3578 = vmatprep.subr.bf16.mxu1 %v15903_v11  ;;  %v907_v8 = vld [vmem:[%s18826_s14 + $0x278] sm:$0xff]  ;;  %v16236_v11 = vcombine.low %v1166_v58, %v1170_v59 }
 0x399   : > { %v15975_v15 = vcombine.high %v903_v7, %v907_v8  ;;  %v15974_v27 = vcombine.low %v903_v7, %v907_v8  ;;  %v1119_v3 = vld [vmem:[%s18826_s14 + $0x918] sm:$0xff] }
 0x39a   : > { %3538 = vmatpush1.bf16.msra.mxu0 %v16156_v16  ;;  %v1150_v16 = vld [vmem:[%s18826_s14 + $0xa10] sm:$0xff]  ;;  %v1123_v6 = vld [vmem:[%s18826_s14 + $0x938] sm:$0xff] }
 0x39b   : > { %3579 = vmatpush1.bf16.msra.mxu1 %v15902_v18  ;;  %3539 = vmatprep.subr.bf16.mxu0 %v16277_v19  ;;  %v1154_v18 = vld [vmem:[%s18826_s14 + $0xa30] sm:$0xff]  ;;  %v19239_v19 = vld [vmem:[%s555_s3] sm:$0xff] }
 0x39c   : > { %3580 = vmatprep.subr.bf16.mxu1 %v16023_v21  ;;  %v895_v21 = vld [vmem:[%s18826_s14 + $0x218] sm:$0xff]  ;;  %v1221_v38 = vrot.slane %v19239_v19, %v1220_v24  ;;  %v16190_v24 = vcombine.low %v1119_v3, %v1123_v6 }
 0x39e   : > { %3540 = vmatpush2.bf16.msra.mxu0 %v16276_v28  ;;  %v16221_v28 = vcombine.high %v1150_v16, %v1154_v18 }
 0x39f   : > { %3581 = vmatpush2.bf16.msra.mxu1 %v16022_v29  ;;  %3541 = vmatprep.subr.bf16.mxu0 %v16269_v30  ;;  %v1217_v29 = vrot.slane %v19239_v19, %v1216_v14  ;;  %v15967_v30 = vcombine.high %v895_v21, %v899_v23  ;;  %v16191_v14 = vcombine.high %v1119_v3, %v1123_v6  ;;  %v1063_v3 = vld [vmem:[%s18826_s14 + $0x758] sm:$0xff] }
 0x3a0   : > { %3582 = vmatprep.subr.bf16.mxu1 %v16015_v32  ;;  %v1015_v32 = vld [vmem:[%s18826_s14 + $0x5d8] sm:$0xff] }
 0x3a1   : > { %v1067_v6 = vld [vmem:[%s18826_s14 + $0x778] sm:$0xff] }
 0x3a2   : > { %3542 = vmatpush2.bf16.msra.mxu0 %v16268_v39  ;;  %v16220_v39 = vcombine.low %v1150_v16, %v1154_v18  ;;  %v987_v16 = vld [vmem:[%s18826_s14 + $0x4f8] sm:$0xff] }
 0x3a3   : > { %3583 = vmatpush2.bf16.msra.mxu1 %v16014_v4  ;;  %3543 = vmatprep.subr.bf16.mxu0 %v16261_v40  ;;  %v15966_v4 = vcombine.low %v895_v21, %v899_v23  ;;  %v16087_v40 = vcombine.high %v1015_v32, %v1019_v33  ;;  %v1111_v18 = vld [vmem:[%s18826_s14 + $0x8d8] sm:$0xff] }
 0x3a4   : > { %3584 = vmatprep.subr.bf16.mxu1 %v16007_v5  ;;  %v3230_v5 = vadd.f32 %v19170_v17, %v1217_v29  ;;  %v1115_v21 = vld [vmem:[%s18826_s14 + $0x8f8] sm:$0xff] }
 0x3a5   : > { %v979_v29 = vld [vmem:[%s18826_s14 + $0x4b8] sm:$0xff] }
 0x3a6   : > { %3544 = vmatpush2.bf16.msra.mxu0 %v16260_v46  ;;  %v1139_v46 = vld [vmem:[%s18826_s14 + $0x9b8] sm:$0xff]  ;;  %v3271_v17 = vadd.f32 %v19175_v20, %v3230_v5  ;;  %v16078_v20 = vcombine.low %v1007_v43, %v1011_v44 }
 0x3a7   : > { %3585 = vmatpush2.bf16.msra.mxu1 %v16006_v47  ;;  %3545 = vmatprep.subr.bf16.mxu0 %v16253_v48  ;;  %v3232_v47 = vadd.f32 %v19178_v22, %v1221_v38  ;;  %v16086_v48 = vcombine.low %v1015_v32, %v1019_v33  ;;  %v16207_v51 = vcombine.high %v1135_v9, %v1139_v46  ;;  %v1107_v32 = vld [vmem:[%s18826_s14 + $0x8b8] sm:$0xff] }
 0x3a8   : > { %3586 = vmatprep.subr.bf16.mxu1 %v15999_v49  ;;  %v16214_v49 = vcombine.low %v1143_v36, %v1147_v37  ;;  %v16206_v59 = vcombine.low %v1135_v9, %v1139_v46  ;;  %v16182_v36 = vcombine.low %v1111_v18, %v1115_v21  ;;  %v1099_v5 = vld [vmem:[%s18826_s14 + $0x878] sm:$0xff] }
 0x3a9   : > { %v3273_v22 = vadd.f32 %v19180_v25, %v3232_v47  ;;  %v959_v46 = vld [vmem:[%s18826_s14 + $0x418] sm:$0xff] }
 0x3aa   : > { %3546 = vmatpush2.bf16.msra.mxu0 %v16252_v34  ;;  %v963_v47 = vld [vmem:[%s18826_s14 + $0x438] sm:$0xff] }
 0x3ab   : > { %3587 = vmatpush2.bf16.msra.mxu1 %v15998_v54  ;;  %3547 = vmatprep.subr.bf16.mxu0 %v16245_v55  ;;  %v1127_v54 = vld [vmem:[%s18826_s14 + $0x958] sm:$0xff] }
 0x3ac   : > { %3588 = vmatprep.subr.bf16.mxu1 %v15991_v57  ;;  %v1131_v55 = vld [vmem:[%s18826_s14 + $0x978] sm:$0xff] }
 0x3ae   : > { %3548 = vmatpush2.bf16.msra.mxu0 %v16244_v62 }
 0x3af   : > { %3589 = vmatpush2.bf16.msra.mxu1 %v15990_v63  ;;  %3549 = vmatprep.subr.bf16.mxu0 %v16237_v0  ;;  %v16199_v63 = vcombine.high %v1127_v54, %v1131_v55  ;;  %v991_v0 = vld [vmem:[%s18826_s14 + $0x518] sm:$0xff] }
 0x3b0   : > { %3590 = vmatprep.subr.bf16.mxu1 %v15983_v2  ;;  %v995_v2 = vld [vmem:[%s18826_s14 + $0x538] sm:$0xff] }
 0x3b1   : > { %v16062_v23 = vcombine.low %v991_v0, %v995_v2 }
 0x3b2   : > { %3550 = vmatpush2.bf16.msra.mxu0 %v16236_v11  ;;  %v16070_v11 = vcombine.low %v999_v52, %v1003_v53  ;;  %v1079_v53 = vld [vmem:[%s18826_s14 + $0x7d8] sm:$0xff] }
 0x3b3   : > { %3591 = vmatpush2.bf16.msra.mxu1 %v15982_v12  ;;  %3551 = vmatprep.subr.bf16.mxu0 %v16229_v13  ;;  %v16198_v12 = vcombine.low %v1127_v54, %v1131_v55  ;;  %v16063_v13 = vcombine.high %v991_v0, %v995_v2  ;;  %v1207_v54 = vld [vmem:[%s18826_s14 + $0xbd8] sm:$0xff] }
 0x3b4   : > { %3592 = vmatprep.subr.bf16.mxu1 %v15975_v15  ;;  %v983_v15 = vld [vmem:[%s18826_s14 + $0x4d8] sm:$0xff] }
 0x3b5   : > { %v16054_v33 = vcombine.low %v983_v15, %v987_v16  ;;  %v1211_v55 = vld [vmem:[%s18826_s14 + $0xbf8] sm:$0xff] }
 0x3b6   : > { %3552 = vmatpush2.bf16.msra.mxu0 %v16228_v26  ;;  %v16055_v26 = vcombine.high %v983_v15, %v987_v16  ;;  %v16278_v0 = vcombine.low %v1207_v54, %v1211_v55  ;;  %v1183_v15 = vld [vmem:[%s18826_s14 + $0xb18] sm:$0xff] }
 0x3b7   : > { %3593 = vmatpush2.bf16.msra.mxu1 %v15974_v27  ;;  %3553 = vmatprep.subr.bf16.mxu0 %v16221_v28  ;;  %v16183_v27 = vcombine.high %v1111_v18, %v1115_v21  ;;  %v975_v28 = vld [vmem:[%s18826_s14 + $0x498] sm:$0xff]  ;;  %v16134_v18 = vcombine.low %v1063_v3, %v1067_v6 }
 0x3b8   : > { %3594 = vmatprep.subr.bf16.mxu1 %v15967_v30  ;;  %v1103_v30 = vld [vmem:[%s18826_s14 + $0x898] sm:$0xff]  ;;  %v16047_v37 = vcombine.high %v975_v28, %v979_v29 }
 0x3b9   : > { %v16175_v38 = vcombine.high %v1103_v30, %v1107_v32  ;;  %v16174_v43 = vcombine.low %v1103_v30, %v1107_v32  ;;  %v1187_v16 = vld [vmem:[%s18826_s14 + $0xb38] sm:$0xff] }
 0x3ba   : > { %3554 = vmatpush2.bf16.msra.mxu0 %v16220_v39  ;;  %v967_v39 = vld [vmem:[%s18826_s14 + $0x458] sm:$0xff]  ;;  %v16254_v32 = vcombine.low %v1183_v15, %v1187_v16 }
 0x3bb   : > { %3595 = vmatpush2.bf16.msra.mxu1 %v15966_v4  ;;  %3605 = vmatprep.subr.bf16.mxu0 %v16087_v40  ;;  %v971_v4 = vld [vmem:[%s18826_s14 + $0x478] sm:$0xff] }
 0x3bc   : > { %3646 = vmatprep.subr.bf16.mxu1 %v16215_v42  ;;  %v1095_v40 = vld [vmem:[%s18826_s14 + $0x858] sm:$0xff]  ;;  %v16046_v42 = vcombine.low %v975_v28, %v979_v29  ;;  %v16039_v44 = vcombine.high %v967_v39, %v971_v4 }
 0x3bd   : > { %v3311_v34 = vpop.f32.mrf.mxu0  ;;  %3556 = vmatmul.mubr.bf16.vlgmr.msra.gmra.mxu0 %v19028_v45  ;;  %v16167_v9 = vcombine.high %v1095_v40, %v1099_v5  ;;  %v1175_v28 = vld [vmem:[%s18826_s14 + $0xad8] sm:$0xff] }
 0x3be   : > { %v3312_v56 = vadd.f32 %v3311_v34, %v3271_v17  ;;  %v19264_v57 = vpop.f32.mrf.mxu1  ;;  %3597 = vmatmul.mubr.bf16.vlgmr.msra.gmra.mxu1 %v18946_v31  ;;  %3606 = vmatpush1.bf16.msra.mxu0 %v16086_v48  ;;  %v1087_v48 = vld [vmem:[%s18826_s14 + $0x818] sm:$0xff]  ;;  %v16166_v17 = vcombine.low %v1095_v40, %v1099_v5 }
 0x3bf   : > { %3647 = vmatpush1.bf16.msra.mxu1 %v16214_v49  ;;  %v3313_v58 = vpop.f32.mrf.mxu0  ;;  %3607 = vmatprep.subr.bf16.mxu0 %v16079_v50  ;;  %v1091_v49 = vld [vmem:[%s18826_s14 + $0x838] sm:$0xff]  ;;  %v16038_v50 = vcombine.low %v967_v39, %v971_v4 }
 0x3c0   : > { %v3687_v61 = vmax.f32 %v3312_v56, 0.0  ;;  %v3314_v62 = vadd.f32 %v3313_v58, %v3273_v22  ;;  %v19267_v25 = vpop.f32.mrf.mxu1  ;;  %3648 = vmatprep.subr.bf16.mxu1 %v16207_v51  ;;  %3637 = vmatprep.mubr.bf16.mxu0 %v18900_v10  ;;  %v16031_v51 = vcombine.high %v959_v46, %v963_v47  ;;  %v16159_v52 = vcombine.high %v1087_v48, %v1091_v49  ;;  %v1083_v34 = vld [vmem:[%s18826_s14 + $0x7f8] sm:$0xff] }
 0x3c1   : > { %v3315_v31 = vpop.f32.mrf.mxu0  ;;  %3678 = vmatprep.mubr.bf16.mxu1 %v18960_v41  ;;  %v16030_v22 = vcombine.low %v959_v46, %v963_v47  ;;  %v16158_v56 = vcombine.low %v1087_v48, %v1091_v49  ;;  %v16279_v58 = vcombine.high %v1207_v54, %v1211_v55  ;;  %v1179_v29 = vld [vmem:[%s18826_s14 + $0xaf8] sm:$0xff] }
 0x3c2   : > { %3698 = vst [vmem:[%s19277_s19] sm:$0xff] %v3687_v61  ;;  %v3688_v7 = vmax.f32 %v3314_v62, 0.0  ;;  %v3356_v8 = vpop.f32.mrf.mxu1  ;;  %3608 = vmatpush1.bf16.msra.mxu0 %v16078_v20  ;;  %v16151_v20 = vcombine.high %v1079_v53, %v1083_v34  ;;  %v1199_v61 = vld [vmem:[%s18826_s14 + $0xb98] sm:$0xff]  ;;  %v16246_v5 = vcombine.low %v1175_v28, %v1179_v29 }
 0x3c3   : > { %3649 = vmatpush1.bf16.msra.mxu1 %v16206_v59  ;;  %v3316_v10 = vpop.f32.mrf.mxu0  ;;  %3609 = vmatprep.subr.bf16.mxu0 %v16071_v60  ;;  %v1071_v59 = vld [vmem:[%s18826_s14 + $0x798] sm:$0xff] }
 0x3c4   : > { %3699 = vst [vmem:[%s19277_s19 + $0x8] sm:$0xff] %v3688_v7  ;;  %v3357_v41 = vpop.f32.mrf.mxu1  ;;  %3650 = vmatprep.subr.bf16.mxu1 %v16199_v63  ;;  %v1075_v60 = vld [vmem:[%s18826_s14 + $0x7b8] sm:$0xff]  ;;  %v16150_v63 = vcombine.low %v1079_v53, %v1083_v34 }
 0x3c5   : > { %v1203_v62 = vld [vmem:[%s18826_s14 + $0xbb8] sm:$0xff]  ;;  %v16143_v2 = vcombine.high %v1071_v59, %v1075_v60 }
 0x3c6   : > { %3610 = vmatpush1.bf16.msra.mxu0 %v16070_v11  ;;  %v16271_v31 = vcombine.high %v1199_v61, %v1203_v62  ;;  %v1191_v7 = vld [vmem:[%s18826_s14 + $0xb58] sm:$0xff]  ;;  %v16142_v11 = vcombine.low %v1071_v59, %v1075_v60  ;;  %v16270_v10 = vcombine.low %v1199_v61, %v1203_v62 }
 0x3c7   : > { %3651 = vmatpush1.bf16.msra.mxu1 %v16198_v12  ;;  %3611 = vmatprep.subr.bf16.mxu0 %v16063_v13  ;;  %v1195_v8 = vld [vmem:[%s18826_s14 + $0xb78] sm:$0xff]  ;;  %v16135_v12 = vcombine.high %v1063_v3, %v1067_v6 }
 0x3c8   : > { %3652 = vmatprep.subr.bf16.mxu1 %v16191_v14  ;;  %v16263_v13 = vcombine.high %v1191_v7, %v1195_v8  ;;  %v1055_v41 = vld [vmem:[%s18826_s14 + $0x718] sm:$0xff]  ;;  %v16262_v21 = vcombine.low %v1191_v7, %v1195_v8 }
 0x3c9   : > { %v1059_v14 = vld [vmem:[%s18826_s14 + $0x738] sm:$0xff] }
 0x3ca   : > { %3612 = vmatpush1.bf16.msra.mxu0 %v16062_v23  ;;  %v16127_v23 = vcombine.high %v1055_v41, %v1059_v14  ;;  %v16126_v30 = vcombine.low %v1055_v41, %v1059_v14  ;;  %v1167_v39 = vld [vmem:[%s18826_s14 + $0xa98] sm:$0xff] }
 0x3cb   : > { %3653 = vmatpush1.bf16.msra.mxu1 %v16190_v24  ;;  %3613 = vmatprep.subr.bf16.mxu0 %v16055_v26  ;;  %v16255_v24 = vcombine.high %v1183_v15, %v1187_v16  ;;  %v1047_v26 = vld [vmem:[%s18826_s14 + $0x6d8] sm:$0xff] }
 0x3cc   : > { %3654 = vmatprep.subr.bf16.mxu1 %v16183_v27  ;;  %v1051_v27 = vld [vmem:[%s18826_s14 + $0x6f8] sm:$0xff] }
 0x3cd   : > { %v1171_v4 = vld [vmem:[%s18826_s14 + $0xab8] sm:$0xff]  ;;  %v16118_v40 = vcombine.low %v1047_v26, %v1051_v27 }
 0x3ce   : > { %3614 = vmatpush1.bf16.msra.mxu0 %v16054_v33  ;;  %v16119_v33 = vcombine.high %v1047_v26, %v1051_v27  ;;  %v1159_v46 = vld [vmem:[%s18826_s14 + $0xa58] sm:$0xff]  ;;  %v16238_v49 = vcombine.low %v1167_v39, %v1171_v4  ;;  %v1232_v26 = vsub.s32 4, %v19228_v1  ;;  %v1236_v27 = vsub.s32 5, %v19228_v1 }
 0x3cf   : > { %3655 = vmatpush1.bf16.msra.mxu1 %v16182_v36  ;;  %3615 = vmatprep.subr.bf16.mxu0 %v16047_v37  ;;  %v16247_v36 = vcombine.high %v1175_v28, %v1179_v29  ;;  %v1039_v37 = vld [vmem:[%s18826_s14 + $0x698] sm:$0xff] }
 0x3d0   : > { %3656 = vmatprep.subr.bf16.mxu1 %v16175_v38  ;;  %v1043_v38 = vld [vmem:[%s18826_s14 + $0x6b8] sm:$0xff]  ;;  %v1233_v28 = vrot.slane %v19239_v19, %v1232_v26  ;;  %v1237_v29 = vrot.slane %v19239_v19, %v1236_v27 }
 0x3d1   : > { %v1163_v47 = vld [vmem:[%s18826_s14 + $0xa78] sm:$0xff]  ;;  %v16110_v48 = vcombine.low %v1039_v37, %v1043_v38 }
 0x3d2   : > { %3616 = vmatpush1.bf16.msra.mxu0 %v16046_v42  ;;  %v16111_v42 = vcombine.high %v1039_v37, %v1043_v38  ;;  %v1151_v53 = vld [vmem:[%s18826_s14 + $0xa18] sm:$0xff]  ;;  %v16230_v55 = vcombine.low %v1159_v46, %v1163_v47 }
 0x3d3   : > { %3657 = vmatpush1.bf16.msra.mxu1 %v16174_v43  ;;  %3617 = vmatprep.subr.bf16.mxu0 %v16039_v44  ;;  %v16239_v43 = vcombine.high %v1167_v39, %v1171_v4  ;;  %v1031_v44 = vld [vmem:[%s18826_s14 + $0x658] sm:$0xff] }
 0x3d4   : > { %3658 = vmatprep.subr.bf16.mxu1 %v16167_v9  ;;  %v1035_v9 = vld [vmem:[%s18826_s14 + $0x678] sm:$0xff] }
 0x3d5   : > { %v1155_v34 = vld [vmem:[%s18826_s14 + $0xa38] sm:$0xff]  ;;  %v16102_v54 = vcombine.low %v1031_v44, %v1035_v9 }
 0x3d6   : > { %3618 = vmatpush1.bf16.msra.mxu0 %v16038_v50  ;;  %v16103_v50 = vcombine.high %v1031_v44, %v1035_v9  ;;  %v16222_v60 = vcombine.low %v1151_v53, %v1155_v34 }
 0x3d7   : > { %3659 = vmatpush1.bf16.msra.mxu1 %v16166_v17  ;;  %3619 = vmatprep.subr.bf16.mxu0 %v16031_v51  ;;  %v16231_v17 = vcombine.high %v1159_v46, %v1163_v47  ;;  %v1023_v51 = vld [vmem:[%s18826_s14 + $0x618] sm:$0xff] }
 0x3d8   : > { %3660 = vmatprep.subr.bf16.mxu1 %v16159_v52  ;;  %v1027_v52 = vld [vmem:[%s18826_s14 + $0x638] sm:$0xff] }
 0x3d9   : > { %v16094_v59 = vcombine.low %v1023_v51, %v1027_v52 }
 0x3da   : > { %3620 = vmatpush1.bf16.msra.mxu0 %v16030_v22  ;;  %v16095_v22 = vcombine.high %v1023_v51, %v1027_v52 }
 0x3db   : > { %3661 = vmatpush1.bf16.msra.mxu1 %v16158_v56  ;;  %3621 = vmatprep.subr.bf16.mxu0 %v16151_v20  ;;  %v1224_v56 = vsub.s32 2, %v19228_v1  ;;  %v16223_v20 = vcombine.high %v1151_v53, %v1155_v34 }
 0x3dc   : > { %3662 = vmatprep.subr.bf16.mxu1 %v16279_v58  ;;  %v1228_v58 = vsub.s32 3, %v19228_v1 }
 0x3dd   : > { %v1225_v61 = vrot.slane %v19239_v19, %v1224_v56 }
 0x3de   : > { %3622 = vmatpush2.bf16.msra.mxu0 %v16150_v63  ;;  %v1229_v62 = vrot.slane %v19239_v19, %v1228_v58 }
 0x3df   : > { %3663 = vmatpush2.bf16.msra.mxu1 %v16278_v0  ;;  %3623 = vmatprep.subr.bf16.mxu0 %v16143_v2  ;;  %v3353_v63 = vadd.f32 %v19264_v57, %v1225_v61 }
 0x3e0   : > { %3664 = vmatprep.subr.bf16.mxu1 %v16271_v31  ;;  %v3355_v2 = vadd.f32 %v19267_v25, %v1229_v62 }
 0x3e2   : > { %3624 = vmatpush2.bf16.msra.mxu0 %v16142_v11 }
 0x3e3   : > { %3665 = vmatpush2.bf16.msra.mxu1 %v16270_v10  ;;  %3625 = vmatprep.subr.bf16.mxu0 %v16135_v12 }
 0x3e4   : > { %3666 = vmatprep.subr.bf16.mxu1 %v16263_v13 }
 0x3e6   : > { %3626 = vmatpush2.bf16.msra.mxu0 %v16134_v18 }
 0x3e7   : > { %3667 = vmatpush2.bf16.msra.mxu1 %v16262_v21  ;;  %3627 = vmatprep.subr.bf16.mxu0 %v16127_v23 }
 0x3e8   : > { %3668 = vmatprep.subr.bf16.mxu1 %v16255_v24 }
 0x3ea   : > { %3628 = vmatpush2.bf16.msra.mxu0 %v16126_v30 }
 0x3eb   : > { %3669 = vmatpush2.bf16.msra.mxu1 %v16254_v32  ;;  %3629 = vmatprep.subr.bf16.mxu0 %v16119_v33 }
 0x3ec   : > { %3670 = vmatprep.subr.bf16.mxu1 %v16247_v36 }
 0x3ee   : > { %3630 = vmatpush2.bf16.msra.mxu0 %v16118_v40 }
 0x3ef   : > { %3671 = vmatpush2.bf16.msra.mxu1 %v16246_v5  ;;  %3631 = vmatprep.subr.bf16.mxu0 %v16111_v42 }
 0x3f0   : > { %3672 = vmatprep.subr.bf16.mxu1 %v16239_v43 }
 0x3f2   : > { %3632 = vmatpush2.bf16.msra.mxu0 %v16110_v48  ;;  %v1240_v48 = vsub.s32 6, %v19228_v1 }
 0x3f3   : > { %3673 = vmatpush2.bf16.msra.mxu1 %v16238_v49  ;;  %3633 = vmatprep.subr.bf16.mxu0 %v16103_v50  ;;  %v1244_v49 = vsub.s32 7, %v19228_v1 }
 0x3f4   : > { %3674 = vmatprep.subr.bf16.mxu1 %v16231_v17  ;;  %v1241_v50 = vrot.slane %v19239_v19, %v1240_v48 }
 0x3f5   : > { %v1245_v17 = vrot.slane %v19239_v19, %v1244_v49 }
 0x3f6   : > { %3634 = vmatpush2.bf16.msra.mxu0 %v16102_v54 }
 0x3f7   : > { %3675 = vmatpush2.bf16.msra.mxu1 %v16230_v55  ;;  %3635 = vmatprep.subr.bf16.mxu0 %v16095_v22 }
 0x3f8   : > { %3676 = vmatprep.subr.bf16.mxu1 %v16223_v20 }
 0x3fa   : > { %3636 = vmatpush2.bf16.msra.mxu0 %v16094_v59 }
 0x3fb   : > { %3677 = vmatpush2.bf16.msra.mxu1 %v16222_v60 }
 0x3fd   : > { %v3393_v0 = vpop.f32.mrf.mxu0  ;;  %3638 = vmatmul.mubr.bf16.vlgmr.msra.gmra.mxu0 %v18954_v35 }
 0x3fe   : > { %v3394_v31 = vadd.f32 %v3393_v0, %v3353_v63  ;;  %v3434_v3 = vpop.f32.mrf.mxu1  ;;  %3679 = vmatmul.mubr.bf16.vlgmr.msra.gmra.mxu1 %v19028_v45 }
 0x3ff   : > { %v3395_v6 = vpop.f32.mrf.mxu0 }
 0x400   : > { %v3435_v7 = vadd.f32 %v3434_v3, %v3394_v31  ;;  %v3396_v8 = vadd.f32 %v3395_v6, %v3355_v2  ;;  %v3436_v11 = vpop.f32.mrf.mxu1 }
 0x401   : > { %v3397_v10 = vpop.f32.mrf.mxu0 }
 0x402   : > { %v3689_v12 = vmax.f32 %v3435_v7, 0.0  ;;  %v3437_v13 = vadd.f32 %v3436_v11, %v3396_v8  ;;  %v3438_v41 = vpop.f32.mrf.mxu1 }
 0x403   : > { %v3398_v57 = vpop.f32.mrf.mxu0 }
 0x404   : > { %3700 = vst [vmem:[%s19277_s19 + $0x10] sm:$0xff] %v3689_v12  ;;  %v3690_v14 = vmax.f32 %v3437_v13, 0.0  ;;  %v3439_v15 = vpop.f32.mrf.mxu1 }
 0x406   : > { %3701 = vst [vmem:[%s19277_s19 + $0x18] sm:$0xff] %v3690_v14 }
 0x43d   : > { %v3475_v35 = vpop.f32.mrf.mxu0 }
 0x43e   : > { %v3516_v25 = vpop.f32.mrf.mxu1  ;;  %v3476_v30 = vadd.f32 %v3475_v35, %v1233_v28 }
 0x43f   : > { %v3477_v16 = vpop.f32.mrf.mxu0 }
 0x440   : > { %v3518_v18 = vpop.f32.mrf.mxu1  ;;  %v3478_v32 = vadd.f32 %v3477_v16, %v1237_v29  ;;  %v3517_v33 = vadd.f32 %v3516_v25, %v3476_v30 }
 0x441   : > { %v3479_v21 = vpop.f32.mrf.mxu0 }
 0x442   : > { %v3520_v23 = vpop.f32.mrf.mxu1  ;;  %v3519_v37 = vadd.f32 %v3518_v18, %v3478_v32 }
 0x443   : > { %v3480_v45 = vpop.f32.mrf.mxu0 }
 0x444   : > { %v3521_v24 = vpop.f32.mrf.mxu1 }
 0x47d   : > { %v3557_v36 = vpop.f32.mrf.mxu0 }
 0x47e   : > { %v3558_v38 = vadd.f32 %v3557_v36, %v3517_v33  ;;  %v3598_v39 = vpop.f32.mrf.mxu1 }
 0x47f   : > { %v3559_v4 = vpop.f32.mrf.mxu0  ;;  %v3599_v51 = vadd.f32 %v3598_v39, %v1241_v50 }
 0x480   : > { %v3691_v40 = vmax.f32 %v3558_v38, 0.0  ;;  %v3560_v5 = vadd.f32 %v3559_v4, %v3519_v37  ;;  %v3600_v42 = vpop.f32.mrf.mxu1 }
 0x481   : > { %v3561_v43 = vpop.f32.mrf.mxu0  ;;  %v3601_v53 = vadd.f32 %v3600_v42, %v1245_v17 }
 0x482   : > { %3702 = vst [vmem:[%s19277_s19 + $0x20] sm:$0xff] %v3691_v40  ;;  %v3692_v44 = vmax.f32 %v3560_v5, 0.0  ;;  %v3602_v9 = vpop.f32.mrf.mxu1 }
 0x483   : > { %v3562_v46 = vpop.f32.mrf.mxu0 }
 0x484   : > { %3703 = vst [vmem:[%s19277_s19 + $0x28] sm:$0xff] %v3692_v44  ;;  %v3603_v47 = vpop.f32.mrf.mxu1 }
 0x4bd   : > { %v3639_v52 = vpop.f32.mrf.mxu0 }
 0x4be   : > { %v3640_v34 = vadd.f32 %v3639_v52, %v3599_v51  ;;  %v3680_v54 = vpop.f32.mrf.mxu1 }
 0x4bf   : > { %v3641_v55 = vpop.f32.mrf.mxu0 }
 0x4c0   : > { %v3681_v22 = vadd.f32 %v3680_v54, %v3640_v34  ;;  %v3642_v56 = vadd.f32 %v3641_v55, %v3601_v53  ;;  %v3682_v20 = vpop.f32.mrf.mxu1 }
 0x4c1   : > { %v3643_v58 = vpop.f32.mrf.mxu0 }
 0x4c2   : > { %v3693_v59 = vmax.f32 %v3681_v22, 0.0  ;;  %v3683_v60 = vadd.f32 %v3682_v20, %v3642_v56  ;;  %v3684_v61 = vpop.f32.mrf.mxu1 }
 0x4c3   : > { %v3644_v1 = vpop.f32.mrf.mxu0 }
 0x4c4   : > { %3704 = vst [vmem:[%s19277_s19 + $0x30] sm:$0xff] %v3693_v59  ;;  %v3694_v62 = vmax.f32 %v3683_v60, 0.0  ;;  %v3685_v63 = vpop.f32.mrf.mxu1 }
 0x4c6   : > { %3705 = vst [vmem:[%s19277_s19 + $0x38] sm:$0xff] %v3694_v62 }
 0x4c7 PF: > { %p16282_p2 = scmp.ne.s32.totalorder %s18522_s27, 3 }
 0x4c9   : > { %3709 = sbr.rel (%p16282_p2) target bundleno = 1658 (0x67a), region = 116 }
 0x4ce   : > { %v3710_v19 = vld [vmem:[#allocation3] sm:$0xff]  ;;  %v3711_v0 = vld [vmem:[#allocation3 + $0x8] sm:$0xff]  ;;  %v3712_v2 = vld [vmem:[#allocation3 + $0x10] sm:$0xff] }
 0x4cf   : > { %v3742_v31 = vadd.f32 %v3711_v0, %v3710_v19  ;;  %v3713_v3 = vld [vmem:[#allocation3 + $0x18] sm:$0xff]  ;;  %v3714_v7 = vld [vmem:[#allocation3 + $0x20] sm:$0xff]  ;;  %v3715_v11 = vld [vmem:[#allocation3 + $0x28] sm:$0xff] }
 0x4d0   : > { %v3716_v12 = vld [vmem:[#allocation3 + $0x30] sm:$0xff]  ;;  %v3717_v41 = vld [vmem:[#allocation3 + $0x38] sm:$0xff]  ;;  %v3719_v14 = vld [vmem:[#allocation3 + $0x40] sm:$0xff] }
 0x4d1   : > { %v3743_v6 = vadd.f32 %v3742_v31, %v3712_v2  ;;  %v3720_v35 = vld [vmem:[#allocation3 + $0x48] sm:$0xff]  ;;  %v3721_v16 = vld [vmem:[#allocation3 + $0x50] sm:$0xff]  ;;  %v3722_v21 = vld [vmem:[#allocation3 + $0x58] sm:$0xff] }
 0x4d2   : > { %v3723_v45 = vld [vmem:[#allocation3 + $0x60] sm:$0xff]  ;;  %v3724_v26 = vld [vmem:[#allocation3 + $0x68] sm:$0xff]  ;;  %v3725_v28 = vld [vmem:[#allocation3 + $0x70] sm:$0xff] }
 0x4d3   : > { %v3744_v8 = vadd.f32 %v3743_v6, %v3713_v3  ;;  %v3726_v30 = vld [vmem:[#allocation3 + $0x78] sm:$0xff]  ;;  %v3728_v33 = vld [vmem:[#allocation3 + $0x80] sm:$0xff]  ;;  %v19352_v37 = vld [vmem:[#allocation3 + $0x88] sm:$0xff] }
 0x4d4   : > { %v19354_v39 = vld [vmem:[#allocation3 + $0x90] sm:$0xff]  ;;  %v19357_v40 = vld [vmem:[#allocation3 + $0x98] sm:$0xff]  ;;  %v19360_v42 = vld [vmem:[#allocation3 + $0xa0] sm:$0xff] }
 0x4d5   : > { %v3745_v10 = vadd.f32 %v3744_v8, %v3714_v7  ;;  %v19363_v44 = vld [vmem:[#allocation3 + $0xa8] sm:$0xff]  ;;  %v19366_v46 = vld [vmem:[#allocation3 + $0xb0] sm:$0xff]  ;;  %v19369_v48 = vld [vmem:[#allocation3 + $0xb8] sm:$0xff] }
 0x4d7   : > { %v3746_v13 = vadd.f32 %v3745_v10, %v3715_v11 }
 0x4d9   : > { %v3747_v57 = vadd.f32 %v3746_v13, %v3716_v12 }
 0x4db   : > { %v3748_v15 = vadd.f32 %v3747_v57, %v3717_v41 }
 0x4dd   : > { %v3749_v25 = vadd.f32 %v3748_v15, %v3719_v14 }
 0x4df   : > { %v3750_v18 = vadd.f32 %v3749_v25, %v3720_v35 }
 0x4e1   : > { %v3751_v23 = vadd.f32 %v3750_v18, %v3721_v16 }
 0x4e3   : > { %v3752_v24 = vadd.f32 %v3751_v23, %v3722_v21 }
 0x4e5   : > { %v3753_v27 = vadd.f32 %v3752_v24, %v3723_v45 }
 0x4e7   : > { %v3754_v29 = vadd.f32 %v3753_v27, %v3724_v26 }
 0x4e9   : > { %v3755_v32 = vadd.f32 %v3754_v29, %v3725_v28 }
 0x4eb   : > { %v3756_v36 = vadd.f32 %v3755_v32, %v3726_v30 }
 0x4ed   : > { %v3757_v38 = vadd.f32 %v3756_v36, %v3728_v33 }
 0x4ef   : > { %v3758_v4 = vadd.f32 %v3757_v38, %v19352_v37 }
 0x4f1   : > { %v3759_v5 = vadd.f32 %v3758_v4, %v19354_v39 }
 0x4f3   : > { %v3760_v43 = vadd.f32 %v3759_v5, %v19357_v40 }
 0x4f5   : > { %v3761_v9 = vadd.f32 %v3760_v43, %v19360_v42 }
 0x4f7   : > { %v3762_v47 = vadd.f32 %v3761_v9, %v19363_v44 }
 0x4f9   : > { %v3763_v49 = vadd.f32 %v3762_v47, %v19366_v46 }
 0x4fb   : > { %v3764_v50 = vadd.f32 %v3763_v49, %v19369_v48 }
 0x4fd   : > { %3765 = vadd.xlane.f32.xlu0 %v3764_v50 }
 0x586   : > { %v3766_v17 = vpop.xlane.xlu0 %3765 }
 0x587   : > { %v19373_v51 = vmul.f32 0.00032552084, %v3766_v17 }
 0x589   : > { %v19376_v52 = vsub.f32 %v3710_v19, %v19373_v51  ;;  %v19379_v53 = vsub.f32 %v3711_v0, %v19373_v51  ;;  %v19382_v34 = vsub.f32 %v3712_v2, %v19373_v51  ;;  %v19389_v22 = vsub.f32 %v3713_v3, %v19373_v51 }
 0x58a   : > { %v19392_v56 = vsub.f32 %v3714_v7, %v19373_v51  ;;  %v19397_v59 = vsub.f32 %v3715_v11, %v19373_v51  ;;  %v19402_v1 = vsub.f32 %v3716_v12, %v19373_v51  ;;  %v19407_v19 = vsub.f32 %v3717_v41, %v19373_v51 }
 0x58b   : > { %v3793_v54 = vmul.f32 %v19376_v52, %v19376_v52  ;;  %v3794_v55 = vmul.f32 %v19379_v53, %v19379_v53  ;;  %v3795_v20 = vmul.f32 %v19382_v34, %v19382_v34  ;;  %v3796_v60 = vmul.f32 %v19389_v22, %v19389_v22 }
 0x58c   : > { %v3797_v62 = vmul.f32 %v19392_v56, %v19392_v56  ;;  %v3798_v0 = vmul.f32 %v19397_v59, %v19397_v59  ;;  %v19412_v31 = vsub.f32 %v3719_v14, %v19373_v51  ;;  %v3799_v3 = vmul.f32 %v19402_v1, %v19402_v1 }
 0x58d   : > { %v3817_v58 = vadd.f32 %v3794_v55, %v3793_v54  ;;  %v19417_v7 = vsub.f32 %v3720_v35, %v19373_v51  ;;  %v3800_v8 = vmul.f32 %v19407_v19, %v19407_v19  ;;  %v19422_v10 = vsub.f32 %v3721_v16, %v19373_v51 }
 0x58e   : > { %v3801_v12 = vmul.f32 %v19412_v31, %v19412_v31  ;;  %v19427_v41 = vsub.f32 %v3722_v21, %v19373_v51  ;;  %v19432_v15 = vsub.f32 %v3723_v45, %v19373_v51  ;;  %v19437_v16 = vsub.f32 %v3724_v26, %v19373_v51 }
 0x58f   : > { %v3818_v61 = vadd.f32 %v3817_v58, %v3795_v20  ;;  %v3802_v57 = vmul.f32 %v19417_v7, %v19417_v7  ;;  %v3803_v35 = vmul.f32 %v19422_v10, %v19422_v10  ;;  %v19442_v21 = vsub.f32 %v3725_v28, %v19373_v51 }
 0x590   : > { %v3804_v18 = vmul.f32 %v19427_v41, %v19427_v41  ;;  %v3805_v24 = vmul.f32 %v19432_v15, %v19432_v15  ;;  %v19447_v45 = vsub.f32 %v3726_v30, %v19373_v51  ;;  %v3806_v29 = vmul.f32 %v19437_v16, %v19437_v16 }
 0x591   : > { %v3819_v63 = vadd.f32 %v3818_v61, %v3796_v60  ;;  %v19452_v26 = vsub.f32 %v3728_v33, %v19373_v51  ;;  %v3807_v36 = vmul.f32 %v19442_v21, %v19442_v21  ;;  %v19458_v28 = vsub.f32 %v19352_v37, %v19373_v51 }
 0x592   : > { %v3808_v4 = vmul.f32 %v19447_v45, %v19447_v45  ;;  %v19464_v5 = vsub.f32 %v19354_v39, %v19373_v51  ;;  %v19470_v9 = vsub.f32 %v19357_v40, %v19373_v51  ;;  %v19476_v49 = vsub.f32 %v19360_v42, %v19373_v51 }
 0x593   : > { %v3820_v2 = vadd.f32 %v3819_v63, %v3797_v62  ;;  %v3809_v33 = vmul.f32 %v19452_v26, %v19452_v26  ;;  %v3810_v37 = vmul.f32 %v19458_v28, %v19458_v28  ;;  %v19482_v17 = vsub.f32 %v19363_v44, %v19373_v51 }
 0x594   : > { %v3811_v39 = vmul.f32 %v19464_v5, %v19464_v5  ;;  %v3812_v40 = vmul.f32 %v19470_v9, %v19470_v9  ;;  %v19488_v55 = vsub.f32 %v19366_v46, %v19373_v51  ;;  %v3813_v42 = vmul.f32 %v19476_v49, %v19476_v49 }
 0x595   : > { %v3821_v6 = vadd.f32 %v3820_v2, %v3798_v0  ;;  %v19494_v58 = vsub.f32 %v19369_v48, %v19373_v51  ;;  %v3814_v44 = vmul.f32 %v19482_v17, %v19482_v17  ;;  %v3872_v2 = vlaneseq }
 0x596   : > { %v3815_v61 = vmul.f32 %v19488_v55, %v19488_v55 }
 0x597   : > { %v3822_v11 = vadd.f32 %v3821_v6, %v3799_v3  ;;  %v3816_v46 = vmul.f32 %v19494_v58, %v19494_v58  ;;  %v3873_v3 = vshrl.u32 %v3872_v2, 7 }
 0x599   : > { %v3823_v13 = vadd.f32 %v3822_v11, %v3800_v8  ;;  %v19502_v48 = vsub.s32 0, %v3873_v3  ;;  %v19504_v11 = vsub.s32 1, %v3873_v3 }
 0x59b   : > { %v3824_v14 = vadd.f32 %v3823_v13, %v3801_v12  ;;  %v19506_v12 = vsub.s32 2, %v3873_v3  ;;  %v19508_v13 = vsub.s32 3, %v3873_v3 }
 0x59d   : > { %v3825_v25 = vadd.f32 %v3824_v14, %v3802_v57  ;;  %v19510_v57 = vld [vmem:[#allocation14] sm:$0xff]  ;;  %v19512_v14 = vsub.s32 4, %v3873_v3 }
 0x59f   : > { %v3826_v23 = vadd.f32 %v3825_v25, %v3803_v35  ;;  %v19514_v35 = vsub.s32 5, %v3873_v3  ;;  %v19516_v25 = vsub.s32 6, %v3873_v3 }
 0x5a1   : > { %v3827_v27 = vadd.f32 %v3826_v23, %v3804_v18  ;;  %v19518_v18 = vsub.s32 7, %v3873_v3  ;;  %v19520_v23 = vld [vmem:[#allocation14 + $0x8] sm:$0xff] }
 0x5a3   : > { %v3828_v32 = vadd.f32 %v3827_v27, %v3805_v24  ;;  %v3875_v24 = vrot.slane %v19510_v57, %v19502_v48  ;;  %v3879_v27 = vrot.slane %v19510_v57, %v19504_v11 }
 0x5a5   : > { %v3829_v38 = vadd.f32 %v3828_v32, %v3806_v29  ;;  %v3883_v29 = vrot.slane %v19510_v57, %v19506_v12  ;;  %v3887_v32 = vrot.slane %v19510_v57, %v19508_v13 }
 0x5a7   : > { %v3830_v30 = vadd.f32 %v3829_v38, %v3807_v36  ;;  %v19530_v36 = vld [vmem:[#allocation14 + $0x10] sm:$0xff]  ;;  %v3891_v38 = vrot.slane %v19510_v57, %v19512_v14 }
 0x5a9   : > { %v3831_v43 = vadd.f32 %v3830_v30, %v3808_v4  ;;  %v3895_v4 = vrot.slane %v19510_v57, %v19514_v35  ;;  %v3899_v30 = vrot.slane %v19510_v57, %v19516_v25 }
 0x5ab   : > { %v3832_v47 = vadd.f32 %v3831_v43, %v3809_v33  ;;  %v3903_v33 = vrot.slane %v19510_v57, %v19518_v18  ;;  %v3907_v43 = vrot.slane %v19520_v23, %v19502_v48 }
 0x5ad   : > { %v3833_v50 = vadd.f32 %v3832_v47, %v3810_v37  ;;  %v3911_v37 = vrot.slane %v19520_v23, %v19504_v11  ;;  %v3915_v47 = vrot.slane %v19520_v23, %v19506_v12 }
 0x5af   : > { %v3834_v54 = vadd.f32 %v3833_v50, %v3811_v39  ;;  %v3919_v39 = vrot.slane %v19520_v23, %v19508_v13  ;;  %v19548_v50 = vld [vmem:[#allocation16] sm:$0xff] }
 0x5b1   : > { %v3835_v20 = vadd.f32 %v3834_v54, %v3812_v40  ;;  %v3923_v40 = vrot.slane %v19520_v23, %v19512_v14  ;;  %v3927_v54 = vrot.slane %v19520_v23, %v19514_v35 }
 0x5b3   : > { %v3836_v60 = vadd.f32 %v3835_v20, %v3813_v42  ;;  %v3931_v42 = vrot.slane %v19520_v23, %v19516_v25 }
 0x5b5   : > { %v3837_v62 = vadd.f32 %v3836_v60, %v3814_v44 }
 0x5b7   : > { %v3838_v63 = vadd.f32 %v3837_v62, %v3815_v61  ;;  %v19584_v62 = vld [vmem:[#allocation16 + $0x10] sm:$0xff] }
 0x5b9   : > { %v3839_v0 = vadd.f32 %v3838_v63, %v3816_v46  ;;  %v19566_v46 = vld [vmem:[#allocation16 + $0x8] sm:$0xff] }
 0x5bb   : > { %3840 = vadd.xlane.f32.xlu0 %v3839_v0 }
 0x644   : > { %v3841_v6 = vpop.xlane.xlu0 %3840 }
 0x645   : > { %v3842_v8 = vmul.f32 0.00032552084, %v3841_v6 }
 0x647   : > { %v3843_v51 = vadd.f32 1e-05, %v3842_v8 }
 0x649   : > { %18028 = vrsqrt.f32 %v3843_v51 }
 0x656   : > { %v18029_v61 = vpop.eup %18028 }
 0x657   : > { %v3845_v0 = vmul.f32 %v18029_v61, %v19376_v52  ;;  %v3846_v2 = vmul.f32 %v18029_v61, %v19379_v53  ;;  %v3847_v60 = vmul.f32 %v18029_v61, %v19382_v34  ;;  %v3848_v3 = vmul.f32 %v18029_v61, %v19389_v22 }
 0x658   : > { %v3849_v44 = vmul.f32 %v18029_v61, %v19392_v56  ;;  %v3850_v6 = vmul.f32 %v18029_v61, %v19397_v59  ;;  %v3851_v8 = vmul.f32 %v18029_v61, %v19402_v1  ;;  %v3852_v20 = vmul.f32 %v18029_v61, %v19407_v19 }
 0x659   : > { %v3853_v51 = vmul.f32 %v18029_v61, %v19412_v31  ;;  %v3854_v63 = vmul.f32 %v18029_v61, %v19417_v7  ;;  %v3855_v52 = vmul.f32 %v18029_v61, %v19422_v10  ;;  %v3856_v53 = vmul.f32 %v18029_v61, %v19427_v41 }
 0x65a   : > { %v3857_v34 = vmul.f32 %v18029_v61, %v19432_v15  ;;  %v3858_v22 = vmul.f32 %v18029_v61, %v19437_v16  ;;  %v3859_v56 = vmul.f32 %v18029_v61, %v19442_v21  ;;  %v3860_v59 = vmul.f32 %v18029_v61, %v19447_v45 }
 0x65b   : > { %v3861_v1 = vmul.f32 %v18029_v61, %v19452_v26  ;;  %v3862_v19 = vmul.f32 %v18029_v61, %v19458_v28  ;;  %v3863_v31 = vmul.f32 %v18029_v61, %v19464_v5  ;;  %v3864_v7 = vmul.f32 %v18029_v61, %v19470_v9 }
 0x65c   : > { %v3865_v10 = vmul.f32 %v18029_v61, %v19476_v49  ;;  %v3866_v41 = vmul.f32 %v18029_v61, %v19482_v17  ;;  %v3867_v15 = vmul.f32 %v18029_v61, %v19488_v55  ;;  %v3868_v16 = vmul.f32 %v18029_v61, %v19494_v58 }
 0x65d   : > { %v3992_v21 = vmul.f32 %v3875_v24, %v3845_v0  ;;  %v3993_v45 = vmul.f32 %v3879_v27, %v3846_v2  ;;  %v3994_v26 = vmul.f32 %v3883_v29, %v3847_v60  ;;  %v3995_v28 = vmul.f32 %v3887_v32, %v3848_v3 }
 0x65e   : > { %v3996_v5 = vmul.f32 %v3891_v38, %v3849_v44  ;;  %v3997_v9 = vmul.f32 %v3895_v4, %v3850_v6  ;;  %v3998_v49 = vmul.f32 %v3899_v30, %v3851_v8  ;;  %v3999_v17 = vmul.f32 %v3903_v33, %v3852_v20 }
 0x65f   : > { %v4000_v55 = vmul.f32 %v3907_v43, %v3853_v51  ;;  %v4001_v58 = vmul.f32 %v3911_v37, %v3854_v63  ;;  %v4002_v24 = vmul.f32 %v3915_v47, %v3855_v52  ;;  %v4003_v27 = vmul.f32 %v3919_v39, %v3856_v53 }
 0x660   : > { %v4004_v57 = vmul.f32 %v3923_v40, %v3857_v34  ;;  %v4005_v29 = vmul.f32 %v3927_v54, %v3858_v22  ;;  %v4006_v32 = vmul.f32 %v3931_v42, %v3859_v56  ;;  %v21834_v38 = vrot.slane %v19520_v23, %v19518_v18 }
 0x661   : > { %v21835_v30 = vrot.slane %v19530_v36, %v19502_v48  ;;  %v21836_v43 = vrot.slane %v19530_v36, %v19504_v11  ;;  %v21837_v47 = vrot.slane %v19530_v36, %v19506_v12  ;;  %v21838_v40 = vrot.slane %v19530_v36, %v19508_v13 }
 0x662   : > { %v4007_v4 = vmul.f32 %v21834_v38, %v3860_v59  ;;  %v21839_v23 = vrot.slane %v19530_v36, %v19512_v14  ;;  %v21840_v20 = vrot.slane %v19530_v36, %v19514_v35  ;;  %v21841_v60 = vrot.slane %v19530_v36, %v19516_v25 }
 0x663   : > { %v4008_v33 = vmul.f32 %v21835_v30, %v3861_v1  ;;  %v4009_v37 = vmul.f32 %v21836_v43, %v3862_v19  ;;  %v4010_v39 = vmul.f32 %v21837_v47, %v3863_v31  ;;  %v4011_v54 = vmul.f32 %v21838_v40, %v3864_v7 }
 0x664   : > { %v4012_v42 = vmul.f32 %v21839_v23, %v3865_v10  ;;  %v4013_v44 = vmul.f32 %v21840_v20, %v3866_v41  ;;  %v4014_v61 = vmul.f32 %v21841_v60, %v3867_v15  ;;  %v21842_v63 = vrot.slane %v19530_v36, %v19518_v18 }
 0x665   : > { %v21843_v2 = vrot.slane %v19548_v50, %v19502_v48  ;;  %v21844_v6 = vrot.slane %v19548_v50, %v19504_v11  ;;  %v21845_v51 = vrot.slane %v19548_v50, %v19506_v12  ;;  %v21846_v53 = vrot.slane %v19548_v50, %v19508_v13 }
 0x666   : > { %v4015_v0 = vmul.f32 %v21842_v63, %v3868_v16  ;;  %v21847_v36 = vrot.slane %v19548_v50, %v19512_v14  ;;  %v21848_v56 = vrot.slane %v19548_v50, %v19514_v35  ;;  %v21849_v1 = vrot.slane %v19548_v50, %v19516_v25 }
 0x667   : > { %v4139_v3 = vadd.f32 %v21843_v2, %v3992_v21  ;;  %v4140_v8 = vadd.f32 %v21844_v6, %v3993_v45  ;;  %v4141_v52 = vadd.f32 %v21845_v51, %v3994_v26  ;;  %v4142_v34 = vadd.f32 %v21846_v53, %v3995_v28 }
 0x668   : > { %v4143_v22 = vadd.f32 %v21847_v36, %v3996_v5  ;;  %v4144_v59 = vadd.f32 %v21848_v56, %v3997_v9  ;;  %v4145_v19 = vadd.f32 %v21849_v1, %v3998_v49  ;;  %v21850_v31 = vrot.slane %v19548_v50, %v19518_v18 }
 0x669   : > { %v21851_v10 = vrot.slane %v19566_v46, %v19502_v48  ;;  %v21852_v15 = vrot.slane %v19566_v46, %v19504_v11  ;;  %v21853_v21 = vrot.slane %v19566_v46, %v19506_v12  ;;  %v21854_v26 = vrot.slane %v19566_v46, %v19508_v13 }
 0x66a   : > { %v4146_v7 = vadd.f32 %v21850_v31, %v3999_v17  ;;  %v21855_v50 = vrot.slane %v19566_v46, %v19512_v14  ;;  %v21856_v9 = vrot.slane %v19566_v46, %v19514_v35  ;;  %v21857_v17 = vrot.slane %v19566_v46, %v19516_v25 }
 0x66b   : > { %v4147_v41 = vadd.f32 %v21851_v10, %v4000_v55  ;;  %v4148_v16 = vadd.f32 %v21852_v15, %v4001_v58  ;;  %v4149_v45 = vadd.f32 %v21853_v21, %v4002_v24  ;;  %v4150_v28 = vadd.f32 %v21854_v26, %v4003_v27 }
 0x66c   : > { %v4151_v5 = vadd.f32 %v21855_v50, %v4004_v57  ;;  %v4152_v49 = vadd.f32 %v21856_v9, %v4005_v29  ;;  %v4153_v55 = vadd.f32 %v21857_v17, %v4006_v32  ;;  %v21858_v58 = vrot.slane %v19566_v46, %v19518_v18 }
 0x66d   : > { %v21859_v38 = vrot.slane %v19584_v62, %v19502_v48  ;;  %v21860_v30 = vrot.slane %v19584_v62, %v19504_v11  ;;  %v21861_v43 = vrot.slane %v19584_v62, %v19506_v12  ;;  %v21862_v47 = vrot.slane %v19584_v62, %v19508_v13 }
 0x66e   : > { %v4154_v24 = vadd.f32 %v21858_v58, %v4007_v4  ;;  %v21863_v46 = vrot.slane %v19584_v62, %v19512_v14  ;;  %v21864_v48 = vrot.slane %v19584_v62, %v19514_v35  ;;  %v21865_v11 = vrot.slane %v19584_v62, %v19516_v25 }
 0x66f   : > { %v4155_v27 = vadd.f32 %v21859_v38, %v4008_v33  ;;  %v4156_v57 = vadd.f32 %v21860_v30, %v4009_v37  ;;  %v4157_v29 = vadd.f32 %v21861_v43, %v4010_v39  ;;  %v4158_v32 = vadd.f32 %v21862_v47, %v4011_v54 }
 0x670   : > { %v4159_v4 = vadd.f32 %v21863_v46, %v4012_v42  ;;  %v4160_v33 = vadd.f32 %v21864_v48, %v4013_v44  ;;  %v4161_v37 = vadd.f32 %v21865_v11, %v4014_v61  ;;  %v21866_v12 = vrot.slane %v19584_v62, %v19518_v18 }
 0x671   : > { %v17867_v40 = vpack.c.bf16 %v4140_v8, %v4139_v3  ;;  %v17868_v23 = vpack.c.bf16 %v4142_v34, %v4141_v52  ;;  %v17869_v13 = vpack.c.bf16 %v4144_v59, %v4143_v22  ;;  %v17870_v54 = vpack.c.bf16 %v4146_v7, %v4145_v19 }
 0x672   : > { %v4162_v39 = vadd.f32 %v21866_v12, %v4015_v0  ;;  %v17871_v20 = vpack.c.bf16 %v4148_v16, %v4147_v41  ;;  %v17872_v60 = vpack.c.bf16 %v4150_v28, %v4149_v45  ;;  %v17873_v14 = vpack.c.bf16 %v4152_v49, %v4151_v5 }
 0x673   : > { %v17874_v42 = vpack.c.bf16 %v4154_v24, %v4153_v55  ;;  %v17875_v63 = vpack.c.bf16 %v4156_v57, %v4155_v27  ;;  %v17876_v2 = vpack.c.bf16 %v4158_v32, %v4157_v29  ;;  %v17877_v35 = vpack.c.bf16 %v4160_v33, %v4159_v4  ;;  %4259 = vst [vmem:[#allocation4 + $0x48] sm:$0xff] %v17867_v40 }
 0x674   : > { %v17878_v44 = vpack.c.bf16 %v4162_v39, %v4161_v37  ;;  %4260 = vst [vmem:[#allocation4 + $0x8] sm:$0xff] %v17868_v23  ;;  %4261 = vst [vmem:[#allocation4 + $0x40] sm:$0xff] %v17869_v13 }
 0x675   : > { %4262 = vst [vmem:[#allocation4 + $0x58] sm:$0xff] %v17870_v54  ;;  %4263 = vst [vmem:[#allocation4 + $0x20] sm:$0xff] %v17871_v20 }
 0x676   : > { %4264 = vst [vmem:[#allocation4 + $0x38] sm:$0xff] %v17872_v60  ;;  %4265 = vst [vmem:[#allocation4 + $0x30] sm:$0xff] %v17873_v14 }
 0x677   : > { %4266 = vst [vmem:[#allocation4 + $0x10] sm:$0xff] %v17874_v42  ;;  %4267 = vst [vmem:[#allocation4] sm:$0xff] %v17875_v63 }
 0x678   : > { %4268 = vst [vmem:[#allocation4 + $0x28] sm:$0xff] %v17876_v2  ;;  %4269 = vst [vmem:[#allocation4 + $0x50] sm:$0xff] %v17877_v35 }
 0x679   : > { %4270 = vst [vmem:[#allocation4 + $0x18] sm:$0xff] %v17878_v44 }
 0x67a PF: > { %p16295_p1 = scmp.lt.s32.totalorder %s18522_s27, 3 }
 0x67b   : > { %s21867_s30 = sld [smem:[#allocation39_spill]] (!%p16295_p1) }
 0x67c   : > { %4274 = sbr.rel (%p16295_p1) target bundleno = 3556 (0xde4), region = 120 }
 0x681   : > { %v4343_v25 = vld [vmem:[%s18840_s1 + $0x1c0] sm:$0xff]  ;;  %v19823_v23 = vld [vmem:[#allocation4 + $0x48] sm:$0xff]  ;;  %vm15666_vm1 = vcmask 7168  }
 0x682   : > { %v4347_v18 = vld [vmem:[%s18840_s1 + $0x1e0] sm:$0xff]  ;;  %v19825_v13 = vld [vmem:[#allocation4 + $0x8] sm:$0xff]  ;;  %v19831_v14 = vcombine.high %v19823_v23, %v19823_v23 }
 0x683   : > { %v4471_v62 = vld [vmem:[%s18840_s1 + $0x5c0] sm:$0xff]  ;;  %v16377_v61 = vcombine.high %v4343_v25, %v4347_v18  ;;  %v16376_v3 = vcombine.low %v4343_v25, %v4347_v18  ;;  %v19835_v42 = vcombine.high %v19825_v13, %v19825_v13 }
 0x684   : > { %v4475_v0 = vld [vmem:[%s18840_s1 + $0x5e0] sm:$0xff]  ;;  %13661 = vmatprep.mubr.bf16.mxu0 %v19831_v14 }
 0x685   : > { %v4335_v6 = vld [vmem:[%s18840_s1 + $0x180] sm:$0xff]  ;;  %v16505_v51 = vcombine.high %v4471_v62, %v4475_v0  ;;  %v16504_v52 = vcombine.low %v4471_v62, %v4475_v0  ;;  %13629 = vmatprep.subr.bf16.mxu0 %v16377_v61  ;;  %13702 = vmatprep.mubr.bf16.mxu1 %v19835_v42 }
 0x686   : > { %v4339_v8 = vld [vmem:[%s18840_s1 + $0x1a0] sm:$0xff]  ;;  %13630 = vmatpush1.bf16.msra.mxu0 %v16376_v3 }
 0x687   : > { %v16369_v53 = vcombine.high %v4335_v6, %v4339_v8  ;;  %v4463_v34 = vld [vmem:[%s18840_s1 + $0x580] sm:$0xff]  ;;  %13670 = vmatprep.subr.bf16.mxu1 %v16505_v51  ;;  %v16368_v31 = vcombine.low %v4335_v6, %v4339_v8 }
 0x688   : > { %v4467_v36 = vld [vmem:[%s18840_s1 + $0x5a0] sm:$0xff]  ;;  %13671 = vmatpush1.bf16.msra.mxu1 %v16504_v52 }
 0x689   : > { %v4327_v22 = vld [vmem:[%s18840_s1 + $0x140] sm:$0xff]  ;;  %v16497_v56 = vcombine.high %v4463_v34, %v4467_v36  ;;  %13631 = vmatprep.subr.bf16.mxu0 %v16369_v53  ;;  %v16496_v7 = vcombine.low %v4463_v34, %v4467_v36 }
 0x68a   : > { %v4331_v59 = vld [vmem:[%s18840_s1 + $0x160] sm:$0xff]  ;;  %13632 = vmatpush1.bf16.msra.mxu0 %v16368_v31 }
 0x68b   : > { %v4455_v1 = vld [vmem:[%s18840_s1 + $0x540] sm:$0xff]  ;;  %v16361_v10 = vcombine.high %v4327_v22, %v4331_v59  ;;  %13672 = vmatprep.subr.bf16.mxu1 %v16497_v56  ;;  %v16360_v26 = vcombine.low %v4327_v22, %v4331_v59 }
 0x68c   : > { %v4459_v19 = vld [vmem:[%s18840_s1 + $0x560] sm:$0xff]  ;;  %13673 = vmatpush1.bf16.msra.mxu1 %v16496_v7 }
 0x68d   : > { %v16489_v41 = vcombine.high %v4455_v1, %v4459_v19  ;;  %v4319_v15 = vld [vmem:[%s18840_s1 + $0x100] sm:$0xff]  ;;  %13633 = vmatprep.subr.bf16.mxu0 %v16361_v10  ;;  %v16488_v28 = vcombine.low %v4455_v1, %v4459_v19 }
 0x68e   : > { %v4323_v16 = vld [vmem:[%s18840_s1 + $0x120] sm:$0xff]  ;;  %13634 = vmatpush1.bf16.msra.mxu0 %v16360_v26 }
 0x68f   : > { %v4447_v21 = vld [vmem:[%s18840_s1 + $0x500] sm:$0xff]  ;;  %v16353_v50 = vcombine.high %v4319_v15, %v4323_v16  ;;  %13674 = vmatprep.subr.bf16.mxu1 %v16489_v41  ;;  %v16352_v58 = vcombine.low %v4319_v15, %v4323_v16 }
 0x690   : > { %v4451_v45 = vld [vmem:[%s18840_s1 + $0x520] sm:$0xff]  ;;  %13675 = vmatpush1.bf16.msra.mxu1 %v16488_v28 }
 0x691   : > { %v16481_v5 = vcombine.high %v4447_v21, %v4451_v45  ;;  %v4311_v9 = vld [vmem:[%s18840_s1 + $0xc0] sm:$0xff]  ;;  %13635 = vmatprep.subr.bf16.mxu0 %v16353_v50  ;;  %v16480_v24 = vcombine.low %v4447_v21, %v4451_v45 }
 0x692   : > { %v4315_v49 = vld [vmem:[%s18840_s1 + $0xe0] sm:$0xff]  ;;  %13636 = vmatpush1.bf16.msra.mxu0 %v16352_v58 }
 0x693   : > { %v4439_v17 = vld [vmem:[%s18840_s1 + $0x4c0] sm:$0xff]  ;;  %v16345_v38 = vcombine.high %v4311_v9, %v4315_v49  ;;  %13676 = vmatprep.subr.bf16.mxu1 %v16481_v5  ;;  %v16344_v47 = vcombine.low %v4311_v9, %v4315_v49 }
 0x694   : > { %v4443_v55 = vld [vmem:[%s18840_s1 + $0x4e0] sm:$0xff]  ;;  %13677 = vmatpush1.bf16.msra.mxu1 %v16480_v24 }
 0x695   : > { %v16473_v27 = vcombine.high %v4439_v17, %v4443_v55  ;;  %v4303_v30 = vld [vmem:[%s18840_s1 + $0x80] sm:$0xff]  ;;  %13637 = vmatprep.subr.bf16.mxu0 %v16345_v38  ;;  %v16472_v32 = vcombine.low %v4439_v17, %v4443_v55 }
 0x696   : > { %v4307_v57 = vld [vmem:[%s18840_s1 + $0xa0] sm:$0xff]  ;;  %13638 = vmatpush1.bf16.msra.mxu0 %v16344_v47 }
 0x697   : > { %v4431_v43 = vld [vmem:[%s18840_s1 + $0x480] sm:$0xff]  ;;  %v16337_v46 = vcombine.high %v4303_v30, %v4307_v57  ;;  %13678 = vmatprep.subr.bf16.mxu1 %v16473_v27  ;;  %v16336_v12 = vcombine.low %v4303_v30, %v4307_v57 }
 0x698   : > { %v4435_v29 = vld [vmem:[%s18840_s1 + $0x4a0] sm:$0xff]  ;;  %13679 = vmatpush1.bf16.msra.mxu1 %v16472_v32 }
 0x699   : > { %v16465_v4 = vcombine.high %v4431_v43, %v4435_v29  ;;  %v4295_v48 = vld [vmem:[%s18840_s1 + $0x40] sm:$0xff]  ;;  %13639 = vmatprep.subr.bf16.mxu0 %v16337_v46  ;;  %v16464_v39 = vcombine.low %v4431_v43, %v4435_v29 }
 0x69a   : > { %v4299_v33 = vld [vmem:[%s18840_s1 + $0x60] sm:$0xff]  ;;  %13640 = vmatpush1.bf16.msra.mxu0 %v16336_v12 }
 0x69b   : > { %v4423_v11 = vld [vmem:[%s18840_s1 + $0x440] sm:$0xff]  ;;  %v16329_v40 = vcombine.high %v4295_v48, %v4299_v33  ;;  %13680 = vmatprep.subr.bf16.mxu1 %v16465_v4  ;;  %v16328_v35 = vcombine.low %v4295_v48, %v4299_v33 }
 0x69c   : > { %v4427_v37 = vld [vmem:[%s18840_s1 + $0x460] sm:$0xff]  ;;  %13681 = vmatpush1.bf16.msra.mxu1 %v16464_v39 }
 0x69d   : > { %v16457_v54 = vcombine.high %v4423_v11, %v4427_v37  ;;  %v4287_v20 = vld [vmem:[%s18840_s1] sm:$0xff]  ;;  %13641 = vmatprep.subr.bf16.mxu0 %v16329_v40  ;;  %v16456_v44 = vcombine.low %v4423_v11, %v4427_v37 }
 0x69e   : > { %v4291_v60 = vld [vmem:[%s18840_s1 + $0x20] sm:$0xff]  ;;  %13642 = vmatpush1.bf16.msra.mxu0 %v16328_v35 }
 0x69f   : > { %v4415_v63 = vld [vmem:[%s18840_s1 + $0x400] sm:$0xff]  ;;  %v16321_v25 = vcombine.high %v4287_v20, %v4291_v60  ;;  %13682 = vmatprep.subr.bf16.mxu1 %v16457_v54  ;;  %v16320_v6 = vcombine.low %v4287_v20, %v4291_v60 }
 0x6a0   : > { %v4419_v2 = vld [vmem:[%s18840_s1 + $0x420] sm:$0xff]  ;;  %13683 = vmatpush1.bf16.msra.mxu1 %v16456_v44 }
 0x6a1   : > { %v16449_v18 = vcombine.high %v4415_v63, %v4419_v2  ;;  %v4407_v62 = vld [vmem:[%s18840_s1 + $0x3c0] sm:$0xff]  ;;  %13643 = vmatprep.subr.bf16.mxu0 %v16321_v25  ;;  %v16448_v8 = vcombine.low %v4415_v63, %v4419_v2 }
 0x6a2   : > { %v4411_v61 = vld [vmem:[%s18840_s1 + $0x3e0] sm:$0xff]  ;;  %13644 = vmatpush1.bf16.msra.mxu0 %v16320_v6 }
 0x6a3   : > { %v4535_v0 = vld [vmem:[%s18840_s1 + $0x7c0] sm:$0xff]  ;;  %v16441_v51 = vcombine.high %v4407_v62, %v4411_v61  ;;  %13684 = vmatprep.subr.bf16.mxu1 %v16449_v18  ;;  %v16440_v56 = vcombine.low %v4407_v62, %v4411_v61 }
 0x6a4   : > { %v4539_v3 = vld [vmem:[%s18840_s1 + $0x7e0] sm:$0xff]  ;;  %13685 = vmatpush1.bf16.msra.mxu1 %v16448_v8 }
 0x6a5   : > { %v16569_v52 = vcombine.high %v4535_v0, %v4539_v3  ;;  %v4399_v53 = vld [vmem:[%s18840_s1 + $0x380] sm:$0xff]  ;;  %13645 = vmatprep.subr.bf16.mxu0 %v16441_v51  ;;  %v16568_v59 = vcombine.low %v4535_v0, %v4539_v3 }
 0x6a6   : > { %v4403_v34 = vld [vmem:[%s18840_s1 + $0x3a0] sm:$0xff]  ;;  %13646 = vmatpush2.bf16.msra.mxu0 %v16440_v56 }
 0x6a7   : > { %v4527_v36 = vld [vmem:[%s18840_s1 + $0x780] sm:$0xff]  ;;  %v16433_v1 = vcombine.high %v4399_v53, %v4403_v34  ;;  %13686 = vmatprep.subr.bf16.mxu1 %v16569_v52  ;;  %v16432_v15 = vcombine.low %v4399_v53, %v4403_v34 }
 0x6a8   : > { %v4531_v22 = vld [vmem:[%s18840_s1 + $0x7a0] sm:$0xff]  ;;  %13687 = vmatpush2.bf16.msra.mxu1 %v16568_v59 }
 0x6a9   : > { %v16561_v19 = vcombine.high %v4527_v36, %v4531_v22  ;;  %v4391_v31 = vld [vmem:[%s18840_s1 + $0x340] sm:$0xff]  ;;  %13647 = vmatprep.subr.bf16.mxu0 %v16433_v1  ;;  %v16560_v16 = vcombine.low %v4527_v36, %v4531_v22  ;;  %v19881_v1 = vcombine.low %v19823_v23, %v19823_v23 }
 0x6aa   : > { %v4395_v7 = vld [vmem:[%s18840_s1 + $0x360] sm:$0xff]  ;;  %13648 = vmatpush2.bf16.msra.mxu0 %v16432_v15 }
 0x6ab   : > { %v4519_v10 = vld [vmem:[%s18840_s1 + $0x740] sm:$0xff]  ;;  %v16425_v21 = vcombine.high %v4391_v31, %v4395_v7  ;;  %13688 = vmatprep.subr.bf16.mxu1 %v16561_v19  ;;  %v16424_v9 = vcombine.low %v4391_v31, %v4395_v7 }
 0x6ac   : > { %v4523_v41 = vld [vmem:[%s18840_s1 + $0x760] sm:$0xff]  ;;  %13689 = vmatpush2.bf16.msra.mxu1 %v16560_v16 }
 0x6ad   : > { %v16553_v45 = vcombine.high %v4519_v10, %v4523_v41  ;;  %v4383_v26 = vld [vmem:[%s18840_s1 + $0x300] sm:$0xff]  ;;  %13649 = vmatprep.subr.bf16.mxu0 %v16425_v21  ;;  %v16552_v49 = vcombine.low %v4519_v10, %v4523_v41  ;;  %v19889_v10 = vcombine.low %v19825_v13, %v19825_v13 }
 0x6ae   : > { %v4387_v28 = vld [vmem:[%s18840_s1 + $0x320] sm:$0xff]  ;;  %13650 = vmatpush2.bf16.msra.mxu0 %v16424_v9 }
 0x6af   : > { %v4511_v50 = vld [vmem:[%s18840_s1 + $0x700] sm:$0xff]  ;;  %v16417_v17 = vcombine.high %v4383_v26, %v4387_v28  ;;  %13690 = vmatprep.subr.bf16.mxu1 %v16553_v45  ;;  %v16416_v30 = vcombine.low %v4383_v26, %v4387_v28 }
 0x6b0   : > { %v4515_v5 = vld [vmem:[%s18840_s1 + $0x720] sm:$0xff]  ;;  %13691 = vmatpush2.bf16.msra.mxu1 %v16552_v49 }
 0x6b1   : > { %v16545_v55 = vcombine.high %v4511_v50, %v4515_v5  ;;  %v4375_v58 = vld [vmem:[%s18840_s1 + $0x2c0] sm:$0xff]  ;;  %13651 = vmatprep.subr.bf16.mxu0 %v16417_v17  ;;  %v16544_v57 = vcombine.low %v4511_v50, %v4515_v5 }
 0x6b2   : > { %v4379_v24 = vld [vmem:[%s18840_s1 + $0x2e0] sm:$0xff]  ;;  %13652 = vmatpush2.bf16.msra.mxu0 %v16416_v30 }
 0x6b3   : > { %v4503_v38 = vld [vmem:[%s18840_s1 + $0x6c0] sm:$0xff]  ;;  %v16409_v43 = vcombine.high %v4375_v58, %v4379_v24  ;;  %13692 = vmatprep.subr.bf16.mxu1 %v16545_v55  ;;  %v16408_v48 = vcombine.low %v4375_v58, %v4379_v24 }
 0x6b4   : > { %v4507_v27 = vld [vmem:[%s18840_s1 + $0x6e0] sm:$0xff]  ;;  %13693 = vmatpush2.bf16.msra.mxu1 %v16544_v57 }
 0x6b5   : > { %v16537_v29 = vcombine.high %v4503_v38, %v4507_v27  ;;  %v4367_v47 = vld [vmem:[%s18840_s1 + $0x280] sm:$0xff]  ;;  %13653 = vmatprep.subr.bf16.mxu0 %v16409_v43  ;;  %v16536_v33 = vcombine.low %v4503_v38, %v4507_v27 }
 0x6b6   : > { %v4371_v32 = vld [vmem:[%s18840_s1 + $0x2a0] sm:$0xff]  ;;  %13654 = vmatpush2.bf16.msra.mxu0 %v16408_v48 }
 0x6b7   : > { %v4495_v46 = vld [vmem:[%s18840_s1 + $0x680] sm:$0xff]  ;;  %v16401_v11 = vcombine.high %v4367_v47, %v4371_v32  ;;  %13694 = vmatprep.subr.bf16.mxu1 %v16537_v29  ;;  %v16400_v20 = vcombine.low %v4367_v47, %v4371_v32 }
 0x6b8   : > { %v4499_v4 = vld [vmem:[%s18840_s1 + $0x6a0] sm:$0xff]  ;;  %13695 = vmatpush2.bf16.msra.mxu1 %v16536_v33 }
 0x6b9   : > { %v16529_v37 = vcombine.high %v4495_v46, %v4499_v4  ;;  %v4359_v12 = vld [vmem:[%s18840_s1 + $0x240] sm:$0xff]  ;;  %13655 = vmatprep.subr.bf16.mxu0 %v16401_v11  ;;  %v16528_v60 = vcombine.low %v4495_v46, %v4499_v4 }
 0x6ba   : > { %v4363_v39 = vld [vmem:[%s18840_s1 + $0x260] sm:$0xff]  ;;  %13656 = vmatpush2.bf16.msra.mxu0 %v16400_v20 }
 0x6bb   : > { %v4487_v40 = vld [vmem:[%s18840_s1 + $0x640] sm:$0xff]  ;;  %v16393_v63 = vcombine.high %v4359_v12, %v4363_v39  ;;  %13696 = vmatprep.subr.bf16.mxu1 %v16529_v37  ;;  %v16392_v62 = vcombine.low %v4359_v12, %v4363_v39 }
 0x6bc   : > { %v4491_v54 = vld [vmem:[%s18840_s1 + $0x660] sm:$0xff]  ;;  %13697 = vmatpush2.bf16.msra.mxu1 %v16528_v60 }
 0x6bd   : > { %v16521_v2 = vcombine.high %v4487_v40, %v4491_v54  ;;  %v4351_v35 = vld [vmem:[%s18840_s1 + $0x200] sm:$0xff]  ;;  %13657 = vmatprep.subr.bf16.mxu0 %v16393_v63  ;;  %v16520_v61 = vcombine.low %v4487_v40, %v4491_v54 }
 0x6be   : > { %v4355_v44 = vld [vmem:[%s18840_s1 + $0x220] sm:$0xff]  ;;  %13658 = vmatpush2.bf16.msra.mxu0 %v16392_v62 }
 0x6bf   : > { %v4479_v25 = vld [vmem:[%s18840_s1 + $0x600] sm:$0xff]  ;;  %v16385_v0 = vcombine.high %v4351_v35, %v4355_v44  ;;  %13698 = vmatprep.subr.bf16.mxu1 %v16521_v2  ;;  %v16384_v53 = vcombine.low %v4351_v35, %v4355_v44 }
 0x6c0   : > { %v4483_v18 = vld [vmem:[%s18840_s1 + $0x620] sm:$0xff]  ;;  %13699 = vmatpush2.bf16.msra.mxu1 %v16520_v61 }
 0x6c1   : > { %v16513_v3 = vcombine.high %v4479_v25, %v4483_v18  ;;  %v4599_v6 = vld [vmem:[%s18840_s1 + $0x9c0] sm:$0xff]  ;;  %13659 = vmatprep.subr.bf16.mxu0 %v16385_v0  ;;  %v16512_v34 = vcombine.low %v4479_v25, %v4483_v18 }
 0x6c2   : > { %v4603_v8 = vld [vmem:[%s18840_s1 + $0x9e0] sm:$0xff]  ;;  %13660 = vmatpush2.bf16.msra.mxu0 %v16384_v53 }
 0x6c3   : > { %v4727_v51 = vld [vmem:[%s18840_s1 + $0xdc0] sm:$0xff]  ;;  %v16633_v36 = vcombine.high %v4599_v6, %v4603_v8  ;;  %13700 = vmatprep.subr.bf16.mxu1 %v16513_v3  ;;  %v16632_v41 = vcombine.low %v4599_v6, %v4603_v8 }
 0x6c4   : > { %v4731_v52 = vld [vmem:[%s18840_s1 + $0xde0] sm:$0xff]  ;;  %13701 = vmatpush2.bf16.msra.mxu1 %v16512_v34 }
 0x6c5   : > { %v16761_v22 = vcombine.high %v4727_v51, %v4731_v52  ;;  %v4591_v56 = vld [vmem:[%s18840_s1 + $0x980] sm:$0xff]  ;;  %13711 = vmatprep.subr.bf16.mxu0 %v16633_v36  ;;  %v16760_v16 = vcombine.low %v4727_v51, %v4731_v52  ;;  %13662 = vmatmul.mubr.bf16.vlgmr.msra.gmra.mxu0 %v19881_v1 }
 0x6c6   : > { %v4595_v59 = vld [vmem:[%s18840_s1 + $0x9a0] sm:$0xff]  ;;  %13712 = vmatpush1.bf16.msra.mxu0 %v16632_v41 }
 0x6c7   : > { %v4719_v19 = vld [vmem:[%s18840_s1 + $0xd80] sm:$0xff]  ;;  %v16625_v21 = vcombine.high %v4591_v56, %v4595_v59  ;;  %13752 = vmatprep.subr.bf16.mxu1 %v16761_v22  ;;  %13703 = vmatmul.mubr.bf16.vlgmr.msra.gmra.mxu1 %v19889_v10  ;;  %v16624_v9 = vcombine.low %v4591_v56, %v4595_v59 }
 0x6c8   : > { %v4723_v31 = vld [vmem:[%s18840_s1 + $0xda0] sm:$0xff]  ;;  %13753 = vmatpush1.bf16.msra.mxu1 %v16760_v16 }
 0x6c9   : > { %v19885_v7 = vld [vmem:[#allocation4 + $0x40] sm:$0xff]  ;;  %v19891_v15 = vld [vmem:[#allocation4 + $0x58] sm:$0xff]  ;;  %v16753_v23 = vcombine.high %v4719_v19, %v4723_v31  ;;  %13713 = vmatprep.subr.bf16.mxu0 %v16625_v21  ;;  %v16752_v49 = vcombine.low %v4719_v19, %v4723_v31 }
 0x6ca   : > { %v4583_v45 = vld [vmem:[%s18840_s1 + $0x940] sm:$0xff]  ;;  %v19897_v28 = vcombine.high %v19885_v7, %v19885_v7  ;;  %v19904_v5 = vcombine.high %v19891_v15, %v19891_v15  ;;  %13714 = vmatpush1.bf16.msra.mxu0 %v16624_v9 }
 0x6cb   : > { %v4587_v26 = vld [vmem:[%s18840_s1 + $0x960] sm:$0xff]  ;;  %13754 = vmatprep.subr.bf16.mxu1 %v16753_v23 }
 0x6cc   : > { %v4711_v13 = vld [vmem:[%s18840_s1 + $0xd40] sm:$0xff]  ;;  %v16617_v17 = vcombine.high %v4583_v45, %v4587_v26  ;;  %13743 = vmatprep.mubr.bf16.mxu0 %v19897_v28  ;;  %13784 = vmatprep.mubr.bf16.mxu1 %v19904_v5  ;;  %v16616_v30 = vcombine.low %v4583_v45, %v4587_v26 }
 0x6cd   : > { %v4715_v50 = vld [vmem:[%s18840_s1 + $0xd60] sm:$0xff]  ;;  %13755 = vmatpush1.bf16.msra.mxu1 %v16752_v49 }
 0x6ce   : > { %v16745_v55 = vcombine.high %v4711_v13, %v4715_v50  ;;  %v4575_v58 = vld [vmem:[%s18840_s1 + $0x900] sm:$0xff]  ;;  %13715 = vmatprep.subr.bf16.mxu0 %v16617_v17  ;;  %v16744_v57 = vcombine.low %v4711_v13, %v4715_v50 }
 0x6cf   : > { %v4579_v24 = vld [vmem:[%s18840_s1 + $0x920] sm:$0xff]  ;;  %13716 = vmatpush1.bf16.msra.mxu0 %v16616_v30 }
 0x6d0   : > { %v4703_v38 = vld [vmem:[%s18840_s1 + $0xd00] sm:$0xff]  ;;  %v16609_v43 = vcombine.high %v4575_v58, %v4579_v24  ;;  %13756 = vmatprep.subr.bf16.mxu1 %v16745_v55  ;;  %v16608_v48 = vcombine.low %v4575_v58, %v4579_v24 }
 0x6d1   : > { %v4707_v27 = vld [vmem:[%s18840_s1 + $0xd20] sm:$0xff]  ;;  %13757 = vmatpush1.bf16.msra.mxu1 %v16744_v57 }
 0x6d2   : > { %v16737_v29 = vcombine.high %v4703_v38, %v4707_v27  ;;  %v4567_v47 = vld [vmem:[%s18840_s1 + $0x8c0] sm:$0xff]  ;;  %13717 = vmatprep.subr.bf16.mxu0 %v16609_v43  ;;  %v16736_v33 = vcombine.low %v4703_v38, %v4707_v27 }
 0x6d3   : > { %v4571_v32 = vld [vmem:[%s18840_s1 + $0x8e0] sm:$0xff]  ;;  %13718 = vmatpush1.bf16.msra.mxu0 %v16608_v48 }
 0x6d4   : > { %v4695_v46 = vld [vmem:[%s18840_s1 + $0xcc0] sm:$0xff]  ;;  %v16601_v11 = vcombine.high %v4567_v47, %v4571_v32  ;;  %13758 = vmatprep.subr.bf16.mxu1 %v16737_v29  ;;  %v16600_v20 = vcombine.low %v4567_v47, %v4571_v32 }
 0x6d5   : > { %v4699_v4 = vld [vmem:[%s18840_s1 + $0xce0] sm:$0xff]  ;;  %13759 = vmatpush1.bf16.msra.mxu1 %v16736_v33 }
 0x6d6   : > { %v16729_v37 = vcombine.high %v4695_v46, %v4699_v4  ;;  %v4559_v12 = vld [vmem:[%s18840_s1 + $0x880] sm:$0xff]  ;;  %13719 = vmatprep.subr.bf16.mxu0 %v16601_v11  ;;  %v16728_v60 = vcombine.low %v4695_v46, %v4699_v4 }
 0x6d7   : > { %v4563_v39 = vld [vmem:[%s18840_s1 + $0x8a0] sm:$0xff]  ;;  %13720 = vmatpush1.bf16.msra.mxu0 %v16600_v20 }
 0x6d8   : > { %v4687_v40 = vld [vmem:[%s18840_s1 + $0xc80] sm:$0xff]  ;;  %v16593_v63 = vcombine.high %v4559_v12, %v4563_v39  ;;  %13760 = vmatprep.subr.bf16.mxu1 %v16729_v37  ;;  %v16592_v62 = vcombine.low %v4559_v12, %v4563_v39 }
 0x6d9   : > { %v4691_v54 = vld [vmem:[%s18840_s1 + $0xca0] sm:$0xff]  ;;  %13761 = vmatpush1.bf16.msra.mxu1 %v16728_v60 }
 0x6da   : > { %v16721_v2 = vcombine.high %v4687_v40, %v4691_v54  ;;  %v4551_v35 = vld [vmem:[%s18840_s1 + $0x840] sm:$0xff]  ;;  %13721 = vmatprep.subr.bf16.mxu0 %v16593_v63  ;;  %v16720_v61 = vcombine.low %v4687_v40, %v4691_v54 }
 0x6db   : > { %v4555_v44 = vld [vmem:[%s18840_s1 + $0x860] sm:$0xff]  ;;  %13722 = vmatpush1.bf16.msra.mxu0 %v16592_v62 }
 0x6dc   : > { %v4679_v25 = vld [vmem:[%s18840_s1 + $0xc40] sm:$0xff]  ;;  %v16585_v0 = vcombine.high %v4551_v35, %v4555_v44  ;;  %13762 = vmatprep.subr.bf16.mxu1 %v16721_v2  ;;  %v16584_v53 = vcombine.low %v4551_v35, %v4555_v44 }
 0x6dd   : > { %v4683_v18 = vld [vmem:[%s18840_s1 + $0xc60] sm:$0xff]  ;;  %13763 = vmatpush1.bf16.msra.mxu1 %v16720_v61 }
 0x6de   : > { %v16713_v3 = vcombine.high %v4679_v25, %v4683_v18  ;;  %v4543_v6 = vld [vmem:[%s18840_s1 + $0x800] sm:$0xff]  ;;  %13723 = vmatprep.subr.bf16.mxu0 %v16585_v0  ;;  %v16712_v34 = vcombine.low %v4679_v25, %v4683_v18 }
 0x6df   : > { %v4547_v8 = vld [vmem:[%s18840_s1 + $0x820] sm:$0xff]  ;;  %13724 = vmatpush1.bf16.msra.mxu0 %v16584_v53 }
 0x6e0   : > { %v4671_v51 = vld [vmem:[%s18840_s1 + $0xc00] sm:$0xff]  ;;  %v16577_v36 = vcombine.high %v4543_v6, %v4547_v8  ;;  %13764 = vmatprep.subr.bf16.mxu1 %v16713_v3  ;;  %v16576_v41 = vcombine.low %v4543_v6, %v4547_v8 }
 0x6e1   : > { %v4675_v52 = vld [vmem:[%s18840_s1 + $0xc20] sm:$0xff]  ;;  %13765 = vmatpush1.bf16.msra.mxu1 %v16712_v34 }
 0x6e2   : > { %v16705_v22 = vcombine.high %v4671_v51, %v4675_v52  ;;  %v4663_v56 = vld [vmem:[%s18840_s1 + $0xbc0] sm:$0xff]  ;;  %13725 = vmatprep.subr.bf16.mxu0 %v16577_v36  ;;  %v16704_v16 = vcombine.low %v4671_v51, %v4675_v52 }
 0x6e3   : > { %v4667_v59 = vld [vmem:[%s18840_s1 + $0xbe0] sm:$0xff]  ;;  %13726 = vmatpush1.bf16.msra.mxu0 %v16576_v41 }
 0x6e4   : > { %v4791_v19 = vld [vmem:[%s18840_s1 + $0xfc0] sm:$0xff]  ;;  %v16697_v21 = vcombine.high %v4663_v56, %v4667_v59  ;;  %13766 = vmatprep.subr.bf16.mxu1 %v16705_v22  ;;  %v16696_v9 = vcombine.low %v4663_v56, %v4667_v59 }
 0x6e5   : > { %v4795_v31 = vld [vmem:[%s18840_s1 + $0xfe0] sm:$0xff]  ;;  %13767 = vmatpush1.bf16.msra.mxu1 %v16704_v16 }
 0x6e6   : > { %v16825_v23 = vcombine.high %v4791_v19, %v4795_v31  ;;  %v4655_v45 = vld [vmem:[%s18840_s1 + $0xb80] sm:$0xff]  ;;  %13727 = vmatprep.subr.bf16.mxu0 %v16697_v21  ;;  %v16824_v49 = vcombine.low %v4791_v19, %v4795_v31 }
 0x6e7   : > { %v4659_v26 = vld [vmem:[%s18840_s1 + $0xba0] sm:$0xff]  ;;  %13728 = vmatpush2.bf16.msra.mxu0 %v16696_v9 }
 0x6e8   : > { %v4783_v13 = vld [vmem:[%s18840_s1 + $0xf80] sm:$0xff]  ;;  %v16689_v17 = vcombine.high %v4655_v45, %v4659_v26  ;;  %13768 = vmatprep.subr.bf16.mxu1 %v16825_v23  ;;  %v16688_v30 = vcombine.low %v4655_v45, %v4659_v26 }
 0x6e9   : > { %v4787_v50 = vld [vmem:[%s18840_s1 + $0xfa0] sm:$0xff]  ;;  %13769 = vmatpush2.bf16.msra.mxu1 %v16824_v49 }
 0x6ea   : > { %v16817_v55 = vcombine.high %v4783_v13, %v4787_v50  ;;  %v4647_v58 = vld [vmem:[%s18840_s1 + $0xb40] sm:$0xff]  ;;  %13729 = vmatprep.subr.bf16.mxu0 %v16689_v17  ;;  %v16816_v57 = vcombine.low %v4783_v13, %v4787_v50 }
 0x6eb   : > { %v4651_v24 = vld [vmem:[%s18840_s1 + $0xb60] sm:$0xff]  ;;  %13730 = vmatpush2.bf16.msra.mxu0 %v16688_v30 }
 0x6ec   : > { %v4775_v38 = vld [vmem:[%s18840_s1 + $0xf40] sm:$0xff]  ;;  %v16681_v43 = vcombine.high %v4647_v58, %v4651_v24  ;;  %13770 = vmatprep.subr.bf16.mxu1 %v16817_v55  ;;  %v16680_v48 = vcombine.low %v4647_v58, %v4651_v24 }
 0x6ed   : > { %v4779_v27 = vld [vmem:[%s18840_s1 + $0xf60] sm:$0xff]  ;;  %13771 = vmatpush2.bf16.msra.mxu1 %v16816_v57 }
 0x6ee   : > { %v16809_v29 = vcombine.high %v4775_v38, %v4779_v27  ;;  %v4639_v47 = vld [vmem:[%s18840_s1 + $0xb00] sm:$0xff]  ;;  %13731 = vmatprep.subr.bf16.mxu0 %v16681_v43  ;;  %v16808_v33 = vcombine.low %v4775_v38, %v4779_v27  ;;  %v19969_v38 = vcombine.low %v19885_v7, %v19885_v7  ;;  %v19977_v43 = vcombine.low %v19891_v15, %v19891_v15 }
 0x6ef   : > { %v4643_v32 = vld [vmem:[%s18840_s1 + $0xb20] sm:$0xff]  ;;  %13732 = vmatpush2.bf16.msra.mxu0 %v16680_v48 }
 0x6f0   : > { %v4767_v46 = vld [vmem:[%s18840_s1 + $0xf00] sm:$0xff]  ;;  %v16673_v11 = vcombine.high %v4639_v47, %v4643_v32  ;;  %13772 = vmatprep.subr.bf16.mxu1 %v16809_v29  ;;  %v16672_v20 = vcombine.low %v4639_v47, %v4643_v32 }
 0x6f1   : > { %v4771_v4 = vld [vmem:[%s18840_s1 + $0xf20] sm:$0xff]  ;;  %13773 = vmatpush2.bf16.msra.mxu1 %v16808_v33 }
 0x6f2   : > { %v16801_v37 = vcombine.high %v4767_v46, %v4771_v4  ;;  %v4631_v12 = vld [vmem:[%s18840_s1 + $0xac0] sm:$0xff]  ;;  %13733 = vmatprep.subr.bf16.mxu0 %v16673_v11  ;;  %v16800_v60 = vcombine.low %v4767_v46, %v4771_v4 }
 0x6f3   : > { %v4635_v39 = vld [vmem:[%s18840_s1 + $0xae0] sm:$0xff]  ;;  %13734 = vmatpush2.bf16.msra.mxu0 %v16672_v20 }
 0x6f4   : > { %v4759_v40 = vld [vmem:[%s18840_s1 + $0xec0] sm:$0xff]  ;;  %v16665_v63 = vcombine.high %v4631_v12, %v4635_v39  ;;  %13774 = vmatprep.subr.bf16.mxu1 %v16801_v37  ;;  %v16664_v62 = vcombine.low %v4631_v12, %v4635_v39 }
 0x6f5   : > { %v4763_v54 = vld [vmem:[%s18840_s1 + $0xee0] sm:$0xff]  ;;  %13775 = vmatpush2.bf16.msra.mxu1 %v16800_v60 }
 0x6f6   : > { %v16793_v2 = vcombine.high %v4759_v40, %v4763_v54  ;;  %v4623_v35 = vld [vmem:[%s18840_s1 + $0xa80] sm:$0xff]  ;;  %13735 = vmatprep.subr.bf16.mxu0 %v16665_v63  ;;  %v16792_v61 = vcombine.low %v4759_v40, %v4763_v54 }
 0x6f7   : > { %v4627_v44 = vld [vmem:[%s18840_s1 + $0xaa0] sm:$0xff]  ;;  %13736 = vmatpush2.bf16.msra.mxu0 %v16664_v62 }
 0x6f8   : > { %v4751_v25 = vld [vmem:[%s18840_s1 + $0xe80] sm:$0xff]  ;;  %v16657_v0 = vcombine.high %v4623_v35, %v4627_v44  ;;  %13776 = vmatprep.subr.bf16.mxu1 %v16793_v2  ;;  %v16656_v53 = vcombine.low %v4623_v35, %v4627_v44 }
 0x6f9   : > { %v4755_v18 = vld [vmem:[%s18840_s1 + $0xea0] sm:$0xff]  ;;  %13777 = vmatpush2.bf16.msra.mxu1 %v16792_v61 }
 0x6fa   : > { %v16785_v3 = vcombine.high %v4751_v25, %v4755_v18  ;;  %v4615_v6 = vld [vmem:[%s18840_s1 + $0xa40] sm:$0xff]  ;;  %13737 = vmatprep.subr.bf16.mxu0 %v16657_v0  ;;  %v16784_v34 = vcombine.low %v4751_v25, %v4755_v18 }
 0x6fb   : > { %v4619_v8 = vld [vmem:[%s18840_s1 + $0xa60] sm:$0xff]  ;;  %13738 = vmatpush2.bf16.msra.mxu0 %v16656_v53 }
 0x6fc   : > { %v4743_v51 = vld [vmem:[%s18840_s1 + $0xe40] sm:$0xff]  ;;  %v16649_v36 = vcombine.high %v4615_v6, %v4619_v8  ;;  %13778 = vmatprep.subr.bf16.mxu1 %v16785_v3  ;;  %v16648_v41 = vcombine.low %v4615_v6, %v4619_v8 }
 0x6fd   : > { %v4747_v52 = vld [vmem:[%s18840_s1 + $0xe60] sm:$0xff]  ;;  %13779 = vmatpush2.bf16.msra.mxu1 %v16784_v34 }
 0x6fe   : > { %v16777_v22 = vcombine.high %v4743_v51, %v4747_v52  ;;  %v4607_v56 = vld [vmem:[%s18840_s1 + $0xa00] sm:$0xff]  ;;  %13739 = vmatprep.subr.bf16.mxu0 %v16649_v36  ;;  %v16776_v16 = vcombine.low %v4743_v51, %v4747_v52 }
 0x6ff   : > { %v4611_v59 = vld [vmem:[%s18840_s1 + $0xa20] sm:$0xff]  ;;  %13740 = vmatpush2.bf16.msra.mxu0 %v16648_v41 }
 0x700   : > { %v4735_v19 = vld [vmem:[%s18840_s1 + $0xe00] sm:$0xff]  ;;  %v16641_v21 = vcombine.high %v4607_v56, %v4611_v59  ;;  %13780 = vmatprep.subr.bf16.mxu1 %v16777_v22  ;;  %v16640_v9 = vcombine.low %v4607_v56, %v4611_v59 }
 0x701   : > { %v4739_v31 = vld [vmem:[%s18840_s1 + $0xe20] sm:$0xff]  ;;  %13781 = vmatpush2.bf16.msra.mxu1 %v16776_v16 }
 0x702   : > { %v16769_v23 = vcombine.high %v4735_v19, %v4739_v31  ;;  %v4855_v45 = vld [vmem:[%s18840_s1 + $0x11c0] sm:$0xff]  ;;  %13741 = vmatprep.subr.bf16.mxu0 %v16641_v21  ;;  %v16768_v49 = vcombine.low %v4735_v19, %v4739_v31 }
 0x703   : > { %v4859_v26 = vld [vmem:[%s18840_s1 + $0x11e0] sm:$0xff]  ;;  %13742 = vmatpush2.bf16.msra.mxu0 %v16640_v9 }
 0x704   : > { %v4983_v13 = vld [vmem:[%s18840_s1 + $0x15c0] sm:$0xff]  ;;  %v16889_v17 = vcombine.high %v4855_v45, %v4859_v26  ;;  %13782 = vmatprep.subr.bf16.mxu1 %v16769_v23  ;;  %v16888_v29 = vcombine.low %v4855_v45, %v4859_v26 }
 0x705   : > { %v4987_v50 = vld [vmem:[%s18840_s1 + $0x15e0] sm:$0xff]  ;;  %13783 = vmatpush2.bf16.msra.mxu1 %v16768_v49 }
 0x706   : > { %v17017_v55 = vcombine.high %v4983_v13, %v4987_v50  ;;  %v4847_v58 = vld [vmem:[%s18840_s1 + $0x1180] sm:$0xff]  ;;  %13793 = vmatprep.subr.bf16.mxu0 %v16889_v17  ;;  %v17016_v32 = vcombine.low %v4983_v13, %v4987_v50  ;;  %13744 = vmatmul.mubr.bf16.vlgmr.msra.gmra.mxu0 %v19969_v38 }
 0x707   : > { %v4851_v24 = vld [vmem:[%s18840_s1 + $0x11a0] sm:$0xff]  ;;  %13794 = vmatpush1.bf16.msra.mxu0 %v16888_v29 }
 0x708   : > { %v4975_v27 = vld [vmem:[%s18840_s1 + $0x1580] sm:$0xff]  ;;  %v16881_v46 = vcombine.high %v4847_v58, %v4851_v24  ;;  %13834 = vmatprep.subr.bf16.mxu1 %v17017_v55  ;;  %13785 = vmatmul.mubr.bf16.vlgmr.msra.gmra.mxu1 %v19977_v43  ;;  %v16880_v12 = vcombine.low %v4847_v58, %v4851_v24 }
 0x709   : > { %v4979_v30 = vld [vmem:[%s18840_s1 + $0x15a0] sm:$0xff]  ;;  %13835 = vmatpush1.bf16.msra.mxu1 %v17016_v32 }
 0x70a   : > { %v19973_v57 = vld [vmem:[#allocation4 + $0x20] sm:$0xff]  ;;  %v19979_v47 = vld [vmem:[#allocation4 + $0x38] sm:$0xff]  ;;  %v17009_v7 = vcombine.high %v4975_v27, %v4979_v30  ;;  %13795 = vmatprep.subr.bf16.mxu0 %v16881_v46  ;;  %v17008_v39 = vcombine.low %v4975_v27, %v4979_v30 }
 0x70b   : > { %v4839_v4 = vld [vmem:[%s18840_s1 + $0x1140] sm:$0xff]  ;;  %v19985_v33 = vcombine.high %v19973_v57, %v19973_v57  ;;  %v19992_v37 = vcombine.high %v19979_v47, %v19979_v47  ;;  %13796 = vmatpush1.bf16.msra.mxu0 %v16880_v12 }
 0x70c   : > { %v4843_v48 = vld [vmem:[%s18840_s1 + $0x1160] sm:$0xff]  ;;  %13836 = vmatprep.subr.bf16.mxu1 %v17009_v7 }
 0x70d   : > { %v4967_v15 = vld [vmem:[%s18840_s1 + $0x1540] sm:$0xff]  ;;  %v16873_v40 = vcombine.high %v4839_v4, %v4843_v48  ;;  %13825 = vmatprep.mubr.bf16.mxu0 %v19985_v33  ;;  %13866 = vmatprep.mubr.bf16.mxu1 %v19992_v37  ;;  %v16872_v35 = vcombine.low %v4839_v4, %v4843_v48 }
 0x70e   : > { %v4971_v11 = vld [vmem:[%s18840_s1 + $0x1560] sm:$0xff]  ;;  %13837 = vmatpush1.bf16.msra.mxu1 %v17008_v39 }
 0x70f   : > { %v17001_v54 = vcombine.high %v4967_v15, %v4971_v11  ;;  %v4831_v20 = vld [vmem:[%s18840_s1 + $0x1100] sm:$0xff]  ;;  %13797 = vmatprep.subr.bf16.mxu0 %v16873_v40  ;;  %v17000_v44 = vcombine.low %v4967_v15, %v4971_v11 }
 0x710   : > { %v4835_v60 = vld [vmem:[%s18840_s1 + $0x1120] sm:$0xff]  ;;  %13798 = vmatpush1.bf16.msra.mxu0 %v16872_v35 }
 0x711   : > { %v4959_v63 = vld [vmem:[%s18840_s1 + $0x1500] sm:$0xff]  ;;  %v16865_v25 = vcombine.high %v4831_v20, %v4835_v60  ;;  %13838 = vmatprep.subr.bf16.mxu1 %v17001_v54  ;;  %v16864_v6 = vcombine.low %v4831_v20, %v4835_v60 }
 0x712   : > { %v4963_v2 = vld [vmem:[%s18840_s1 + $0x1520] sm:$0xff]  ;;  %13839 = vmatpush1.bf16.msra.mxu1 %v17000_v44 }
 0x713   : > { %v16993_v18 = vcombine.high %v4959_v63, %v4963_v2  ;;  %v4823_v62 = vld [vmem:[%s18840_s1 + $0x10c0] sm:$0xff]  ;;  %13799 = vmatprep.subr.bf16.mxu0 %v16865_v25  ;;  %v16992_v8 = vcombine.low %v4959_v63, %v4963_v2 }
 0x714   : > { %v4827_v61 = vld [vmem:[%s18840_s1 + $0x10e0] sm:$0xff]  ;;  %13800 = vmatpush1.bf16.msra.mxu0 %v16864_v6 }
 0x715   : > { %v4951_v0 = vld [vmem:[%s18840_s1 + $0x14c0] sm:$0xff]  ;;  %v16857_v51 = vcombine.high %v4823_v62, %v4827_v61  ;;  %13840 = vmatprep.subr.bf16.mxu1 %v16993_v18  ;;  %v16856_v56 = vcombine.low %v4823_v62, %v4827_v61 }
 0x716   : > { %v4955_v3 = vld [vmem:[%s18840_s1 + $0x14e0] sm:$0xff]  ;;  %13841 = vmatpush1.bf16.msra.mxu1 %v16992_v8 }
 0x717   : > { %v16985_v52 = vcombine.high %v4951_v0, %v4955_v3  ;;  %v4815_v53 = vld [vmem:[%s18840_s1 + $0x1080] sm:$0xff]  ;;  %13801 = vmatprep.subr.bf16.mxu0 %v16857_v51  ;;  %v16984_v59 = vcombine.low %v4951_v0, %v4955_v3 }
 0x718   : > { %v4819_v34 = vld [vmem:[%s18840_s1 + $0x10a0] sm:$0xff]  ;;  %13802 = vmatpush1.bf16.msra.mxu0 %v16856_v56 }
 0x719   : > { %v4943_v36 = vld [vmem:[%s18840_s1 + $0x1480] sm:$0xff]  ;;  %v16849_v19 = vcombine.high %v4815_v53, %v4819_v34  ;;  %13842 = vmatprep.subr.bf16.mxu1 %v16985_v52  ;;  %v16848_v45 = vcombine.low %v4815_v53, %v4819_v34 }
 0x71a   : > { %v4947_v22 = vld [vmem:[%s18840_s1 + $0x14a0] sm:$0xff]  ;;  %13843 = vmatpush1.bf16.msra.mxu1 %v16984_v59 }
 0x71b   : > { %v16977_v31 = vcombine.high %v4943_v36, %v4947_v22  ;;  %v4807_v41 = vld [vmem:[%s18840_s1 + $0x1040] sm:$0xff]  ;;  %13803 = vmatprep.subr.bf16.mxu0 %v16849_v19  ;;  %v16976_v26 = vcombine.low %v4943_v36, %v4947_v22 }
 0x71c   : > { %v4811_v16 = vld [vmem:[%s18840_s1 + $0x1060] sm:$0xff]  ;;  %13804 = vmatpush1.bf16.msra.mxu0 %v16848_v45 }
 0x71d   : > { %v4935_v21 = vld [vmem:[%s18840_s1 + $0x1440] sm:$0xff]  ;;  %v16841_v13 = vcombine.high %v4807_v41, %v4811_v16  ;;  %13844 = vmatprep.subr.bf16.mxu1 %v16977_v31  ;;  %v16840_v58 = vcombine.low %v4807_v41, %v4811_v16 }
 0x71e   : > { %v4939_v23 = vld [vmem:[%s18840_s1 + $0x1460] sm:$0xff]  ;;  %13845 = vmatpush1.bf16.msra.mxu1 %v16976_v26 }
 0x71f   : > { %v16969_v50 = vcombine.high %v4935_v21, %v4939_v23  ;;  %v4799_v9 = vld [vmem:[%s18840_s1 + $0x1000] sm:$0xff]  ;;  %13805 = vmatprep.subr.bf16.mxu0 %v16841_v13  ;;  %v16968_v24 = vcombine.low %v4935_v21, %v4939_v23 }
 0x720   : > { %v4803_v49 = vld [vmem:[%s18840_s1 + $0x1020] sm:$0xff]  ;;  %13806 = vmatpush1.bf16.msra.mxu0 %v16840_v58 }
 0x721   : > { %v4927_v17 = vld [vmem:[%s18840_s1 + $0x1400] sm:$0xff]  ;;  %v16833_v27 = vcombine.high %v4799_v9, %v4803_v49  ;;  %13846 = vmatprep.subr.bf16.mxu1 %v16969_v50  ;;  %v16832_v4 = vcombine.low %v4799_v9, %v4803_v49 }
 0x722   : > { %v4931_v55 = vld [vmem:[%s18840_s1 + $0x1420] sm:$0xff]  ;;  %13847 = vmatpush1.bf16.msra.mxu1 %v16968_v24 }
 0x723   : > { %v16961_v30 = vcombine.high %v4927_v17, %v4931_v55  ;;  %v4919_v29 = vld [vmem:[%s18840_s1 + $0x13c0] sm:$0xff]  ;;  %13807 = vmatprep.subr.bf16.mxu0 %v16833_v27  ;;  %v16960_v48 = vcombine.low %v4927_v17, %v4931_v55 }
 0x724   : > { %v4923_v32 = vld [vmem:[%s18840_s1 + $0x13e0] sm:$0xff]  ;;  %13808 = vmatpush1.bf16.msra.mxu0 %v16832_v4 }
 0x725   : > { %v5047_v46 = vld [vmem:[%s18840_s1 + $0x17c0] sm:$0xff]  ;;  %v16953_v15 = vcombine.high %v4919_v29, %v4923_v32  ;;  %13848 = vmatprep.subr.bf16.mxu1 %v16961_v30  ;;  %v16952_v20 = vcombine.low %v4919_v29, %v4923_v32 }
 0x726   : > { %v5051_v7 = vld [vmem:[%s18840_s1 + $0x17e0] sm:$0xff]  ;;  %13849 = vmatpush1.bf16.msra.mxu1 %v16960_v48 }
 0x727   : > { %v17081_v11 = vcombine.high %v5047_v46, %v5051_v7  ;;  %v4911_v12 = vld [vmem:[%s18840_s1 + $0x1380] sm:$0xff]  ;;  %13809 = vmatprep.subr.bf16.mxu0 %v16953_v15  ;;  %v17080_v60 = vcombine.low %v5047_v46, %v5051_v7 }
 0x728   : > { %v4915_v39 = vld [vmem:[%s18840_s1 + $0x13a0] sm:$0xff]  ;;  %13810 = vmatpush2.bf16.msra.mxu0 %v16952_v20 }
 0x729   : > { %v5039_v40 = vld [vmem:[%s18840_s1 + $0x1780] sm:$0xff]  ;;  %v16945_v63 = vcombine.high %v4911_v12, %v4915_v39  ;;  %13850 = vmatprep.subr.bf16.mxu1 %v17081_v11  ;;  %v16944_v62 = vcombine.low %v4911_v12, %v4915_v39 }
 0x72a   : > { %v5043_v54 = vld [vmem:[%s18840_s1 + $0x17a0] sm:$0xff]  ;;  %13851 = vmatpush2.bf16.msra.mxu1 %v17080_v60 }
 0x72b   : > { %v17073_v2 = vcombine.high %v5039_v40, %v5043_v54  ;;  %v4903_v35 = vld [vmem:[%s18840_s1 + $0x1340] sm:$0xff]  ;;  %13811 = vmatprep.subr.bf16.mxu0 %v16945_v63  ;;  %v17072_v61 = vcombine.low %v5039_v40, %v5043_v54 }
 0x72c   : > { %v4907_v44 = vld [vmem:[%s18840_s1 + $0x1360] sm:$0xff]  ;;  %13812 = vmatpush2.bf16.msra.mxu0 %v16944_v62 }
 0x72d   : > { %v5031_v25 = vld [vmem:[%s18840_s1 + $0x1740] sm:$0xff]  ;;  %v16937_v0 = vcombine.high %v4903_v35, %v4907_v44  ;;  %13852 = vmatprep.subr.bf16.mxu1 %v17073_v2  ;;  %v16936_v53 = vcombine.low %v4903_v35, %v4907_v44 }
 0x72e   : > { %v5035_v18 = vld [vmem:[%s18840_s1 + $0x1760] sm:$0xff]  ;;  %13853 = vmatpush2.bf16.msra.mxu1 %v17072_v61 }
 0x72f   : > { %v17065_v3 = vcombine.high %v5031_v25, %v5035_v18  ;;  %v4895_v6 = vld [vmem:[%s18840_s1 + $0x1300] sm:$0xff]  ;;  %13813 = vmatprep.subr.bf16.mxu0 %v16937_v0  ;;  %v17064_v34 = vcombine.low %v5031_v25, %v5035_v18  ;;  %v20057_v0 = vcombine.low %v19973_v57, %v19973_v57 }
 0x730   : > { %v4899_v8 = vld [vmem:[%s18840_s1 + $0x1320] sm:$0xff]  ;;  %13814 = vmatpush2.bf16.msra.mxu0 %v16936_v53  ;;  %v20067_v53 = vld [vmem:[#allocation4 + $0x10] sm:$0xff] }
 0x731   : > { %v5023_v51 = vld [vmem:[%s18840_s1 + $0x1700] sm:$0xff]  ;;  %v16929_v36 = vcombine.high %v4895_v6, %v4899_v8  ;;  %13854 = vmatprep.subr.bf16.mxu1 %v17065_v3  ;;  %v16928_v41 = vcombine.low %v4895_v6, %v4899_v8  ;;  %v20061_v8 = vld [vmem:[#allocation4 + $0x30] sm:$0xff] }
 0x732   : > { %v5027_v52 = vld [vmem:[%s18840_s1 + $0x1720] sm:$0xff]  ;;  %13855 = vmatpush2.bf16.msra.mxu1 %v17064_v34 }
 0x733   : > { %v17057_v22 = vcombine.high %v5023_v51, %v5027_v52  ;;  %v4887_v56 = vld [vmem:[%s18840_s1 + $0x12c0] sm:$0xff]  ;;  %13815 = vmatprep.subr.bf16.mxu0 %v16929_v36  ;;  %v17056_v16 = vcombine.low %v5023_v51, %v5027_v52  ;;  %v20065_v51 = vcombine.low %v19979_v47, %v19979_v47 }
 0x734   : > { %v4891_v59 = vld [vmem:[%s18840_s1 + $0x12e0] sm:$0xff]  ;;  %13816 = vmatpush2.bf16.msra.mxu0 %v16928_v41 }
 0x735   : > { %v5015_v19 = vld [vmem:[%s18840_s1 + $0x16c0] sm:$0xff]  ;;  %v16921_v21 = vcombine.high %v4887_v56, %v4891_v59  ;;  %13856 = vmatprep.subr.bf16.mxu1 %v17057_v22  ;;  %v16920_v9 = vcombine.low %v4887_v56, %v4891_v59  ;;  %v20073_v59 = vcombine.high %v20061_v8, %v20061_v8 }
 0x736   : > { %v5019_v31 = vld [vmem:[%s18840_s1 + $0x16e0] sm:$0xff]  ;;  %13857 = vmatpush2.bf16.msra.mxu1 %v17056_v16 }
 0x737   : > { %v17049_v23 = vcombine.high %v5015_v19, %v5019_v31  ;;  %v4879_v45 = vld [vmem:[%s18840_s1 + $0x1280] sm:$0xff]  ;;  %13817 = vmatprep.subr.bf16.mxu0 %v16921_v21  ;;  %v17048_v49 = vcombine.low %v5015_v19, %v5019_v31  ;;  %v20080_v31 = vcombine.high %v20067_v53, %v20067_v53 }
 0x738   : > { %v4883_v26 = vld [vmem:[%s18840_s1 + $0x12a0] sm:$0xff]  ;;  %13818 = vmatpush2.bf16.msra.mxu0 %v16920_v9 }
 0x739   : > { %v5007_v13 = vld [vmem:[%s18840_s1 + $0x1680] sm:$0xff]  ;;  %v16913_v17 = vcombine.high %v4879_v45, %v4883_v26  ;;  %13858 = vmatprep.subr.bf16.mxu1 %v17049_v23  ;;  %v16912_v29 = vcombine.low %v4879_v45, %v4883_v26 }
 0x73a   : > { %v5011_v50 = vld [vmem:[%s18840_s1 + $0x16a0] sm:$0xff]  ;;  %13859 = vmatpush2.bf16.msra.mxu1 %v17048_v49 }
 0x73b   : > { %v17041_v55 = vcombine.high %v5007_v13, %v5011_v50  ;;  %v4871_v58 = vld [vmem:[%s18840_s1 + $0x1240] sm:$0xff]  ;;  %13819 = vmatprep.subr.bf16.mxu0 %v16913_v17  ;;  %v17040_v32 = vcombine.low %v5007_v13, %v5011_v50 }
 0x73c   : > { %v4875_v24 = vld [vmem:[%s18840_s1 + $0x1260] sm:$0xff]  ;;  %13820 = vmatpush2.bf16.msra.mxu0 %v16912_v29 }
 0x73d   : > { %v4999_v27 = vld [vmem:[%s18840_s1 + $0x1640] sm:$0xff]  ;;  %v16905_v46 = vcombine.high %v4871_v58, %v4875_v24  ;;  %13860 = vmatprep.subr.bf16.mxu1 %v17041_v55  ;;  %v16904_v12 = vcombine.low %v4871_v58, %v4875_v24 }
 0x73e   : > { %v5003_v30 = vld [vmem:[%s18840_s1 + $0x1660] sm:$0xff]  ;;  %13861 = vmatpush2.bf16.msra.mxu1 %v17040_v32 }
 0x73f   : > { %v17033_v7 = vcombine.high %v4999_v27, %v5003_v30  ;;  %v4863_v4 = vld [vmem:[%s18840_s1 + $0x1200] sm:$0xff]  ;;  %13821 = vmatprep.subr.bf16.mxu0 %v16905_v46  ;;  %v17032_v39 = vcombine.low %v4999_v27, %v5003_v30 }
 0x740   : > { %v4867_v48 = vld [vmem:[%s18840_s1 + $0x1220] sm:$0xff]  ;;  %13822 = vmatpush2.bf16.msra.mxu0 %v16904_v12 }
 0x741   : > { %v4991_v15 = vld [vmem:[%s18840_s1 + $0x1600] sm:$0xff]  ;;  %v16897_v40 = vcombine.high %v4863_v4, %v4867_v48  ;;  %13862 = vmatprep.subr.bf16.mxu1 %v17033_v7  ;;  %v16896_v35 = vcombine.low %v4863_v4, %v4867_v48 }
 0x742   : > { %v4995_v11 = vld [vmem:[%s18840_s1 + $0x1620] sm:$0xff]  ;;  %13863 = vmatpush2.bf16.msra.mxu1 %v17032_v39 }
 0x743   : > { %v17025_v54 = vcombine.high %v4991_v15, %v4995_v11  ;;  %v5111_v20 = vld [vmem:[%s18840_s1 + $0x19c0] sm:$0xff]  ;;  %13823 = vmatprep.subr.bf16.mxu0 %v16897_v40  ;;  %v17024_v44 = vcombine.low %v4991_v15, %v4995_v11 }
 0x744   : > { %v5115_v60 = vld [vmem:[%s18840_s1 + $0x19e0] sm:$0xff]  ;;  %13824 = vmatpush2.bf16.msra.mxu0 %v16896_v35 }
 0x745   : > { %v5239_v63 = vld [vmem:[%s18840_s1 + $0x1dc0] sm:$0xff]  ;;  %v17145_v25 = vcombine.high %v5111_v20, %v5115_v60  ;;  %13864 = vmatprep.subr.bf16.mxu1 %v17025_v54  ;;  %v17144_v52 = vcombine.low %v5111_v20, %v5115_v60 }
 0x746   : > { %v5243_v2 = vld [vmem:[%s18840_s1 + $0x1de0] sm:$0xff]  ;;  %13865 = vmatpush2.bf16.msra.mxu1 %v17024_v44 }
 0x747   : > { %v17273_v18 = vcombine.high %v5239_v63, %v5243_v2  ;;  %v5103_v62 = vld [vmem:[%s18840_s1 + $0x1980] sm:$0xff]  ;;  %13875 = vmatprep.subr.bf16.mxu0 %v17145_v25  ;;  %v17272_v34 = vcombine.low %v5239_v63, %v5243_v2  ;;  %13826 = vmatmul.mubr.bf16.vlgmr.msra.gmra.mxu0 %v20057_v0 }
 0x748   : > { %v5107_v61 = vld [vmem:[%s18840_s1 + $0x19a0] sm:$0xff]  ;;  %13876 = vmatpush1.bf16.msra.mxu0 %v17144_v52  ;;  %13907 = vmatprep.mubr.bf16.mxu0 %v20073_v59 }
 0x749   : > { %v5231_v3 = vld [vmem:[%s18840_s1 + $0x1d80] sm:$0xff]  ;;  %v17137_v36 = vcombine.high %v5103_v62, %v5107_v61  ;;  %13916 = vmatprep.subr.bf16.mxu1 %v17273_v18  ;;  %13867 = vmatmul.mubr.bf16.vlgmr.msra.gmra.mxu1 %v20065_v51  ;;  %v17136_v41 = vcombine.low %v5103_v62, %v5107_v61 }
 0x74a   : > { %v5235_v6 = vld [vmem:[%s18840_s1 + $0x1da0] sm:$0xff]  ;;  %13917 = vmatpush1.bf16.msra.mxu1 %v17272_v34  ;;  %13948 = vmatprep.mubr.bf16.mxu1 %v20080_v31 }
 0x74b   : > { %v17265_v57 = vcombine.high %v5231_v3, %v5235_v6  ;;  %v5095_v22 = vld [vmem:[%s18840_s1 + $0x1940] sm:$0xff]  ;;  %13877 = vmatprep.subr.bf16.mxu0 %v17137_v36  ;;  %v17264_v16 = vcombine.low %v5231_v3, %v5235_v6 }
 0x74c   : > { %v5099_v56 = vld [vmem:[%s18840_s1 + $0x1960] sm:$0xff]  ;;  %13878 = vmatpush1.bf16.msra.mxu0 %v17136_v41 }
 0x74d   : > { %v5223_v47 = vld [vmem:[%s18840_s1 + $0x1d40] sm:$0xff]  ;;  %v17129_v21 = vcombine.high %v5095_v22, %v5099_v56  ;;  %13918 = vmatprep.subr.bf16.mxu1 %v17265_v57  ;;  %v17128_v9 = vcombine.low %v5095_v22, %v5099_v56 }
 0x74e   : > { %v5227_v19 = vld [vmem:[%s18840_s1 + $0x1d60] sm:$0xff]  ;;  %13919 = vmatpush1.bf16.msra.mxu1 %v17264_v16 }
 0x74f   : > { %v17257_v23 = vcombine.high %v5223_v47, %v5227_v19  ;;  %v5087_v45 = vld [vmem:[%s18840_s1 + $0x1900] sm:$0xff]  ;;  %13879 = vmatprep.subr.bf16.mxu0 %v17129_v21  ;;  %v17256_v49 = vcombine.low %v5223_v47, %v5227_v19 }
 0x750   : > { %v5091_v26 = vld [vmem:[%s18840_s1 + $0x1920] sm:$0xff]  ;;  %13880 = vmatpush1.bf16.msra.mxu0 %v17128_v9 }
 0x751   : > { %v5215_v13 = vld [vmem:[%s18840_s1 + $0x1d00] sm:$0xff]  ;;  %v17121_v17 = vcombine.high %v5087_v45, %v5091_v26  ;;  %13920 = vmatprep.subr.bf16.mxu1 %v17257_v23  ;;  %v17120_v29 = vcombine.low %v5087_v45, %v5091_v26 }
 0x752   : > { %v5219_v50 = vld [vmem:[%s18840_s1 + $0x1d20] sm:$0xff]  ;;  %13921 = vmatpush1.bf16.msra.mxu1 %v17256_v49 }
 0x753   : > { %v17249_v55 = vcombine.high %v5215_v13, %v5219_v50  ;;  %v5079_v58 = vld [vmem:[%s18840_s1 + $0x18c0] sm:$0xff]  ;;  %13881 = vmatprep.subr.bf16.mxu0 %v17121_v17  ;;  %v17248_v32 = vcombine.low %v5215_v13, %v5219_v50 }
 0x754   : > { %v5083_v24 = vld [vmem:[%s18840_s1 + $0x18e0] sm:$0xff]  ;;  %13882 = vmatpush1.bf16.msra.mxu0 %v17120_v29 }
 0x755   : > { %v5207_v27 = vld [vmem:[%s18840_s1 + $0x1cc0] sm:$0xff]  ;;  %v17113_v46 = vcombine.high %v5079_v58, %v5083_v24  ;;  %13922 = vmatprep.subr.bf16.mxu1 %v17249_v55  ;;  %v17112_v12 = vcombine.low %v5079_v58, %v5083_v24 }
 0x756   : > { %v5211_v30 = vld [vmem:[%s18840_s1 + $0x1ce0] sm:$0xff]  ;;  %13923 = vmatpush1.bf16.msra.mxu1 %v17248_v32 }
 0x757   : > { %v17241_v7 = vcombine.high %v5207_v27, %v5211_v30  ;;  %v5071_v4 = vld [vmem:[%s18840_s1 + $0x1880] sm:$0xff]  ;;  %13883 = vmatprep.subr.bf16.mxu0 %v17113_v46  ;;  %v17240_v39 = vcombine.low %v5207_v27, %v5211_v30 }
 0x758   : > { %v5075_v48 = vld [vmem:[%s18840_s1 + $0x18a0] sm:$0xff]  ;;  %13884 = vmatpush1.bf16.msra.mxu0 %v17112_v12 }
 0x759   : > { %v5199_v15 = vld [vmem:[%s18840_s1 + $0x1c80] sm:$0xff]  ;;  %v17105_v40 = vcombine.high %v5071_v4, %v5075_v48  ;;  %13924 = vmatprep.subr.bf16.mxu1 %v17241_v7  ;;  %v17104_v35 = vcombine.low %v5071_v4, %v5075_v48 }
 0x75a   : > { %v5203_v11 = vld [vmem:[%s18840_s1 + $0x1ca0] sm:$0xff]  ;;  %13925 = vmatpush1.bf16.msra.mxu1 %v17240_v39 }
 0x75b   : > { %v17233_v54 = vcombine.high %v5199_v15, %v5203_v11  ;;  %v5063_v20 = vld [vmem:[%s18840_s1 + $0x1840] sm:$0xff]  ;;  %13885 = vmatprep.subr.bf16.mxu0 %v17105_v40  ;;  %v17232_v44 = vcombine.low %v5199_v15, %v5203_v11 }
 0x75c   : > { %v5067_v60 = vld [vmem:[%s18840_s1 + $0x1860] sm:$0xff]  ;;  %13886 = vmatpush1.bf16.msra.mxu0 %v17104_v35 }
 0x75d   : > { %v5191_v63 = vld [vmem:[%s18840_s1 + $0x1c40] sm:$0xff]  ;;  %v17097_v25 = vcombine.high %v5063_v20, %v5067_v60  ;;  %13926 = vmatprep.subr.bf16.mxu1 %v17233_v54  ;;  %v17096_v52 = vcombine.low %v5063_v20, %v5067_v60 }
 0x75e   : > { %v5195_v2 = vld [vmem:[%s18840_s1 + $0x1c60] sm:$0xff]  ;;  %13927 = vmatpush1.bf16.msra.mxu1 %v17232_v44 }
 0x75f   : > { %v17225_v18 = vcombine.high %v5191_v63, %v5195_v2  ;;  %v5055_v62 = vld [vmem:[%s18840_s1 + $0x1800] sm:$0xff]  ;;  %13887 = vmatprep.subr.bf16.mxu0 %v17097_v25  ;;  %v17224_v34 = vcombine.low %v5191_v63, %v5195_v2 }
 0x760   : > { %v5059_v61 = vld [vmem:[%s18840_s1 + $0x1820] sm:$0xff]  ;;  %13888 = vmatpush1.bf16.msra.mxu0 %v17096_v52 }
 0x761   : > { %v5183_v3 = vld [vmem:[%s18840_s1 + $0x1c00] sm:$0xff]  ;;  %v17089_v36 = vcombine.high %v5055_v62, %v5059_v61  ;;  %13928 = vmatprep.subr.bf16.mxu1 %v17225_v18  ;;  %v17088_v41 = vcombine.low %v5055_v62, %v5059_v61 }
 0x762   : > { %v5187_v6 = vld [vmem:[%s18840_s1 + $0x1c20] sm:$0xff]  ;;  %13929 = vmatpush1.bf16.msra.mxu1 %v17224_v34 }
 0x763   : > { %v17217_v57 = vcombine.high %v5183_v3, %v5187_v6  ;;  %v5175_v22 = vld [vmem:[%s18840_s1 + $0x1bc0] sm:$0xff]  ;;  %13889 = vmatprep.subr.bf16.mxu0 %v17089_v36  ;;  %v17216_v16 = vcombine.low %v5183_v3, %v5187_v6 }
 0x764   : > { %v5179_v56 = vld [vmem:[%s18840_s1 + $0x1be0] sm:$0xff]  ;;  %13890 = vmatpush1.bf16.msra.mxu0 %v17088_v41 }
 0x765   : > { %v5303_v47 = vld [vmem:[%s18840_s1 + $0x1fc0] sm:$0xff]  ;;  %v17209_v21 = vcombine.high %v5175_v22, %v5179_v56  ;;  %13930 = vmatprep.subr.bf16.mxu1 %v17217_v57  ;;  %v17208_v9 = vcombine.low %v5175_v22, %v5179_v56 }
 0x766   : > { %v5307_v19 = vld [vmem:[%s18840_s1 + $0x1fe0] sm:$0xff]  ;;  %13931 = vmatpush1.bf16.msra.mxu1 %v17216_v16  ;;  %v5825_v16 = vlaneseq }
 0x767   : > { %v17337_v23 = vcombine.high %v5303_v47, %v5307_v19  ;;  %v5167_v45 = vld [vmem:[%s18840_s1 + $0x1b80] sm:$0xff]  ;;  %13891 = vmatprep.subr.bf16.mxu0 %v17209_v21  ;;  %v17336_v49 = vcombine.low %v5303_v47, %v5307_v19 }
 0x768   : > { %v5171_v26 = vld [vmem:[%s18840_s1 + $0x1ba0] sm:$0xff]  ;;  %13892 = vmatpush2.bf16.msra.mxu0 %v17208_v9 }
 0x769   : > { %v5295_v13 = vld [vmem:[%s18840_s1 + $0x1f80] sm:$0xff]  ;;  %v17201_v17 = vcombine.high %v5167_v45, %v5171_v26  ;;  %13932 = vmatprep.subr.bf16.mxu1 %v17337_v23  ;;  %v17200_v29 = vcombine.low %v5167_v45, %v5171_v26 }
 0x76a   : > { %v5299_v50 = vld [vmem:[%s18840_s1 + $0x1fa0] sm:$0xff]  ;;  %13933 = vmatpush2.bf16.msra.mxu1 %v17336_v49 }
 0x76b   : > { %v17329_v55 = vcombine.high %v5295_v13, %v5299_v50  ;;  %v5159_v58 = vld [vmem:[%s18840_s1 + $0x1b40] sm:$0xff]  ;;  %13893 = vmatprep.subr.bf16.mxu0 %v17201_v17  ;;  %v17328_v32 = vcombine.low %v5295_v13, %v5299_v50  ;;  %v20137_v17 = vshrl.u32 %v5825_v16, 7 }
 0x76c   : > { %v5163_v24 = vld [vmem:[%s18840_s1 + $0x1b60] sm:$0xff]  ;;  %13894 = vmatpush2.bf16.msra.mxu0 %v17200_v29 }
 0x76d   : > { %v5287_v27 = vld [vmem:[%s18840_s1 + $0x1f40] sm:$0xff]  ;;  %v17193_v46 = vcombine.high %v5159_v58, %v5163_v24  ;;  %13934 = vmatprep.subr.bf16.mxu1 %v17329_v55  ;;  %v17192_v12 = vcombine.low %v5159_v58, %v5163_v24 }
 0x76e   : > { %v5291_v30 = vld [vmem:[%s18840_s1 + $0x1f60] sm:$0xff]  ;;  %13935 = vmatpush2.bf16.msra.mxu1 %v17328_v32 }
 0x76f   : > { %v17321_v7 = vcombine.high %v5287_v27, %v5291_v30  ;;  %v5151_v4 = vld [vmem:[%s18840_s1 + $0x1b00] sm:$0xff]  ;;  %13895 = vmatprep.subr.bf16.mxu0 %v17193_v46  ;;  %v17320_v39 = vcombine.low %v5287_v27, %v5291_v30 }
 0x770   : > { %v5155_v48 = vld [vmem:[%s18840_s1 + $0x1b20] sm:$0xff]  ;;  %13896 = vmatpush2.bf16.msra.mxu0 %v17192_v12  ;;  %v5831_v12 = vsub.s32 1, %v20137_v17 }
 0x771   : > { %v5279_v15 = vld [vmem:[%s18840_s1 + $0x1f00] sm:$0xff]  ;;  %v17185_v40 = vcombine.high %v5151_v4, %v5155_v48  ;;  %13936 = vmatprep.subr.bf16.mxu1 %v17321_v7  ;;  %v17184_v35 = vcombine.low %v5151_v4, %v5155_v48  ;;  %v5827_v7 = vsub.s32 0, %v20137_v17 }
 0x772   : > { %v5283_v11 = vld [vmem:[%s18840_s1 + $0x1f20] sm:$0xff]  ;;  %13937 = vmatpush2.bf16.msra.mxu1 %v17320_v39 }
 0x773   : > { %v17313_v54 = vcombine.high %v5279_v15, %v5283_v11  ;;  %v5143_v20 = vld [vmem:[%s18840_s1 + $0x1ac0] sm:$0xff]  ;;  %13897 = vmatprep.subr.bf16.mxu0 %v17185_v40  ;;  %v17312_v44 = vcombine.low %v5279_v15, %v5283_v11 }
 0x774   : > { %v5147_v60 = vld [vmem:[%s18840_s1 + $0x1ae0] sm:$0xff]  ;;  %13898 = vmatpush2.bf16.msra.mxu0 %v17184_v35  ;;  %v20160_v35 = vcombine.low %v20067_v53, %v20067_v53 }
 0x775   : > { %v5271_v63 = vld [vmem:[%s18840_s1 + $0x1ec0] sm:$0xff]  ;;  %v17177_v25 = vcombine.high %v5143_v20, %v5147_v60  ;;  %13938 = vmatprep.subr.bf16.mxu1 %v17313_v54  ;;  %v17176_v52 = vcombine.low %v5143_v20, %v5147_v60  ;;  %v20150_v54 = vcombine.low %v20061_v8, %v20061_v8 }
 0x776   : > { %v5275_v2 = vld [vmem:[%s18840_s1 + $0x1ee0] sm:$0xff]  ;;  %13939 = vmatpush2.bf16.msra.mxu1 %v17312_v44 }
 0x777   : > { %v17305_v18 = vcombine.high %v5271_v63, %v5275_v2  ;;  %v5135_v62 = vld [vmem:[%s18840_s1 + $0x1a80] sm:$0xff]  ;;  %13899 = vmatprep.subr.bf16.mxu0 %v17177_v25  ;;  %v17304_v34 = vcombine.low %v5271_v63, %v5275_v2  ;;  %v20162_v25 = vld [vmem:[#allocation4 + $0x28] sm:$0xff] }
 0x778   : > { %v5139_v61 = vld [vmem:[%s18840_s1 + $0x1aa0] sm:$0xff]  ;;  %13900 = vmatpush2.bf16.msra.mxu0 %v17176_v52 }
 0x779   : > { %v5263_v3 = vld [vmem:[%s18840_s1 + $0x1e80] sm:$0xff]  ;;  %v17169_v36 = vcombine.high %v5135_v62, %v5139_v61  ;;  %13940 = vmatprep.subr.bf16.mxu1 %v17305_v18  ;;  %v17168_v41 = vcombine.low %v5135_v62, %v5139_v61 }
 0x77a   : > { %v5267_v6 = vld [vmem:[%s18840_s1 + $0x1ea0] sm:$0xff]  ;;  %13941 = vmatpush2.bf16.msra.mxu1 %v17304_v34 }
 0x77b   : > { %v17297_v57 = vcombine.high %v5263_v3, %v5267_v6  ;;  %v5127_v22 = vld [vmem:[%s18840_s1 + $0x1a40] sm:$0xff]  ;;  %13901 = vmatprep.subr.bf16.mxu0 %v17169_v36  ;;  %v17296_v21 = vcombine.low %v5263_v3, %v5267_v6 }
 0x77c   : > { %v5131_v56 = vld [vmem:[%s18840_s1 + $0x1a60] sm:$0xff]  ;;  %13902 = vmatpush2.bf16.msra.mxu0 %v17168_v41 }
 0x77d   : > { %v5255_v47 = vld [vmem:[%s18840_s1 + $0x1e40] sm:$0xff]  ;;  %v17161_v23 = vcombine.high %v5127_v22, %v5131_v56  ;;  %13942 = vmatprep.subr.bf16.mxu1 %v17297_v57  ;;  %v17160_v49 = vcombine.low %v5127_v22, %v5131_v56  ;;  %v20177_v57 = vcombine.high %v20162_v25, %v20162_v25 }
 0x77e   : > { %v5259_v19 = vld [vmem:[%s18840_s1 + $0x1e60] sm:$0xff]  ;;  %13943 = vmatpush2.bf16.msra.mxu1 %v17296_v21 }
 0x77f   : > { %v17289_v45 = vcombine.high %v5255_v47, %v5259_v19  ;;  %v5119_v26 = vld [vmem:[%s18840_s1 + $0x1a00] sm:$0xff]  ;;  %13903 = vmatprep.subr.bf16.mxu0 %v17161_v23  ;;  %v17288_v55 = vcombine.low %v5255_v47, %v5259_v19 }
 0x780   : > { %v5123_v13 = vld [vmem:[%s18840_s1 + $0x1a20] sm:$0xff]  ;;  %13904 = vmatpush2.bf16.msra.mxu0 %v17160_v49 }
 0x781   : > { %v5247_v50 = vld [vmem:[%s18840_s1 + $0x1e00] sm:$0xff]  ;;  %v17153_v58 = vcombine.high %v5119_v26, %v5123_v13  ;;  %13944 = vmatprep.subr.bf16.mxu1 %v17289_v45  ;;  %v17152_v46 = vcombine.low %v5119_v26, %v5123_v13 }
 0x782   : > { %v5251_v9 = vld [vmem:[%s18840_s1 + $0x1e20] sm:$0xff]  ;;  %13945 = vmatpush2.bf16.msra.mxu1 %v17288_v55 }
 0x783   : > { %v17281_v24 = vcombine.high %v5247_v50, %v5251_v9  ;;  %v5367_v27 = vld [vmem:[%s18840_s1 + $0x21c0] sm:$0xff]  ;;  %13905 = vmatprep.subr.bf16.mxu0 %v17153_v58  ;;  %v17280_v4 = vcombine.low %v5247_v50, %v5251_v9 }
 0x784   : > { %v5371_v30 = vld [vmem:[%s18840_s1 + $0x21e0] sm:$0xff]  ;;  %13906 = vmatpush2.bf16.msra.mxu0 %v17152_v46 }
 0x785   : > { %v5495_v29 = vld [vmem:[%s18840_s1 + $0x25c0] sm:$0xff]  ;;  %v17401_v15 = vcombine.high %v5367_v27, %v5371_v30  ;;  %13946 = vmatprep.subr.bf16.mxu1 %v17281_v24  ;;  %v17400_v44 = vcombine.low %v5367_v27, %v5371_v30  ;;  %v13663_v53 = vpop.f32.mrf.mxu0 }
 0x786   : > { %v5499_v32 = vld [vmem:[%s18840_s1 + $0x25e0] sm:$0xff]  ;;  %13947 = vmatpush2.bf16.msra.mxu1 %v17280_v4 }
 0x787   : > { %v5823_v48 = vld [vmem:[%s18846_s24] sm:$0xff]  ;;  %v17529_v11 = vcombine.high %v5495_v29, %v5499_v32  ;;  %13957 = vmatprep.subr.bf16.mxu0 %v17401_v15  ;;  %v17528_v8 = vcombine.low %v5495_v29, %v5499_v32  ;;  %13908 = vmatmul.mubr.bf16.vlgmr.msra.gmra.mxu0 %v20150_v54  ;;  %v13704_v56 = vpop.f32.mrf.mxu1  ;;  %v13665_v19 = vpop.f32.mrf.mxu0 }
 0x788   : > { %v5359_v39 = vld [vmem:[%s18840_s1 + $0x2180] sm:$0xff]  ;;  %v5828_v2 = vrot.slane %v5823_v48, %v5827_v7  ;;  %v5832_v62 = vrot.slane %v5823_v48, %v5831_v12  ;;  %13958 = vmatpush1.bf16.msra.mxu0 %v17400_v44 }
 0x789   : > { %v5363_v40 = vld [vmem:[%s18840_s1 + $0x21a0] sm:$0xff]  ;;  %13998 = vmatprep.subr.bf16.mxu1 %v17529_v11  ;;  %13949 = vmatmul.mubr.bf16.vlgmr.msra.gmra.mxu1 %v20160_v35  ;;  %v13706_v45 = vpop.f32.mrf.mxu1  ;;  %v13667_v9 = vpop.f32.mrf.mxu0 }
 0x78a   : > { %v5487_v20 = vld [vmem:[%s18840_s1 + $0x2580] sm:$0xff]  ;;  %v17393_v18 = vcombine.high %v5359_v39, %v5363_v40  ;;  %v13664_v22 = vadd.f32 %v13663_v53, %v5828_v2  ;;  %v17392_v47 = vcombine.low %v5359_v39, %v5363_v40  ;;  %13999 = vmatpush1.bf16.msra.mxu1 %v17528_v8  ;;  %v13666_v23 = vadd.f32 %v13665_v19, %v5832_v62 }
 0x78b   : > { %v5491_v60 = vld [vmem:[%s18840_s1 + $0x25a0] sm:$0xff]  ;;  %14030 = vmatprep.mubr.bf16.mxu1 %v20177_v57  ;;  %v13708_v24 = vpop.f32.mrf.mxu1  ;;  %v13668_v30 = vpop.f32.mrf.mxu0 }
 0x78c   : > { %v20154_v63 = vld [vmem:[#allocation4] sm:$0xff]  ;;  %v17521_v61 = vcombine.high %v5487_v20, %v5491_v60  ;;  %13959 = vmatprep.subr.bf16.mxu0 %v17393_v18  ;;  %v17520_v41 = vcombine.low %v5487_v20, %v5491_v60  ;;  %v20180_v21 = vadd.f32 %v13704_v56, %v13664_v22  ;;  %v20188_v58 = vadd.f32 %v13706_v45, %v13666_v23 }
 0x78d   : > { %v5351_v3 = vld [vmem:[%s18840_s1 + $0x2140] sm:$0xff]  ;;  %v20170_v52 = vcombine.high %v20154_v63, %v20154_v63  ;;  %13960 = vmatpush1.bf16.msra.mxu0 %v17392_v47  ;;  %v13709_v46 = vpop.f32.mrf.mxu1 }
 0x78e   : > { %v5355_v6 = vld [vmem:[%s18840_s1 + $0x2160] sm:$0xff]  ;;  %14000 = vmatprep.subr.bf16.mxu1 %v17521_v61 }
 0x78f   : > { %v5479_v34 = vld [vmem:[%s18840_s1 + $0x2540] sm:$0xff]  ;;  %v17385_v16 = vcombine.high %v5351_v3, %v5355_v6  ;;  %13989 = vmatprep.mubr.bf16.mxu0 %v20170_v52  ;;  %v17384_v27 = vcombine.low %v5351_v3, %v5355_v6  ;;  %14001 = vmatpush1.bf16.msra.mxu1 %v17520_v41 }
 0x790   : > { %v5483_v36 = vld [vmem:[%s18840_s1 + $0x2560] sm:$0xff] }
 0x791   : > { %v17513_v26 = vcombine.high %v5479_v34, %v5483_v36  ;;  %v5343_v13 = vld [vmem:[%s18840_s1 + $0x2100] sm:$0xff]  ;;  %13961 = vmatprep.subr.bf16.mxu0 %v17385_v16  ;;  %v17512_v29 = vcombine.low %v5479_v34, %v5483_v36 }
 0x792   : > { %v5347_v50 = vld [vmem:[%s18840_s1 + $0x2120] sm:$0xff]  ;;  %13962 = vmatpush1.bf16.msra.mxu0 %v17384_v27 }
 0x793   : > { %v5471_v49 = vld [vmem:[%s18840_s1 + $0x2500] sm:$0xff]  ;;  %v17377_v32 = vcombine.high %v5343_v13, %v5347_v50  ;;  %14002 = vmatprep.subr.bf16.mxu1 %v17513_v26  ;;  %v17376_v40 = vcombine.low %v5343_v13, %v5347_v50 }
 0x794   : > { %v5475_v55 = vld [vmem:[%s18840_s1 + $0x2520] sm:$0xff]  ;;  %14003 = vmatpush1.bf16.msra.mxu1 %v17512_v29 }
 0x795   : > { %v17505_v4 = vcombine.high %v5471_v49, %v5475_v55  ;;  %v5335_v48 = vld [vmem:[%s18840_s1 + $0x20c0] sm:$0xff]  ;;  %13963 = vmatprep.subr.bf16.mxu0 %v17377_v32  ;;  %v17504_v20 = vcombine.low %v5471_v49, %v5475_v55 }
 0x796   : > { %v5339_v15 = vld [vmem:[%s18840_s1 + $0x20e0] sm:$0xff]  ;;  %13964 = vmatpush1.bf16.msra.mxu0 %v17376_v40 }
 0x797   : > { %v5463_v11 = vld [vmem:[%s18840_s1 + $0x24c0] sm:$0xff]  ;;  %v17369_v60 = vcombine.high %v5335_v48, %v5339_v15  ;;  %14004 = vmatprep.subr.bf16.mxu1 %v17505_v4  ;;  %v17368_v61 = vcombine.low %v5335_v48, %v5339_v15 }
 0x798   : > { %v5467_v39 = vld [vmem:[%s18840_s1 + $0x24e0] sm:$0xff]  ;;  %14005 = vmatpush1.bf16.msra.mxu1 %v17504_v20 }
 0x799   : > { %v17497_v2 = vcombine.high %v5463_v11, %v5467_v39  ;;  %v5327_v44 = vld [vmem:[%s18840_s1 + $0x2080] sm:$0xff]  ;;  %13965 = vmatprep.subr.bf16.mxu0 %v17369_v60  ;;  %v17496_v3 = vcombine.low %v5463_v11, %v5467_v39 }
 0x79a   : > { %v5331_v8 = vld [vmem:[%s18840_s1 + $0x20a0] sm:$0xff]  ;;  %13966 = vmatpush1.bf16.msra.mxu0 %v17368_v61 }
 0x79b   : > { %v5455_v18 = vld [vmem:[%s18840_s1 + $0x2480] sm:$0xff]  ;;  %v17361_v6 = vcombine.high %v5327_v44, %v5331_v8  ;;  %14006 = vmatprep.subr.bf16.mxu1 %v17497_v2  ;;  %v17360_v47 = vcombine.low %v5327_v44, %v5331_v8 }
 0x79c   : > { %v5459_v62 = vld [vmem:[%s18840_s1 + $0x24a0] sm:$0xff]  ;;  %14007 = vmatpush1.bf16.msra.mxu1 %v17496_v3 }
 0x79d   : > { %v17489_v53 = vcombine.high %v5455_v18, %v5459_v62  ;;  %v5319_v34 = vld [vmem:[%s18840_s1 + $0x2040] sm:$0xff]  ;;  %13967 = vmatprep.subr.bf16.mxu0 %v17361_v6  ;;  %v17488_v19 = vcombine.low %v5455_v18, %v5459_v62 }
 0x79e   : > { %v5323_v36 = vld [vmem:[%s18840_s1 + $0x2060] sm:$0xff]  ;;  %13968 = vmatpush1.bf16.msra.mxu0 %v17360_v47 }
 0x79f   : > { %v5447_v22 = vld [vmem:[%s18840_s1 + $0x2440] sm:$0xff]  ;;  %v17353_v41 = vcombine.high %v5319_v34, %v5323_v36  ;;  %14008 = vmatprep.subr.bf16.mxu1 %v17489_v53  ;;  %v17352_v50 = vcombine.low %v5319_v34, %v5323_v36 }
 0x7a0   : > { %v5451_v56 = vld [vmem:[%s18840_s1 + $0x2460] sm:$0xff]  ;;  %14009 = vmatpush1.bf16.msra.mxu1 %v17488_v19 }
 0x7a1   : > { %v17481_v16 = vcombine.high %v5447_v22, %v5451_v56  ;;  %v5311_v23 = vld [vmem:[%s18840_s1 + $0x2000] sm:$0xff]  ;;  %13969 = vmatprep.subr.bf16.mxu0 %v17353_v41  ;;  %v17480_v9 = vcombine.low %v5447_v22, %v5451_v56 }
 0x7a2   : > { %v5315_v45 = vld [vmem:[%s18840_s1 + $0x2020] sm:$0xff]  ;;  %13970 = vmatpush1.bf16.msra.mxu0 %v17352_v50 }
 0x7a3   : > { %v5439_v26 = vld [vmem:[%s18840_s1 + $0x2400] sm:$0xff]  ;;  %v17345_v49 = vcombine.high %v5311_v23, %v5315_v45  ;;  %14010 = vmatprep.subr.bf16.mxu1 %v17481_v16  ;;  %v17344_v32 = vcombine.low %v5311_v23, %v5315_v45 }
 0x7a4   : > { %v5443_v13 = vld [vmem:[%s18840_s1 + $0x2420] sm:$0xff]  ;;  %14011 = vmatpush1.bf16.msra.mxu1 %v17480_v9 }
 0x7a5   : > { %v17473_v55 = vcombine.high %v5439_v26, %v5443_v13  ;;  %v5431_v24 = vld [vmem:[%s18840_s1 + $0x23c0] sm:$0xff]  ;;  %13971 = vmatprep.subr.bf16.mxu0 %v17345_v49  ;;  %v17472_v46 = vcombine.low %v5439_v26, %v5443_v13 }
 0x7a6   : > { %v5435_v27 = vld [vmem:[%s18840_s1 + $0x23e0] sm:$0xff]  ;;  %13972 = vmatpush1.bf16.msra.mxu0 %v17344_v32 }
 0x7a7   : > { %v5559_v30 = vld [vmem:[%s18840_s1 + $0x27c0] sm:$0xff]  ;;  %v17465_v4 = vcombine.high %v5431_v24, %v5435_v27  ;;  %14012 = vmatprep.subr.bf16.mxu1 %v17473_v55  ;;  %v17464_v20 = vcombine.low %v5431_v24, %v5435_v27 }
 0x7a8   : > { %v5563_v29 = vld [vmem:[%s18840_s1 + $0x27e0] sm:$0xff]  ;;  %14013 = vmatpush1.bf16.msra.mxu1 %v17472_v46 }
 0x7a9   : > { %v17593_v48 = vcombine.high %v5559_v30, %v5563_v29  ;;  %v5423_v15 = vld [vmem:[%s18840_s1 + $0x2380] sm:$0xff]  ;;  %13973 = vmatprep.subr.bf16.mxu0 %v17465_v4  ;;  %v17592_v60 = vcombine.low %v5559_v30, %v5563_v29 }
 0x7aa   : > { %v5427_v11 = vld [vmem:[%s18840_s1 + $0x23a0] sm:$0xff]  ;;  %13974 = vmatpush2.bf16.msra.mxu0 %v17464_v20 }
 0x7ab   : > { %v5551_v39 = vld [vmem:[%s18840_s1 + $0x2780] sm:$0xff]  ;;  %v17457_v2 = vcombine.high %v5423_v15, %v5427_v11  ;;  %14014 = vmatprep.subr.bf16.mxu1 %v17593_v48  ;;  %v17456_v3 = vcombine.low %v5423_v15, %v5427_v11 }
 0x7ac   : > { %v5555_v40 = vld [vmem:[%s18840_s1 + $0x27a0] sm:$0xff]  ;;  %14015 = vmatpush2.bf16.msra.mxu1 %v17592_v60 }
 0x7ad   : > { %v17585_v44 = vcombine.high %v5551_v39, %v5555_v40  ;;  %v5415_v8 = vld [vmem:[%s18840_s1 + $0x2340] sm:$0xff]  ;;  %13975 = vmatprep.subr.bf16.mxu0 %v17457_v2  ;;  %v17584_v6 = vcombine.low %v5551_v39, %v5555_v40 }
 0x7ae   : > { %v5419_v18 = vld [vmem:[%s18840_s1 + $0x2360] sm:$0xff]  ;;  %13976 = vmatpush2.bf16.msra.mxu0 %v17456_v3 }
 0x7af   : > { %v5543_v62 = vld [vmem:[%s18840_s1 + $0x2740] sm:$0xff]  ;;  %v17449_v53 = vcombine.high %v5415_v8, %v5419_v18  ;;  %14016 = vmatprep.subr.bf16.mxu1 %v17585_v44  ;;  %v17448_v19 = vcombine.low %v5415_v8, %v5419_v18 }
 0x7b0   : > { %v5547_v61 = vld [vmem:[%s18840_s1 + $0x2760] sm:$0xff]  ;;  %14017 = vmatpush2.bf16.msra.mxu1 %v17584_v6 }
 0x7b1   : > { %v17577_v34 = vcombine.high %v5543_v62, %v5547_v61  ;;  %v5407_v36 = vld [vmem:[%s18840_s1 + $0x2300] sm:$0xff]  ;;  %13977 = vmatprep.subr.bf16.mxu0 %v17449_v53  ;;  %v17576_v41 = vcombine.low %v5543_v62, %v5547_v61 }
 0x7b2   : > { %v5411_v22 = vld [vmem:[%s18840_s1 + $0x2320] sm:$0xff]  ;;  %13978 = vmatpush2.bf16.msra.mxu0 %v17448_v19 }
 0x7b3   : > { %v5535_v56 = vld [vmem:[%s18840_s1 + $0x2700] sm:$0xff]  ;;  %v17441_v16 = vcombine.high %v5407_v36, %v5411_v22  ;;  %14018 = vmatprep.subr.bf16.mxu1 %v17577_v34  ;;  %v17440_v9 = vcombine.low %v5407_v36, %v5411_v22 }
 0x7b4   : > { %v5539_v47 = vld [vmem:[%s18840_s1 + $0x2720] sm:$0xff]  ;;  %14019 = vmatpush2.bf16.msra.mxu1 %v17576_v41 }
 0x7b5   : > { %v17569_v23 = vcombine.high %v5535_v56, %v5539_v47  ;;  %v5399_v45 = vld [vmem:[%s18840_s1 + $0x22c0] sm:$0xff]  ;;  %13979 = vmatprep.subr.bf16.mxu0 %v17441_v16  ;;  %v17568_v49 = vcombine.low %v5535_v56, %v5539_v47 }
 0x7b6   : > { %v5403_v26 = vld [vmem:[%s18840_s1 + $0x22e0] sm:$0xff]  ;;  %13980 = vmatpush2.bf16.msra.mxu0 %v17440_v9 }
 0x7b7   : > { %v5527_v13 = vld [vmem:[%s18840_s1 + $0x26c0] sm:$0xff]  ;;  %v17433_v55 = vcombine.high %v5399_v45, %v5403_v26  ;;  %14020 = vmatprep.subr.bf16.mxu1 %v17569_v23  ;;  %v17432_v46 = vcombine.low %v5399_v45, %v5403_v26 }
 0x7b8   : > { %v5531_v50 = vld [vmem:[%s18840_s1 + $0x26e0] sm:$0xff]  ;;  %14021 = vmatpush2.bf16.msra.mxu1 %v17568_v49 }
 0x7b9   : > { %v17561_v24 = vcombine.high %v5527_v13, %v5531_v50  ;;  %v5391_v27 = vld [vmem:[%s18840_s1 + $0x2280] sm:$0xff]  ;;  %13981 = vmatprep.subr.bf16.mxu0 %v17433_v55  ;;  %v17560_v4 = vcombine.low %v5527_v13, %v5531_v50  ;;  %v20246_v50 = vcombine.low %v20154_v63, %v20154_v63  ;;  %v20250_v55 = vld [vmem:[#allocation4 + $0x50] sm:$0xff] }
 0x7ba   : > { %v5395_v30 = vld [vmem:[%s18840_s1 + $0x22a0] sm:$0xff]  ;;  %13982 = vmatpush2.bf16.msra.mxu0 %v17432_v46 }
 0x7bb   : > { %v5519_v29 = vld [vmem:[%s18840_s1 + $0x2680] sm:$0xff]  ;;  %v17425_v48 = vcombine.high %v5391_v27, %v5395_v30  ;;  %14022 = vmatprep.subr.bf16.mxu1 %v17561_v24  ;;  %v17424_v60 = vcombine.low %v5391_v27, %v5395_v30  ;;  %v20254_v24 = vcombine.low %v20162_v25, %v20162_v25 }
 0x7bc   : > { %v5523_v32 = vld [vmem:[%s18840_s1 + $0x26a0] sm:$0xff]  ;;  %14023 = vmatpush2.bf16.msra.mxu1 %v17560_v4 }
 0x7bd   : > { %v17553_v15 = vcombine.high %v5519_v29, %v5523_v32  ;;  %v5383_v11 = vld [vmem:[%s18840_s1 + $0x2240] sm:$0xff]  ;;  %13983 = vmatprep.subr.bf16.mxu0 %v17425_v48  ;;  %v17552_v2 = vcombine.low %v5519_v29, %v5523_v32  ;;  %v20262_v48 = vcombine.high %v20250_v55, %v20250_v55 }
 0x7be   : > { %v5387_v39 = vld [vmem:[%s18840_s1 + $0x2260] sm:$0xff]  ;;  %13984 = vmatpush2.bf16.msra.mxu0 %v17424_v60 }
 0x7bf   : > { %v5511_v40 = vld [vmem:[%s18840_s1 + $0x2640] sm:$0xff]  ;;  %v17417_v44 = vcombine.high %v5383_v11, %v5387_v39  ;;  %14024 = vmatprep.subr.bf16.mxu1 %v17553_v15  ;;  %v17416_v6 = vcombine.low %v5383_v11, %v5387_v39 }
 0x7c0   : > { %v5515_v20 = vld [vmem:[%s18840_s1 + $0x2660] sm:$0xff]  ;;  %14025 = vmatpush2.bf16.msra.mxu1 %v17552_v2 }
 0x7c1   : > { %v17545_v8 = vcombine.high %v5511_v40, %v5515_v20  ;;  %v5375_v18 = vld [vmem:[%s18840_s1 + $0x2200] sm:$0xff]  ;;  %13985 = vmatprep.subr.bf16.mxu0 %v17417_v44  ;;  %v17544_v53 = vcombine.low %v5511_v40, %v5515_v20 }
 0x7c2   : > { %v5379_v62 = vld [vmem:[%s18840_s1 + $0x2220] sm:$0xff]  ;;  %13986 = vmatpush2.bf16.msra.mxu0 %v17416_v6 }
 0x7c3   : > { %v5503_v61 = vld [vmem:[%s18840_s1 + $0x2600] sm:$0xff]  ;;  %v17409_v34 = vcombine.high %v5375_v18, %v5379_v62  ;;  %14026 = vmatprep.subr.bf16.mxu1 %v17545_v8  ;;  %v17408_v41 = vcombine.low %v5375_v18, %v5379_v62 }
 0x7c4   : > { %v5507_v3 = vld [vmem:[%s18840_s1 + $0x2620] sm:$0xff]  ;;  %14027 = vmatpush2.bf16.msra.mxu1 %v17544_v53 }
 0x7c5   : > { %v17537_v36 = vcombine.high %v5503_v61, %v5507_v3  ;;  %v5623_v22 = vld [vmem:[%s18840_s1 + $0x29c0] sm:$0xff]  ;;  %13987 = vmatprep.subr.bf16.mxu0 %v17409_v34  ;;  %v17536_v16 = vcombine.low %v5503_v61, %v5507_v3 }
 0x7c6   : > { %v5627_v56 = vld [vmem:[%s18840_s1 + $0x29e0] sm:$0xff]  ;;  %13988 = vmatpush2.bf16.msra.mxu0 %v17408_v41  ;;  %v13745_v15 = vpop.f32.mrf.mxu0 }
 0x7c7   : > { %v5751_v47 = vld [vmem:[%s18840_s1 + $0x2dc0] sm:$0xff]  ;;  %v17657_v23 = vcombine.high %v5623_v22, %v5627_v56  ;;  %14028 = vmatprep.subr.bf16.mxu1 %v17537_v36  ;;  %v17656_v27 = vcombine.low %v5623_v22, %v5627_v56  ;;  %v13746_v40 = vadd.f32 %v13745_v15, %v20180_v21 }
 0x7c8   : > { %v5755_v19 = vld [vmem:[%s18840_s1 + $0x2de0] sm:$0xff]  ;;  %14029 = vmatpush2.bf16.msra.mxu1 %v17536_v16  ;;  %v13786_v20 = vpop.f32.mrf.mxu1  ;;  %v13747_v2 = vpop.f32.mrf.mxu0 }
 0x7c9   : > { %v17785_v45 = vcombine.high %v5751_v47, %v5755_v19  ;;  %v5615_v26 = vld [vmem:[%s18840_s1 + $0x2980] sm:$0xff]  ;;  %14039 = vmatprep.subr.bf16.mxu0 %v17657_v23  ;;  %v17784_v29 = vcombine.low %v5751_v47, %v5755_v19  ;;  %13990 = vmatmul.mubr.bf16.vlgmr.msra.gmra.mxu0 %v20246_v50  ;;  %v20273_v18 = vadd.f32 %v13786_v20, %v13746_v40 }
 0x7ca   : > { %v5619_v13 = vld [vmem:[%s18840_s1 + $0x29a0] sm:$0xff]  ;;  %14040 = vmatpush1.bf16.msra.mxu0 %v17656_v27  ;;  %v13748_v62 = vadd.f32 %v13747_v2, %v20188_v58  ;;  %v13788_v61 = vpop.f32.mrf.mxu1  ;;  %14071 = vmatprep.mubr.bf16.mxu0 %v20262_v48  ;;  %v13749_v53 = vpop.f32.mrf.mxu0 }
 0x7cb   : > { %v5743_v9 = vld [vmem:[%s18840_s1 + $0x2d80] sm:$0xff]  ;;  %v17649_v32 = vcombine.high %v5615_v26, %v5619_v13  ;;  %14080 = vmatprep.subr.bf16.mxu1 %v17785_v45  ;;  %14031 = vmatmul.mubr.bf16.vlgmr.msra.gmra.mxu1 %v20254_v24  ;;  %v17648_v60 = vcombine.low %v5615_v26, %v5619_v13 }
 0x7cc   : > { %v5747_v49 = vld [vmem:[%s18840_s1 + $0x2da0] sm:$0xff]  ;;  %14081 = vmatpush1.bf16.msra.mxu1 %v17784_v29  ;;  %v20282_v22 = vadd.f32 %v13788_v61, %v13748_v62  ;;  %v13790_v56 = vpop.f32.mrf.mxu1  ;;  %v13750_v47 = vpop.f32.mrf.mxu0 }
 0x7cd   : > { %v20256_v30 = vld [vmem:[#allocation4 + $0x18] sm:$0xff]  ;;  %v17777_v63 = vcombine.high %v5743_v9, %v5747_v49  ;;  %14041 = vmatprep.subr.bf16.mxu0 %v17649_v32  ;;  %v17776_v44 = vcombine.low %v5743_v9, %v5747_v49 }
 0x7ce   : > { %v5607_v46 = vld [vmem:[%s18840_s1 + $0x2940] sm:$0xff]  ;;  %v20269_v39 = vcombine.high %v20256_v30, %v20256_v30  ;;  %14042 = vmatpush1.bf16.msra.mxu0 %v17648_v60  ;;  %v13791_v16 = vpop.f32.mrf.mxu1 }
 0x7cf   : > { %v5611_v4 = vld [vmem:[%s18840_s1 + $0x2960] sm:$0xff]  ;;  %14082 = vmatprep.subr.bf16.mxu1 %v17777_v63 }
 0x7d0   : > { %v5735_v25 = vld [vmem:[%s18840_s1 + $0x2d40] sm:$0xff]  ;;  %v17641_v8 = vcombine.high %v5607_v46, %v5611_v4  ;;  %14112 = vmatprep.mubr.bf16.mxu1 %v20269_v39  ;;  %v17640_v58 = vcombine.low %v5607_v46, %v5611_v4  ;;  %14083 = vmatpush1.bf16.msra.mxu1 %v17776_v44 }
 0x7d1   : > { %v5739_v11 = vld [vmem:[%s18840_s1 + $0x2d60] sm:$0xff] }
 0x7d2   : > { %v17769_v21 = vcombine.high %v5735_v25, %v5739_v11  ;;  %v5599_v3 = vld [vmem:[%s18840_s1 + $0x2900] sm:$0xff]  ;;  %14043 = vmatprep.subr.bf16.mxu0 %v17641_v8  ;;  %v17768_v19 = vcombine.low %v5735_v25, %v5739_v11 }
 0x7d3   : > { %v5603_v6 = vld [vmem:[%s18840_s1 + $0x2920] sm:$0xff]  ;;  %14044 = vmatpush1.bf16.msra.mxu0 %v17640_v58 }
 0x7d4   : > { %v5727_v34 = vld [vmem:[%s18840_s1 + $0x2d00] sm:$0xff]  ;;  %v17633_v41 = vcombine.high %v5599_v3, %v5603_v6  ;;  %14084 = vmatprep.subr.bf16.mxu1 %v17769_v21  ;;  %v17632_v49 = vcombine.low %v5599_v3, %v5603_v6 }
 0x7d5   : > { %v5731_v36 = vld [vmem:[%s18840_s1 + $0x2d20] sm:$0xff]  ;;  %14085 = vmatpush1.bf16.msra.mxu1 %v17768_v19 }
 0x7d6   : > { %v17761_v23 = vcombine.high %v5727_v34, %v5731_v36  ;;  %v5591_v45 = vld [vmem:[%s18840_s1 + $0x28c0] sm:$0xff]  ;;  %14045 = vmatprep.subr.bf16.mxu0 %v17633_v41  ;;  %v17760_v27 = vcombine.low %v5727_v34, %v5731_v36 }
 0x7d7   : > { %v5595_v26 = vld [vmem:[%s18840_s1 + $0x28e0] sm:$0xff]  ;;  %14046 = vmatpush1.bf16.msra.mxu0 %v17632_v49 }
 0x7d8   : > { %v5719_v13 = vld [vmem:[%s18840_s1 + $0x2cc0] sm:$0xff]  ;;  %v17625_v29 = vcombine.high %v5591_v45, %v5595_v26  ;;  %14086 = vmatprep.subr.bf16.mxu1 %v17761_v23  ;;  %v17624_v25 = vcombine.low %v5591_v45, %v5595_v26 }
 0x7d9   : > { %v5723_v9 = vld [vmem:[%s18840_s1 + $0x2ce0] sm:$0xff]  ;;  %14087 = vmatpush1.bf16.msra.mxu1 %v17760_v27 }
 0x7da   : > { %v17753_v32 = vcombine.high %v5719_v13, %v5723_v9  ;;  %v5583_v63 = vld [vmem:[%s18840_s1 + $0x2880] sm:$0xff]  ;;  %14047 = vmatprep.subr.bf16.mxu0 %v17625_v29  ;;  %v17752_v11 = vcombine.low %v5719_v13, %v5723_v9 }
 0x7db   : > { %v5587_v46 = vld [vmem:[%s18840_s1 + $0x28a0] sm:$0xff]  ;;  %14048 = vmatpush1.bf16.msra.mxu0 %v17624_v25 }
 0x7dc   : > { %v5711_v4 = vld [vmem:[%s18840_s1 + $0x2c80] sm:$0xff]  ;;  %v17617_v40 = vcombine.high %v5583_v63, %v5587_v46  ;;  %14088 = vmatprep.subr.bf16.mxu1 %v17753_v32  ;;  %v17616_v62 = vcombine.low %v5583_v63, %v5587_v46 }
 0x7dd   : > { %v5715_v15 = vld [vmem:[%s18840_s1 + $0x2ca0] sm:$0xff]  ;;  %14089 = vmatpush1.bf16.msra.mxu1 %v17752_v11 }
 0x7de   : > { %v17745_v20 = vcombine.high %v5711_v4, %v5715_v15  ;;  %v5575_v60 = vld [vmem:[%s18840_s1 + $0x2840] sm:$0xff]  ;;  %14049 = vmatprep.subr.bf16.mxu0 %v17617_v40  ;;  %v17744_v61 = vcombine.low %v5711_v4, %v5715_v15 }
 0x7df   : > { %v5579_v2 = vld [vmem:[%s18840_s1 + $0x2860] sm:$0xff]  ;;  %14050 = vmatpush1.bf16.msra.mxu0 %v17616_v62 }
 0x7e0   : > { %v5703_v44 = vld [vmem:[%s18840_s1 + $0x2c40] sm:$0xff]  ;;  %v17609_v21 = vcombine.high %v5575_v60, %v5579_v2  ;;  %14090 = vmatprep.subr.bf16.mxu1 %v17745_v20  ;;  %v17608_v56 = vcombine.low %v5575_v60, %v5579_v2 }
 0x7e1   : > { %v5707_v8 = vld [vmem:[%s18840_s1 + $0x2c60] sm:$0xff]  ;;  %14091 = vmatpush1.bf16.msra.mxu1 %v17744_v61 }
 0x7e2   : > { %v17737_v3 = vcombine.high %v5703_v44, %v5707_v8  ;;  %v5567_v6 = vld [vmem:[%s18840_s1 + $0x2800] sm:$0xff]  ;;  %14051 = vmatprep.subr.bf16.mxu0 %v17609_v21  ;;  %v17736_v58 = vcombine.low %v5703_v44, %v5707_v8 }
 0x7e3   : > { %v5571_v53 = vld [vmem:[%s18840_s1 + $0x2820] sm:$0xff]  ;;  %14052 = vmatpush1.bf16.msra.mxu0 %v17608_v56 }
 0x7e4   : > { %v5695_v34 = vld [vmem:[%s18840_s1 + $0x2c00] sm:$0xff]  ;;  %v17601_v47 = vcombine.high %v5567_v6, %v5571_v53  ;;  %14092 = vmatprep.subr.bf16.mxu1 %v17737_v3  ;;  %v17600_v26 = vcombine.low %v5567_v6, %v5571_v53 }
 0x7e5   : > { %v5699_v36 = vld [vmem:[%s18840_s1 + $0x2c20] sm:$0xff]  ;;  %14093 = vmatpush1.bf16.msra.mxu1 %v17736_v58 }
 0x7e6   : > { %v17729_v19 = vcombine.high %v5695_v34, %v5699_v36  ;;  %v5687_v41 = vld [vmem:[%s18840_s1 + $0x2bc0] sm:$0xff]  ;;  %14053 = vmatprep.subr.bf16.mxu0 %v17601_v47  ;;  %v17728_v13 = vcombine.low %v5695_v34, %v5699_v36 }
 0x7e7   : > { %v5691_v16 = vld [vmem:[%s18840_s1 + $0x2be0] sm:$0xff]  ;;  %14054 = vmatpush1.bf16.msra.mxu0 %v17600_v26 }
 0x7e8   : > { %v5815_v23 = vld [vmem:[%s18840_s1 + $0x2fc0] sm:$0xff]  ;;  %v17721_v9 = vcombine.high %v5687_v41, %v5691_v16  ;;  %14094 = vmatprep.subr.bf16.mxu1 %v17729_v19  ;;  %v17720_v46 = vcombine.low %v5687_v41, %v5691_v16 }
 0x7e9   : > { %v5819_v45 = vld [vmem:[%s18840_s1 + $0x2fe0] sm:$0xff]  ;;  %14095 = vmatpush1.bf16.msra.mxu1 %v17728_v13 }
 0x7ea   : > { %v17849_v49 = vcombine.high %v5815_v23, %v5819_v45  ;;  %v5679_v27 = vld [vmem:[%s18840_s1 + $0x2b80] sm:$0xff]  ;;  %14055 = vmatprep.subr.bf16.mxu0 %v17721_v9  ;;  %v17848_v4 = vcombine.low %v5815_v23, %v5819_v45 }
 0x7eb   : > { %v5683_v29 = vld [vmem:[%s18840_s1 + $0x2ba0] sm:$0xff]  ;;  %14056 = vmatpush2.bf16.msra.mxu0 %v17720_v46 }
 0x7ec   : > { %v5807_v32 = vld [vmem:[%s18840_s1 + $0x2f80] sm:$0xff]  ;;  %v17713_v15 = vcombine.high %v5679_v27, %v5683_v29  ;;  %14096 = vmatprep.subr.bf16.mxu1 %v17849_v49  ;;  %v17712_v2 = vcombine.low %v5679_v27, %v5683_v29 }
 0x7ed   : > { %v5811_v63 = vld [vmem:[%s18840_s1 + $0x2fa0] sm:$0xff]  ;;  %14097 = vmatpush2.bf16.msra.mxu1 %v17848_v4 }
 0x7ee   : > { %v17841_v25 = vcombine.high %v5807_v32, %v5811_v63  ;;  %v5671_v11 = vld [vmem:[%s18840_s1 + $0x2b40] sm:$0xff]  ;;  %14057 = vmatprep.subr.bf16.mxu0 %v17713_v15  ;;  %v17840_v44 = vcombine.low %v5807_v32, %v5811_v63 }
 0x7ef   : > { %v5675_v40 = vld [vmem:[%s18840_s1 + $0x2b60] sm:$0xff]  ;;  %14058 = vmatpush2.bf16.msra.mxu0 %v17712_v2 }
 0x7f0   : > { %v5799_v20 = vld [vmem:[%s18840_s1 + $0x2f40] sm:$0xff]  ;;  %v17705_v8 = vcombine.high %v5671_v11, %v5675_v40  ;;  %14098 = vmatprep.subr.bf16.mxu1 %v17841_v25  ;;  %v17704_v53 = vcombine.low %v5671_v11, %v5675_v40 }
 0x7f1   : > { %v5803_v60 = vld [vmem:[%s18840_s1 + $0x2f60] sm:$0xff]  ;;  %14099 = vmatpush2.bf16.msra.mxu1 %v17840_v44 }
 0x7f2   : > { %v17833_v62 = vcombine.high %v5799_v20, %v5803_v60  ;;  %v5663_v61 = vld [vmem:[%s18840_s1 + $0x2b00] sm:$0xff]  ;;  %14059 = vmatprep.subr.bf16.mxu0 %v17705_v8  ;;  %v17832_v34 = vcombine.low %v5799_v20, %v5803_v60 }
 0x7f3   : > { %v5667_v21 = vld [vmem:[%s18840_s1 + $0x2b20] sm:$0xff]  ;;  %14060 = vmatpush2.bf16.msra.mxu0 %v17704_v53 }
 0x7f4   : > { %v5791_v3 = vld [vmem:[%s18840_s1 + $0x2f00] sm:$0xff]  ;;  %v17697_v36 = vcombine.high %v5663_v61, %v5667_v21  ;;  %14100 = vmatprep.subr.bf16.mxu1 %v17833_v62  ;;  %v17696_v16 = vcombine.low %v5663_v61, %v5667_v21 }
 0x7f5   : > { %v5795_v6 = vld [vmem:[%s18840_s1 + $0x2f20] sm:$0xff]  ;;  %14101 = vmatpush2.bf16.msra.mxu1 %v17832_v34  ;;  %v4344_v34 = vld [vmem:[%s18840_s1 + $0x1c8] sm:$0xff] }
 0x7f6   : > { %v17825_v56 = vcombine.high %v5791_v3, %v5795_v6  ;;  %v5655_v58 = vld [vmem:[%s18840_s1 + $0x2ac0] sm:$0xff]  ;;  %14061 = vmatprep.subr.bf16.mxu0 %v17697_v36  ;;  %v17824_v23 = vcombine.low %v5791_v3, %v5795_v6  ;;  %v4348_v36 = vld [vmem:[%s18840_s1 + $0x1e8] sm:$0xff] }
 0x7f7   : > { %v5659_v47 = vld [vmem:[%s18840_s1 + $0x2ae0] sm:$0xff]  ;;  %14062 = vmatpush2.bf16.msra.mxu0 %v17696_v16 }
 0x7f8   : > { %v5783_v19 = vld [vmem:[%s18840_s1 + $0x2ec0] sm:$0xff]  ;;  %v17689_v45 = vcombine.high %v5655_v58, %v5659_v47  ;;  %14102 = vmatprep.subr.bf16.mxu1 %v17825_v56  ;;  %v17688_v29 = vcombine.low %v5655_v58, %v5659_v47  ;;  %v4472_v56 = vld [vmem:[%s18840_s1 + $0x5c8] sm:$0xff] }
 0x7f9   : > { %v5787_v41 = vld [vmem:[%s18840_s1 + $0x2ee0] sm:$0xff]  ;;  %14103 = vmatpush2.bf16.msra.mxu1 %v17824_v23  ;;  %v4476_v58 = vld [vmem:[%s18840_s1 + $0x5e8] sm:$0xff] }
 0x7fa   : > { %v17817_v26 = vcombine.high %v5783_v19, %v5787_v41  ;;  %v5647_v13 = vld [vmem:[%s18840_s1 + $0x2a80] sm:$0xff]  ;;  %14063 = vmatprep.subr.bf16.mxu0 %v17689_v45  ;;  %v17816_v32 = vcombine.low %v5783_v19, %v5787_v41  ;;  %v16379_v41 = vcombine.high %v4344_v34, %v4348_v36  ;;  %v16507_v16 = vcombine.high %v4472_v56, %v4476_v58  ;;  %v4336_v23 = vld [vmem:[%s18840_s1 + $0x188] sm:$0xff] }
 0x7fb   : > { %v5651_v9 = vld [vmem:[%s18840_s1 + $0x2aa0] sm:$0xff]  ;;  %14064 = vmatpush2.bf16.msra.mxu0 %v17688_v29  ;;  %v4340_v45 = vld [vmem:[%s18840_s1 + $0x1a8] sm:$0xff]  ;;  %v16506_v29 = vcombine.low %v4472_v56, %v4476_v58 }
 0x7fc   : > { %v5775_v49 = vld [vmem:[%s18840_s1 + $0x2e80] sm:$0xff]  ;;  %v17681_v63 = vcombine.high %v5647_v13, %v5651_v9  ;;  %14104 = vmatprep.subr.bf16.mxu1 %v17817_v26  ;;  %v17680_v40 = vcombine.low %v5647_v13, %v5651_v9  ;;  %v20340_v26 = vcombine.low %v20250_v55, %v20250_v55  ;;  %v4464_v13 = vld [vmem:[%s18840_s1 + $0x588] sm:$0xff] }
 0x7fd   : > { %v5779_v27 = vld [vmem:[%s18840_s1 + $0x2ea0] sm:$0xff]  ;;  %14105 = vmatpush2.bf16.msra.mxu1 %v17816_v32  ;;  %v4468_v9 = vld [vmem:[%s18840_s1 + $0x5a8] sm:$0xff]  ;;  %v16371_v32 = vcombine.high %v4336_v23, %v4340_v45 }
 0x7fe   : > { %v17809_v46 = vcombine.high %v5775_v49, %v5779_v27  ;;  %v5639_v4 = vld [vmem:[%s18840_s1 + $0x2a40] sm:$0xff]  ;;  %14065 = vmatprep.subr.bf16.mxu0 %v17681_v63  ;;  %v17808_v20 = vcombine.low %v5775_v49, %v5779_v27  ;;  %v20346_v49 = vcombine.low %v20256_v30, %v20256_v30  ;;  %v16378_v27 = vcombine.low %v4344_v34, %v4348_v36 }
 0x7ff   : > { %v5643_v15 = vld [vmem:[%s18840_s1 + $0x2a60] sm:$0xff]  ;;  %14066 = vmatpush2.bf16.msra.mxu0 %v17680_v40  ;;  %v16499_v63 = vcombine.high %v4464_v13, %v4468_v9  ;;  %v16370_v40 = vcombine.low %v4336_v23, %v4340_v45  ;;  %v4316_v23 = vld [vmem:[%s18840_s1 + $0xe8] sm:$0xff] }
 0x800   : > { %v5767_v25 = vld [vmem:[%s18840_s1 + $0x2e40] sm:$0xff]  ;;  %v17673_v60 = vcombine.high %v5639_v4, %v5643_v15  ;;  %14106 = vmatprep.subr.bf16.mxu1 %v17809_v46  ;;  %v17672_v21 = vcombine.low %v5639_v4, %v5643_v15  ;;  %v4328_v46 = vld [vmem:[%s18840_s1 + $0x148] sm:$0xff] }
 0x801   : > { %v5771_v11 = vld [vmem:[%s18840_s1 + $0x2e60] sm:$0xff]  ;;  %14107 = vmatpush2.bf16.msra.mxu1 %v17808_v20  ;;  %v4332_v4 = vld [vmem:[%s18840_s1 + $0x168] sm:$0xff] }
 0x802   : > { %v17801_v2 = vcombine.high %v5767_v25, %v5771_v11  ;;  %v5631_v44 = vld [vmem:[%s18840_s1 + $0x2a00] sm:$0xff]  ;;  %14067 = vmatprep.subr.bf16.mxu0 %v17673_v60  ;;  %v17800_v3 = vcombine.low %v5767_v25, %v5771_v11  ;;  %v4456_v15 = vld [vmem:[%s18840_s1 + $0x548] sm:$0xff]  ;;  %v16498_v60 = vcombine.low %v4464_v13, %v4468_v9 }
 0x803   : > { %v5635_v8 = vld [vmem:[%s18840_s1 + $0x2a20] sm:$0xff]  ;;  %14068 = vmatpush2.bf16.msra.mxu0 %v17672_v21  ;;  %v4460_v25 = vld [vmem:[%s18840_s1 + $0x568] sm:$0xff] }
 0x804   : > { %v5759_v62 = vld [vmem:[%s18840_s1 + $0x2e00] sm:$0xff]  ;;  %v17665_v6 = vcombine.high %v5631_v44, %v5635_v8  ;;  %14108 = vmatprep.subr.bf16.mxu1 %v17801_v2  ;;  %v17664_v47 = vcombine.low %v5631_v44, %v5635_v8  ;;  %v16363_v2 = vcombine.high %v4328_v46, %v4332_v4  ;;  %v4324_v21 = vld [vmem:[%s18840_s1 + $0x128] sm:$0xff]  ;;  %v16490_v58 = vcombine.low %v4456_v15, %v4460_v25 }
 0x805   : > { %v5763_v61 = vld [vmem:[%s18840_s1 + $0x2e20] sm:$0xff]  ;;  %14109 = vmatpush2.bf16.msra.mxu1 %v17800_v3  ;;  %v4440_v45 = vld [vmem:[%s18840_s1 + $0x4c8] sm:$0xff] }
 0x806   : > { %v17793_v53 = vcombine.high %v5759_v62, %v5763_v61  ;;  %14069 = vmatprep.subr.bf16.mxu0 %v17665_v6  ;;  %v17792_v19 = vcombine.low %v5759_v62, %v5763_v61  ;;  %v4320_v61 = vld [vmem:[%s18840_s1 + $0x108] sm:$0xff] }
 0x807   : > { %14070 = vmatpush2.bf16.msra.mxu0 %v17664_v47  ;;  %v13827_v55 = vpop.f32.mrf.mxu0  ;;  %v4448_v6 = vld [vmem:[%s18840_s1 + $0x508] sm:$0xff]  ;;  %v16355_v47 = vcombine.high %v4320_v61, %v4324_v21  ;;  %v16354_v9 = vcombine.low %v4320_v61, %v4324_v21 }
 0x808   : > { %14110 = vmatprep.subr.bf16.mxu1 %v17793_v53  ;;  %14121 = vmatprep.subr.bf16.mxu0 %v16379_v41  ;;  %v13828_v11 = vadd.f32 %v13827_v55, %v20273_v18  ;;  %v16491_v18 = vcombine.high %v4456_v15, %v4460_v25  ;;  %v4452_v53 = vld [vmem:[%s18840_s1 + $0x528] sm:$0xff] }
 0x809   : > { %14111 = vmatpush2.bf16.msra.mxu1 %v17792_v19  ;;  %v13868_v30 = vpop.f32.mrf.mxu1  ;;  %v13829_v20 = vpop.f32.mrf.mxu0  ;;  %v16483_v41 = vcombine.high %v4448_v6, %v4452_v53  ;;  %v4444_v13 = vld [vmem:[%s18840_s1 + $0x4e8] sm:$0xff] }
 0x80a   : > { %14162 = vmatprep.subr.bf16.mxu1 %v16507_v16  ;;  %14072 = vmatmul.mubr.bf16.vlgmr.msra.gmra.mxu0 %v20340_v26  ;;  %v20355_v44 = vadd.f32 %v13868_v30, %v13828_v11  ;;  %v13830_v8 = vadd.f32 %v13829_v20, %v20282_v22  ;;  %v16362_v22 = vcombine.low %v4328_v46, %v4332_v4  ;;  %v4312_v16 = vld [vmem:[%s18840_s1 + $0xc8] sm:$0xff] }
 0x80b   : > { %14122 = vmatpush1.bf16.msra.mxu0 %v16378_v27  ;;  %v13870_v62 = vpop.f32.mrf.mxu1  ;;  %14153 = vmatprep.mubr.bf16.mxu0 %v19831_v14  ;;  %v13831_v3 = vpop.f32.mrf.mxu0  ;;  %v16482_v27 = vcombine.low %v4448_v6, %v4452_v53  ;;  %v4308_v46 = vld [vmem:[%s18840_s1 + $0xa8] sm:$0xff]  ;;  %v16346_v15 = vcombine.low %v4312_v16, %v4316_v23  ;;  %v16474_v25 = vcombine.low %v4440_v45, %v4444_v13 }
 0x80c   : > { %14113 = vmatmul.mubr.bf16.vlgmr.msra.gmra.mxu1 %v20346_v49  ;;  %14123 = vmatprep.subr.bf16.mxu0 %v16371_v32  ;;  %v20364_v34 = vadd.f32 %v13870_v62, %v13830_v8  ;;  %v16475_v32 = vcombine.high %v4440_v45, %v4444_v13  ;;  %v4432_v4 = vld [vmem:[%s18840_s1 + $0x488] sm:$0xff] }
 0x80d   : > { %14163 = vmatpush1.bf16.msra.mxu1 %v16506_v29  ;;  %14194 = vmatprep.mubr.bf16.mxu1 %v19835_v42  ;;  %v13872_v36 = vpop.f32.mrf.mxu1  ;;  %v13832_v56 = vpop.f32.mrf.mxu0  ;;  %v16347_v29 = vcombine.high %v4312_v16, %v4316_v23  ;;  %v4436_v55 = vld [vmem:[%s18840_s1 + $0x4a8] sm:$0xff] }
 0x80e   : > { %14164 = vmatprep.subr.bf16.mxu1 %v16499_v63  ;;  %v4304_v63 = vld [vmem:[%s18840_s1 + $0x88] sm:$0xff]  ;;  %v16467_v30 = vcombine.high %v4432_v4, %v4436_v55  ;;  %v16466_v62 = vcombine.low %v4432_v4, %v4436_v55 }
 0x80f   : > { %14124 = vmatpush1.bf16.msra.mxu0 %v16370_v40  ;;  %v13873_v19 = vpop.f32.mrf.mxu1  ;;  %v16339_v11 = vcombine.high %v4304_v63, %v4308_v46  ;;  %v4296_v40 = vld [vmem:[%s18840_s1 + $0x48] sm:$0xff]  ;;  %v16338_v8 = vcombine.low %v4304_v63, %v4308_v46 }
 0x810   : > { %14125 = vmatprep.subr.bf16.mxu0 %v16363_v2  ;;  %v4300_v20 = vld [vmem:[%s18840_s1 + $0x68] sm:$0xff] }
 0x811   : > { %14165 = vmatpush1.bf16.msra.mxu1 %v16498_v60  ;;  %v4424_v60 = vld [vmem:[%s18840_s1 + $0x448] sm:$0xff]  ;;  %v16330_v36 = vcombine.low %v4296_v40, %v4300_v20 }
 0x812   : > { %14166 = vmatprep.subr.bf16.mxu1 %v16491_v18  ;;  %v4428_v2 = vld [vmem:[%s18840_s1 + $0x468] sm:$0xff]  ;;  %v16331_v18 = vcombine.high %v4296_v40, %v4300_v20 }
 0x813   : > { %14126 = vmatpush1.bf16.msra.mxu0 %v16362_v22  ;;  %v16459_v61 = vcombine.high %v4424_v60, %v4428_v2  ;;  %v4288_v21 = vld [vmem:[%s18840_s1 + $0x8] sm:$0xff]  ;;  %v16458_v22 = vcombine.low %v4424_v60, %v4428_v2 }
 0x814   : > { %14127 = vmatprep.subr.bf16.mxu0 %v16355_v47  ;;  %v4292_v3 = vld [vmem:[%s18840_s1 + $0x28] sm:$0xff] }
 0x815   : > { %14167 = vmatpush1.bf16.msra.mxu1 %v16490_v58  ;;  %v4416_v6 = vld [vmem:[%s18840_s1 + $0x408] sm:$0xff]  ;;  %v16323_v56 = vcombine.high %v4288_v21, %v4292_v3  ;;  %v16322_v23 = vcombine.low %v4288_v21, %v4292_v3 }
 0x816   : > { %14168 = vmatprep.subr.bf16.mxu1 %v16483_v41  ;;  %v4420_v53 = vld [vmem:[%s18840_s1 + $0x428] sm:$0xff] }
 0x817   : > { %14128 = vmatpush1.bf16.msra.mxu0 %v16354_v9  ;;  %v16451_v58 = vcombine.high %v4416_v6, %v4420_v53  ;;  %v4408_v47 = vld [vmem:[%s18840_s1 + $0x3c8] sm:$0xff]  ;;  %v16450_v45 = vcombine.low %v4416_v6, %v4420_v53 }
 0x818   : > { %14129 = vmatprep.subr.bf16.mxu0 %v16347_v29  ;;  %v4412_v19 = vld [vmem:[%s18840_s1 + $0x3e8] sm:$0xff] }
 0x819   : > { %14169 = vmatpush1.bf16.msra.mxu1 %v16482_v27  ;;  %v4536_v41 = vld [vmem:[%s18840_s1 + $0x7c8] sm:$0xff]  ;;  %v16443_v13 = vcombine.high %v4408_v47, %v4412_v19  ;;  %v16442_v46 = vcombine.low %v4408_v47, %v4412_v19 }
 0x81a   : > { %14170 = vmatprep.subr.bf16.mxu1 %v16475_v32  ;;  %v4540_v16 = vld [vmem:[%s18840_s1 + $0x7e8] sm:$0xff] }
 0x81b   : > { %14130 = vmatpush1.bf16.msra.mxu0 %v16346_v15  ;;  %v16571_v9 = vcombine.high %v4536_v41, %v4540_v16  ;;  %v4400_v27 = vld [vmem:[%s18840_s1 + $0x388] sm:$0xff]  ;;  %v16570_v4 = vcombine.low %v4536_v41, %v4540_v16 }
 0x81c   : > { %14131 = vmatprep.subr.bf16.mxu0 %v16339_v11  ;;  %v4404_v29 = vld [vmem:[%s18840_s1 + $0x3a8] sm:$0xff] }
 0x81d   : > { %14171 = vmatpush1.bf16.msra.mxu1 %v16474_v25  ;;  %v4528_v32 = vld [vmem:[%s18840_s1 + $0x788] sm:$0xff]  ;;  %v16435_v55 = vcombine.high %v4400_v27, %v4404_v29  ;;  %v16434_v20 = vcombine.low %v4400_v27, %v4404_v29 }
 0x81e   : > { %14172 = vmatprep.subr.bf16.mxu1 %v16467_v30  ;;  %v4532_v63 = vld [vmem:[%s18840_s1 + $0x7a8] sm:$0xff] }
 0x81f   : > { %14132 = vmatpush1.bf16.msra.mxu0 %v16338_v8  ;;  %v16563_v15 = vcombine.high %v4528_v32, %v4532_v63  ;;  %v4392_v25 = vld [vmem:[%s18840_s1 + $0x348] sm:$0xff]  ;;  %v16562_v60 = vcombine.low %v4528_v32, %v4532_v63 }
 0x820   : > { %14133 = vmatprep.subr.bf16.mxu0 %v16331_v18  ;;  %v4396_v11 = vld [vmem:[%s18840_s1 + $0x368] sm:$0xff] }
 0x821   : > { %14173 = vmatpush1.bf16.msra.mxu1 %v16466_v62  ;;  %v4520_v30 = vld [vmem:[%s18840_s1 + $0x748] sm:$0xff]  ;;  %v16427_v2 = vcombine.high %v4392_v25, %v4396_v11  ;;  %v16426_v3 = vcombine.low %v4392_v25, %v4396_v11 }
 0x822   : > { %14174 = vmatprep.subr.bf16.mxu1 %v16459_v61  ;;  %v4524_v40 = vld [vmem:[%s18840_s1 + $0x768] sm:$0xff] }
 0x823   : > { %14134 = vmatpush1.bf16.msra.mxu0 %v16330_v36  ;;  %v16555_v8 = vcombine.high %v4520_v30, %v4524_v40  ;;  %v4384_v62 = vld [vmem:[%s18840_s1 + $0x308] sm:$0xff]  ;;  %v16554_v6 = vcombine.low %v4520_v30, %v4524_v40 }
 0x824   : > { %14135 = vmatprep.subr.bf16.mxu0 %v16323_v56  ;;  %v4388_v18 = vld [vmem:[%s18840_s1 + $0x328] sm:$0xff] }
 0x825   : > { %14175 = vmatpush1.bf16.msra.mxu1 %v16458_v22  ;;  %v4512_v61 = vld [vmem:[%s18840_s1 + $0x708] sm:$0xff]  ;;  %v16419_v53 = vcombine.high %v4384_v62, %v4388_v18  ;;  %v16418_v19 = vcombine.low %v4384_v62, %v4388_v18 }
 0x826   : > { %14176 = vmatprep.subr.bf16.mxu1 %v16451_v58  ;;  %v4516_v21 = vld [vmem:[%s18840_s1 + $0x728] sm:$0xff] }
 0x827   : > { %14136 = vmatpush1.bf16.msra.mxu0 %v16322_v23  ;;  %v16547_v36 = vcombine.high %v4512_v61, %v4516_v21  ;;  %v4376_v22 = vld [vmem:[%s18840_s1 + $0x2c8] sm:$0xff]  ;;  %v16546_v41 = vcombine.low %v4512_v61, %v4516_v21 }
 0x828   : > { %14137 = vmatprep.subr.bf16.mxu0 %v16443_v13  ;;  %v4380_v56 = vld [vmem:[%s18840_s1 + $0x2e8] sm:$0xff] }
 0x829   : > { %14177 = vmatpush1.bf16.msra.mxu1 %v16450_v45  ;;  %v4504_v58 = vld [vmem:[%s18840_s1 + $0x6c8] sm:$0xff]  ;;  %v16411_v16 = vcombine.high %v4376_v22, %v4380_v56  ;;  %v16410_v29 = vcombine.low %v4376_v22, %v4380_v56 }
 0x82a   : > { %14178 = vmatprep.subr.bf16.mxu1 %v16571_v9  ;;  %v4508_v47 = vld [vmem:[%s18840_s1 + $0x6e8] sm:$0xff] }
 0x82b   : > { %14138 = vmatpush2.bf16.msra.mxu0 %v16442_v46  ;;  %v16539_v23 = vcombine.high %v4504_v58, %v4508_v47  ;;  %v4368_v45 = vld [vmem:[%s18840_s1 + $0x288] sm:$0xff]  ;;  %v16538_v32 = vcombine.low %v4504_v58, %v4508_v47 }
 0x82c   : > { %14139 = vmatprep.subr.bf16.mxu0 %v16435_v55  ;;  %v4372_v13 = vld [vmem:[%s18840_s1 + $0x2a8] sm:$0xff] }
 0x82d   : > { %14179 = vmatpush2.bf16.msra.mxu1 %v16570_v4  ;;  %v4496_v9 = vld [vmem:[%s18840_s1 + $0x688] sm:$0xff]  ;;  %v16403_v63 = vcombine.high %v4368_v45, %v4372_v13  ;;  %v16402_v11 = vcombine.low %v4368_v45, %v4372_v13 }
 0x82e   : > { %14180 = vmatprep.subr.bf16.mxu1 %v16563_v15  ;;  %v4500_v27 = vld [vmem:[%s18840_s1 + $0x6a8] sm:$0xff] }
 0x82f   : > { %14140 = vmatpush2.bf16.msra.mxu0 %v16434_v20  ;;  %v16531_v46 = vcombine.high %v4496_v9, %v4500_v27  ;;  %v4360_v4 = vld [vmem:[%s18840_s1 + $0x248] sm:$0xff]  ;;  %v16530_v30 = vcombine.low %v4496_v9, %v4500_v27 }
 0x830   : > { %14141 = vmatprep.subr.bf16.mxu0 %v16427_v2  ;;  %v4364_v55 = vld [vmem:[%s18840_s1 + $0x268] sm:$0xff] }
 0x831   : > { %14181 = vmatpush2.bf16.msra.mxu1 %v16562_v60  ;;  %v4488_v15 = vld [vmem:[%s18840_s1 + $0x648] sm:$0xff]  ;;  %v16395_v40 = vcombine.high %v4360_v4, %v4364_v55  ;;  %v16394_v18 = vcombine.low %v4360_v4, %v4364_v55 }
 0x832   : > { %14182 = vmatprep.subr.bf16.mxu1 %v16555_v8  ;;  %v4492_v25 = vld [vmem:[%s18840_s1 + $0x668] sm:$0xff] }
 0x833   : > { %14142 = vmatpush2.bf16.msra.mxu0 %v16426_v3  ;;  %v16523_v20 = vcombine.high %v4488_v15, %v4492_v25  ;;  %v4352_v60 = vld [vmem:[%s18840_s1 + $0x208] sm:$0xff]  ;;  %v16522_v61 = vcombine.low %v4488_v15, %v4492_v25 }
 0x834   : > { %14143 = vmatprep.subr.bf16.mxu0 %v16419_v53  ;;  %v4356_v2 = vld [vmem:[%s18840_s1 + $0x228] sm:$0xff] }
 0x835   : > { %14183 = vmatpush2.bf16.msra.mxu1 %v16554_v6  ;;  %v4480_v8 = vld [vmem:[%s18840_s1 + $0x608] sm:$0xff]  ;;  %v16387_v21 = vcombine.high %v4352_v60, %v4356_v2  ;;  %v16386_v56 = vcombine.low %v4352_v60, %v4356_v2 }
 0x836   : > { %14184 = vmatprep.subr.bf16.mxu1 %v16547_v36  ;;  %v4484_v62 = vld [vmem:[%s18840_s1 + $0x628] sm:$0xff] }
 0x837   : > { %14144 = vmatpush2.bf16.msra.mxu0 %v16418_v19  ;;  %v16515_v3 = vcombine.high %v4480_v8, %v4484_v62  ;;  %v4600_v6 = vld [vmem:[%s18840_s1 + $0x9c8] sm:$0xff]  ;;  %v16514_v58 = vcombine.low %v4480_v8, %v4484_v62 }
 0x838   : > { %14145 = vmatprep.subr.bf16.mxu0 %v16411_v16  ;;  %v4604_v53 = vld [vmem:[%s18840_s1 + $0x9e8] sm:$0xff] }
 0x839   : > { %14185 = vmatpush2.bf16.msra.mxu1 %v16546_v41  ;;  %v4728_v36 = vld [vmem:[%s18840_s1 + $0xdc8] sm:$0xff]  ;;  %v16635_v47 = vcombine.high %v4600_v6, %v4604_v53  ;;  %v16634_v13 = vcombine.low %v4600_v6, %v4604_v53 }
 0x83a   : > { %14186 = vmatprep.subr.bf16.mxu1 %v16539_v23  ;;  %v4732_v22 = vld [vmem:[%s18840_s1 + $0xde8] sm:$0xff] }
 0x83b   : > { %14146 = vmatpush2.bf16.msra.mxu0 %v16410_v29  ;;  %v16763_v19 = vcombine.high %v4728_v36, %v4732_v22  ;;  %v4592_v41 = vld [vmem:[%s18840_s1 + $0x988] sm:$0xff]  ;;  %v16762_v9 = vcombine.low %v4728_v36, %v4732_v22 }
 0x83c   : > { %14147 = vmatprep.subr.bf16.mxu0 %v16403_v63  ;;  %v4596_v16 = vld [vmem:[%s18840_s1 + $0x9a8] sm:$0xff] }
 0x83d   : > { %14187 = vmatpush2.bf16.msra.mxu1 %v16538_v32  ;;  %v4720_v23 = vld [vmem:[%s18840_s1 + $0xd88] sm:$0xff]  ;;  %v16627_v27 = vcombine.high %v4592_v41, %v4596_v16 }
 0x83e   : > { %14188 = vmatprep.subr.bf16.mxu1 %v16531_v46  ;;  %v4724_v45 = vld [vmem:[%s18840_s1 + $0xda8] sm:$0xff] }
 0x83f   : > { %14148 = vmatpush2.bf16.msra.mxu0 %v16402_v11  ;;  %v16755_v29 = vcombine.high %v4720_v23, %v4724_v45  ;;  %v4584_v32 = vld [vmem:[%s18840_s1 + $0x948] sm:$0xff]  ;;  %v16626_v11 = vcombine.low %v4592_v41, %v4596_v16 }
 0x840   : > { %14149 = vmatprep.subr.bf16.mxu0 %v16395_v40  ;;  %v4588_v63 = vld [vmem:[%s18840_s1 + $0x968] sm:$0xff]  ;;  %v16754_v40 = vcombine.low %v4720_v23, %v4724_v45 }
 0x841   : > { %14189 = vmatpush2.bf16.msra.mxu1 %v16530_v30  ;;  %v4712_v4 = vld [vmem:[%s18840_s1 + $0xd48] sm:$0xff] }
 0x842   : > { %14190 = vmatprep.subr.bf16.mxu1 %v16523_v20  ;;  %v4716_v55 = vld [vmem:[%s18840_s1 + $0xd68] sm:$0xff]  ;;  %v16619_v20 = vcombine.high %v4584_v32, %v4588_v63 }
 0x843   : > { %14150 = vmatpush2.bf16.msra.mxu0 %v16394_v18  ;;  %v4576_v62 = vld [vmem:[%s18840_s1 + $0x908] sm:$0xff]  ;;  %v16746_v22 = vcombine.low %v4712_v4, %v4716_v55 }
 0x844   : > { %14151 = vmatprep.subr.bf16.mxu0 %v16387_v21  ;;  %v4580_v18 = vld [vmem:[%s18840_s1 + $0x928] sm:$0xff] }
 0x845   : > { %14191 = vmatpush2.bf16.msra.mxu1 %v16522_v61  ;;  %v4704_v21 = vld [vmem:[%s18840_s1 + $0xd08] sm:$0xff]  ;;  %v16610_v45 = vcombine.low %v4576_v62, %v4580_v18 }
 0x846   : > { %14192 = vmatprep.subr.bf16.mxu1 %v16515_v3  ;;  %v4708_v3 = vld [vmem:[%s18840_s1 + $0xd28] sm:$0xff] }
 0x847   : > { %14152 = vmatpush2.bf16.msra.mxu0 %v16386_v56  ;;  %v13909_v46 = vpop.f32.mrf.mxu0  ;;  %v16611_v56 = vcombine.high %v4576_v62, %v4580_v18  ;;  %v4572_v41 = vld [vmem:[%s18840_s1 + $0x8e8] sm:$0xff] }
 0x848   : > { %14203 = vmatprep.subr.bf16.mxu0 %v16635_v47  ;;  %v13910_v15 = vadd.f32 %v13909_v46, %v20355_v44  ;;  %v16747_v44 = vcombine.high %v4712_v4, %v4716_v55  ;;  %v16739_v47 = vcombine.high %v4704_v21, %v4708_v3  ;;  %v4696_v16 = vld [vmem:[%s18840_s1 + $0xcc8] sm:$0xff] }
 0x849   : > { %14193 = vmatpush2.bf16.msra.mxu1 %v16514_v58  ;;  %v13950_v25 = vpop.f32.mrf.mxu1  ;;  %v13911_v30 = vpop.f32.mrf.mxu0  ;;  %v4700_v23 = vld [vmem:[%s18840_s1 + $0xce8] sm:$0xff] }
 0x84a   : > { %14244 = vmatprep.subr.bf16.mxu1 %v16763_v19  ;;  %14154 = vmatmul.mubr.bf16.vlgmr.msra.gmra.mxu0 %v19881_v1  ;;  %v20429_v60 = vadd.f32 %v13950_v25, %v13910_v15  ;;  %v13912_v2 = vadd.f32 %v13911_v30, %v20364_v34  ;;  %v16618_v34 = vcombine.low %v4584_v32, %v4588_v63  ;;  %v4568_v19 = vld [vmem:[%s18840_s1 + $0x8c8] sm:$0xff] }
 0x84b   : > { %14204 = vmatpush1.bf16.msra.mxu0 %v16634_v13  ;;  %v13952_v8 = vpop.f32.mrf.mxu1  ;;  %14235 = vmatprep.mubr.bf16.mxu0 %v19897_v28  ;;  %v13913_v61 = vpop.f32.mrf.mxu0  ;;  %v16738_v13 = vcombine.low %v4704_v21, %v4708_v3  ;;  %v4564_v32 = vld [vmem:[%s18840_s1 + $0x8a8] sm:$0xff]  ;;  %v16602_v4 = vcombine.low %v4568_v19, %v4572_v41  ;;  %v16730_v55 = vcombine.low %v4696_v16, %v4700_v23 }
 0x84c   : > { %14195 = vmatmul.mubr.bf16.vlgmr.msra.gmra.mxu1 %v19889_v10  ;;  %14205 = vmatprep.subr.bf16.mxu0 %v16627_v27  ;;  %v20438_v6 = vadd.f32 %v13952_v8, %v13912_v2  ;;  %v16731_v27 = vcombine.high %v4696_v16, %v4700_v23  ;;  %v4688_v63 = vld [vmem:[%s18840_s1 + $0xc88] sm:$0xff] }
 0x84d   : > { %14245 = vmatpush1.bf16.msra.mxu1 %v16762_v9  ;;  %14276 = vmatprep.mubr.bf16.mxu1 %v19904_v5  ;;  %v13954_v53 = vpop.f32.mrf.mxu1  ;;  %v13914_v36 = vpop.f32.mrf.mxu0  ;;  %v16603_v9 = vcombine.high %v4568_v19, %v4572_v41  ;;  %v4692_v46 = vld [vmem:[%s18840_s1 + $0xca8] sm:$0xff] }
 0x84e   : > { %14246 = vmatprep.subr.bf16.mxu1 %v16755_v29  ;;  %v4560_v29 = vld [vmem:[%s18840_s1 + $0x888] sm:$0xff]  ;;  %v16723_v25 = vcombine.high %v4688_v63, %v4692_v46  ;;  %v16722_v8 = vcombine.low %v4688_v63, %v4692_v46 }
 0x84f   : > { %14206 = vmatpush1.bf16.msra.mxu0 %v16626_v11  ;;  %v13955_v58 = vpop.f32.mrf.mxu1  ;;  %v16595_v15 = vcombine.high %v4560_v29, %v4564_v32  ;;  %v4552_v11 = vld [vmem:[%s18840_s1 + $0x848] sm:$0xff]  ;;  %v16594_v2 = vcombine.low %v4560_v29, %v4564_v32 }
 0x850   : > { %14207 = vmatprep.subr.bf16.mxu0 %v16619_v20  ;;  %v4556_v30 = vld [vmem:[%s18840_s1 + $0x868] sm:$0xff] }
 0x851   : > { %14247 = vmatpush1.bf16.msra.mxu1 %v16754_v40  ;;  %v4680_v40 = vld [vmem:[%s18840_s1 + $0xc48] sm:$0xff]  ;;  %v16586_v53 = vcombine.low %v4552_v11, %v4556_v30 }
 0x852   : > { %14248 = vmatprep.subr.bf16.mxu1 %v16747_v44  ;;  %v4684_v20 = vld [vmem:[%s18840_s1 + $0xc68] sm:$0xff]  ;;  %v16587_v44 = vcombine.high %v4552_v11, %v4556_v30 }
 0x853   : > { %14208 = vmatpush1.bf16.msra.mxu0 %v16618_v34  ;;  %v16715_v62 = vcombine.high %v4680_v40, %v4684_v20  ;;  %v4544_v18 = vld [vmem:[%s18840_s1 + $0x808] sm:$0xff]  ;;  %v16714_v34 = vcombine.low %v4680_v40, %v4684_v20 }
 0x854   : > { %14209 = vmatprep.subr.bf16.mxu0 %v16611_v56  ;;  %v4548_v61 = vld [vmem:[%s18840_s1 + $0x828] sm:$0xff] }
 0x855   : > { %14249 = vmatpush1.bf16.msra.mxu1 %v16746_v22  ;;  %v4672_v21 = vld [vmem:[%s18840_s1 + $0xc08] sm:$0xff]  ;;  %v16579_v36 = vcombine.high %v4544_v18, %v4548_v61  ;;  %v16578_v41 = vcombine.low %v4544_v18, %v4548_v61 }
 0x856   : > { %14250 = vmatprep.subr.bf16.mxu1 %v16739_v47  ;;  %v4676_v3 = vld [vmem:[%s18840_s1 + $0xc28] sm:$0xff] }
 0x857   : > { %14210 = vmatpush1.bf16.msra.mxu0 %v16610_v45  ;;  %v16707_v22 = vcombine.high %v4672_v21, %v4676_v3  ;;  %v4664_v56 = vld [vmem:[%s18840_s1 + $0xbc8] sm:$0xff]  ;;  %v16706_v16 = vcombine.low %v4672_v21, %v4676_v3 }
 0x858   : > { %14211 = vmatprep.subr.bf16.mxu0 %v16603_v9  ;;  %v4668_v58 = vld [vmem:[%s18840_s1 + $0xbe8] sm:$0xff] }
 0x859   : > { %14251 = vmatpush1.bf16.msra.mxu1 %v16738_v13  ;;  %v4792_v47 = vld [vmem:[%s18840_s1 + $0xfc8] sm:$0xff]  ;;  %v16699_v23 = vcombine.high %v4664_v56, %v4668_v58  ;;  %v16698_v32 = vcombine.low %v4664_v56, %v4668_v58 }
 0x85a   : > { %14252 = vmatprep.subr.bf16.mxu1 %v16731_v27  ;;  %v4796_v19 = vld [vmem:[%s18840_s1 + $0xfe8] sm:$0xff] }
 0x85b   : > { %14212 = vmatpush1.bf16.msra.mxu0 %v16602_v4  ;;  %v16827_v45 = vcombine.high %v4792_v47, %v4796_v19  ;;  %v4656_v13 = vld [vmem:[%s18840_s1 + $0xb88] sm:$0xff]  ;;  %v16826_v63 = vcombine.low %v4792_v47, %v4796_v19 }
 0x85c   : > { %14213 = vmatprep.subr.bf16.mxu0 %v16595_v15  ;;  %v4660_v9 = vld [vmem:[%s18840_s1 + $0xba8] sm:$0xff] }
 0x85d   : > { %14253 = vmatpush1.bf16.msra.mxu1 %v16730_v55  ;;  %v4784_v27 = vld [vmem:[%s18840_s1 + $0xf88] sm:$0xff]  ;;  %v16691_v46 = vcombine.high %v4656_v13, %v4660_v9  ;;  %v16690_v30 = vcombine.low %v4656_v13, %v4660_v9 }
 0x85e   : > { %14254 = vmatprep.subr.bf16.mxu1 %v16723_v25  ;;  %v4788_v29 = vld [vmem:[%s18840_s1 + $0xfa8] sm:$0xff] }
 0x85f   : > { %14214 = vmatpush1.bf16.msra.mxu0 %v16594_v2  ;;  %v16819_v4 = vcombine.high %v4784_v27, %v4788_v29  ;;  %v4648_v55 = vld [vmem:[%s18840_s1 + $0xb48] sm:$0xff]  ;;  %v16818_v40 = vcombine.low %v4784_v27, %v4788_v29 }
 0x860   : > { %14215 = vmatprep.subr.bf16.mxu0 %v16587_v44  ;;  %v4652_v15 = vld [vmem:[%s18840_s1 + $0xb68] sm:$0xff] }
 0x861   : > { %14255 = vmatpush1.bf16.msra.mxu1 %v16722_v8  ;;  %v4776_v25 = vld [vmem:[%s18840_s1 + $0xf48] sm:$0xff]  ;;  %v16683_v20 = vcombine.high %v4648_v55, %v4652_v15  ;;  %v16682_v61 = vcombine.low %v4648_v55, %v4652_v15 }
 0x862   : > { %14256 = vmatprep.subr.bf16.mxu1 %v16715_v62  ;;  %v4780_v11 = vld [vmem:[%s18840_s1 + $0xf68] sm:$0xff] }
 0x863   : > { %14216 = vmatpush1.bf16.msra.mxu0 %v16586_v53  ;;  %v16811_v2 = vcombine.high %v4776_v25, %v4780_v11  ;;  %v4640_v8 = vld [vmem:[%s18840_s1 + $0xb08] sm:$0xff]  ;;  %v16810_v21 = vcombine.low %v4776_v25, %v4780_v11 }
 0x864   : > { %14217 = vmatprep.subr.bf16.mxu0 %v16579_v36  ;;  %v4644_v44 = vld [vmem:[%s18840_s1 + $0xb28] sm:$0xff] }
 0x865   : > { %14257 = vmatpush1.bf16.msra.mxu1 %v16714_v34  ;;  %v4768_v62 = vld [vmem:[%s18840_s1 + $0xf08] sm:$0xff]  ;;  %v16675_v3 = vcombine.high %v4640_v8, %v4644_v44  ;;  %v16674_v58 = vcombine.low %v4640_v8, %v4644_v44 }
 0x866   : > { %14258 = vmatprep.subr.bf16.mxu1 %v16707_v22  ;;  %v4772_v18 = vld [vmem:[%s18840_s1 + $0xf28] sm:$0xff] }
 0x867   : > { %14218 = vmatpush1.bf16.msra.mxu0 %v16578_v41  ;;  %v16803_v53 = vcombine.high %v4768_v62, %v4772_v18  ;;  %v4632_v34 = vld [vmem:[%s18840_s1 + $0xac8] sm:$0xff]  ;;  %v16802_v47 = vcombine.low %v4768_v62, %v4772_v18 }
 0x868   : > { %14219 = vmatprep.subr.bf16.mxu0 %v16699_v23  ;;  %v4636_v36 = vld [vmem:[%s18840_s1 + $0xae8] sm:$0xff] }
 0x869   : > { %14259 = vmatpush1.bf16.msra.mxu1 %v16706_v16  ;;  %v4760_v22 = vld [vmem:[%s18840_s1 + $0xec8] sm:$0xff]  ;;  %v16667_v19 = vcombine.high %v4632_v34, %v4636_v36  ;;  %v16666_v9 = vcombine.low %v4632_v34, %v4636_v36 }
 0x86a   : > { %14260 = vmatprep.subr.bf16.mxu1 %v16827_v45  ;;  %v4764_v56 = vld [vmem:[%s18840_s1 + $0xee8] sm:$0xff] }
 0x86b   : > { %14220 = vmatpush2.bf16.msra.mxu0 %v16698_v32  ;;  %v16795_v41 = vcombine.high %v4760_v22, %v4764_v56  ;;  %v4624_v16 = vld [vmem:[%s18840_s1 + $0xa88] sm:$0xff]  ;;  %v16794_v27 = vcombine.low %v4760_v22, %v4764_v56 }
 0x86c   : > { %14221 = vmatprep.subr.bf16.mxu0 %v16691_v46  ;;  %v4628_v23 = vld [vmem:[%s18840_s1 + $0xaa8] sm:$0xff] }
 0x86d   : > { %14261 = vmatpush2.bf16.msra.mxu1 %v16826_v63  ;;  %v4752_v45 = vld [vmem:[%s18840_s1 + $0xe88] sm:$0xff]  ;;  %v16659_v29 = vcombine.high %v4624_v16, %v4628_v23  ;;  %v16658_v15 = vcombine.low %v4624_v16, %v4628_v23 }
 0x86e   : > { %14262 = vmatprep.subr.bf16.mxu1 %v16819_v4  ;;  %v4756_v13 = vld [vmem:[%s18840_s1 + $0xea8] sm:$0xff] }
 0x86f   : > { %14222 = vmatpush2.bf16.msra.mxu0 %v16690_v30  ;;  %v16787_v32 = vcombine.high %v4752_v45, %v4756_v13  ;;  %v4616_v63 = vld [vmem:[%s18840_s1 + $0xa48] sm:$0xff]  ;;  %v16786_v25 = vcombine.low %v4752_v45, %v4756_v13 }
 0x870   : > { %14223 = vmatprep.subr.bf16.mxu0 %v16683_v20  ;;  %v4620_v46 = vld [vmem:[%s18840_s1 + $0xa68] sm:$0xff] }
 0x871   : > { %14263 = vmatpush2.bf16.msra.mxu1 %v16818_v40  ;;  %v4744_v4 = vld [vmem:[%s18840_s1 + $0xe48] sm:$0xff]  ;;  %v16651_v11 = vcombine.high %v4616_v63, %v4620_v46  ;;  %v16650_v44 = vcombine.low %v4616_v63, %v4620_v46 }
 0x872   : > { %14264 = vmatprep.subr.bf16.mxu1 %v16811_v2  ;;  %v4748_v55 = vld [vmem:[%s18840_s1 + $0xe68] sm:$0xff] }
 0x873   : > { %14224 = vmatpush2.bf16.msra.mxu0 %v16682_v61  ;;  %v16779_v30 = vcombine.high %v4744_v4, %v4748_v55  ;;  %v4608_v40 = vld [vmem:[%s18840_s1 + $0xa08] sm:$0xff]  ;;  %v16778_v62 = vcombine.low %v4744_v4, %v4748_v55 }
 0x874   : > { %14225 = vmatprep.subr.bf16.mxu0 %v16675_v3  ;;  %v4612_v20 = vld [vmem:[%s18840_s1 + $0xa28] sm:$0xff] }
 0x875   : > { %14265 = vmatpush2.bf16.msra.mxu1 %v16810_v21  ;;  %v4736_v2 = vld [vmem:[%s18840_s1 + $0xe08] sm:$0xff]  ;;  %v16643_v18 = vcombine.high %v4608_v40, %v4612_v20  ;;  %v16642_v36 = vcombine.low %v4608_v40, %v4612_v20 }
 0x876   : > { %14266 = vmatprep.subr.bf16.mxu1 %v16803_v53  ;;  %v4740_v8 = vld [vmem:[%s18840_s1 + $0xe28] sm:$0xff] }
 0x877   : > { %14226 = vmatpush2.bf16.msra.mxu0 %v16674_v58  ;;  %v16771_v61 = vcombine.high %v4736_v2, %v4740_v8  ;;  %v4856_v21 = vld [vmem:[%s18840_s1 + $0x11c8] sm:$0xff]  ;;  %v16770_v22 = vcombine.low %v4736_v2, %v4740_v8 }
 0x878   : > { %14227 = vmatprep.subr.bf16.mxu0 %v16667_v19  ;;  %v4860_v3 = vld [vmem:[%s18840_s1 + $0x11e8] sm:$0xff] }
 0x879   : > { %14267 = vmatpush2.bf16.msra.mxu1 %v16802_v47  ;;  %v4984_v53 = vld [vmem:[%s18840_s1 + $0x15c8] sm:$0xff]  ;;  %v16891_v56 = vcombine.high %v4856_v21, %v4860_v3  ;;  %v16890_v23 = vcombine.low %v4856_v21, %v4860_v3 }
 0x87a   : > { %14268 = vmatprep.subr.bf16.mxu1 %v16795_v41  ;;  %v4988_v34 = vld [vmem:[%s18840_s1 + $0x15e8] sm:$0xff] }
 0x87b   : > { %14228 = vmatpush2.bf16.msra.mxu0 %v16666_v9  ;;  %v17019_v58 = vcombine.high %v4984_v53, %v4988_v34  ;;  %v4848_v47 = vld [vmem:[%s18840_s1 + $0x1188] sm:$0xff]  ;;  %v17018_v45 = vcombine.low %v4984_v53, %v4988_v34 }
 0x87c   : > { %14229 = vmatprep.subr.bf16.mxu0 %v16659_v29  ;;  %v4852_v19 = vld [vmem:[%s18840_s1 + $0x11a8] sm:$0xff] }
 0x87d   : > { %14269 = vmatpush2.bf16.msra.mxu1 %v16794_v27  ;;  %v4976_v41 = vld [vmem:[%s18840_s1 + $0x1588] sm:$0xff]  ;;  %v16883_v13 = vcombine.high %v4848_v47, %v4852_v19 }
 0x87e   : > { %14270 = vmatprep.subr.bf16.mxu1 %v16787_v32  ;;  %v4980_v16 = vld [vmem:[%s18840_s1 + $0x15a8] sm:$0xff] }
 0x87f   : > { %14230 = vmatpush2.bf16.msra.mxu0 %v16658_v15  ;;  %v17011_v9 = vcombine.high %v4976_v41, %v4980_v16  ;;  %v4840_v27 = vld [vmem:[%s18840_s1 + $0x1148] sm:$0xff]  ;;  %v16882_v15 = vcombine.low %v4848_v47, %v4852_v19 }
 0x880   : > { %14231 = vmatprep.subr.bf16.mxu0 %v16651_v11  ;;  %v4844_v29 = vld [vmem:[%s18840_s1 + $0x1168] sm:$0xff]  ;;  %v17010_v11 = vcombine.low %v4976_v41, %v4980_v16 }
 0x881   : > { %14271 = vmatpush2.bf16.msra.mxu1 %v16786_v25  ;;  %v4968_v63 = vld [vmem:[%s18840_s1 + $0x1548] sm:$0xff] }
 0x882   : > { %14272 = vmatprep.subr.bf16.mxu1 %v16779_v30  ;;  %v4972_v46 = vld [vmem:[%s18840_s1 + $0x1568] sm:$0xff]  ;;  %v16875_v30 = vcombine.high %v4840_v27, %v4844_v29 }
 0x883   : > { %14232 = vmatpush2.bf16.msra.mxu0 %v16650_v44  ;;  %v4832_v8 = vld [vmem:[%s18840_s1 + $0x1108] sm:$0xff]  ;;  %v17002_v34 = vcombine.low %v4968_v63, %v4972_v46 }
 0x884   : > { %14233 = vmatprep.subr.bf16.mxu0 %v16643_v18  ;;  %v4836_v44 = vld [vmem:[%s18840_s1 + $0x1128] sm:$0xff] }
 0x885   : > { %14273 = vmatpush2.bf16.msra.mxu1 %v16778_v62  ;;  %v4960_v18 = vld [vmem:[%s18840_s1 + $0x1508] sm:$0xff]  ;;  %v16866_v16 = vcombine.low %v4832_v8, %v4836_v44 }
 0x886   : > { %14274 = vmatprep.subr.bf16.mxu1 %v16771_v61  ;;  %v4964_v61 = vld [vmem:[%s18840_s1 + $0x1528] sm:$0xff] }
 0x887   : > { %14234 = vmatpush2.bf16.msra.mxu0 %v16642_v36  ;;  %v16867_v36 = vcombine.high %v4832_v8, %v4836_v44  ;;  %v4828_v47 = vld [vmem:[%s18840_s1 + $0x10e8] sm:$0xff] }
 0x888   : > { %14285 = vmatprep.subr.bf16.mxu0 %v16891_v56  ;;  %v16995_v56 = vcombine.high %v4960_v18, %v4964_v61  ;;  %v4952_v19 = vld [vmem:[%s18840_s1 + $0x14c8] sm:$0xff] }
 0x889   : > { %14275 = vmatpush2.bf16.msra.mxu1 %v16770_v22  ;;  %v13991_v32 = vpop.f32.mrf.mxu0  ;;  %v4956_v41 = vld [vmem:[%s18840_s1 + $0x14e8] sm:$0xff] }
 0x88a   : > { %14326 = vmatprep.subr.bf16.mxu1 %v17019_v58  ;;  %14236 = vmatmul.mubr.bf16.vlgmr.msra.gmra.mxu0 %v19969_v38  ;;  %v13992_v4 = vadd.f32 %v13991_v32, %v20429_v60  ;;  %v17003_v60 = vcombine.high %v4968_v63, %v4972_v46  ;;  %v4824_v58 = vld [vmem:[%s18840_s1 + $0x10c8] sm:$0xff]  ;;  %v16986_v46 = vcombine.low %v4952_v19, %v4956_v41 }
 0x88b   : > { %v14032_v55 = vpop.f32.mrf.mxu1  ;;  %14286 = vmatpush1.bf16.msra.mxu0 %v16890_v23  ;;  %v13993_v25 = vpop.f32.mrf.mxu0  ;;  %14317 = vmatprep.mubr.bf16.mxu0 %v19985_v33  ;;  %v16994_v23 = vcombine.low %v4960_v18, %v4964_v61  ;;  %v4948_v32 = vld [vmem:[%s18840_s1 + $0x14a8] sm:$0xff]  ;;  %v16858_v63 = vcombine.low %v4824_v58, %v4828_v47 }
 0x88c   : > { %14277 = vmatmul.mubr.bf16.vlgmr.msra.gmra.mxu1 %v19977_v43  ;;  %14287 = vmatprep.subr.bf16.mxu0 %v16883_v13  ;;  %v20503_v40 = vadd.f32 %v14032_v55, %v13992_v4  ;;  %v13994_v20 = vadd.f32 %v13993_v25, %v20438_v6  ;;  %v16874_v6 = vcombine.low %v4840_v27, %v4844_v29  ;;  %v4820_v27 = vld [vmem:[%s18840_s1 + $0x10a8] sm:$0xff] }
 0x88d   : > { %14327 = vmatpush1.bf16.msra.mxu1 %v17018_v45  ;;  %v14034_v2 = vpop.f32.mrf.mxu1  ;;  %v13995_v62 = vpop.f32.mrf.mxu0  ;;  %14358 = vmatprep.mubr.bf16.mxu1 %v19992_v37  ;;  %v16859_v45 = vcombine.high %v4824_v58, %v4828_v47  ;;  %v16987_v13 = vcombine.high %v4952_v19, %v4956_v41  ;;  %v4944_v29 = vld [vmem:[%s18840_s1 + $0x1488] sm:$0xff] }
 0x88e   : > { %14328 = vmatprep.subr.bf16.mxu1 %v17011_v9  ;;  %v20512_v21 = vadd.f32 %v14034_v2, %v13994_v20  ;;  %v4816_v9 = vld [vmem:[%s18840_s1 + $0x1088] sm:$0xff]  ;;  %v16979_v55 = vcombine.high %v4944_v29, %v4948_v32  ;;  %v16978_v2 = vcombine.low %v4944_v29, %v4948_v32 }
 0x88f   : > { %v14036_v3 = vpop.f32.mrf.mxu1  ;;  %14288 = vmatpush1.bf16.msra.mxu0 %v16882_v15  ;;  %v13996_v53 = vpop.f32.mrf.mxu0  ;;  %v16851_v4 = vcombine.high %v4816_v9, %v4820_v27  ;;  %v4808_v15 = vld [vmem:[%s18840_s1 + $0x1048] sm:$0xff]  ;;  %v16850_v20 = vcombine.low %v4816_v9, %v4820_v27 }
 0x890   : > { %14289 = vmatprep.subr.bf16.mxu0 %v16875_v30  ;;  %v4812_v25 = vld [vmem:[%s18840_s1 + $0x1068] sm:$0xff] }
 0x891   : > { %14329 = vmatpush1.bf16.msra.mxu1 %v17010_v11  ;;  %v14037_v22 = vpop.f32.mrf.mxu1  ;;  %v4936_v11 = vld [vmem:[%s18840_s1 + $0x1448] sm:$0xff]  ;;  %v16842_v3 = vcombine.low %v4808_v15, %v4812_v25 }
 0x892   : > { %14330 = vmatprep.subr.bf16.mxu1 %v17003_v60  ;;  %v4940_v30 = vld [vmem:[%s18840_s1 + $0x1468] sm:$0xff]  ;;  %v16843_v60 = vcombine.high %v4808_v15, %v4812_v25 }
 0x893   : > { %14290 = vmatpush1.bf16.msra.mxu0 %v16874_v6  ;;  %v16971_v8 = vcombine.high %v4936_v11, %v4940_v30  ;;  %v4800_v44 = vld [vmem:[%s18840_s1 + $0x1008] sm:$0xff]  ;;  %v16970_v6 = vcombine.low %v4936_v11, %v4940_v30 }
 0x894   : > { %14291 = vmatprep.subr.bf16.mxu0 %v16867_v36  ;;  %v4804_v62 = vld [vmem:[%s18840_s1 + $0x1028] sm:$0xff] }
 0x895   : > { %14331 = vmatpush1.bf16.msra.mxu1 %v17002_v34  ;;  %v4928_v18 = vld [vmem:[%s18840_s1 + $0x1408] sm:$0xff]  ;;  %v16835_v53 = vcombine.high %v4800_v44, %v4804_v62  ;;  %v16834_v47 = vcombine.low %v4800_v44, %v4804_v62 }
 0x896   : > { %14332 = vmatprep.subr.bf16.mxu1 %v16995_v56  ;;  %v4932_v61 = vld [vmem:[%s18840_s1 + $0x1428] sm:$0xff] }
 0x897   : > { %14292 = vmatpush1.bf16.msra.mxu0 %v16866_v16  ;;  %v16963_v34 = vcombine.high %v4928_v18, %v4932_v61  ;;  %v4920_v36 = vld [vmem:[%s18840_s1 + $0x13c8] sm:$0xff]  ;;  %v16962_v19 = vcombine.low %v4928_v18, %v4932_v61 }
 0x898   : > { %14293 = vmatprep.subr.bf16.mxu0 %v16859_v45  ;;  %v4924_v22 = vld [vmem:[%s18840_s1 + $0x13e8] sm:$0xff] }
 0x899   : > { %14333 = vmatpush1.bf16.msra.mxu1 %v16994_v23  ;;  %v5048_v56 = vld [vmem:[%s18840_s1 + $0x17c8] sm:$0xff]  ;;  %v16955_v41 = vcombine.high %v4920_v36, %v4924_v22  ;;  %v16954_v27 = vcombine.low %v4920_v36, %v4924_v22 }
 0x89a   : > { %14334 = vmatprep.subr.bf16.mxu1 %v16987_v13  ;;  %v5052_v58 = vld [vmem:[%s18840_s1 + $0x17e8] sm:$0xff] }
 0x89b   : > { %14294 = vmatpush1.bf16.msra.mxu0 %v16858_v63  ;;  %v17083_v16 = vcombine.high %v5048_v56, %v5052_v58  ;;  %v4912_v23 = vld [vmem:[%s18840_s1 + $0x1388] sm:$0xff]  ;;  %v17082_v29 = vcombine.low %v5048_v56, %v5052_v58 }
 0x89c   : > { %14295 = vmatprep.subr.bf16.mxu0 %v16851_v4  ;;  %v4916_v45 = vld [vmem:[%s18840_s1 + $0x13a8] sm:$0xff] }
 0x89d   : > { %14335 = vmatpush1.bf16.msra.mxu1 %v16986_v46  ;;  %v5040_v13 = vld [vmem:[%s18840_s1 + $0x1788] sm:$0xff]  ;;  %v16947_v32 = vcombine.high %v4912_v23, %v4916_v45  ;;  %v16946_v25 = vcombine.low %v4912_v23, %v4916_v45 }
 0x89e   : > { %14336 = vmatprep.subr.bf16.mxu1 %v16979_v55  ;;  %v5044_v9 = vld [vmem:[%s18840_s1 + $0x17a8] sm:$0xff] }
 0x89f   : > { %14296 = vmatpush1.bf16.msra.mxu0 %v16850_v20  ;;  %v17075_v63 = vcombine.high %v5040_v13, %v5044_v9  ;;  %v4904_v46 = vld [vmem:[%s18840_s1 + $0x1348] sm:$0xff]  ;;  %v17074_v11 = vcombine.low %v5040_v13, %v5044_v9 }
 0x8a0   : > { %14297 = vmatprep.subr.bf16.mxu0 %v16843_v60  ;;  %v4908_v4 = vld [vmem:[%s18840_s1 + $0x1368] sm:$0xff] }
 0x8a1   : > { %14337 = vmatpush1.bf16.msra.mxu1 %v16978_v2  ;;  %v5032_v55 = vld [vmem:[%s18840_s1 + $0x1748] sm:$0xff]  ;;  %v16939_v30 = vcombine.high %v4904_v46, %v4908_v4  ;;  %v16938_v62 = vcombine.low %v4904_v46, %v4908_v4 }
 0x8a2   : > { %14338 = vmatprep.subr.bf16.mxu1 %v16971_v8  ;;  %v5036_v15 = vld [vmem:[%s18840_s1 + $0x1768] sm:$0xff] }
 0x8a3   : > { %14298 = vmatpush1.bf16.msra.mxu0 %v16842_v3  ;;  %v17067_v20 = vcombine.high %v5032_v55, %v5036_v15  ;;  %v4896_v2 = vld [vmem:[%s18840_s1 + $0x1308] sm:$0xff]  ;;  %v17066_v18 = vcombine.low %v5032_v55, %v5036_v15 }
 0x8a4   : > { %14299 = vmatprep.subr.bf16.mxu0 %v16835_v53  ;;  %v4900_v60 = vld [vmem:[%s18840_s1 + $0x1328] sm:$0xff] }
 0x8a5   : > { %14339 = vmatpush1.bf16.msra.mxu1 %v16970_v6  ;;  %v5024_v8 = vld [vmem:[%s18840_s1 + $0x1708] sm:$0xff]  ;;  %v16931_v61 = vcombine.high %v4896_v2, %v4900_v60  ;;  %v16930_v22 = vcombine.low %v4896_v2, %v4900_v60 }
 0x8a6   : > { %14340 = vmatprep.subr.bf16.mxu1 %v16963_v34  ;;  %v5028_v44 = vld [vmem:[%s18840_s1 + $0x1728] sm:$0xff] }
 0x8a7   : > { %14300 = vmatpush1.bf16.msra.mxu0 %v16834_v47  ;;  %v17059_v3 = vcombine.high %v5024_v8, %v5028_v44  ;;  %v4888_v6 = vld [vmem:[%s18840_s1 + $0x12c8] sm:$0xff]  ;;  %v17058_v56 = vcombine.low %v5024_v8, %v5028_v44 }
 0x8a8   : > { %14301 = vmatprep.subr.bf16.mxu0 %v16955_v41  ;;  %v4892_v53 = vld [vmem:[%s18840_s1 + $0x12e8] sm:$0xff] }
 0x8a9   : > { %14341 = vmatpush1.bf16.msra.mxu1 %v16962_v19  ;;  %v5016_v34 = vld [vmem:[%s18840_s1 + $0x16c8] sm:$0xff]  ;;  %v16923_v58 = vcombine.high %v4888_v6, %v4892_v53  ;;  %v16922_v45 = vcombine.low %v4888_v6, %v4892_v53 }
 0x8aa   : > { %14342 = vmatprep.subr.bf16.mxu1 %v17083_v16  ;;  %v5020_v36 = vld [vmem:[%s18840_s1 + $0x16e8] sm:$0xff] }
 0x8ab   : > { %14302 = vmatpush2.bf16.msra.mxu0 %v16954_v27  ;;  %v17051_v47 = vcombine.high %v5016_v34, %v5020_v36  ;;  %v4880_v19 = vld [vmem:[%s18840_s1 + $0x1288] sm:$0xff]  ;;  %v17050_v13 = vcombine.low %v5016_v34, %v5020_v36 }
 0x8ac   : > { %14303 = vmatprep.subr.bf16.mxu0 %v16947_v32  ;;  %v4884_v41 = vld [vmem:[%s18840_s1 + $0x12a8] sm:$0xff] }
 0x8ad   : > { %14343 = vmatpush2.bf16.msra.mxu1 %v17082_v29  ;;  %v5008_v16 = vld [vmem:[%s18840_s1 + $0x1688] sm:$0xff]  ;;  %v16915_v9 = vcombine.high %v4880_v19, %v4884_v41  ;;  %v16914_v4 = vcombine.low %v4880_v19, %v4884_v41 }
 0x8ae   : > { %14344 = vmatprep.subr.bf16.mxu1 %v17075_v63  ;;  %v5012_v23 = vld [vmem:[%s18840_s1 + $0x16a8] sm:$0xff] }
 0x8af   : > { %14304 = vmatpush2.bf16.msra.mxu0 %v16946_v25  ;;  %v17043_v27 = vcombine.high %v5008_v16, %v5012_v23  ;;  %v4872_v29 = vld [vmem:[%s18840_s1 + $0x1248] sm:$0xff]  ;;  %v17042_v55 = vcombine.low %v5008_v16, %v5012_v23 }
 0x8b0   : > { %14305 = vmatprep.subr.bf16.mxu0 %v16939_v30  ;;  %v4876_v32 = vld [vmem:[%s18840_s1 + $0x1268] sm:$0xff] }
 0x8b1   : > { %14345 = vmatpush2.bf16.msra.mxu1 %v17074_v11  ;;  %v5000_v63 = vld [vmem:[%s18840_s1 + $0x1648] sm:$0xff]  ;;  %v16907_v15 = vcombine.high %v4872_v29, %v4876_v32  ;;  %v16906_v60 = vcombine.low %v4872_v29, %v4876_v32 }
 0x8b2   : > { %14346 = vmatprep.subr.bf16.mxu1 %v17067_v20  ;;  %v5004_v46 = vld [vmem:[%s18840_s1 + $0x1668] sm:$0xff] }
 0x8b3   : > { %14306 = vmatpush2.bf16.msra.mxu0 %v16938_v62  ;;  %v17035_v25 = vcombine.high %v5000_v63, %v5004_v46  ;;  %v4864_v11 = vld [vmem:[%s18840_s1 + $0x1208] sm:$0xff]  ;;  %v17034_v8 = vcombine.low %v5000_v63, %v5004_v46 }
 0x8b4   : > { %14307 = vmatprep.subr.bf16.mxu0 %v16931_v61  ;;  %v4868_v30 = vld [vmem:[%s18840_s1 + $0x1228] sm:$0xff] }
 0x8b5   : > { %14347 = vmatpush2.bf16.msra.mxu1 %v17066_v18  ;;  %v4992_v20 = vld [vmem:[%s18840_s1 + $0x1608] sm:$0xff]  ;;  %v16899_v44 = vcombine.high %v4864_v11, %v4868_v30  ;;  %v16898_v53 = vcombine.low %v4864_v11, %v4868_v30 }
 0x8b6   : > { %14348 = vmatprep.subr.bf16.mxu1 %v17059_v3  ;;  %v4996_v2 = vld [vmem:[%s18840_s1 + $0x1628] sm:$0xff] }
 0x8b7   : > { %14308 = vmatpush2.bf16.msra.mxu0 %v16930_v22  ;;  %v17027_v62 = vcombine.high %v4992_v20, %v4996_v2  ;;  %v5112_v18 = vld [vmem:[%s18840_s1 + $0x19c8] sm:$0xff]  ;;  %v17026_v34 = vcombine.low %v4992_v20, %v4996_v2 }
 0x8b8   : > { %14309 = vmatprep.subr.bf16.mxu0 %v16923_v58  ;;  %v5116_v61 = vld [vmem:[%s18840_s1 + $0x19e8] sm:$0xff] }
 0x8b9   : > { %14349 = vmatpush2.bf16.msra.mxu1 %v17058_v56  ;;  %v5240_v3 = vld [vmem:[%s18840_s1 + $0x1dc8] sm:$0xff]  ;;  %v17147_v36 = vcombine.high %v5112_v18, %v5116_v61  ;;  %v17146_v41 = vcombine.low %v5112_v18, %v5116_v61 }
 0x8ba   : > { %14350 = vmatprep.subr.bf16.mxu1 %v17051_v47  ;;  %v5244_v6 = vld [vmem:[%s18840_s1 + $0x1de8] sm:$0xff] }
 0x8bb   : > { %14310 = vmatpush2.bf16.msra.mxu0 %v16922_v45  ;;  %v17275_v22 = vcombine.high %v5240_v3, %v5244_v6  ;;  %v5104_v56 = vld [vmem:[%s18840_s1 + $0x1988] sm:$0xff]  ;;  %v17274_v16 = vcombine.low %v5240_v3, %v5244_v6 }
 0x8bc   : > { %14311 = vmatprep.subr.bf16.mxu0 %v16915_v9  ;;  %v5108_v58 = vld [vmem:[%s18840_s1 + $0x19a8] sm:$0xff] }
 0x8bd   : > { %14351 = vmatpush2.bf16.msra.mxu1 %v17050_v13  ;;  %v5232_v47 = vld [vmem:[%s18840_s1 + $0x1d88] sm:$0xff]  ;;  %v17139_v23 = vcombine.high %v5104_v56, %v5108_v58 }
 0x8be   : > { %14352 = vmatprep.subr.bf16.mxu1 %v17043_v27  ;;  %v5236_v19 = vld [vmem:[%s18840_s1 + $0x1da8] sm:$0xff] }
 0x8bf   : > { %14312 = vmatpush2.bf16.msra.mxu0 %v16914_v4  ;;  %v17267_v45 = vcombine.high %v5232_v47, %v5236_v19  ;;  %v5096_v13 = vld [vmem:[%s18840_s1 + $0x1948] sm:$0xff]  ;;  %v15605_v4 = vld [vmem:[%s18848_s5] sm:$0xff] }
 0x8c0   : > { %14313 = vmatprep.subr.bf16.mxu0 %v16907_v15  ;;  %v5100_v9 = vld [vmem:[%s18840_s1 + $0x1968] sm:$0xff] }
 0x8c1   : > { %14353 = vmatpush2.bf16.msra.mxu1 %v17042_v55  ;;  %v5224_v29 = vld [vmem:[%s18840_s1 + $0x1d48] sm:$0xff]  ;;  %v17138_v55 = vcombine.low %v5104_v56, %v5108_v58  ;;  %v17131_v11 = vcombine.high %v5096_v13, %v5100_v9 }
 0x8c2   : > { %14354 = vmatprep.subr.bf16.mxu1 %v17035_v25  ;;  %v5228_v32 = vld [vmem:[%s18840_s1 + $0x1d68] sm:$0xff]  ;;  %v17266_v25 = vcombine.low %v5232_v47, %v5236_v19 }
 0x8c3   : > { %14314 = vmatpush2.bf16.msra.mxu0 %v16906_v60  ;;  %v5088_v60 = vld [vmem:[%s18840_s1 + $0x1908] sm:$0xff] }
 0x8c4   : > { %14315 = vmatprep.subr.bf16.mxu0 %v16899_v44  ;;  %v15610_v44 = vrot.slane %v15605_v4, %v5827_v7  ;;  %v5216_v18 = vld [vmem:[%s18840_s1 + $0x1d08] sm:$0xff]  ;;  %v17258_v7 = vcombine.low %v5224_v29, %v5228_v32 }
 0x8c5   : > { %14355 = vmatpush2.bf16.msra.mxu1 %v17034_v8  ;;  %v5092_v8 = vld [vmem:[%s18840_s1 + $0x1928] sm:$0xff] }
 0x8c6   : > { %14356 = vmatprep.subr.bf16.mxu1 %v17027_v62  ;;  %v5220_v61 = vld [vmem:[%s18840_s1 + $0x1d28] sm:$0xff] }
 0x8c7   : > { %14316 = vmatpush2.bf16.msra.mxu0 %v16898_v53  ;;  %v17251_v47 = vcombine.high %v5216_v18, %v5220_v61  ;;  %v5080_v19 = vld [vmem:[%s18840_s1 + $0x18c8] sm:$0xff] }
 0x8c8   : > { %14367 = vmatprep.subr.bf16.mxu0 %v17147_v36 }
 0x8c9   : > { %14357 = vmatpush2.bf16.msra.mxu1 %v17026_v34  ;;  %v17130_v34 = vcombine.low %v5096_v13, %v5100_v9  ;;  %v17122_v13 = vcombine.low %v5088_v60, %v5092_v8  ;;  %v17250_v9 = vcombine.low %v5216_v18, %v5220_v61  ;;  %v5056_v61 = vld [vmem:[%s18840_s1 + $0x1808] sm:$0xff] }
 0x8ca   : > { %14408 = vmatprep.subr.bf16.mxu1 %v17275_v22  ;;  %v14073_v27 = vpop.f32.mrf.mxu0  ;;  %14318 = vmatmul.mubr.bf16.vlgmr.msra.gmra.mxu0 %v20057_v0  ;;  %v17123_v22 = vcombine.high %v5088_v60, %v5092_v8  ;;  %v5196_v60 = vld [vmem:[%s18840_s1 + $0x1c68] sm:$0xff] }
 0x8cb   : > { %v14074_v63 = vadd.f32 %v14073_v27, %v20503_v40  ;;  %14368 = vmatpush1.bf16.msra.mxu0 %v17146_v41  ;;  %v17259_v40 = vcombine.high %v5224_v29, %v5228_v32  ;;  %14399 = vmatprep.mubr.bf16.mxu0 %v20073_v59  ;;  %v5084_v41 = vld [vmem:[%s18840_s1 + $0x18e8] sm:$0xff] }
 0x8cc   : > { %v14114_v46 = vpop.f32.mrf.mxu1  ;;  %14359 = vmatmul.mubr.bf16.vlgmr.msra.gmra.mxu1 %v20065_v51  ;;  %v14075_v15 = vpop.f32.mrf.mxu0  ;;  %14369 = vmatprep.subr.bf16.mxu0 %v17139_v23  ;;  %v17115_v27 = vcombine.high %v5080_v19, %v5084_v41 }
 0x8cd   : > { %14409 = vmatpush1.bf16.msra.mxu1 %v17274_v16  ;;  %v14115_v30 = vadd.f32 %v14114_v46, %v14074_v63  ;;  %v14076_v20 = vadd.f32 %v14075_v15, %v20512_v21  ;;  %14440 = vmatprep.mubr.bf16.mxu1 %v20080_v31  ;;  %v15614_v21 = vrot.slane %v15605_v4, %v5831_v12  ;;  %v5208_v16 = vld [vmem:[%s18840_s1 + $0x1cc8] sm:$0xff] }
 0x8ce   : > { %v14116_v2 = vpop.f32.mrf.mxu1  ;;  %14410 = vmatprep.subr.bf16.mxu1 %v17267_v45  ;;  %v14077_v62 = vpop.f32.mrf.mxu0  ;;  %v5212_v12 = vld [vmem:[%s18840_s1 + $0x1ce8] sm:$0xff]  ;;  %v17114_v15 = vcombine.low %v5080_v19, %v5084_v41 }
 0x8cf   : > { %v15597_v3 = vmax.f32 %v14115_v30, 0.0  ;;  %v14117_v6 = vadd.f32 %v14116_v2, %v14076_v20  ;;  %14370 = vmatpush1.bf16.msra.mxu0 %v17138_v55  ;;  %v17243_v32 = vcombine.high %v5208_v16, %v5212_v12  ;;  %v5072_v63 = vld [vmem:[%s18840_s1 + $0x1888] sm:$0xff] }
 0x8d0   : > { %v14118_v53 = vpop.f32.mrf.mxu1  ;;  %v14078_v36 = vpop.f32.mrf.mxu0  ;;  %14371 = vmatprep.subr.bf16.mxu0 %v17131_v11  ;;  %v5076_v46 = vld [vmem:[%s18840_s1 + $0x18a8] sm:$0xff] }
 0x8d1   : > { %14411 = vmatpush1.bf16.msra.mxu1 %v17266_v25  ;;  %v15598_v56 = vmax.f32 %v14117_v6, 0.0  ;;  %v15647_v23 = vmul.f32 %v15610_v44, %v15597_v3  ;;  %v5200_v4 = vld [vmem:[%s18840_s1 + $0x1c88] sm:$0xff]  ;;  %v17242_v25 = vcombine.low %v5208_v16, %v5212_v12  ;;  %v17107_v11 = vcombine.high %v5072_v63, %v5076_v46 }
 0x8d2   : > { %v14119_v58 = vpop.f32.mrf.mxu1  ;;  %14412 = vmatprep.subr.bf16.mxu1 %v17259_v40  ;;  %v5204_v55 = vld [vmem:[%s18840_s1 + $0x1ca8] sm:$0xff]  ;;  %v17106_v8 = vcombine.low %v5072_v63, %v5076_v46 }
 0x8d3   : > { %v15648_v45 = vmul.f32 %v15614_v21, %v15598_v56  ;;  %14372 = vmatpush1.bf16.msra.mxu0 %v17130_v34  ;;  %v17235_v30 = vcombine.high %v5200_v4, %v5204_v55  ;;  %v5064_v20 = vld [vmem:[%s18840_s1 + $0x1848] sm:$0xff]  ;;  %v17234_v44 = vcombine.low %v5200_v4, %v5204_v55 }
 0x8d4   : > { %14373 = vmatprep.subr.bf16.mxu0 %v17123_v22  ;;  %v5068_v2 = vld [vmem:[%s18840_s1 + $0x1868] sm:$0xff] }
 0x8d5   : > { %14413 = vmatpush1.bf16.msra.mxu1 %v17258_v7  ;;  %v20593_v29 = vadd.f32 %v15648_v45, %v15647_v23  ;;  %v5192_v40 = vld [vmem:[%s18840_s1 + $0x1c48] sm:$0xff]  ;;  %v17099_v62 = vcombine.high %v5064_v20, %v5068_v2  ;;  %v17098_v53 = vcombine.low %v5064_v20, %v5068_v2 }
 0x8d6   : > { %14414 = vmatprep.subr.bf16.mxu1 %v17251_v47  ;;  %v17227_v18 = vcombine.high %v5192_v40, %v5196_v60  ;;  %v5060_v3 = vld [vmem:[%s18840_s1 + $0x1828] sm:$0xff]  ;;  %v17226_v34 = vcombine.low %v5192_v40, %v5196_v60 }
 0x8d7   : > { %14374 = vmatpush1.bf16.msra.mxu0 %v17122_v13  ;;  %v5184_v6 = vld [vmem:[%s18840_s1 + $0x1c08] sm:$0xff]  ;;  %v17091_v36 = vcombine.high %v5056_v61, %v5060_v3  ;;  %v17090_v19 = vcombine.low %v5056_v61, %v5060_v3 }
 0x8d8   : > { %14375 = vmatprep.subr.bf16.mxu0 %v17115_v27  ;;  %v5188_v21 = vld [vmem:[%s18840_s1 + $0x1c28] sm:$0xff] }
 0x8d9   : > { %14415 = vmatpush1.bf16.msra.mxu1 %v17250_v9  ;;  %v17219_v7 = vcombine.high %v5184_v6, %v5188_v21  ;;  %v5176_v22 = vld [vmem:[%s18840_s1 + $0x1bc8] sm:$0xff]  ;;  %v17218_v41 = vcombine.low %v5184_v6, %v5188_v21 }
 0x8da   : > { %14416 = vmatprep.subr.bf16.mxu1 %v17243_v32  ;;  %v5180_v56 = vld [vmem:[%s18840_s1 + $0x1be8] sm:$0xff] }
 0x8db   : > { %14376 = vmatpush1.bf16.msra.mxu0 %v17114_v15  ;;  %v5304_v58 = vld [vmem:[%s18840_s1 + $0x1fc8] sm:$0xff]  ;;  %v17211_v16 = vcombine.high %v5176_v22, %v5180_v56  ;;  %v17210_v27 = vcombine.low %v5176_v22, %v5180_v56 }
 0x8dc   : > { %14377 = vmatprep.subr.bf16.mxu0 %v17107_v11  ;;  %v5308_v47 = vld [vmem:[%s18840_s1 + $0x1fe8] sm:$0xff] }
 0x8dd   : > { %14417 = vmatpush1.bf16.msra.mxu1 %v17242_v25  ;;  %v17339_v12 = vcombine.high %v5304_v58, %v5308_v47  ;;  %v5168_v23 = vld [vmem:[%s18840_s1 + $0x1b88] sm:$0xff]  ;;  %v17338_v32 = vcombine.low %v5304_v58, %v5308_v47 }
 0x8de   : > { %14418 = vmatprep.subr.bf16.mxu1 %v17235_v30  ;;  %v5172_v45 = vld [vmem:[%s18840_s1 + $0x1ba8] sm:$0xff] }
 0x8df   : > { %14378 = vmatpush1.bf16.msra.mxu0 %v17106_v8  ;;  %v5296_v13 = vld [vmem:[%s18840_s1 + $0x1f88] sm:$0xff]  ;;  %v17203_v63 = vcombine.high %v5168_v23, %v5172_v45  ;;  %v17202_v11 = vcombine.low %v5168_v23, %v5172_v45 }
 0x8e0   : > { %14379 = vmatprep.subr.bf16.mxu0 %v17099_v62  ;;  %v5300_v9 = vld [vmem:[%s18840_s1 + $0x1fa8] sm:$0xff] }
 0x8e1   : > { %14419 = vmatpush1.bf16.msra.mxu1 %v17234_v44  ;;  %v17331_v46 = vcombine.high %v5296_v13, %v5300_v9  ;;  %v5160_v4 = vld [vmem:[%s18840_s1 + $0x1b48] sm:$0xff]  ;;  %v17330_v30 = vcombine.low %v5296_v13, %v5300_v9 }
 0x8e2   : > { %14420 = vmatprep.subr.bf16.mxu1 %v17227_v18  ;;  %v5164_v55 = vld [vmem:[%s18840_s1 + $0x1b68] sm:$0xff] }
 0x8e3   : > { %14380 = vmatpush1.bf16.msra.mxu0 %v17098_v53  ;;  %v5288_v15 = vld [vmem:[%s18840_s1 + $0x1f48] sm:$0xff]  ;;  %v17195_v20 = vcombine.high %v5160_v4, %v5164_v55  ;;  %v17194_v62 = vcombine.low %v5160_v4, %v5164_v55 }
 0x8e4   : > { %14381 = vmatprep.subr.bf16.mxu0 %v17091_v36  ;;  %v5292_v25 = vld [vmem:[%s18840_s1 + $0x1f68] sm:$0xff] }
 0x8e5   : > { %14421 = vmatpush1.bf16.msra.mxu1 %v17226_v34  ;;  %v17323_v2 = vcombine.high %v5288_v15, %v5292_v25  ;;  %v5152_v40 = vld [vmem:[%s18840_s1 + $0x1b08] sm:$0xff]  ;;  %v17322_v18 = vcombine.low %v5288_v15, %v5292_v25 }
 0x8e6   : > { %14422 = vmatprep.subr.bf16.mxu1 %v17219_v7  ;;  %v5156_v60 = vld [vmem:[%s18840_s1 + $0x1b28] sm:$0xff] }
 0x8e7   : > { %14382 = vmatpush1.bf16.msra.mxu0 %v17090_v19  ;;  %v5280_v8 = vld [vmem:[%s18840_s1 + $0x1f08] sm:$0xff]  ;;  %v17187_v61 = vcombine.high %v5152_v40, %v5156_v60  ;;  %v17186_v36 = vcombine.low %v5152_v40, %v5156_v60 }
 0x8e8   : > { %14383 = vmatprep.subr.bf16.mxu0 %v17211_v16  ;;  %v5284_v44 = vld [vmem:[%s18840_s1 + $0x1f28] sm:$0xff] }
 0x8e9   : > { %14423 = vmatpush1.bf16.msra.mxu1 %v17218_v41  ;;  %v17315_v3 = vcombine.high %v5280_v8, %v5284_v44  ;;  %v5144_v6 = vld [vmem:[%s18840_s1 + $0x1ac8] sm:$0xff]  ;;  %v17314_v7 = vcombine.low %v5280_v8, %v5284_v44 }
 0x8ea   : > { %14424 = vmatprep.subr.bf16.mxu1 %v17339_v12  ;;  %v5148_v21 = vld [vmem:[%s18840_s1 + $0x1ae8] sm:$0xff] }
 0x8eb   : > { %14384 = vmatpush2.bf16.msra.mxu0 %v17210_v27  ;;  %v5272_v53 = vld [vmem:[%s18840_s1 + $0x1ec8] sm:$0xff]  ;;  %v17179_v22 = vcombine.high %v5144_v6, %v5148_v21  ;;  %v17178_v16 = vcombine.low %v5144_v6, %v5148_v21 }
 0x8ec   : > { %14385 = vmatprep.subr.bf16.mxu0 %v17203_v63  ;;  %v5276_v34 = vld [vmem:[%s18840_s1 + $0x1ee8] sm:$0xff] }
 0x8ed   : > { %14425 = vmatpush2.bf16.msra.mxu1 %v17338_v32  ;;  %v17307_v56 = vcombine.high %v5272_v53, %v5276_v34  ;;  %v5136_v58 = vld [vmem:[%s18840_s1 + $0x1a88] sm:$0xff]  ;;  %v17306_v12 = vcombine.low %v5272_v53, %v5276_v34  ;;  %v5839_v34 = vsub.s32 3, %v20137_v17 }
 0x8ee   : > { %14426 = vmatprep.subr.bf16.mxu1 %v17331_v46  ;;  %v5140_v47 = vld [vmem:[%s18840_s1 + $0x1aa8] sm:$0xff] }
 0x8ef   : > { %14386 = vmatpush2.bf16.msra.mxu0 %v17202_v11  ;;  %v5264_v19 = vld [vmem:[%s18840_s1 + $0x1e88] sm:$0xff]  ;;  %v17171_v23 = vcombine.high %v5136_v58, %v5140_v47  ;;  %v17170_v63 = vcombine.low %v5136_v58, %v5140_v47 }
 0x8f0   : > { %14387 = vmatprep.subr.bf16.mxu0 %v17195_v20  ;;  %v5268_v41 = vld [vmem:[%s18840_s1 + $0x1ea8] sm:$0xff] }
 0x8f1   : > { %14427 = vmatpush2.bf16.msra.mxu1 %v17330_v30  ;;  %v17299_v45 = vcombine.high %v5264_v19, %v5268_v41  ;;  %v5128_v13 = vld [vmem:[%s18840_s1 + $0x1a48] sm:$0xff]  ;;  %v17298_v46 = vcombine.low %v5264_v19, %v5268_v41 }
 0x8f2   : > { %14428 = vmatprep.subr.bf16.mxu1 %v17323_v2  ;;  %v5132_v9 = vld [vmem:[%s18840_s1 + $0x1a68] sm:$0xff] }
 0x8f3   : > { %14388 = vmatpush2.bf16.msra.mxu0 %v17194_v62  ;;  %v5256_v27 = vld [vmem:[%s18840_s1 + $0x1e48] sm:$0xff]  ;;  %v17163_v4 = vcombine.high %v5128_v13, %v5132_v9  ;;  %v17162_v20 = vcombine.low %v5128_v13, %v5132_v9 }
 0x8f4   : > { %14389 = vmatprep.subr.bf16.mxu0 %v17187_v61  ;;  %v5260_v32 = vld [vmem:[%s18840_s1 + $0x1e68] sm:$0xff] }
 0x8f5   : > { %14429 = vmatpush2.bf16.msra.mxu1 %v17322_v18  ;;  %v17291_v55 = vcombine.high %v5256_v27, %v5260_v32  ;;  %v5120_v15 = vld [vmem:[%s18840_s1 + $0x1a08] sm:$0xff]  ;;  %v17290_v2 = vcombine.low %v5256_v27, %v5260_v32 }
 0x8f6   : > { %14430 = vmatprep.subr.bf16.mxu1 %v17315_v3  ;;  %v5124_v25 = vld [vmem:[%s18840_s1 + $0x1a28] sm:$0xff]  ;;  %v5835_v3 = vsub.s32 2, %v20137_v17 }
 0x8f7   : > { %14390 = vmatpush2.bf16.msra.mxu0 %v17186_v36  ;;  %v5248_v11 = vld [vmem:[%s18840_s1 + $0x1e08] sm:$0xff]  ;;  %v17155_v40 = vcombine.high %v5120_v15, %v5124_v25  ;;  %v17154_v61 = vcombine.low %v5120_v15, %v5124_v25 }
 0x8f8   : > { %14391 = vmatprep.subr.bf16.mxu0 %v17179_v22  ;;  %v5252_v30 = vld [vmem:[%s18840_s1 + $0x1e28] sm:$0xff] }
 0x8f9   : > { %14431 = vmatpush2.bf16.msra.mxu1 %v17314_v7  ;;  %v17283_v60 = vcombine.high %v5248_v11, %v5252_v30  ;;  %v5368_v8 = vld [vmem:[%s18840_s1 + $0x21c8] sm:$0xff]  ;;  %v17282_v6 = vcombine.low %v5248_v11, %v5252_v30 }
 0x8fa   : > { %14432 = vmatprep.subr.bf16.mxu1 %v17307_v56  ;;  %v5372_v44 = vld [vmem:[%s18840_s1 + $0x21e8] sm:$0xff] }
 0x8fb   : > { %14392 = vmatpush2.bf16.msra.mxu0 %v17178_v16  ;;  %v5496_v62 = vld [vmem:[%s18840_s1 + $0x25c8] sm:$0xff]  ;;  %v17403_v21 = vcombine.high %v5368_v8, %v5372_v44  ;;  %v17402_v19 = vcombine.low %v5368_v8, %v5372_v44 }
 0x8fc   : > { %14393 = vmatprep.subr.bf16.mxu0 %v17171_v23  ;;  %v5500_v18 = vld [vmem:[%s18840_s1 + $0x25e8] sm:$0xff] }
 0x8fd   : > { %14433 = vmatpush2.bf16.msra.mxu1 %v17306_v12  ;;  %v17531_v53 = vcombine.high %v5496_v62, %v5500_v18  ;;  %v5360_v36 = vld [vmem:[%s18840_s1 + $0x2188] sm:$0xff]  ;;  %v17530_v41 = vcombine.low %v5496_v62, %v5500_v18 }
 0x8fe   : > { %14434 = vmatprep.subr.bf16.mxu1 %v17299_v45  ;;  %v5364_v7 = vld [vmem:[%s18840_s1 + $0x21a8] sm:$0xff] }
 0x8ff   : > { %14394 = vmatpush2.bf16.msra.mxu0 %v17170_v63  ;;  %v5488_v22 = vld [vmem:[%s18840_s1 + $0x2588] sm:$0xff]  ;;  %v17395_v16 = vcombine.high %v5360_v36, %v5364_v7 }
 0x900   : > { %14395 = vmatprep.subr.bf16.mxu0 %v17163_v4  ;;  %v5492_v56 = vld [vmem:[%s18840_s1 + $0x25a8] sm:$0xff]  ;;  %v17394_v4 = vcombine.low %v5360_v36, %v5364_v7 }
 0x901   : > { %14435 = vmatpush2.bf16.msra.mxu1 %v17298_v46  ;;  %v18054_v58 = vld [vmem:[%s18846_s24] sm:$0xff]  ;;  %v17523_v23 = vcombine.high %v5488_v22, %v5492_v56  ;;  %v17522_v15 = vcombine.low %v5488_v22, %v5492_v56 }
 0x902   : > { %14436 = vmatprep.subr.bf16.mxu1 %v17291_v55  ;;  %v5836_v47 = vrot.slane %v18054_v58, %v5835_v3  ;;  %v5840_v12 = vrot.slane %v18054_v58, %v5839_v34  ;;  %v5352_v45 = vld [vmem:[%s18840_s1 + $0x2148] sm:$0xff] }
 0x903   : > { %14396 = vmatpush2.bf16.msra.mxu0 %v17162_v20  ;;  %v5356_v13 = vld [vmem:[%s18840_s1 + $0x2168] sm:$0xff] }
 0x904   : > { %14397 = vmatprep.subr.bf16.mxu0 %v17155_v40  ;;  %v5480_v27 = vld [vmem:[%s18840_s1 + $0x2548] sm:$0xff]  ;;  %v17387_v25 = vcombine.high %v5352_v45, %v5356_v13 }
 0x905   : > { %14437 = vmatpush2.bf16.msra.mxu1 %v17290_v2  ;;  %v5484_v32 = vld [vmem:[%s18840_s1 + $0x2568] sm:$0xff] }
 0x906   : > { %14438 = vmatprep.subr.bf16.mxu1 %v17283_v60  ;;  %v17515_v2 = vcombine.high %v5480_v27, %v5484_v32  ;;  %v5344_v40 = vld [vmem:[%s18840_s1 + $0x2108] sm:$0xff] }
 0x907   : > { %14398 = vmatpush2.bf16.msra.mxu0 %v17154_v61  ;;  %v5348_v60 = vld [vmem:[%s18840_s1 + $0x2128] sm:$0xff] }
 0x908   : > { %14449 = vmatprep.subr.bf16.mxu0 %v17403_v21  ;;  %v5472_v44 = vld [vmem:[%s18840_s1 + $0x2508] sm:$0xff]  ;;  %v17379_v36 = vcombine.high %v5344_v40, %v5348_v60 }
 0x909   : > { %14439 = vmatpush2.bf16.msra.mxu1 %v17282_v6  ;;  %v5476_v62 = vld [vmem:[%s18840_s1 + $0x2528] sm:$0xff]  ;;  %v17386_v6 = vcombine.low %v5352_v45, %v5356_v13 }
 0x90a   : > { %14490 = vmatprep.subr.bf16.mxu1 %v17531_v53  ;;  %v14155_v9 = vpop.f32.mrf.mxu0  ;;  %14400 = vmatmul.mubr.bf16.vlgmr.msra.gmra.mxu0 %v20150_v54  ;;  %v17514_v53 = vcombine.low %v5480_v27, %v5484_v32  ;;  %v17507_v22 = vcombine.high %v5472_v44, %v5476_v62  ;;  %v5336_v56 = vld [vmem:[%s18840_s1 + $0x20c8] sm:$0xff] }
 0x90b   : > { %v14156_v63 = vadd.f32 %v14155_v9, %v5836_v47  ;;  %14450 = vmatpush1.bf16.msra.mxu0 %v17402_v19  ;;  %14481 = vmatprep.mubr.bf16.mxu0 %v20170_v52  ;;  %v5340_v58 = vld [vmem:[%s18840_s1 + $0x20e8] sm:$0xff] }
 0x90c   : > { %v14196_v46 = vpop.f32.mrf.mxu1  ;;  %14441 = vmatmul.mubr.bf16.vlgmr.msra.gmra.mxu1 %v20160_v35  ;;  %v14157_v55 = vpop.f32.mrf.mxu0  ;;  %14451 = vmatprep.subr.bf16.mxu0 %v17395_v16  ;;  %v5464_v47 = vld [vmem:[%s18840_s1 + $0x24c8] sm:$0xff]  ;;  %v17506_v16 = vcombine.low %v5472_v44, %v5476_v62  ;;  %v17370_v32 = vcombine.low %v5336_v56, %v5340_v58 }
 0x90d   : > { %14491 = vmatpush1.bf16.msra.mxu1 %v17530_v41  ;;  %v20660_v11 = vadd.f32 %v14196_v46, %v14156_v63  ;;  %v14158_v30 = vadd.f32 %v14157_v55, %v5840_v12  ;;  %14522 = vmatprep.mubr.bf16.mxu1 %v20177_v57  ;;  %v5468_v19 = vld [vmem:[%s18840_s1 + $0x24e8] sm:$0xff]  ;;  %v17378_v41 = vcombine.low %v5344_v40, %v5348_v60 }
 0x90e   : > { %v14198_v20 = vpop.f32.mrf.mxu1  ;;  %14492 = vmatprep.subr.bf16.mxu1 %v17523_v23  ;;  %v14159_v8 = vpop.f32.mrf.mxu0  ;;  %v17371_v12 = vcombine.high %v5336_v56, %v5340_v58  ;;  %v17499_v23 = vcombine.high %v5464_v47, %v5468_v19  ;;  %v5328_v45 = vld [vmem:[%s18840_s1 + $0x2088] sm:$0xff]  ;;  %v17498_v63 = vcombine.low %v5464_v47, %v5468_v19 }
 0x90f   : > { %v20668_v18 = vadd.f32 %v14198_v20, %v14158_v30  ;;  %14452 = vmatpush1.bf16.msra.mxu0 %v17394_v4  ;;  %v5332_v13 = vld [vmem:[%s18840_s1 + $0x20a8] sm:$0xff] }
 0x910   : > { %v14200_v61 = vpop.f32.mrf.mxu1  ;;  %v14160_v21 = vpop.f32.mrf.mxu0  ;;  %14453 = vmatprep.subr.bf16.mxu0 %v17387_v25  ;;  %v5456_v9 = vld [vmem:[%s18840_s1 + $0x2488] sm:$0xff]  ;;  %v17363_v46 = vcombine.high %v5328_v45, %v5332_v13  ;;  %v17362_v20 = vcombine.low %v5328_v45, %v5332_v13 }
 0x911   : > { %14493 = vmatpush1.bf16.msra.mxu1 %v17522_v15  ;;  %v5460_v27 = vld [vmem:[%s18840_s1 + $0x24a8] sm:$0xff] }
 0x912   : > { %v14201_v7 = vpop.f32.mrf.mxu1  ;;  %14494 = vmatprep.subr.bf16.mxu1 %v17515_v2  ;;  %v17491_v4 = vcombine.high %v5456_v9, %v5460_v27  ;;  %v5320_v55 = vld [vmem:[%s18840_s1 + $0x2048] sm:$0xff]  ;;  %v17490_v2 = vcombine.low %v5456_v9, %v5460_v27 }
 0x913   : > { %14454 = vmatpush1.bf16.msra.mxu0 %v17386_v6  ;;  %v5324_v15 = vld [vmem:[%s18840_s1 + $0x2068] sm:$0xff] }
 0x914   : > { %14455 = vmatprep.subr.bf16.mxu0 %v17379_v36  ;;  %v5448_v25 = vld [vmem:[%s18840_s1 + $0x2448] sm:$0xff]  ;;  %v17355_v40 = vcombine.high %v5320_v55, %v5324_v15  ;;  %v17354_v6 = vcombine.low %v5320_v55, %v5324_v15 }
 0x915   : > { %14495 = vmatpush1.bf16.msra.mxu1 %v17514_v53  ;;  %v5452_v30 = vld [vmem:[%s18840_s1 + $0x2468] sm:$0xff] }
 0x916   : > { %14496 = vmatprep.subr.bf16.mxu1 %v17507_v22  ;;  %v17483_v60 = vcombine.high %v5448_v25, %v5452_v30  ;;  %v5312_v8 = vld [vmem:[%s18840_s1 + $0x2008] sm:$0xff]  ;;  %v17482_v21 = vcombine.low %v5448_v25, %v5452_v30 }
 0x917   : > { %14456 = vmatpush1.bf16.msra.mxu0 %v17378_v41  ;;  %v5316_v44 = vld [vmem:[%s18840_s1 + $0x2028] sm:$0xff] }
 0x918   : > { %14457 = vmatprep.subr.bf16.mxu0 %v17371_v12  ;;  %v5440_v62 = vld [vmem:[%s18840_s1 + $0x2408] sm:$0xff]  ;;  %v17347_v53 = vcombine.high %v5312_v8, %v5316_v44  ;;  %v17346_v47 = vcombine.low %v5312_v8, %v5316_v44 }
 0x919   : > { %14497 = vmatpush1.bf16.msra.mxu1 %v17506_v16  ;;  %v5444_v61 = vld [vmem:[%s18840_s1 + $0x2428] sm:$0xff] }
 0x91a   : > { %14498 = vmatprep.subr.bf16.mxu1 %v17499_v23  ;;  %v17475_v36 = vcombine.high %v5440_v62, %v5444_v61  ;;  %v5432_v7 = vld [vmem:[%s18840_s1 + $0x23c8] sm:$0xff]  ;;  %v17474_v19 = vcombine.low %v5440_v62, %v5444_v61 }
 0x91b   : > { %14458 = vmatpush1.bf16.msra.mxu0 %v17370_v32  ;;  %v5436_v22 = vld [vmem:[%s18840_s1 + $0x23e8] sm:$0xff] }
 0x91c   : > { %14459 = vmatprep.subr.bf16.mxu0 %v17363_v46  ;;  %v5560_v56 = vld [vmem:[%s18840_s1 + $0x27c8] sm:$0xff]  ;;  %v17467_v41 = vcombine.high %v5432_v7, %v5436_v22  ;;  %v17466_v9 = vcombine.low %v5432_v7, %v5436_v22 }
 0x91d   : > { %14499 = vmatpush1.bf16.msra.mxu1 %v17498_v63  ;;  %v5564_v58 = vld [vmem:[%s18840_s1 + $0x27e8] sm:$0xff] }
 0x91e   : > { %14500 = vmatprep.subr.bf16.mxu1 %v17491_v4  ;;  %v17595_v16 = vcombine.high %v5560_v56, %v5564_v58  ;;  %v5424_v12 = vld [vmem:[%s18840_s1 + $0x2388] sm:$0xff]  ;;  %v17594_v27 = vcombine.low %v5560_v56, %v5564_v58 }
 0x91f   : > { %14460 = vmatpush1.bf16.msra.mxu0 %v17362_v20  ;;  %v5428_v23 = vld [vmem:[%s18840_s1 + $0x23a8] sm:$0xff] }
 0x920   : > { %14461 = vmatprep.subr.bf16.mxu0 %v17355_v40  ;;  %v5552_v45 = vld [vmem:[%s18840_s1 + $0x2788] sm:$0xff]  ;;  %v17459_v32 = vcombine.high %v5424_v12, %v5428_v23  ;;  %v17458_v25 = vcombine.low %v5424_v12, %v5428_v23 }
 0x921   : > { %14501 = vmatpush1.bf16.msra.mxu1 %v17490_v2  ;;  %v5556_v13 = vld [vmem:[%s18840_s1 + $0x27a8] sm:$0xff] }
 0x922   : > { %14502 = vmatprep.subr.bf16.mxu1 %v17483_v60  ;;  %v17587_v63 = vcombine.high %v5552_v45, %v5556_v13  ;;  %v5416_v46 = vld [vmem:[%s18840_s1 + $0x2348] sm:$0xff]  ;;  %v17586_v30 = vcombine.low %v5552_v45, %v5556_v13 }
 0x923   : > { %14462 = vmatpush1.bf16.msra.mxu0 %v17354_v6  ;;  %v5420_v4 = vld [vmem:[%s18840_s1 + $0x2368] sm:$0xff] }
 0x924   : > { %14463 = vmatprep.subr.bf16.mxu0 %v17347_v53  ;;  %v5544_v55 = vld [vmem:[%s18840_s1 + $0x2748] sm:$0xff]  ;;  %v17451_v20 = vcombine.high %v5416_v46, %v5420_v4  ;;  %v17450_v62 = vcombine.low %v5416_v46, %v5420_v4 }
 0x925   : > { %14503 = vmatpush1.bf16.msra.mxu1 %v17482_v21  ;;  %v5548_v15 = vld [vmem:[%s18840_s1 + $0x2768] sm:$0xff] }
 0x926   : > { %14504 = vmatprep.subr.bf16.mxu1 %v17475_v36  ;;  %v17579_v2 = vcombine.high %v5544_v55, %v5548_v15  ;;  %v5408_v40 = vld [vmem:[%s18840_s1 + $0x2308] sm:$0xff]  ;;  %v17578_v61 = vcombine.low %v5544_v55, %v5548_v15 }
 0x927   : > { %14464 = vmatpush1.bf16.msra.mxu0 %v17346_v47  ;;  %v5412_v60 = vld [vmem:[%s18840_s1 + $0x2328] sm:$0xff] }
 0x928   : > { %14465 = vmatprep.subr.bf16.mxu0 %v17467_v41  ;;  %v5536_v8 = vld [vmem:[%s18840_s1 + $0x2708] sm:$0xff]  ;;  %v17443_v6 = vcombine.high %v5408_v40, %v5412_v60  ;;  %v17442_v56 = vcombine.low %v5408_v40, %v5412_v60 }
 0x929   : > { %14505 = vmatpush1.bf16.msra.mxu1 %v17474_v19  ;;  %v5540_v44 = vld [vmem:[%s18840_s1 + $0x2728] sm:$0xff] }
 0x92a   : > { %14506 = vmatprep.subr.bf16.mxu1 %v17595_v16  ;;  %v17571_v21 = vcombine.high %v5536_v8, %v5540_v44  ;;  %v5400_v53 = vld [vmem:[%s18840_s1 + $0x22c8] sm:$0xff]  ;;  %v17570_v58 = vcombine.low %v5536_v8, %v5540_v44 }
 0x92b   : > { %14466 = vmatpush2.bf16.msra.mxu0 %v17466_v9  ;;  %v5404_v36 = vld [vmem:[%s18840_s1 + $0x22e8] sm:$0xff] }
 0x92c   : > { %14467 = vmatprep.subr.bf16.mxu0 %v17459_v32  ;;  %v5528_v7 = vld [vmem:[%s18840_s1 + $0x26c8] sm:$0xff]  ;;  %v17435_v47 = vcombine.high %v5400_v53, %v5404_v36  ;;  %v17434_v45 = vcombine.low %v5400_v53, %v5404_v36 }
 0x92d   : > { %14507 = vmatpush2.bf16.msra.mxu1 %v17594_v27  ;;  %v5532_v22 = vld [vmem:[%s18840_s1 + $0x26e8] sm:$0xff] }
 0x92e   : > { %14508 = vmatprep.subr.bf16.mxu1 %v17587_v63  ;;  %v17563_v19 = vcombine.high %v5528_v7, %v5532_v22  ;;  %v5392_v41 = vld [vmem:[%s18840_s1 + $0x2288] sm:$0xff]  ;;  %v17562_v13 = vcombine.low %v5528_v7, %v5532_v22 }
 0x92f   : > { %14468 = vmatpush2.bf16.msra.mxu0 %v17458_v25  ;;  %v5396_v16 = vld [vmem:[%s18840_s1 + $0x22a8] sm:$0xff] }
 0x930   : > { %14469 = vmatprep.subr.bf16.mxu0 %v17451_v20  ;;  %v5520_v12 = vld [vmem:[%s18840_s1 + $0x2688] sm:$0xff]  ;;  %v17427_v9 = vcombine.high %v5392_v41, %v5396_v16  ;;  %v17426_v55 = vcombine.low %v5392_v41, %v5396_v16 }
 0x931   : > { %14509 = vmatpush2.bf16.msra.mxu1 %v17586_v30  ;;  %v5524_v23 = vld [vmem:[%s18840_s1 + $0x26a8] sm:$0xff] }
 0x932   : > { %14510 = vmatprep.subr.bf16.mxu1 %v17579_v2  ;;  %v17555_v27 = vcombine.high %v5520_v12, %v5524_v23  ;;  %v5384_v32 = vld [vmem:[%s18840_s1 + $0x2248] sm:$0xff]  ;;  %v17554_v15 = vcombine.low %v5520_v12, %v5524_v23 }
 0x933   : > { %14470 = vmatpush2.bf16.msra.mxu0 %v17450_v62  ;;  %v5388_v63 = vld [vmem:[%s18840_s1 + $0x2268] sm:$0xff] }
 0x934   : > { %14471 = vmatprep.subr.bf16.mxu0 %v17443_v6  ;;  %v5512_v46 = vld [vmem:[%s18840_s1 + $0x2648] sm:$0xff]  ;;  %v17419_v25 = vcombine.high %v5384_v32, %v5388_v63  ;;  %v17418_v8 = vcombine.low %v5384_v32, %v5388_v63 }
 0x935   : > { %14511 = vmatpush2.bf16.msra.mxu1 %v17578_v61  ;;  %v5516_v4 = vld [vmem:[%s18840_s1 + $0x2668] sm:$0xff] }
 0x936   : > { %14512 = vmatprep.subr.bf16.mxu1 %v17571_v21  ;;  %v17547_v30 = vcombine.high %v5512_v46, %v5516_v4  ;;  %v5376_v20 = vld [vmem:[%s18840_s1 + $0x2208] sm:$0xff]  ;;  %v17546_v44 = vcombine.low %v5512_v46, %v5516_v4 }
 0x937   : > { %14472 = vmatpush2.bf16.msra.mxu0 %v17442_v56  ;;  %v5380_v2 = vld [vmem:[%s18840_s1 + $0x2228] sm:$0xff] }
 0x938   : > { %14473 = vmatprep.subr.bf16.mxu0 %v17435_v47  ;;  %v5504_v40 = vld [vmem:[%s18840_s1 + $0x2608] sm:$0xff]  ;;  %v17411_v62 = vcombine.high %v5376_v20, %v5380_v2  ;;  %v17410_v7 = vcombine.low %v5376_v20, %v5380_v2 }
 0x939   : > { %14513 = vmatpush2.bf16.msra.mxu1 %v17570_v58  ;;  %v5508_v60 = vld [vmem:[%s18840_s1 + $0x2628] sm:$0xff] }
 0x93a   : > { %14514 = vmatprep.subr.bf16.mxu1 %v17563_v19  ;;  %v17539_v61 = vcombine.high %v5504_v40, %v5508_v60  ;;  %v5624_v6 = vld [vmem:[%s18840_s1 + $0x29c8] sm:$0xff]  ;;  %v17538_v22 = vcombine.low %v5504_v40, %v5508_v60 }
 0x93b   : > { %14474 = vmatpush2.bf16.msra.mxu0 %v17434_v45  ;;  %v5628_v21 = vld [vmem:[%s18840_s1 + $0x29e8] sm:$0xff] }
 0x93c   : > { %14475 = vmatprep.subr.bf16.mxu0 %v17427_v9  ;;  %v5752_v53 = vld [vmem:[%s18840_s1 + $0x2dc8] sm:$0xff]  ;;  %v17659_v56 = vcombine.high %v5624_v6, %v5628_v21  ;;  %v17658_v12 = vcombine.low %v5624_v6, %v5628_v21 }
 0x93d   : > { %14515 = vmatpush2.bf16.msra.mxu1 %v17562_v13  ;;  %v5756_v36 = vld [vmem:[%s18840_s1 + $0x2de8] sm:$0xff] }
 0x93e   : > { %14516 = vmatprep.subr.bf16.mxu1 %v17555_v27  ;;  %v17787_v58 = vcombine.high %v5752_v53, %v5756_v36  ;;  %v5616_v47 = vld [vmem:[%s18840_s1 + $0x2988] sm:$0xff]  ;;  %v17786_v23 = vcombine.low %v5752_v53, %v5756_v36 }
 0x93f   : > { %14476 = vmatpush2.bf16.msra.mxu0 %v17426_v55  ;;  %v5620_v19 = vld [vmem:[%s18840_s1 + $0x29a8] sm:$0xff] }
 0x940   : > { %14477 = vmatprep.subr.bf16.mxu0 %v17419_v25  ;;  %v5744_v41 = vld [vmem:[%s18840_s1 + $0x2d88] sm:$0xff]  ;;  %v17651_v45 = vcombine.high %v5616_v47, %v5620_v19 }
 0x941   : > { %14517 = vmatpush2.bf16.msra.mxu1 %v17554_v15  ;;  %v5748_v16 = vld [vmem:[%s18840_s1 + $0x2da8] sm:$0xff]  ;;  %v17650_v15 = vcombine.low %v5616_v47, %v5620_v19 }
 0x942   : > { %14518 = vmatprep.subr.bf16.mxu1 %v17547_v30  ;;  %v17779_v13 = vcombine.high %v5744_v41, %v5748_v16  ;;  %v5608_v9 = vld [vmem:[%s18840_s1 + $0x2948] sm:$0xff]  ;;  %v17778_v30 = vcombine.low %v5744_v41, %v5748_v16 }
 0x943   : > { %14478 = vmatpush2.bf16.msra.mxu0 %v17418_v8  ;;  %v5612_v27 = vld [vmem:[%s18840_s1 + $0x2968] sm:$0xff] }
 0x944   : > { %14479 = vmatprep.subr.bf16.mxu0 %v17411_v62  ;;  %v5736_v63 = vld [vmem:[%s18840_s1 + $0x2d48] sm:$0xff]  ;;  %v17643_v20 = vcombine.high %v5608_v9, %v5612_v27 }
 0x945   : > { %14519 = vmatpush2.bf16.msra.mxu1 %v17546_v44  ;;  %v5740_v46 = vld [vmem:[%s18840_s1 + $0x2d68] sm:$0xff] }
 0x946   : > { %14520 = vmatprep.subr.bf16.mxu1 %v17539_v61  ;;  %v5600_v8 = vld [vmem:[%s18840_s1 + $0x2908] sm:$0xff] }
 0x947   : > { %14480 = vmatpush2.bf16.msra.mxu0 %v17410_v7  ;;  %v5604_v44 = vld [vmem:[%s18840_s1 + $0x2928] sm:$0xff]  ;;  %v17770_v7 = vcombine.low %v5736_v63, %v5740_v46 }
 0x948   : > { %14531 = vmatprep.subr.bf16.mxu0 %v17659_v56  ;;  %v5728_v61 = vld [vmem:[%s18840_s1 + $0x2d08] sm:$0xff] }
 0x949   : > { %14521 = vmatpush2.bf16.msra.mxu1 %v17538_v22  ;;  %v5732_v6 = vld [vmem:[%s18840_s1 + $0x2d28] sm:$0xff]  ;;  %v17635_v22 = vcombine.high %v5600_v8, %v5604_v44 }
 0x94a   : > { %14572 = vmatprep.subr.bf16.mxu1 %v17787_v58  ;;  %v14237_v32 = vpop.f32.mrf.mxu0  ;;  %14482 = vmatmul.mubr.bf16.vlgmr.msra.gmra.mxu0 %v20246_v50  ;;  %v17763_v58 = vcombine.high %v5728_v61, %v5732_v6  ;;  %v5592_v47 = vld [vmem:[%s18840_s1 + $0x28c8] sm:$0xff] }
 0x94b   : > { %v14238_v4 = vadd.f32 %v14237_v32, %v20660_v11  ;;  %14532 = vmatpush1.bf16.msra.mxu0 %v17658_v12  ;;  %v17771_v11 = vcombine.high %v5736_v63, %v5740_v46  ;;  %14563 = vmatprep.mubr.bf16.mxu0 %v20262_v48  ;;  %v5596_v19 = vld [vmem:[%s18840_s1 + $0x28e8] sm:$0xff]  ;;  %v17634_v12 = vcombine.low %v5600_v8, %v5604_v44 }
 0x94c   : > { %v14278_v55 = vpop.f32.mrf.mxu1  ;;  %14523 = vmatmul.mubr.bf16.vlgmr.msra.gmra.mxu1 %v20254_v24  ;;  %v14239_v25 = vpop.f32.mrf.mxu0  ;;  %14533 = vmatprep.subr.bf16.mxu0 %v17651_v45  ;;  %v5720_v41 = vld [vmem:[%s18840_s1 + $0x2cc8] sm:$0xff]  ;;  %v17627_v45 = vcombine.high %v5592_v47, %v5596_v19  ;;  %v17626_v46 = vcombine.low %v5592_v47, %v5596_v19 }
 0x94d   : > { %14573 = vmatpush1.bf16.msra.mxu1 %v17786_v23  ;;  %v20733_v2 = vadd.f32 %v14278_v55, %v14238_v4  ;;  %v14240_v40 = vadd.f32 %v14239_v25, %v20668_v18  ;;  %14604 = vmatprep.mubr.bf16.mxu1 %v20269_v39  ;;  %v17642_v18 = vcombine.low %v5608_v9, %v5612_v27  ;;  %v5724_v16 = vld [vmem:[%s18840_s1 + $0x2ce8] sm:$0xff] }
 0x94e   : > { %v14280_v60 = vpop.f32.mrf.mxu1  ;;  %14574 = vmatprep.subr.bf16.mxu1 %v17779_v13  ;;  %v14241_v62 = vpop.f32.mrf.mxu0  ;;  %v17762_v23 = vcombine.low %v5728_v61, %v5732_v6  ;;  %v17755_v13 = vcombine.high %v5720_v41, %v5724_v16  ;;  %v5584_v9 = vld [vmem:[%s18840_s1 + $0x2888] sm:$0xff]  ;;  %v17754_v4 = vcombine.low %v5720_v41, %v5724_v16 }
 0x94f   : > { %v20742_v21 = vadd.f32 %v14280_v60, %v14240_v40  ;;  %14534 = vmatpush1.bf16.msra.mxu0 %v17650_v15  ;;  %v5588_v27 = vld [vmem:[%s18840_s1 + $0x28a8] sm:$0xff] }
 0x950   : > { %v14282_v53 = vpop.f32.mrf.mxu1  ;;  %v14242_v36 = vpop.f32.mrf.mxu0  ;;  %14535 = vmatprep.subr.bf16.mxu0 %v17643_v20  ;;  %v5712_v32 = vld [vmem:[%s18840_s1 + $0x2c88] sm:$0xff]  ;;  %v17619_v55 = vcombine.high %v5584_v9, %v5588_v27  ;;  %v17618_v60 = vcombine.low %v5584_v9, %v5588_v27 }
 0x951   : > { %14575 = vmatpush1.bf16.msra.mxu1 %v17778_v30  ;;  %v5716_v63 = vld [vmem:[%s18840_s1 + $0x2ca8] sm:$0xff] }
 0x952   : > { %v14283_v56 = vpop.f32.mrf.mxu1  ;;  %14576 = vmatprep.subr.bf16.mxu1 %v17771_v11  ;;  %v17747_v15 = vcombine.high %v5712_v32, %v5716_v63  ;;  %v5576_v25 = vld [vmem:[%s18840_s1 + $0x2848] sm:$0xff]  ;;  %v17746_v11 = vcombine.low %v5712_v32, %v5716_v63 }
 0x953   : > { %14536 = vmatpush1.bf16.msra.mxu0 %v17642_v18  ;;  %v5580_v30 = vld [vmem:[%s18840_s1 + $0x2868] sm:$0xff] }
 0x954   : > { %14537 = vmatprep.subr.bf16.mxu0 %v17635_v22  ;;  %v5704_v20 = vld [vmem:[%s18840_s1 + $0x2c48] sm:$0xff]  ;;  %v17611_v8 = vcombine.high %v5576_v25, %v5580_v30  ;;  %v17610_v18 = vcombine.low %v5576_v25, %v5580_v30 }
 0x955   : > { %14577 = vmatpush1.bf16.msra.mxu1 %v17770_v7  ;;  %v5708_v40 = vld [vmem:[%s18840_s1 + $0x2c68] sm:$0xff] }
 0x956   : > { %14578 = vmatprep.subr.bf16.mxu1 %v17763_v58  ;;  %v17739_v44 = vcombine.high %v5704_v20, %v5708_v40  ;;  %v5568_v62 = vld [vmem:[%s18840_s1 + $0x2808] sm:$0xff]  ;;  %v17738_v36 = vcombine.low %v5704_v20, %v5708_v40 }
 0x957   : > { %14538 = vmatpush1.bf16.msra.mxu0 %v17634_v12  ;;  %v5572_v61 = vld [vmem:[%s18840_s1 + $0x2828] sm:$0xff] }
 0x958   : > { %14539 = vmatprep.subr.bf16.mxu0 %v17627_v45  ;;  %v5696_v6 = vld [vmem:[%s18840_s1 + $0x2c08] sm:$0xff]  ;;  %v17603_v7 = vcombine.high %v5568_v62, %v5572_v61  ;;  %v17602_v41 = vcombine.low %v5568_v62, %v5572_v61 }
 0x959   : > { %14579 = vmatpush1.bf16.msra.mxu1 %v17762_v23  ;;  %v5700_v53 = vld [vmem:[%s18840_s1 + $0x2c28] sm:$0xff] }
 0x95a   : > { %14580 = vmatprep.subr.bf16.mxu1 %v17755_v13  ;;  %v17731_v22 = vcombine.high %v5696_v6, %v5700_v53  ;;  %v5688_v56 = vld [vmem:[%s18840_s1 + $0x2bc8] sm:$0xff]  ;;  %v17730_v16 = vcombine.low %v5696_v6, %v5700_v53 }
 0x95b   : > { %14540 = vmatpush1.bf16.msra.mxu0 %v17626_v46  ;;  %v5692_v58 = vld [vmem:[%s18840_s1 + $0x2be8] sm:$0xff] }
 0x95c   : > { %14541 = vmatprep.subr.bf16.mxu0 %v17619_v55  ;;  %v5816_v47 = vld [vmem:[%s18840_s1 + $0x2fc8] sm:$0xff]  ;;  %v17723_v12 = vcombine.high %v5688_v56, %v5692_v58  ;;  %v17722_v32 = vcombine.low %v5688_v56, %v5692_v58 }
 0x95d   : > { %14581 = vmatpush1.bf16.msra.mxu1 %v17754_v4  ;;  %v5820_v19 = vld [vmem:[%s18840_s1 + $0x2fe8] sm:$0xff] }
 0x95e   : > { %14582 = vmatprep.subr.bf16.mxu1 %v17747_v15  ;;  %v17851_v23 = vcombine.high %v5816_v47, %v5820_v19  ;;  %v5680_v45 = vld [vmem:[%s18840_s1 + $0x2b88] sm:$0xff]  ;;  %v17850_v63 = vcombine.low %v5816_v47, %v5820_v19 }
 0x95f   : > { %14542 = vmatpush1.bf16.msra.mxu0 %v17618_v60  ;;  %v5684_v13 = vld [vmem:[%s18840_s1 + $0x2ba8] sm:$0xff] }
 0x960   : > { %14543 = vmatprep.subr.bf16.mxu0 %v17611_v8  ;;  %v5808_v9 = vld [vmem:[%s18840_s1 + $0x2f88] sm:$0xff]  ;;  %v17715_v46 = vcombine.high %v5680_v45, %v5684_v13  ;;  %v17714_v20 = vcombine.low %v5680_v45, %v5684_v13 }
 0x961   : > { %14583 = vmatpush1.bf16.msra.mxu1 %v17746_v11  ;;  %v5812_v27 = vld [vmem:[%s18840_s1 + $0x2fa8] sm:$0xff] }
 0x962   : > { %14584 = vmatprep.subr.bf16.mxu1 %v17739_v44  ;;  %v17843_v4 = vcombine.high %v5808_v9, %v5812_v27  ;;  %v5672_v55 = vld [vmem:[%s18840_s1 + $0x2b48] sm:$0xff]  ;;  %v17842_v40 = vcombine.low %v5808_v9, %v5812_v27 }
 0x963   : > { %14544 = vmatpush1.bf16.msra.mxu0 %v17610_v18  ;;  %v5676_v15 = vld [vmem:[%s18840_s1 + $0x2b68] sm:$0xff] }
 0x964   : > { %14545 = vmatprep.subr.bf16.mxu0 %v17603_v7  ;;  %v5800_v25 = vld [vmem:[%s18840_s1 + $0x2f48] sm:$0xff]  ;;  %v17707_v60 = vcombine.high %v5672_v55, %v5676_v15  ;;  %v17706_v6 = vcombine.low %v5672_v55, %v5676_v15 }
 0x965   : > { %14585 = vmatpush1.bf16.msra.mxu1 %v17738_v36  ;;  %v5804_v30 = vld [vmem:[%s18840_s1 + $0x2f68] sm:$0xff] }
 0x966   : > { %14586 = vmatprep.subr.bf16.mxu1 %v17731_v22  ;;  %v17835_v11 = vcombine.high %v5800_v25, %v5804_v30  ;;  %v5664_v8 = vld [vmem:[%s18840_s1 + $0x2b08] sm:$0xff]  ;;  %v17834_v53 = vcombine.low %v5800_v25, %v5804_v30 }
 0x967   : > { %14546 = vmatpush1.bf16.msra.mxu0 %v17602_v41  ;;  %v5668_v44 = vld [vmem:[%s18840_s1 + $0x2b28] sm:$0xff] }
 0x968   : > { %14547 = vmatprep.subr.bf16.mxu0 %v17723_v12  ;;  %v5792_v62 = vld [vmem:[%s18840_s1 + $0x2f08] sm:$0xff]  ;;  %v17699_v18 = vcombine.high %v5664_v8, %v5668_v44  ;;  %v17698_v47 = vcombine.low %v5664_v8, %v5668_v44 }
 0x969   : > { %14587 = vmatpush1.bf16.msra.mxu1 %v17730_v16  ;;  %v5796_v61 = vld [vmem:[%s18840_s1 + $0x2f28] sm:$0xff] }
 0x96a   : > { %14588 = vmatprep.subr.bf16.mxu1 %v17851_v23  ;;  %v17827_v36 = vcombine.high %v5792_v62, %v5796_v61  ;;  %v5656_v7 = vld [vmem:[%s18840_s1 + $0x2ac8] sm:$0xff]  ;;  %v17826_v19 = vcombine.low %v5792_v62, %v5796_v61 }
 0x96b   : > { %14548 = vmatpush2.bf16.msra.mxu0 %v17722_v32  ;;  %v5660_v22 = vld [vmem:[%s18840_s1 + $0x2ae8] sm:$0xff] }
 0x96c   : > { %14549 = vmatprep.subr.bf16.mxu0 %v17715_v46  ;;  %v5784_v56 = vld [vmem:[%s18840_s1 + $0x2ec8] sm:$0xff]  ;;  %v17691_v41 = vcombine.high %v5656_v7, %v5660_v22  ;;  %v17690_v9 = vcombine.low %v5656_v7, %v5660_v22  ;;  %v4473_v7 = vld [vmem:[%s18840_s1 + $0x5d0] sm:$0xff] }
 0x96d   : > { %14589 = vmatpush2.bf16.msra.mxu1 %v17850_v63  ;;  %v5788_v58 = vld [vmem:[%s18840_s1 + $0x2ee8] sm:$0xff]  ;;  %v4477_v22 = vld [vmem:[%s18840_s1 + $0x5f0] sm:$0xff] }
 0x96e   : > { %14590 = vmatprep.subr.bf16.mxu1 %v17843_v4  ;;  %v17819_v16 = vcombine.high %v5784_v56, %v5788_v58  ;;  %v5648_v12 = vld [vmem:[%s18840_s1 + $0x2a88] sm:$0xff]  ;;  %v17818_v27 = vcombine.low %v5784_v56, %v5788_v58 }
 0x96f   : > { %14550 = vmatpush2.bf16.msra.mxu0 %v17714_v20  ;;  %v5652_v23 = vld [vmem:[%s18840_s1 + $0x2aa8] sm:$0xff] }
 0x970   : > { %14551 = vmatprep.subr.bf16.mxu0 %v17707_v60  ;;  %v5776_v45 = vld [vmem:[%s18840_s1 + $0x2e88] sm:$0xff]  ;;  %v17683_v32 = vcombine.high %v5648_v12, %v5652_v23  ;;  %v17682_v25 = vcombine.low %v5648_v12, %v5652_v23  ;;  %v4465_v12 = vld [vmem:[%s18840_s1 + $0x590] sm:$0xff] }
 0x971   : > { %14591 = vmatpush2.bf16.msra.mxu1 %v17842_v40  ;;  %v5780_v13 = vld [vmem:[%s18840_s1 + $0x2ea8] sm:$0xff]  ;;  %v4469_v23 = vld [vmem:[%s18840_s1 + $0x5b0] sm:$0xff] }
 0x972   : > { %14592 = vmatprep.subr.bf16.mxu1 %v17835_v11  ;;  %v17811_v63 = vcombine.high %v5776_v45, %v5780_v13  ;;  %v5640_v46 = vld [vmem:[%s18840_s1 + $0x2a48] sm:$0xff]  ;;  %v17810_v30 = vcombine.low %v5776_v45, %v5780_v13  ;;  %v16508_v13 = vcombine.low %v4473_v7, %v4477_v22 }
 0x973   : > { %14552 = vmatpush2.bf16.msra.mxu0 %v17706_v6  ;;  %v5644_v4 = vld [vmem:[%s18840_s1 + $0x2a68] sm:$0xff] }
 0x974   : > { %14553 = vmatprep.subr.bf16.mxu0 %v17699_v18  ;;  %v5768_v55 = vld [vmem:[%s18840_s1 + $0x2e48] sm:$0xff]  ;;  %v17675_v20 = vcombine.high %v5640_v46, %v5644_v4  ;;  %v17674_v62 = vcombine.low %v5640_v46, %v5644_v4  ;;  %v4345_v18 = vld [vmem:[%s18840_s1 + $0x1d0] sm:$0xff] }
 0x975   : > { %14593 = vmatpush2.bf16.msra.mxu1 %v17834_v53  ;;  %v5772_v15 = vld [vmem:[%s18840_s1 + $0x2e68] sm:$0xff]  ;;  %v4457_v4 = vld [vmem:[%s18840_s1 + $0x550] sm:$0xff] }
 0x976   : > { %14594 = vmatprep.subr.bf16.mxu1 %v17827_v36  ;;  %v17803_v40 = vcombine.high %v5768_v55, %v5772_v15  ;;  %v5632_v60 = vld [vmem:[%s18840_s1 + $0x2a08] sm:$0xff]  ;;  %v17802_v61 = vcombine.low %v5768_v55, %v5772_v15  ;;  %v4349_v36 = vld [vmem:[%s18840_s1 + $0x1f0] sm:$0xff] }
 0x977   : > { %14554 = vmatpush2.bf16.msra.mxu0 %v17698_v47  ;;  %v5636_v11 = vld [vmem:[%s18840_s1 + $0x2a28] sm:$0xff]  ;;  %v16381_v47 = vcombine.high %v4345_v18, %v4349_v36  ;;  %v16380_v45 = vcombine.low %v4345_v18, %v4349_v36  ;;  %v4461_v55 = vld [vmem:[%s18840_s1 + $0x570] sm:$0xff] }
 0x978   : > { %14555 = vmatprep.subr.bf16.mxu0 %v17691_v41  ;;  %v5760_v8 = vld [vmem:[%s18840_s1 + $0x2e08] sm:$0xff]  ;;  %v17667_v6 = vcombine.high %v5632_v60, %v5636_v11  ;;  %v17666_v56 = vcombine.low %v5632_v60, %v5636_v11  ;;  %v4337_v41 = vld [vmem:[%s18840_s1 + $0x190] sm:$0xff] }
 0x979   : > { %14595 = vmatpush2.bf16.msra.mxu1 %v17826_v19  ;;  %v5764_v44 = vld [vmem:[%s18840_s1 + $0x2e28] sm:$0xff]  ;;  %v16509_v19 = vcombine.high %v4473_v7, %v4477_v22  ;;  %v4453_v18 = vld [vmem:[%s18840_s1 + $0x530] sm:$0xff] }
 0x97a   : > { %14596 = vmatprep.subr.bf16.mxu1 %v17819_v16  ;;  %v17795_v53 = vcombine.high %v5760_v8, %v5764_v44  ;;  %v17794_v58 = vcombine.low %v5760_v8, %v5764_v44  ;;  %v4341_v16 = vld [vmem:[%s18840_s1 + $0x1b0] sm:$0xff] }
 0x97b   : > { %14556 = vmatpush2.bf16.msra.mxu0 %v17690_v9  ;;  %v16373_v9 = vcombine.high %v4337_v41, %v4341_v16 }
 0x97c   : > { %14557 = vmatprep.subr.bf16.mxu0 %v17683_v32  ;;  %v4329_v32 = vld [vmem:[%s18840_s1 + $0x150] sm:$0xff] }
 0x97d   : > { %14597 = vmatpush2.bf16.msra.mxu1 %v17818_v27  ;;  %v16501_v27 = vcombine.high %v4465_v12, %v4469_v23 }
 0x97e   : > { %14598 = vmatprep.subr.bf16.mxu1 %v17811_v63  ;;  %v4333_v63 = vld [vmem:[%s18840_s1 + $0x170] sm:$0xff] }
 0x97f   : > { %14558 = vmatpush2.bf16.msra.mxu0 %v17682_v25  ;;  %v16365_v60 = vcombine.high %v4329_v32, %v4333_v63 }
 0x980   : > { %14559 = vmatprep.subr.bf16.mxu0 %v17675_v20 }
 0x981   : > { %14599 = vmatpush2.bf16.msra.mxu1 %v17810_v30  ;;  %v16372_v30 = vcombine.low %v4337_v41, %v4341_v16  ;;  %v4313_v41 = vld [vmem:[%s18840_s1 + $0xd0] sm:$0xff] }
 0x982   : > { %14600 = vmatprep.subr.bf16.mxu1 %v17803_v40  ;;  %v16500_v40 = vcombine.low %v4465_v12, %v4469_v23  ;;  %v4317_v16 = vld [vmem:[%s18840_s1 + $0xf0] sm:$0xff] }
 0x983   : > { %14560 = vmatpush2.bf16.msra.mxu0 %v17674_v62  ;;  %v4321_v62 = vld [vmem:[%s18840_s1 + $0x110] sm:$0xff] }
 0x984   : > { %14561 = vmatprep.subr.bf16.mxu0 %v17667_v6  ;;  %v4441_v12 = vld [vmem:[%s18840_s1 + $0x4d0] sm:$0xff] }
 0x985   : > { %14601 = vmatpush2.bf16.msra.mxu1 %v17802_v61  ;;  %v4325_v61 = vld [vmem:[%s18840_s1 + $0x130] sm:$0xff] }
 0x986   : > { %14602 = vmatprep.subr.bf16.mxu1 %v17795_v53  ;;  %v4449_v53 = vld [vmem:[%s18840_s1 + $0x510] sm:$0xff] }
 0x987   : > { %14562 = vmatpush2.bf16.msra.mxu0 %v17666_v56  ;;  %v16492_v56 = vcombine.low %v4457_v4, %v4461_v55  ;;  %v4445_v23 = vld [vmem:[%s18840_s1 + $0x4f0] sm:$0xff] }
 0x988   : > { %14613 = vmatprep.subr.bf16.mxu0 %v16381_v47 }
 0x989   : > { %14603 = vmatpush2.bf16.msra.mxu1 %v17794_v58  ;;  %v16357_v58 = vcombine.high %v4321_v62, %v4325_v61 }
 0x98a   : > { %14654 = vmatprep.subr.bf16.mxu1 %v16509_v19  ;;  %v14319_v46 = vpop.f32.mrf.mxu0  ;;  %14564 = vmatmul.mubr.bf16.vlgmr.msra.gmra.mxu0 %v20340_v26  ;;  %v16485_v19 = vcombine.high %v4449_v53, %v4453_v18 }
 0x98b   : > { %v14320_v15 = vadd.f32 %v14319_v46, %v20733_v2  ;;  %14614 = vmatpush1.bf16.msra.mxu0 %v16380_v45  ;;  %v16493_v2 = vcombine.high %v4457_v4, %v4461_v55  ;;  %14645 = vmatprep.mubr.bf16.mxu0 %v19831_v14  ;;  %v16356_v45 = vcombine.low %v4321_v62, %v4325_v61  ;;  %v4433_v46 = vld [vmem:[%s18840_s1 + $0x490] sm:$0xff] }
 0x98c   : > { %v14360_v25 = vpop.f32.mrf.mxu1  ;;  %14605 = vmatmul.mubr.bf16.vlgmr.msra.gmra.mxu1 %v20346_v49  ;;  %v14321_v20 = vpop.f32.mrf.mxu0  ;;  %14615 = vmatprep.subr.bf16.mxu0 %v16373_v9  ;;  %v16349_v9 = vcombine.high %v4313_v41, %v4317_v16  ;;  %v4437_v4 = vld [vmem:[%s18840_s1 + $0x4b0] sm:$0xff]  ;;  %v16348_v55 = vcombine.low %v4313_v41, %v4317_v16 }
 0x98d   : > { %14655 = vmatpush1.bf16.msra.mxu1 %v16508_v13  ;;  %v20807_v11 = vadd.f32 %v14360_v25, %v14320_v15  ;;  %v14322_v8 = vadd.f32 %v14321_v20, %v20742_v21  ;;  %14686 = vmatprep.mubr.bf16.mxu1 %v19835_v42  ;;  %v16364_v21 = vcombine.low %v4329_v32, %v4333_v63  ;;  %v4305_v32 = vld [vmem:[%s18840_s1 + $0x90] sm:$0xff] }
 0x98e   : > { %v14362_v44 = vpop.f32.mrf.mxu1  ;;  %14656 = vmatprep.subr.bf16.mxu1 %v16501_v27  ;;  %v14323_v6 = vpop.f32.mrf.mxu0  ;;  %v16484_v13 = vcombine.low %v4449_v53, %v4453_v18  ;;  %v16477_v27 = vcombine.high %v4441_v12, %v4445_v23  ;;  %v4309_v63 = vld [vmem:[%s18840_s1 + $0xb0] sm:$0xff]  ;;  %v16476_v15 = vcombine.low %v4441_v12, %v4445_v23 }
 0x98f   : > { %v20816_v36 = vadd.f32 %v14362_v44, %v14322_v8  ;;  %14616 = vmatpush1.bf16.msra.mxu0 %v16372_v30  ;;  %v16341_v25 = vcombine.high %v4305_v32, %v4309_v63  ;;  %v16469_v30 = vcombine.high %v4433_v46, %v4437_v4  ;;  %v4297_v20 = vld [vmem:[%s18840_s1 + $0x50] sm:$0xff]  ;;  %v16340_v44 = vcombine.low %v4305_v32, %v4309_v63 }
 0x990   : > { %v14364_v7 = vpop.f32.mrf.mxu1  ;;  %v14324_v22 = vpop.f32.mrf.mxu0  ;;  %14617 = vmatprep.subr.bf16.mxu0 %v16365_v60  ;;  %v4425_v60 = vld [vmem:[%s18840_s1 + $0x450] sm:$0xff] }
 0x991   : > { %14657 = vmatpush1.bf16.msra.mxu1 %v16500_v40  ;;  %v4301_v40 = vld [vmem:[%s18840_s1 + $0x70] sm:$0xff] }
 0x992   : > { %v14365_v47 = vpop.f32.mrf.mxu1  ;;  %14658 = vmatprep.subr.bf16.mxu1 %v16493_v2  ;;  %v4429_v8 = vld [vmem:[%s18840_s1 + $0x470] sm:$0xff]  ;;  %v16468_v2 = vcombine.low %v4433_v46, %v4437_v4  ;;  %v16333_v62 = vcombine.high %v4297_v20, %v4301_v40 }
 0x993   : > { %14618 = vmatpush1.bf16.msra.mxu0 %v16364_v21  ;;  %v16461_v61 = vcombine.high %v4425_v60, %v4429_v8  ;;  %v4289_v6 = vld [vmem:[%s18840_s1 + $0x10] sm:$0xff]  ;;  %v16332_v21 = vcombine.low %v4297_v20, %v4301_v40  ;;  %v16460_v22 = vcombine.low %v4425_v60, %v4429_v8 }
 0x994   : > { %14619 = vmatprep.subr.bf16.mxu0 %v16357_v58  ;;  %v4293_v53 = vld [vmem:[%s18840_s1 + $0x30] sm:$0xff] }
 0x995   : > { %14659 = vmatpush1.bf16.msra.mxu1 %v16492_v56  ;;  %v4417_v18 = vld [vmem:[%s18840_s1 + $0x410] sm:$0xff]  ;;  %v16325_v56 = vcombine.high %v4289_v6, %v4293_v53  ;;  %v16324_v12 = vcombine.low %v4289_v6, %v4293_v53 }
 0x996   : > { %14660 = vmatprep.subr.bf16.mxu1 %v16485_v19  ;;  %v4421_v7 = vld [vmem:[%s18840_s1 + $0x430] sm:$0xff] }
 0x997   : > { %14620 = vmatpush1.bf16.msra.mxu0 %v16356_v45  ;;  %v16453_v58 = vcombine.high %v4417_v18, %v4421_v7  ;;  %v4409_v47 = vld [vmem:[%s18840_s1 + $0x3d0] sm:$0xff]  ;;  %v16452_v23 = vcombine.low %v4417_v18, %v4421_v7 }
 0x998   : > { %14621 = vmatprep.subr.bf16.mxu0 %v16349_v9  ;;  %v4413_v19 = vld [vmem:[%s18840_s1 + $0x3f0] sm:$0xff] }
 0x999   : > { %14661 = vmatpush1.bf16.msra.mxu1 %v16484_v13  ;;  %v4537_v41 = vld [vmem:[%s18840_s1 + $0x7d0] sm:$0xff]  ;;  %v16445_v45 = vcombine.high %v4409_v47, %v4413_v19  ;;  %v16444_v46 = vcombine.low %v4409_v47, %v4413_v19 }
 0x99a   : > { %14662 = vmatprep.subr.bf16.mxu1 %v16477_v27  ;;  %v4541_v16 = vld [vmem:[%s18840_s1 + $0x7f0] sm:$0xff] }
 0x99b   : > { %14622 = vmatpush1.bf16.msra.mxu0 %v16348_v55  ;;  %v16573_v13 = vcombine.high %v4537_v41, %v4541_v16  ;;  %v4401_v9 = vld [vmem:[%s18840_s1 + $0x390] sm:$0xff]  ;;  %v16572_v4 = vcombine.low %v4537_v41, %v4541_v16 }
 0x99c   : > { %14623 = vmatprep.subr.bf16.mxu0 %v16341_v25  ;;  %v4405_v27 = vld [vmem:[%s18840_s1 + $0x3b0] sm:$0xff] }
 0x99d   : > { %14663 = vmatpush1.bf16.msra.mxu1 %v16476_v15  ;;  %v4529_v32 = vld [vmem:[%s18840_s1 + $0x790] sm:$0xff]  ;;  %v16437_v55 = vcombine.high %v4401_v9, %v4405_v27  ;;  %v16436_v60 = vcombine.low %v4401_v9, %v4405_v27 }
 0x99e   : > { %14664 = vmatprep.subr.bf16.mxu1 %v16469_v30  ;;  %v4533_v63 = vld [vmem:[%s18840_s1 + $0x7b0] sm:$0xff] }
 0x99f   : > { %14624 = vmatpush1.bf16.msra.mxu0 %v16340_v44  ;;  %v16565_v15 = vcombine.high %v4529_v32, %v4533_v63  ;;  %v4393_v25 = vld [vmem:[%s18840_s1 + $0x350] sm:$0xff]  ;;  %v16564_v8 = vcombine.low %v4529_v32, %v4533_v63 }
 0x9a0   : > { %14625 = vmatprep.subr.bf16.mxu0 %v16333_v62  ;;  %v4397_v30 = vld [vmem:[%s18840_s1 + $0x370] sm:$0xff] }
 0x9a1   : > { %14665 = vmatpush1.bf16.msra.mxu1 %v16468_v2  ;;  %v4521_v20 = vld [vmem:[%s18840_s1 + $0x750] sm:$0xff]  ;;  %v16429_v44 = vcombine.high %v4393_v25, %v4397_v30  ;;  %v16428_v18 = vcombine.low %v4393_v25, %v4397_v30 }
 0x9a2   : > { %14666 = vmatprep.subr.bf16.mxu1 %v16461_v61  ;;  %v4525_v40 = vld [vmem:[%s18840_s1 + $0x770] sm:$0xff] }
 0x9a3   : > { %14626 = vmatpush1.bf16.msra.mxu0 %v16332_v21  ;;  %v16557_v2 = vcombine.high %v4521_v20, %v4525_v40  ;;  %v4385_v62 = vld [vmem:[%s18840_s1 + $0x310] sm:$0xff]  ;;  %v16556_v7 = vcombine.low %v4521_v20, %v4525_v40 }
 0x9a4   : > { %14627 = vmatprep.subr.bf16.mxu0 %v16325_v56  ;;  %v4389_v61 = vld [vmem:[%s18840_s1 + $0x330] sm:$0xff] }
 0x9a5   : > { %14667 = vmatpush1.bf16.msra.mxu1 %v16460_v22  ;;  %v4513_v6 = vld [vmem:[%s18840_s1 + $0x710] sm:$0xff]  ;;  %v16421_v21 = vcombine.high %v4385_v62, %v4389_v61  ;;  %v16420_v41 = vcombine.low %v4385_v62, %v4389_v61 }
 0x9a6   : > { %14668 = vmatprep.subr.bf16.mxu1 %v16453_v58  ;;  %v4517_v53 = vld [vmem:[%s18840_s1 + $0x730] sm:$0xff] }
 0x9a7   : > { %14628 = vmatpush1.bf16.msra.mxu0 %v16324_v12  ;;  %v16549_v22 = vcombine.high %v4513_v6, %v4517_v53  ;;  %v4377_v56 = vld [vmem:[%s18840_s1 + $0x2d0] sm:$0xff]  ;;  %v16548_v16 = vcombine.low %v4513_v6, %v4517_v53 }
 0x9a8   : > { %14629 = vmatprep.subr.bf16.mxu0 %v16445_v45  ;;  %v4381_v58 = vld [vmem:[%s18840_s1 + $0x2f0] sm:$0xff] }
 0x9a9   : > { %14669 = vmatpush1.bf16.msra.mxu1 %v16452_v23  ;;  %v4505_v47 = vld [vmem:[%s18840_s1 + $0x6d0] sm:$0xff]  ;;  %v16413_v12 = vcombine.high %v4377_v56, %v4381_v58  ;;  %v16412_v32 = vcombine.low %v4377_v56, %v4381_v58 }
 0x9aa   : > { %14670 = vmatprep.subr.bf16.mxu1 %v16573_v13  ;;  %v4509_v19 = vld [vmem:[%s18840_s1 + $0x6f0] sm:$0xff] }
 0x9ab   : > { %14630 = vmatpush2.bf16.msra.mxu0 %v16444_v46  ;;  %v16541_v23 = vcombine.high %v4505_v47, %v4509_v19  ;;  %v4369_v45 = vld [vmem:[%s18840_s1 + $0x290] sm:$0xff]  ;;  %v16540_v63 = vcombine.low %v4505_v47, %v4509_v19 }
 0x9ac   : > { %14631 = vmatprep.subr.bf16.mxu0 %v16437_v55  ;;  %v4373_v13 = vld [vmem:[%s18840_s1 + $0x2b0] sm:$0xff] }
 0x9ad   : > { %14671 = vmatpush2.bf16.msra.mxu1 %v16572_v4  ;;  %v4497_v9 = vld [vmem:[%s18840_s1 + $0x690] sm:$0xff]  ;;  %v16405_v46 = vcombine.high %v4369_v45, %v4373_v13  ;;  %v16404_v20 = vcombine.low %v4369_v45, %v4373_v13 }
 0x9ae   : > { %14672 = vmatprep.subr.bf16.mxu1 %v16565_v15  ;;  %v4501_v27 = vld [vmem:[%s18840_s1 + $0x6b0] sm:$0xff] }
 0x9af   : > { %14632 = vmatpush2.bf16.msra.mxu0 %v16436_v60  ;;  %v16533_v4 = vcombine.high %v4497_v9, %v4501_v27  ;;  %v4361_v55 = vld [vmem:[%s18840_s1 + $0x250] sm:$0xff]  ;;  %v16532_v40 = vcombine.low %v4497_v9, %v4501_v27 }
 0x9b0   : > { %14633 = vmatprep.subr.bf16.mxu0 %v16429_v44  ;;  %v4365_v15 = vld [vmem:[%s18840_s1 + $0x270] sm:$0xff] }
 0x9b1   : > { %14673 = vmatpush2.bf16.msra.mxu1 %v16564_v8  ;;  %v4489_v25 = vld [vmem:[%s18840_s1 + $0x650] sm:$0xff]  ;;  %v16397_v60 = vcombine.high %v4361_v55, %v4365_v15  ;;  %v16396_v6 = vcombine.low %v4361_v55, %v4365_v15 }
 0x9b2   : > { %14674 = vmatprep.subr.bf16.mxu1 %v16557_v2  ;;  %v4493_v30 = vld [vmem:[%s18840_s1 + $0x670] sm:$0xff] }
 0x9b3   : > { %14634 = vmatpush2.bf16.msra.mxu0 %v16428_v18  ;;  %v16525_v8 = vcombine.high %v4489_v25, %v4493_v30  ;;  %v4353_v44 = vld [vmem:[%s18840_s1 + $0x210] sm:$0xff]  ;;  %v16524_v53 = vcombine.low %v4489_v25, %v4493_v30 }
 0x9b4   : > { %14635 = vmatprep.subr.bf16.mxu0 %v16421_v21  ;;  %v4357_v2 = vld [vmem:[%s18840_s1 + $0x230] sm:$0xff] }
 0x9b5   : > { %14675 = vmatpush2.bf16.msra.mxu1 %v16556_v7  ;;  %v4481_v62 = vld [vmem:[%s18840_s1 + $0x610] sm:$0xff]  ;;  %v16389_v18 = vcombine.high %v4353_v44, %v4357_v2  ;;  %v16388_v47 = vcombine.low %v4353_v44, %v4357_v2 }
 0x9b6   : > { %14676 = vmatprep.subr.bf16.mxu1 %v16549_v22  ;;  %v4485_v61 = vld [vmem:[%s18840_s1 + $0x630] sm:$0xff] }
 0x9b7   : > { %14636 = vmatpush2.bf16.msra.mxu0 %v16420_v41  ;;  %v16517_v7 = vcombine.high %v4481_v62, %v4485_v61  ;;  %v4601_v21 = vld [vmem:[%s18840_s1 + $0x9d0] sm:$0xff]  ;;  %v16516_v19 = vcombine.low %v4481_v62, %v4485_v61 }
 0x9b8   : > { %14637 = vmatprep.subr.bf16.mxu0 %v16413_v12  ;;  %v4605_v22 = vld [vmem:[%s18840_s1 + $0x9f0] sm:$0xff] }
 0x9b9   : > { %14677 = vmatpush2.bf16.msra.mxu1 %v16548_v16  ;;  %v4729_v56 = vld [vmem:[%s18840_s1 + $0xdd0] sm:$0xff]  ;;  %v16637_v41 = vcombine.high %v4601_v21, %v4605_v22  ;;  %v16636_v9 = vcombine.low %v4601_v21, %v4605_v22 }
 0x9ba   : > { %14678 = vmatprep.subr.bf16.mxu1 %v16541_v23  ;;  %v4733_v58 = vld [vmem:[%s18840_s1 + $0xdf0] sm:$0xff] }
 0x9bb   : > { %14638 = vmatpush2.bf16.msra.mxu0 %v16412_v32  ;;  %v16765_v16 = vcombine.high %v4729_v56, %v4733_v58  ;;  %v4593_v12 = vld [vmem:[%s18840_s1 + $0x990] sm:$0xff]  ;;  %v16764_v27 = vcombine.low %v4729_v56, %v4733_v58 }
 0x9bc   : > { %14639 = vmatprep.subr.bf16.mxu0 %v16405_v46  ;;  %v4597_v23 = vld [vmem:[%s18840_s1 + $0x9b0] sm:$0xff] }
 0x9bd   : > { %14679 = vmatpush2.bf16.msra.mxu1 %v16540_v63  ;;  %v4721_v45 = vld [vmem:[%s18840_s1 + $0xd90] sm:$0xff]  ;;  %v16629_v32 = vcombine.high %v4593_v12, %v4597_v23 }
 0x9be   : > { %14680 = vmatprep.subr.bf16.mxu1 %v16533_v4  ;;  %v4725_v13 = vld [vmem:[%s18840_s1 + $0xdb0] sm:$0xff] }
 0x9bf   : > { %14640 = vmatpush2.bf16.msra.mxu0 %v16404_v20  ;;  %v16757_v63 = vcombine.high %v4721_v45, %v4725_v13  ;;  %v4585_v46 = vld [vmem:[%s18840_s1 + $0x950] sm:$0xff] }
 0x9c0   : > { %14641 = vmatprep.subr.bf16.mxu0 %v16397_v60  ;;  %v4589_v4 = vld [vmem:[%s18840_s1 + $0x970] sm:$0xff] }
 0x9c1   : > { %14681 = vmatpush2.bf16.msra.mxu1 %v16532_v40  ;;  %v4713_v15 = vld [vmem:[%s18840_s1 + $0xd50] sm:$0xff]  ;;  %v16628_v40 = vcombine.low %v4593_v12, %v4597_v23  ;;  %v16621_v44 = vcombine.high %v4585_v46, %v4589_v4 }
 0x9c2   : > { %14682 = vmatprep.subr.bf16.mxu1 %v16525_v8  ;;  %v4717_v25 = vld [vmem:[%s18840_s1 + $0xd70] sm:$0xff]  ;;  %v16756_v8 = vcombine.low %v4721_v45, %v4725_v13 }
 0x9c3   : > { %14642 = vmatpush2.bf16.msra.mxu0 %v16396_v6  ;;  %v4577_v6 = vld [vmem:[%s18840_s1 + $0x910] sm:$0xff] }
 0x9c4   : > { %14643 = vmatprep.subr.bf16.mxu0 %v16389_v18  ;;  %v4709_v21 = vld [vmem:[%s18840_s1 + $0xd30] sm:$0xff] }
 0x9c5   : > { %14683 = vmatpush2.bf16.msra.mxu1 %v16524_v53  ;;  %v4581_v53 = vld [vmem:[%s18840_s1 + $0x930] sm:$0xff] }
 0x9c6   : > { %14684 = vmatprep.subr.bf16.mxu1 %v16517_v7  ;;  %v4705_v7 = vld [vmem:[%s18840_s1 + $0xd10] sm:$0xff] }
 0x9c7   : > { %14644 = vmatpush2.bf16.msra.mxu0 %v16388_v47  ;;  %v16748_v47 = vcombine.low %v4713_v15, %v4717_v25  ;;  %v4569_v12 = vld [vmem:[%s18840_s1 + $0x8d0] sm:$0xff] }
 0x9c8   : > { %14695 = vmatprep.subr.bf16.mxu0 %v16637_v41  ;;  %v4573_v23 = vld [vmem:[%s18840_s1 + $0x8f0] sm:$0xff] }
 0x9c9   : > { %14685 = vmatpush2.bf16.msra.mxu1 %v16516_v19  ;;  %v16613_v19 = vcombine.high %v4577_v6, %v4581_v53  ;;  %v4697_v45 = vld [vmem:[%s18840_s1 + $0xcd0] sm:$0xff] }
 0x9ca   : > { %14736 = vmatprep.subr.bf16.mxu1 %v16765_v16  ;;  %v14401_v55 = vpop.f32.mrf.mxu0  ;;  %14646 = vmatmul.mubr.bf16.vlgmr.msra.gmra.mxu0 %v19881_v1  ;;  %v16741_v16 = vcombine.high %v4705_v7, %v4709_v21  ;;  %v4701_v13 = vld [vmem:[%s18840_s1 + $0xcf0] sm:$0xff] }
 0x9cb   : > { %v14402_v30 = vadd.f32 %v14401_v55, %v20807_v11  ;;  %14696 = vmatpush1.bf16.msra.mxu0 %v16636_v9  ;;  %v16749_v11 = vcombine.high %v4713_v15, %v4717_v25  ;;  %14727 = vmatprep.mubr.bf16.mxu0 %v19897_v28  ;;  %v16612_v9 = vcombine.low %v4577_v6, %v4581_v53  ;;  %v4689_v55 = vld [vmem:[%s18840_s1 + $0xc90] sm:$0xff] }
 0x9cc   : > { %v14442_v20 = vpop.f32.mrf.mxu1  ;;  %14687 = vmatmul.mubr.bf16.vlgmr.msra.gmra.mxu1 %v19889_v10  ;;  %v14403_v60 = vpop.f32.mrf.mxu0  ;;  %14697 = vmatprep.subr.bf16.mxu0 %v16629_v32  ;;  %v16605_v32 = vcombine.high %v4569_v12, %v4573_v23  ;;  %v4693_v15 = vld [vmem:[%s18840_s1 + $0xcb0] sm:$0xff]  ;;  %v16604_v25 = vcombine.low %v4569_v12, %v4573_v23 }
 0x9cd   : > { %14737 = vmatpush1.bf16.msra.mxu1 %v16764_v27  ;;  %v20881_v2 = vadd.f32 %v14442_v20, %v14402_v30  ;;  %v14404_v62 = vadd.f32 %v14403_v60, %v20816_v36  ;;  %14768 = vmatprep.mubr.bf16.mxu1 %v19904_v5  ;;  %v16620_v36 = vcombine.low %v4585_v46, %v4589_v4  ;;  %v4561_v46 = vld [vmem:[%s18840_s1 + $0x890] sm:$0xff] }
 0x9ce   : > { %v14444_v61 = vpop.f32.mrf.mxu1  ;;  %14738 = vmatprep.subr.bf16.mxu1 %v16757_v63  ;;  %v14405_v18 = vpop.f32.mrf.mxu0  ;;  %v16740_v27 = vcombine.low %v4705_v7, %v4709_v21  ;;  %v16733_v63 = vcombine.high %v4697_v45, %v4701_v13  ;;  %v4565_v4 = vld [vmem:[%s18840_s1 + $0x8b0] sm:$0xff]  ;;  %v16732_v30 = vcombine.low %v4697_v45, %v4701_v13 }
 0x9cf   : > { %v20890_v22 = vadd.f32 %v14444_v61, %v14404_v62  ;;  %14698 = vmatpush1.bf16.msra.mxu0 %v16628_v40  ;;  %v16597_v20 = vcombine.high %v4561_v46, %v4565_v4  ;;  %v16725_v40 = vcombine.high %v4689_v55, %v4693_v15  ;;  %v4553_v60 = vld [vmem:[%s18840_s1 + $0x850] sm:$0xff]  ;;  %v16596_v61 = vcombine.low %v4561_v46, %v4565_v4 }
 0x9d0   : > { %v14446_v56 = vpop.f32.mrf.mxu1  ;;  %v14406_v58 = vpop.f32.mrf.mxu0  ;;  %14699 = vmatprep.subr.bf16.mxu0 %v16621_v44  ;;  %v4681_v44 = vld [vmem:[%s18840_s1 + $0xc50] sm:$0xff] }
 0x9d1   : > { %14739 = vmatpush1.bf16.msra.mxu1 %v16756_v8  ;;  %v4557_v8 = vld [vmem:[%s18840_s1 + $0x870] sm:$0xff] }
 0x9d2   : > { %v14447_v41 = vpop.f32.mrf.mxu1  ;;  %14740 = vmatprep.subr.bf16.mxu1 %v16749_v11  ;;  %v4685_v62 = vld [vmem:[%s18840_s1 + $0xc70] sm:$0xff]  ;;  %v16724_v11 = vcombine.low %v4689_v55, %v4693_v15  ;;  %v16589_v6 = vcombine.high %v4553_v60, %v4557_v8 }
 0x9d3   : > { %14700 = vmatpush1.bf16.msra.mxu0 %v16620_v36  ;;  %v16717_v53 = vcombine.high %v4681_v44, %v4685_v62  ;;  %v4545_v18 = vld [vmem:[%s18840_s1 + $0x810] sm:$0xff]  ;;  %v16588_v36 = vcombine.low %v4553_v60, %v4557_v8  ;;  %v16716_v58 = vcombine.low %v4681_v44, %v4685_v62 }
 0x9d4   : > { %14701 = vmatprep.subr.bf16.mxu0 %v16613_v19  ;;  %v4549_v7 = vld [vmem:[%s18840_s1 + $0x830] sm:$0xff] }
 0x9d5   : > { %14741 = vmatpush1.bf16.msra.mxu1 %v16748_v47  ;;  %v4673_v21 = vld [vmem:[%s18840_s1 + $0xc10] sm:$0xff]  ;;  %v16581_v47 = vcombine.high %v4545_v18, %v4549_v7  ;;  %v16580_v45 = vcombine.low %v4545_v18, %v4549_v7 }
 0x9d6   : > { %14742 = vmatprep.subr.bf16.mxu1 %v16741_v16  ;;  %v4677_v56 = vld [vmem:[%s18840_s1 + $0xc30] sm:$0xff] }
 0x9d7   : > { %14702 = vmatpush1.bf16.msra.mxu0 %v16612_v9  ;;  %v16709_v19 = vcombine.high %v4673_v21, %v4677_v56  ;;  %v4665_v41 = vld [vmem:[%s18840_s1 + $0xbd0] sm:$0xff]  ;;  %v16708_v13 = vcombine.low %v4673_v21, %v4677_v56 }
 0x9d8   : > { %14703 = vmatprep.subr.bf16.mxu0 %v16605_v32  ;;  %v4669_v16 = vld [vmem:[%s18840_s1 + $0xbf0] sm:$0xff] }
 0x9d9   : > { %14743 = vmatpush1.bf16.msra.mxu1 %v16740_v27  ;;  %v4793_v12 = vld [vmem:[%s18840_s1 + $0xfd0] sm:$0xff]  ;;  %v16701_v9 = vcombine.high %v4665_v41, %v4669_v16  ;;  %v16700_v55 = vcombine.low %v4665_v41, %v4669_v16 }
 0x9da   : > { %14744 = vmatprep.subr.bf16.mxu1 %v16733_v63  ;;  %v4797_v23 = vld [vmem:[%s18840_s1 + $0xff0] sm:$0xff] }
 0x9db   : > { %14704 = vmatpush1.bf16.msra.mxu0 %v16604_v25  ;;  %v16829_v27 = vcombine.high %v4793_v12, %v4797_v23  ;;  %v4657_v32 = vld [vmem:[%s18840_s1 + $0xb90] sm:$0xff]  ;;  %v16828_v15 = vcombine.low %v4793_v12, %v4797_v23 }
 0x9dc   : > { %14705 = vmatprep.subr.bf16.mxu0 %v16597_v20  ;;  %v4661_v63 = vld [vmem:[%s18840_s1 + $0xbb0] sm:$0xff] }
 0x9dd   : > { %14745 = vmatpush1.bf16.msra.mxu1 %v16732_v30  ;;  %v4785_v46 = vld [vmem:[%s18840_s1 + $0xf90] sm:$0xff]  ;;  %v16693_v25 = vcombine.high %v4657_v32, %v4661_v63  ;;  %v16692_v44 = vcombine.low %v4657_v32, %v4661_v63 }
 0x9de   : > { %14746 = vmatprep.subr.bf16.mxu1 %v16725_v40  ;;  %v4789_v4 = vld [vmem:[%s18840_s1 + $0xfb0] sm:$0xff] }
 0x9df   : > { %14706 = vmatpush1.bf16.msra.mxu0 %v16596_v61  ;;  %v16821_v30 = vcombine.high %v4785_v46, %v4789_v4  ;;  %v4649_v20 = vld [vmem:[%s18840_s1 + $0xb50] sm:$0xff]  ;;  %v16820_v62 = vcombine.low %v4785_v46, %v4789_v4 }
 0x9e0   : > { %14707 = vmatprep.subr.bf16.mxu0 %v16589_v6  ;;  %v4653_v40 = vld [vmem:[%s18840_s1 + $0xb70] sm:$0xff] }
 0x9e1   : > { %14747 = vmatpush1.bf16.msra.mxu1 %v16724_v11  ;;  %v4777_v60 = vld [vmem:[%s18840_s1 + $0xf50] sm:$0xff]  ;;  %v16685_v61 = vcombine.high %v4649_v20, %v4653_v40  ;;  %v16684_v21 = vcombine.low %v4649_v20, %v4653_v40 }
 0x9e2   : > { %14748 = vmatprep.subr.bf16.mxu1 %v16717_v53  ;;  %v4781_v8 = vld [vmem:[%s18840_s1 + $0xf70] sm:$0xff] }
 0x9e3   : > { %14708 = vmatpush1.bf16.msra.mxu0 %v16588_v36  ;;  %v16813_v11 = vcombine.high %v4777_v60, %v4781_v8  ;;  %v4641_v6 = vld [vmem:[%s18840_s1 + $0xb10] sm:$0xff]  ;;  %v16812_v56 = vcombine.low %v4777_v60, %v4781_v8 }
 0x9e4   : > { %14709 = vmatprep.subr.bf16.mxu0 %v16581_v47  ;;  %v4645_v53 = vld [vmem:[%s18840_s1 + $0xb30] sm:$0xff] }
 0x9e5   : > { %14749 = vmatpush1.bf16.msra.mxu1 %v16716_v58  ;;  %v4769_v18 = vld [vmem:[%s18840_s1 + $0xf10] sm:$0xff]  ;;  %v16677_v36 = vcombine.high %v4641_v6, %v4645_v53  ;;  %v16676_v12 = vcombine.low %v4641_v6, %v4645_v53 }
 0x9e6   : > { %14750 = vmatprep.subr.bf16.mxu1 %v16709_v19  ;;  %v4773_v7 = vld [vmem:[%s18840_s1 + $0xf30] sm:$0xff] }
 0x9e7   : > { %14710 = vmatpush1.bf16.msra.mxu0 %v16580_v45  ;;  %v16805_v58 = vcombine.high %v4769_v18, %v4773_v7  ;;  %v4633_v47 = vld [vmem:[%s18840_s1 + $0xad0] sm:$0xff]  ;;  %v16804_v23 = vcombine.low %v4769_v18, %v4773_v7 }
 0x9e8   : > { %14711 = vmatprep.subr.bf16.mxu0 %v16701_v9  ;;  %v4637_v19 = vld [vmem:[%s18840_s1 + $0xaf0] sm:$0xff] }
 0x9e9   : > { %14751 = vmatpush1.bf16.msra.mxu1 %v16708_v13  ;;  %v4761_v41 = vld [vmem:[%s18840_s1 + $0xed0] sm:$0xff]  ;;  %v16669_v45 = vcombine.high %v4633_v47, %v4637_v19  ;;  %v16668_v46 = vcombine.low %v4633_v47, %v4637_v19 }
 0x9ea   : > { %14752 = vmatprep.subr.bf16.mxu1 %v16829_v27  ;;  %v4765_v16 = vld [vmem:[%s18840_s1 + $0xef0] sm:$0xff] }
 0x9eb   : > { %14712 = vmatpush2.bf16.msra.mxu0 %v16700_v55  ;;  %v16797_v13 = vcombine.high %v4761_v41, %v4765_v16  ;;  %v4625_v9 = vld [vmem:[%s18840_s1 + $0xa90] sm:$0xff]  ;;  %v16796_v4 = vcombine.low %v4761_v41, %v4765_v16 }
 0x9ec   : > { %14713 = vmatprep.subr.bf16.mxu0 %v16693_v25  ;;  %v4629_v27 = vld [vmem:[%s18840_s1 + $0xab0] sm:$0xff] }
 0x9ed   : > { %14753 = vmatpush2.bf16.msra.mxu1 %v16828_v15  ;;  %v4753_v32 = vld [vmem:[%s18840_s1 + $0xe90] sm:$0xff]  ;;  %v16661_v55 = vcombine.high %v4625_v9, %v4629_v27  ;;  %v16660_v60 = vcombine.low %v4625_v9, %v4629_v27 }
 0x9ee   : > { %14754 = vmatprep.subr.bf16.mxu1 %v16821_v30  ;;  %v4757_v63 = vld [vmem:[%s18840_s1 + $0xeb0] sm:$0xff] }
 0x9ef   : > { %14714 = vmatpush2.bf16.msra.mxu0 %v16692_v44  ;;  %v16789_v15 = vcombine.high %v4753_v32, %v4757_v63  ;;  %v4617_v25 = vld [vmem:[%s18840_s1 + $0xa50] sm:$0xff]  ;;  %v16788_v8 = vcombine.low %v4753_v32, %v4757_v63 }
 0x9f0   : > { %14715 = vmatprep.subr.bf16.mxu0 %v16685_v61  ;;  %v4621_v30 = vld [vmem:[%s18840_s1 + $0xa70] sm:$0xff] }
 0x9f1   : > { %14755 = vmatpush2.bf16.msra.mxu1 %v16820_v62  ;;  %v4745_v20 = vld [vmem:[%s18840_s1 + $0xe50] sm:$0xff]  ;;  %v16653_v44 = vcombine.high %v4617_v25, %v4621_v30  ;;  %v16652_v18 = vcombine.low %v4617_v25, %v4621_v30 }
 0x9f2   : > { %14756 = vmatprep.subr.bf16.mxu1 %v16813_v11  ;;  %v4749_v40 = vld [vmem:[%s18840_s1 + $0xe70] sm:$0xff] }
 0x9f3   : > { %14716 = vmatpush2.bf16.msra.mxu0 %v16684_v21  ;;  %v16781_v62 = vcombine.high %v4745_v20, %v4749_v40  ;;  %v4609_v61 = vld [vmem:[%s18840_s1 + $0xa10] sm:$0xff]  ;;  %v16780_v7 = vcombine.low %v4745_v20, %v4749_v40 }
 0x9f4   : > { %14717 = vmatprep.subr.bf16.mxu0 %v16677_v36  ;;  %v4613_v11 = vld [vmem:[%s18840_s1 + $0xa30] sm:$0xff] }
 0x9f5   : > { %14757 = vmatpush2.bf16.msra.mxu1 %v16812_v56  ;;  %v4737_v6 = vld [vmem:[%s18840_s1 + $0xe10] sm:$0xff]  ;;  %v16645_v21 = vcombine.high %v4609_v61, %v4613_v11  ;;  %v16644_v41 = vcombine.low %v4609_v61, %v4613_v11 }
 0x9f6   : > { %14758 = vmatprep.subr.bf16.mxu1 %v16805_v58  ;;  %v4741_v53 = vld [vmem:[%s18840_s1 + $0xe30] sm:$0xff] }
 0x9f7   : > { %14718 = vmatpush2.bf16.msra.mxu0 %v16676_v12  ;;  %v16773_v56 = vcombine.high %v4737_v6, %v4741_v53  ;;  %v4857_v36 = vld [vmem:[%s18840_s1 + $0x11d0] sm:$0xff]  ;;  %v16772_v16 = vcombine.low %v4737_v6, %v4741_v53 }
 0x9f8   : > { %14719 = vmatprep.subr.bf16.mxu0 %v16669_v45  ;;  %v4861_v58 = vld [vmem:[%s18840_s1 + $0x11f0] sm:$0xff] }
 0x9f9   : > { %14759 = vmatpush2.bf16.msra.mxu1 %v16804_v23  ;;  %v4985_v47 = vld [vmem:[%s18840_s1 + $0x15d0] sm:$0xff]  ;;  %v16893_v12 = vcombine.high %v4857_v36, %v4861_v58  ;;  %v16892_v32 = vcombine.low %v4857_v36, %v4861_v58 }
 0x9fa   : > { %14760 = vmatprep.subr.bf16.mxu1 %v16797_v13  ;;  %v4989_v19 = vld [vmem:[%s18840_s1 + $0x15f0] sm:$0xff] }
 0x9fb   : > { %14720 = vmatpush2.bf16.msra.mxu0 %v16668_v46  ;;  %v17021_v23 = vcombine.high %v4985_v47, %v4989_v19  ;;  %v4849_v45 = vld [vmem:[%s18840_s1 + $0x1190] sm:$0xff]  ;;  %v17020_v63 = vcombine.low %v4985_v47, %v4989_v19 }
 0x9fc   : > { %14721 = vmatprep.subr.bf16.mxu0 %v16661_v55  ;;  %v4853_v13 = vld [vmem:[%s18840_s1 + $0x11b0] sm:$0xff] }
 0x9fd   : > { %14761 = vmatpush2.bf16.msra.mxu1 %v16796_v4  ;;  %v4977_v9 = vld [vmem:[%s18840_s1 + $0x1590] sm:$0xff]  ;;  %v16885_v46 = vcombine.high %v4849_v45, %v4853_v13 }
 0x9fe   : > { %14762 = vmatprep.subr.bf16.mxu1 %v16789_v15  ;;  %v4981_v27 = vld [vmem:[%s18840_s1 + $0x15b0] sm:$0xff] }
 0x9ff   : > { %14722 = vmatpush2.bf16.msra.mxu0 %v16660_v60  ;;  %v17013_v4 = vcombine.high %v4977_v9, %v4981_v27  ;;  %v4841_v55 = vld [vmem:[%s18840_s1 + $0x1150] sm:$0xff] }
 0xa00   : > { %14723 = vmatprep.subr.bf16.mxu0 %v16653_v44  ;;  %v4845_v15 = vld [vmem:[%s18840_s1 + $0x1170] sm:$0xff] }
 0xa01   : > { %14763 = vmatpush2.bf16.msra.mxu1 %v16788_v8  ;;  %v4969_v30 = vld [vmem:[%s18840_s1 + $0x1550] sm:$0xff]  ;;  %v16884_v8 = vcombine.low %v4849_v45, %v4853_v13  ;;  %v16877_v61 = vcombine.high %v4841_v55, %v4845_v15 }
 0xa02   : > { %14764 = vmatprep.subr.bf16.mxu1 %v16781_v62  ;;  %v4973_v20 = vld [vmem:[%s18840_s1 + $0x1570] sm:$0xff]  ;;  %v17012_v62 = vcombine.low %v4977_v9, %v4981_v27 }
 0xa03   : > { %14724 = vmatpush2.bf16.msra.mxu0 %v16652_v18  ;;  %v4833_v18 = vld [vmem:[%s18840_s1 + $0x1110] sm:$0xff] }
 0xa04   : > { %14725 = vmatprep.subr.bf16.mxu0 %v16645_v21  ;;  %v4965_v36 = vld [vmem:[%s18840_s1 + $0x1530] sm:$0xff] }
 0xa05   : > { %14765 = vmatpush2.bf16.msra.mxu1 %v16780_v7  ;;  %v4837_v7 = vld [vmem:[%s18840_s1 + $0x1130] sm:$0xff] }
 0xa06   : > { %14766 = vmatprep.subr.bf16.mxu1 %v16773_v56  ;;  %v4961_v56 = vld [vmem:[%s18840_s1 + $0x1510] sm:$0xff] }
 0xa07   : > { %14726 = vmatpush2.bf16.msra.mxu0 %v16644_v41  ;;  %v17004_v41 = vcombine.low %v4969_v30, %v4973_v20  ;;  %v4825_v45 = vld [vmem:[%s18840_s1 + $0x10d0] sm:$0xff] }
 0xa08   : > { %14777 = vmatprep.subr.bf16.mxu0 %v16893_v12  ;;  %v4829_v13 = vld [vmem:[%s18840_s1 + $0x10f0] sm:$0xff] }
 0xa09   : > { %14767 = vmatpush2.bf16.msra.mxu1 %v16772_v16  ;;  %v16869_v16 = vcombine.high %v4833_v18, %v4837_v7  ;;  %v4953_v9 = vld [vmem:[%s18840_s1 + $0x14d0] sm:$0xff] }
 0xa0a   : > { %14818 = vmatprep.subr.bf16.mxu1 %v17021_v23  ;;  %v14483_v25 = vpop.f32.mrf.mxu0  ;;  %14728 = vmatmul.mubr.bf16.vlgmr.msra.gmra.mxu0 %v19969_v38  ;;  %v16997_v23 = vcombine.high %v4961_v56, %v4965_v36  ;;  %v4957_v27 = vld [vmem:[%s18840_s1 + $0x14f0] sm:$0xff] }
 0xa0b   : > { %v14484_v40 = vadd.f32 %v14483_v25, %v20881_v2  ;;  %14778 = vmatpush1.bf16.msra.mxu0 %v16892_v32  ;;  %v17005_v2 = vcombine.high %v4969_v30, %v4973_v20  ;;  %14809 = vmatprep.mubr.bf16.mxu0 %v19985_v33  ;;  %v16868_v32 = vcombine.low %v4833_v18, %v4837_v7  ;;  %v4945_v25 = vld [vmem:[%s18840_s1 + $0x1490] sm:$0xff] }
 0xa0c   : > { %v14524_v60 = vpop.f32.mrf.mxu1  ;;  %14769 = vmatmul.mubr.bf16.vlgmr.msra.gmra.mxu1 %v19977_v43  ;;  %v14485_v44 = vpop.f32.mrf.mxu0  ;;  %14779 = vmatprep.subr.bf16.mxu0 %v16885_v46  ;;  %v16861_v46 = vcombine.high %v4825_v45, %v4829_v13  ;;  %v4949_v30 = vld [vmem:[%s18840_s1 + $0x14b0] sm:$0xff]  ;;  %v16860_v20 = vcombine.low %v4825_v45, %v4829_v13 }
 0xa0d   : > { %14819 = vmatpush1.bf16.msra.mxu1 %v17020_v63  ;;  %v20955_v11 = vadd.f32 %v14524_v60, %v14484_v40  ;;  %v14486_v6 = vadd.f32 %v14485_v44, %v20890_v22  ;;  %14850 = vmatprep.mubr.bf16.mxu1 %v19992_v37  ;;  %v16876_v22 = vcombine.low %v4841_v55, %v4845_v15  ;;  %v4817_v55 = vld [vmem:[%s18840_s1 + $0x1090] sm:$0xff] }
 0xa0e   : > { %v14526_v53 = vpop.f32.mrf.mxu1  ;;  %14820 = vmatprep.subr.bf16.mxu1 %v17013_v4  ;;  %v14487_v21 = vpop.f32.mrf.mxu0  ;;  %v16996_v63 = vcombine.low %v4961_v56, %v4965_v36  ;;  %v16989_v4 = vcombine.high %v4953_v9, %v4957_v27  ;;  %v4821_v15 = vld [vmem:[%s18840_s1 + $0x10b0] sm:$0xff]  ;;  %v16988_v40 = vcombine.low %v4953_v9, %v4957_v27 }
 0xa0f   : > { %v20964_v58 = vadd.f32 %v14526_v53, %v14486_v6  ;;  %14780 = vmatpush1.bf16.msra.mxu0 %v16884_v8  ;;  %v16853_v60 = vcombine.high %v4817_v55, %v4821_v15  ;;  %v16981_v8 = vcombine.high %v4945_v25, %v4949_v30  ;;  %v4809_v44 = vld [vmem:[%s18840_s1 + $0x1050] sm:$0xff]  ;;  %v16852_v53 = vcombine.low %v4817_v55, %v4821_v15 }
 0xa10   : > { %v14528_v47 = vpop.f32.mrf.mxu1  ;;  %v14488_v19 = vpop.f32.mrf.mxu0  ;;  %14781 = vmatprep.subr.bf16.mxu0 %v16877_v61  ;;  %v4937_v61 = vld [vmem:[%s18840_s1 + $0x1450] sm:$0xff] }
 0xa11   : > { %14821 = vmatpush1.bf16.msra.mxu1 %v17012_v62  ;;  %v4813_v62 = vld [vmem:[%s18840_s1 + $0x1070] sm:$0xff] }
 0xa12   : > { %v14529_v12 = vpop.f32.mrf.mxu1  ;;  %14822 = vmatprep.subr.bf16.mxu1 %v17005_v2  ;;  %v4941_v6 = vld [vmem:[%s18840_s1 + $0x1470] sm:$0xff]  ;;  %v16980_v2 = vcombine.low %v4945_v25, %v4949_v30  ;;  %v16845_v18 = vcombine.high %v4809_v44, %v4813_v62 }
 0xa13   : > { %14782 = vmatpush1.bf16.msra.mxu0 %v16876_v22  ;;  %v16973_v7 = vcombine.high %v4937_v61, %v4941_v6  ;;  %v4801_v21 = vld [vmem:[%s18840_s1 + $0x1010] sm:$0xff]  ;;  %v16844_v22 = vcombine.low %v4809_v44, %v4813_v62  ;;  %v16972_v19 = vcombine.low %v4937_v61, %v4941_v6 }
 0xa14   : > { %14783 = vmatprep.subr.bf16.mxu0 %v16869_v16  ;;  %v4805_v56 = vld [vmem:[%s18840_s1 + $0x1030] sm:$0xff] }
 0xa15   : > { %14823 = vmatpush1.bf16.msra.mxu1 %v17004_v41  ;;  %v4929_v36 = vld [vmem:[%s18840_s1 + $0x1410] sm:$0xff]  ;;  %v16837_v41 = vcombine.high %v4801_v21, %v4805_v56  ;;  %v16836_v9 = vcombine.low %v4801_v21, %v4805_v56 }
 0xa16   : > { %14824 = vmatprep.subr.bf16.mxu1 %v16997_v23  ;;  %v4933_v47 = vld [vmem:[%s18840_s1 + $0x1430] sm:$0xff] }
 0xa17   : > { %14784 = vmatpush1.bf16.msra.mxu0 %v16868_v32  ;;  %v16965_v16 = vcombine.high %v4929_v36, %v4933_v47  ;;  %v4921_v12 = vld [vmem:[%s18840_s1 + $0x13d0] sm:$0xff]  ;;  %v16964_v27 = vcombine.low %v4929_v36, %v4933_v47 }
 0xa18   : > { %14785 = vmatprep.subr.bf16.mxu0 %v16861_v46  ;;  %v4925_v23 = vld [vmem:[%s18840_s1 + $0x13f0] sm:$0xff] }
 0xa19   : > { %14825 = vmatpush1.bf16.msra.mxu1 %v16996_v63  ;;  %v5049_v45 = vld [vmem:[%s18840_s1 + $0x17d0] sm:$0xff]  ;;  %v16957_v32 = vcombine.high %v4921_v12, %v4925_v23  ;;  %v16956_v25 = vcombine.low %v4921_v12, %v4925_v23 }
 0xa1a   : > { %14826 = vmatprep.subr.bf16.mxu1 %v16989_v4  ;;  %v5053_v13 = vld [vmem:[%s18840_s1 + $0x17f0] sm:$0xff] }
 0xa1b   : > { %14786 = vmatpush1.bf16.msra.mxu0 %v16860_v20  ;;  %v17085_v63 = vcombine.high %v5049_v45, %v5053_v13  ;;  %v4913_v46 = vld [vmem:[%s18840_s1 + $0x1390] sm:$0xff]  ;;  %v17084_v30 = vcombine.low %v5049_v45, %v5053_v13 }
 0xa1c   : > { %14787 = vmatprep.subr.bf16.mxu0 %v16853_v60  ;;  %v4917_v4 = vld [vmem:[%s18840_s1 + $0x13b0] sm:$0xff] }
 0xa1d   : > { %14827 = vmatpush1.bf16.msra.mxu1 %v16988_v40  ;;  %v5041_v55 = vld [vmem:[%s18840_s1 + $0x1790] sm:$0xff]  ;;  %v16949_v20 = vcombine.high %v4913_v46, %v4917_v4  ;;  %v16948_v61 = vcombine.low %v4913_v46, %v4917_v4 }
 0xa1e   : > { %14828 = vmatprep.subr.bf16.mxu1 %v16981_v8  ;;  %v5045_v15 = vld [vmem:[%s18840_s1 + $0x17b0] sm:$0xff] }
 0xa1f   : > { %14788 = vmatpush1.bf16.msra.mxu0 %v16852_v53  ;;  %v17077_v40 = vcombine.high %v5041_v55, %v5045_v15  ;;  %v4905_v60 = vld [vmem:[%s18840_s1 + $0x1350] sm:$0xff]  ;;  %v17076_v6 = vcombine.low %v5041_v55, %v5045_v15 }
 0xa20   : > { %14789 = vmatprep.subr.bf16.mxu0 %v16845_v18  ;;  %v4909_v8 = vld [vmem:[%s18840_s1 + $0x1370] sm:$0xff] }
 0xa21   : > { %14829 = vmatpush1.bf16.msra.mxu1 %v16980_v2  ;;  %v5033_v44 = vld [vmem:[%s18840_s1 + $0x1750] sm:$0xff]  ;;  %v16941_v53 = vcombine.high %v4905_v60, %v4909_v8  ;;  %v16940_v36 = vcombine.low %v4905_v60, %v4909_v8 }
 0xa22   : > { %14830 = vmatprep.subr.bf16.mxu1 %v16973_v7  ;;  %v5037_v62 = vld [vmem:[%s18840_s1 + $0x1770] sm:$0xff] }
 0xa23   : > { %14790 = vmatpush1.bf16.msra.mxu0 %v16844_v22  ;;  %v17069_v2 = vcombine.high %v5033_v44, %v5037_v62  ;;  %v4897_v18 = vld [vmem:[%s18840_s1 + $0x1310] sm:$0xff]  ;;  %v17068_v47 = vcombine.low %v5033_v44, %v5037_v62 }
 0xa24   : > { %14791 = vmatprep.subr.bf16.mxu0 %v16837_v41  ;;  %v4901_v7 = vld [vmem:[%s18840_s1 + $0x1330] sm:$0xff] }
 0xa25   : > { %14831 = vmatpush1.bf16.msra.mxu1 %v16972_v19  ;;  %v5025_v21 = vld [vmem:[%s18840_s1 + $0x1710] sm:$0xff]  ;;  %v16933_v22 = vcombine.high %v4897_v18, %v4901_v7  ;;  %v16932_v45 = vcombine.low %v4897_v18, %v4901_v7 }
 0xa26   : > { %14832 = vmatprep.subr.bf16.mxu1 %v16965_v16  ;;  %v5029_v56 = vld [vmem:[%s18840_s1 + $0x1730] sm:$0xff] }
 0xa27   : > { %14792 = vmatpush1.bf16.msra.mxu0 %v16836_v9  ;;  %v17061_v19 = vcombine.high %v5025_v21, %v5029_v56  ;;  %v4889_v41 = vld [vmem:[%s18840_s1 + $0x12d0] sm:$0xff]  ;;  %v17060_v13 = vcombine.low %v5025_v21, %v5029_v56 }
 0xa28   : > { %14793 = vmatprep.subr.bf16.mxu0 %v16957_v32  ;;  %v4893_v16 = vld [vmem:[%s18840_s1 + $0x12f0] sm:$0xff] }
 0xa29   : > { %14833 = vmatpush1.bf16.msra.mxu1 %v16964_v27  ;;  %v5017_v12 = vld [vmem:[%s18840_s1 + $0x16d0] sm:$0xff]  ;;  %v16925_v9 = vcombine.high %v4889_v41, %v4893_v16  ;;  %v16924_v55 = vcombine.low %v4889_v41, %v4893_v16 }
 0xa2a   : > { %14834 = vmatprep.subr.bf16.mxu1 %v17085_v63  ;;  %v5021_v23 = vld [vmem:[%s18840_s1 + $0x16f0] sm:$0xff] }
 0xa2b   : > { %14794 = vmatpush2.bf16.msra.mxu0 %v16956_v25  ;;  %v17053_v27 = vcombine.high %v5017_v12, %v5021_v23  ;;  %v4881_v32 = vld [vmem:[%s18840_s1 + $0x1290] sm:$0xff]  ;;  %v17052_v15 = vcombine.low %v5017_v12, %v5021_v23 }
 0xa2c   : > { %14795 = vmatprep.subr.bf16.mxu0 %v16949_v20  ;;  %v4885_v63 = vld [vmem:[%s18840_s1 + $0x12b0] sm:$0xff] }
 0xa2d   : > { %14835 = vmatpush2.bf16.msra.mxu1 %v17084_v30  ;;  %v5009_v46 = vld [vmem:[%s18840_s1 + $0x1690] sm:$0xff]  ;;  %v16917_v25 = vcombine.high %v4881_v32, %v4885_v63  ;;  %v16916_v44 = vcombine.low %v4881_v32, %v4885_v63 }
 0xa2e   : > { %14836 = vmatprep.subr.bf16.mxu1 %v17077_v40  ;;  %v5013_v4 = vld [vmem:[%s18840_s1 + $0x16b0] sm:$0xff] }
 0xa2f   : > { %14796 = vmatpush2.bf16.msra.mxu0 %v16948_v61  ;;  %v17045_v30 = vcombine.high %v5009_v46, %v5013_v4  ;;  %v4873_v20 = vld [vmem:[%s18840_s1 + $0x1250] sm:$0xff]  ;;  %v17044_v62 = vcombine.low %v5009_v46, %v5013_v4 }
 0xa30   : > { %14797 = vmatprep.subr.bf16.mxu0 %v16941_v53  ;;  %v4877_v40 = vld [vmem:[%s18840_s1 + $0x1270] sm:$0xff] }
 0xa31   : > { %14837 = vmatpush2.bf16.msra.mxu1 %v17076_v6  ;;  %v5001_v60 = vld [vmem:[%s18840_s1 + $0x1650] sm:$0xff]  ;;  %v16909_v61 = vcombine.high %v4873_v20, %v4877_v40  ;;  %v16908_v21 = vcombine.low %v4873_v20, %v4877_v40 }
 0xa32   : > { %14838 = vmatprep.subr.bf16.mxu1 %v17069_v2  ;;  %v5005_v8 = vld [vmem:[%s18840_s1 + $0x1670] sm:$0xff] }
 0xa33   : > { %14798 = vmatpush2.bf16.msra.mxu0 %v16940_v36  ;;  %v17037_v6 = vcombine.high %v5001_v60, %v5005_v8  ;;  %v4865_v53 = vld [vmem:[%s18840_s1 + $0x1210] sm:$0xff]  ;;  %v17036_v56 = vcombine.low %v5001_v60, %v5005_v8 }
 0xa34   : > { %14799 = vmatprep.subr.bf16.mxu0 %v16933_v22  ;;  %v4869_v2 = vld [vmem:[%s18840_s1 + $0x1230] sm:$0xff] }
 0xa35   : > { %14839 = vmatpush2.bf16.msra.mxu1 %v17068_v47  ;;  %v4993_v18 = vld [vmem:[%s18840_s1 + $0x1610] sm:$0xff]  ;;  %v16901_v36 = vcombine.high %v4865_v53, %v4869_v2  ;;  %v16900_v12 = vcombine.low %v4865_v53, %v4869_v2 }
 0xa36   : > { %14840 = vmatprep.subr.bf16.mxu1 %v17061_v19  ;;  %v4997_v7 = vld [vmem:[%s18840_s1 + $0x1630] sm:$0xff] }
 0xa37   : > { %14800 = vmatpush2.bf16.msra.mxu0 %v16932_v45  ;;  %v17029_v47 = vcombine.high %v4993_v18, %v4997_v7  ;;  %v5113_v22 = vld [vmem:[%s18840_s1 + $0x19d0] sm:$0xff]  ;;  %v17028_v23 = vcombine.low %v4993_v18, %v4997_v7 }
 0xa38   : > { %14801 = vmatprep.subr.bf16.mxu0 %v16925_v9  ;;  %v5117_v19 = vld [vmem:[%s18840_s1 + $0x19f0] sm:$0xff] }
 0xa39   : > { %14841 = vmatpush2.bf16.msra.mxu1 %v17060_v13  ;;  %v5241_v41 = vld [vmem:[%s18840_s1 + $0x1dd0] sm:$0xff]  ;;  %v17149_v45 = vcombine.high %v5113_v22, %v5117_v19  ;;  %v17148_v46 = vcombine.low %v5113_v22, %v5117_v19 }
 0xa3a   : > { %14842 = vmatprep.subr.bf16.mxu1 %v17053_v27  ;;  %v5245_v16 = vld [vmem:[%s18840_s1 + $0x1df0] sm:$0xff] }
 0xa3b   : > { %14802 = vmatpush2.bf16.msra.mxu0 %v16924_v55  ;;  %v17277_v13 = vcombine.high %v5241_v41, %v5245_v16  ;;  %v5105_v9 = vld [vmem:[%s18840_s1 + $0x1990] sm:$0xff]  ;;  %v17276_v4 = vcombine.low %v5241_v41, %v5245_v16 }
 0xa3c   : > { %14803 = vmatprep.subr.bf16.mxu0 %v16917_v25  ;;  %v5109_v27 = vld [vmem:[%s18840_s1 + $0x19b0] sm:$0xff] }
 0xa3d   : > { %14843 = vmatpush2.bf16.msra.mxu1 %v17052_v15  ;;  %v5233_v32 = vld [vmem:[%s18840_s1 + $0x1d90] sm:$0xff]  ;;  %v17141_v55 = vcombine.high %v5105_v9, %v5109_v27 }
 0xa3e   : > { %14844 = vmatprep.subr.bf16.mxu1 %v17045_v30  ;;  %v5237_v63 = vld [vmem:[%s18840_s1 + $0x1db0] sm:$0xff] }
 0xa3f   : > { %14804 = vmatpush2.bf16.msra.mxu0 %v16916_v44  ;;  %v17269_v15 = vcombine.high %v5233_v32, %v5237_v63  ;;  %v5097_v25 = vld [vmem:[%s18840_s1 + $0x1950] sm:$0xff]  ;;  %v17268_v2 = vcombine.low %v5233_v32, %v5237_v63 }
 0xa40   : > { %14805 = vmatprep.subr.bf16.mxu0 %v16909_v61  ;;  %v5101_v30 = vld [vmem:[%s18840_s1 + $0x1970] sm:$0xff] }
 0xa41   : > { %14845 = vmatpush2.bf16.msra.mxu1 %v17044_v62  ;;  %v5225_v40 = vld [vmem:[%s18840_s1 + $0x1d50] sm:$0xff]  ;;  %v17140_v62 = vcombine.low %v5105_v9, %v5109_v27  ;;  %v17133_v18 = vcombine.high %v5097_v25, %v5101_v30 }
 0xa42   : > { %14846 = vmatprep.subr.bf16.mxu1 %v17037_v6  ;;  %v5229_v60 = vld [vmem:[%s18840_s1 + $0x1d70] sm:$0xff] }
 0xa43   : > { %14806 = vmatpush2.bf16.msra.mxu0 %v16908_v21  ;;  %v18055_v61 = vld [vmem:[%s18848_s5] sm:$0xff] }
 0xa44   : > { %14807 = vmatprep.subr.bf16.mxu0 %v16901_v36  ;;  %v15618_v6 = vrot.slane %v18055_v61, %v5835_v3  ;;  %v5089_v36 = vld [vmem:[%s18840_s1 + $0x1910] sm:$0xff] }
 0xa45   : > { %14847 = vmatpush2.bf16.msra.mxu1 %v17036_v56  ;;  %v17261_v56 = vcombine.high %v5225_v40, %v5229_v60  ;;  %v5217_v19 = vld [vmem:[%s18840_s1 + $0x1d10] sm:$0xff] }
 0xa46   : > { %14848 = vmatprep.subr.bf16.mxu1 %v17029_v47  ;;  %v5093_v47 = vld [vmem:[%s18840_s1 + $0x1930] sm:$0xff] }
 0xa47   : > { %14808 = vmatpush2.bf16.msra.mxu0 %v16900_v12  ;;  %v5221_v41 = vld [vmem:[%s18840_s1 + $0x1d30] sm:$0xff]  ;;  %v15622_v12 = vrot.slane %v18055_v61, %v5839_v34  ;;  %v17125_v9 = vcombine.high %v5089_v36, %v5093_v47 }
 0xa48   : > { %14859 = vmatprep.subr.bf16.mxu0 %v17149_v45  ;;  %v5209_v34 = vld [vmem:[%s18840_s1 + $0x1cd0] sm:$0xff] }
 0xa49   : > { %14849 = vmatpush2.bf16.msra.mxu1 %v17028_v23  ;;  %v17132_v23 = vcombine.low %v5097_v25, %v5101_v30  ;;  %v5077_v61 = vld [vmem:[%s18840_s1 + $0x18b0] sm:$0xff] }
 0xa4a   : > { %14900 = vmatprep.subr.bf16.mxu1 %v17277_v13  ;;  %v14565_v20 = vpop.f32.mrf.mxu0  ;;  %14810 = vmatmul.mubr.bf16.vlgmr.msra.gmra.mxu0 %v20057_v0  ;;  %v17260_v13 = vcombine.low %v5225_v40, %v5229_v60  ;;  %v17252_v40 = vcombine.low %v5217_v19, %v5221_v41 }
 0xa4b   : > { %v14566_v8 = vadd.f32 %v14565_v20, %v20955_v11  ;;  %14860 = vmatpush1.bf16.msra.mxu0 %v17148_v46  ;;  %14891 = vmatprep.mubr.bf16.mxu0 %v20073_v59  ;;  %v17253_v46 = vcombine.high %v5217_v19, %v5221_v41  ;;  %v17124_v20 = vcombine.low %v5089_v36, %v5093_v47  ;;  %v5197_v36 = vld [vmem:[%s18840_s1 + $0x1c70] sm:$0xff] }
 0xa4c   : > { %v14606_v44 = vpop.f32.mrf.mxu1  ;;  %14851 = vmatmul.mubr.bf16.vlgmr.msra.gmra.mxu1 %v20065_v51  ;;  %v14567_v53 = vpop.f32.mrf.mxu0  ;;  %14861 = vmatprep.subr.bf16.mxu0 %v17141_v55  ;;  %v5085_v55 = vld [vmem:[%s18840_s1 + $0x18f0] sm:$0xff] }
 0xa4d   : > { %14901 = vmatpush1.bf16.msra.mxu1 %v17276_v4  ;;  %v14607_v7 = vadd.f32 %v14606_v44, %v14566_v8  ;;  %v14568_v11 = vadd.f32 %v14567_v53, %v20964_v58  ;;  %14932 = vmatprep.mubr.bf16.mxu1 %v20080_v31  ;;  %v5081_v4 = vld [vmem:[%s18840_s1 + $0x18d0] sm:$0xff] }
 0xa4e   : > { %v14608_v21 = vpop.f32.mrf.mxu1  ;;  %14902 = vmatprep.subr.bf16.mxu1 %v17269_v15  ;;  %v14569_v22 = vpop.f32.mrf.mxu0  ;;  %v5213_v15 = vld [vmem:[%s18840_s1 + $0x1cf0] sm:$0xff]  ;;  %v17117_v60 = vcombine.high %v5081_v4, %v5085_v55 }
 0xa4f   : > { %v15599_v3 = vmax.f32 %v14607_v7, 0.0  ;;  %v14609_v16 = vadd.f32 %v14608_v21, %v14568_v11  ;;  %14862 = vmatpush1.bf16.msra.mxu0 %v17140_v62  ;;  %v17245_v44 = vcombine.high %v5209_v34, %v5213_v15  ;;  %v5073_v62 = vld [vmem:[%s18840_s1 + $0x1890] sm:$0xff] }
 0xa50   : > { %v14610_v58 = vpop.f32.mrf.mxu1  ;;  %v14570_v45 = vpop.f32.mrf.mxu0  ;;  %14863 = vmatprep.subr.bf16.mxu0 %v17133_v18  ;;  %v5205_v53 = vld [vmem:[%s18840_s1 + $0x1cb0] sm:$0xff]  ;;  %v17109_v18 = vcombine.high %v5073_v62, %v5077_v61  ;;  %v17108_v47 = vcombine.low %v5073_v62, %v5077_v61 }
 0xa51   : > { %14903 = vmatpush1.bf16.msra.mxu1 %v17268_v2  ;;  %v15649_v27 = vmul.f32 %v15618_v6, %v15599_v3  ;;  %v15600_v32 = vmax.f32 %v14609_v16, 0.0  ;;  %v5201_v6 = vld [vmem:[%s18840_s1 + $0x1c90] sm:$0xff]  ;;  %v17244_v2 = vcombine.low %v5209_v34, %v5213_v15 }
 0xa52   : > { %v14611_v63 = vpop.f32.mrf.mxu1  ;;  %14904 = vmatprep.subr.bf16.mxu1 %v17261_v56  ;;  %v17237_v7 = vcombine.high %v5201_v6, %v5205_v53  ;;  %v5065_v11 = vld [vmem:[%s18840_s1 + $0x1850] sm:$0xff]  ;;  %v17236_v22 = vcombine.low %v5201_v6, %v5205_v53 }
 0xa53   : > { %v15656_v25 = vadd.f32 %v20593_v29, %v15649_v27  ;;  %v15650_v30 = vmul.f32 %v15622_v12, %v15600_v32  ;;  %14864 = vmatpush1.bf16.msra.mxu0 %v17132_v23  ;;  %v17116_v29 = vcombine.low %v5081_v4, %v5085_v55  ;;  %v5069_v21 = vld [vmem:[%s18840_s1 + $0x1870] sm:$0xff] }
 0xa54   : > { %14865 = vmatprep.subr.bf16.mxu0 %v17125_v9  ;;  %v5193_v56 = vld [vmem:[%s18840_s1 + $0x1c50] sm:$0xff]  ;;  %v17101_v19 = vcombine.high %v5065_v11, %v5069_v21  ;;  %v17100_v23 = vcombine.low %v5065_v11, %v5069_v21 }
 0xa55   : > { %14905 = vmatpush1.bf16.msra.mxu1 %v17260_v13  ;;  %v21046_v8 = vadd.f32 %v15656_v25, %v15650_v30  ;;  %v17229_v41 = vcombine.high %v5193_v56, %v5197_v36  ;;  %v5057_v3 = vld [vmem:[%s18840_s1 + $0x1810] sm:$0xff]  ;;  %v17228_v45 = vcombine.low %v5193_v56, %v5197_v36 }
 0xa56   : > { %14906 = vmatprep.subr.bf16.mxu1 %v17253_v46  ;;  %v5061_v16 = vld [vmem:[%s18840_s1 + $0x1830] sm:$0xff] }
 0xa57   : > { %14866 = vmatpush1.bf16.msra.mxu0 %v17124_v20  ;;  %v5185_v12 = vld [vmem:[%s18840_s1 + $0x1c10] sm:$0xff]  ;;  %v17093_v13 = vcombine.high %v5057_v3, %v5061_v16  ;;  %v17092_v4 = vcombine.low %v5057_v3, %v5061_v16 }
 0xa58   : > { %14867 = vmatprep.subr.bf16.mxu0 %v17117_v60  ;;  %v5189_v58 = vld [vmem:[%s18840_s1 + $0x1c30] sm:$0xff] }
 0xa59   : > { %14907 = vmatpush1.bf16.msra.mxu1 %v17252_v40  ;;  %v17221_v9 = vcombine.high %v5185_v12, %v5189_v58  ;;  %v5177_v27 = vld [vmem:[%s18840_s1 + $0x1bd0] sm:$0xff]  ;;  %v17220_v55 = vcombine.low %v5185_v12, %v5189_v58 }
 0xa5a   : > { %14908 = vmatprep.subr.bf16.mxu1 %v17245_v44  ;;  %v5181_v32 = vld [vmem:[%s18840_s1 + $0x1bf0] sm:$0xff] }
 0xa5b   : > { %14868 = vmatpush1.bf16.msra.mxu0 %v17116_v29  ;;  %v5305_v63 = vld [vmem:[%s18840_s1 + $0x1fd0] sm:$0xff]  ;;  %v17213_v34 = vcombine.high %v5177_v27, %v5181_v32  ;;  %v17212_v60 = vcombine.low %v5177_v27, %v5181_v32 }
 0xa5c   : > { %14869 = vmatprep.subr.bf16.mxu0 %v17109_v18  ;;  %v5309_v46 = vld [vmem:[%s18840_s1 + $0x1ff0] sm:$0xff] }
 0xa5d   : > { %14909 = vmatpush1.bf16.msra.mxu1 %v17244_v2  ;;  %v17341_v15 = vcombine.high %v5305_v63, %v5309_v46  ;;  %v5169_v25 = vld [vmem:[%s18840_s1 + $0x1b90] sm:$0xff]  ;;  %v17340_v44 = vcombine.low %v5305_v63, %v5309_v46 }
 0xa5e   : > { %14910 = vmatprep.subr.bf16.mxu1 %v17237_v7  ;;  %v5173_v30 = vld [vmem:[%s18840_s1 + $0x1bb0] sm:$0xff] }
 0xa5f   : > { %14870 = vmatpush1.bf16.msra.mxu0 %v17108_v47  ;;  %v5297_v20 = vld [vmem:[%s18840_s1 + $0x1f90] sm:$0xff]  ;;  %v17205_v62 = vcombine.high %v5169_v25, %v5173_v30  ;;  %v17204_v18 = vcombine.low %v5169_v25, %v5173_v30 }
 0xa60   : > { %14871 = vmatprep.subr.bf16.mxu0 %v17101_v19  ;;  %v5301_v40 = vld [vmem:[%s18840_s1 + $0x1fb0] sm:$0xff] }
 0xa61   : > { %14911 = vmatpush1.bf16.msra.mxu1 %v17236_v22  ;;  %v17333_v61 = vcombine.high %v5297_v20, %v5301_v40  ;;  %v5161_v6 = vld [vmem:[%s18840_s1 + $0x1b50] sm:$0xff]  ;;  %v17332_v7 = vcombine.low %v5297_v20, %v5301_v40 }
 0xa62   : > { %14912 = vmatprep.subr.bf16.mxu1 %v17229_v41  ;;  %v5165_v53 = vld [vmem:[%s18840_s1 + $0x1b70] sm:$0xff] }
 0xa63   : > { %14872 = vmatpush1.bf16.msra.mxu0 %v17100_v23  ;;  %v5289_v29 = vld [vmem:[%s18840_s1 + $0x1f50] sm:$0xff]  ;;  %v17197_v11 = vcombine.high %v5161_v6, %v5165_v53  ;;  %v17196_v19 = vcombine.low %v5161_v6, %v5165_v53 }
 0xa64   : > { %14873 = vmatprep.subr.bf16.mxu0 %v17093_v13  ;;  %v5293_v2 = vld [vmem:[%s18840_s1 + $0x1f70] sm:$0xff] }
 0xa65   : > { %14913 = vmatpush1.bf16.msra.mxu1 %v17228_v45  ;;  %v17325_v21 = vcombine.high %v5289_v29, %v5293_v2  ;;  %v5153_v56 = vld [vmem:[%s18840_s1 + $0x1b10] sm:$0xff]  ;;  %v17324_v41 = vcombine.low %v5289_v29, %v5293_v2 }
 0xa66   : > { %14914 = vmatprep.subr.bf16.mxu1 %v17221_v9  ;;  %v5157_v36 = vld [vmem:[%s18840_s1 + $0x1b30] sm:$0xff] }
 0xa67   : > { %14874 = vmatpush1.bf16.msra.mxu0 %v17092_v4  ;;  %v5281_v47 = vld [vmem:[%s18840_s1 + $0x1f10] sm:$0xff]  ;;  %v17189_v3 = vcombine.high %v5153_v56, %v5157_v36  ;;  %v17188_v13 = vcombine.low %v5153_v56, %v5157_v36 }
 0xa68   : > { %14875 = vmatprep.subr.bf16.mxu0 %v17213_v34  ;;  %v5285_v22 = vld [vmem:[%s18840_s1 + $0x1f30] sm:$0xff] }
 0xa69   : > { %14915 = vmatpush1.bf16.msra.mxu1 %v17220_v55  ;;  %v17317_v16 = vcombine.high %v5281_v47, %v5285_v22  ;;  %v5145_v12 = vld [vmem:[%s18840_s1 + $0x1ad0] sm:$0xff]  ;;  %v17316_v9 = vcombine.low %v5281_v47, %v5285_v22 }
 0xa6a   : > { %14916 = vmatprep.subr.bf16.mxu1 %v17341_v15  ;;  %v5149_v58 = vld [vmem:[%s18840_s1 + $0x1af0] sm:$0xff] }
 0xa6b   : > { %14876 = vmatpush2.bf16.msra.mxu0 %v17212_v60  ;;  %v5273_v23 = vld [vmem:[%s18840_s1 + $0x1ed0] sm:$0xff]  ;;  %v17181_v27 = vcombine.high %v5145_v12, %v5149_v58  ;;  %v17180_v34 = vcombine.low %v5145_v12, %v5149_v58 }
 0xa6c   : > { %14877 = vmatprep.subr.bf16.mxu0 %v17205_v62  ;;  %v5277_v45 = vld [vmem:[%s18840_s1 + $0x1ef0] sm:$0xff] }
 0xa6d   : > { %14917 = vmatpush2.bf16.msra.mxu1 %v17340_v44  ;;  %v17309_v32 = vcombine.high %v5273_v23, %v5277_v45  ;;  %v5137_v63 = vld [vmem:[%s18840_s1 + $0x1a90] sm:$0xff]  ;;  %v17308_v15 = vcombine.low %v5273_v23, %v5277_v45  ;;  %v5847_v45 = vsub.s32 5, %v20137_v17 }
 0xa6e   : > { %14918 = vmatprep.subr.bf16.mxu1 %v17333_v61  ;;  %v5141_v46 = vld [vmem:[%s18840_s1 + $0x1ab0] sm:$0xff] }
 0xa6f   : > { %14878 = vmatpush2.bf16.msra.mxu0 %v17204_v18  ;;  %v5265_v4 = vld [vmem:[%s18840_s1 + $0x1e90] sm:$0xff]  ;;  %v17173_v25 = vcombine.high %v5137_v63, %v5141_v46  ;;  %v17172_v62 = vcombine.low %v5137_v63, %v5141_v46  ;;  %v18056_v63 = vld [vmem:[%s18846_s24] sm:$0xff] }
 0xa70   : > { %14879 = vmatprep.subr.bf16.mxu0 %v17197_v11  ;;  %v5269_v55 = vld [vmem:[%s18840_s1 + $0x1eb0] sm:$0xff] }
 0xa71   : > { %14919 = vmatpush2.bf16.msra.mxu1 %v17332_v7  ;;  %v17301_v30 = vcombine.high %v5265_v4, %v5269_v55  ;;  %v5129_v20 = vld [vmem:[%s18840_s1 + $0x1a50] sm:$0xff]  ;;  %v17300_v61 = vcombine.low %v5265_v4, %v5269_v55 }
 0xa72   : > { %14920 = vmatprep.subr.bf16.mxu1 %v17325_v21  ;;  %v5133_v40 = vld [vmem:[%s18840_s1 + $0x1a70] sm:$0xff] }
 0xa73   : > { %14880 = vmatpush2.bf16.msra.mxu0 %v17196_v19  ;;  %v5257_v60 = vld [vmem:[%s18840_s1 + $0x1e50] sm:$0xff]  ;;  %v17165_v6 = vcombine.high %v5129_v20, %v5133_v40  ;;  %v17164_v11 = vcombine.low %v5129_v20, %v5133_v40 }
 0xa74   : > { %14881 = vmatprep.subr.bf16.mxu0 %v17189_v3  ;;  %v5261_v44 = vld [vmem:[%s18840_s1 + $0x1e70] sm:$0xff] }
 0xa75   : > { %14921 = vmatpush2.bf16.msra.mxu1 %v17324_v41  ;;  %v17293_v53 = vcombine.high %v5257_v60, %v5261_v44  ;;  %v5121_v29 = vld [vmem:[%s18840_s1 + $0x1a10] sm:$0xff]  ;;  %v17292_v21 = vcombine.low %v5257_v60, %v5261_v44 }
 0xa76   : > { %14922 = vmatprep.subr.bf16.mxu1 %v17317_v16  ;;  %v5125_v2 = vld [vmem:[%s18840_s1 + $0x1a30] sm:$0xff]  ;;  %v5843_v16 = vsub.s32 4, %v20137_v17 }
 0xa77   : > { %14882 = vmatpush2.bf16.msra.mxu0 %v17188_v13  ;;  %v5249_v18 = vld [vmem:[%s18840_s1 + $0x1e10] sm:$0xff]  ;;  %v17157_v56 = vcombine.high %v5121_v29, %v5125_v2  ;;  %v17156_v3 = vcombine.low %v5121_v29, %v5125_v2 }
 0xa78   : > { %14883 = vmatprep.subr.bf16.mxu0 %v17181_v27  ;;  %v5253_v7 = vld [vmem:[%s18840_s1 + $0x1e30] sm:$0xff]  ;;  %v5844_v46 = vrot.slane %v18056_v63, %v5843_v16 }
 0xa79   : > { %14923 = vmatpush2.bf16.msra.mxu1 %v17316_v9  ;;  %v17285_v36 = vcombine.high %v5249_v18, %v5253_v7  ;;  %v5369_v47 = vld [vmem:[%s18840_s1 + $0x21d0] sm:$0xff]  ;;  %v17284_v12 = vcombine.low %v5249_v18, %v5253_v7 }
 0xa7a   : > { %14924 = vmatprep.subr.bf16.mxu1 %v17309_v32  ;;  %v5373_v22 = vld [vmem:[%s18840_s1 + $0x21f0] sm:$0xff] }
 0xa7b   : > { %14884 = vmatpush2.bf16.msra.mxu0 %v17180_v34  ;;  %v5497_v19 = vld [vmem:[%s18840_s1 + $0x25d0] sm:$0xff]  ;;  %v17405_v58 = vcombine.high %v5369_v47, %v5373_v22  ;;  %v17404_v4 = vcombine.low %v5369_v47, %v5373_v22 }
 0xa7c   : > { %14885 = vmatprep.subr.bf16.mxu0 %v17173_v25  ;;  %v5501_v41 = vld [vmem:[%s18840_s1 + $0x25f0] sm:$0xff] }
 0xa7d   : > { %14925 = vmatpush2.bf16.msra.mxu1 %v17308_v15  ;;  %v17533_v23 = vcombine.high %v5497_v19, %v5501_v41  ;;  %v5361_v13 = vld [vmem:[%s18840_s1 + $0x2190] sm:$0xff]  ;;  %v17532_v55 = vcombine.low %v5497_v19, %v5501_v41  ;;  %v5848_v15 = vrot.slane %v18056_v63, %v5847_v45 }
 0xa7e   : > { %14926 = vmatprep.subr.bf16.mxu1 %v17301_v30  ;;  %v5365_v9 = vld [vmem:[%s18840_s1 + $0x21b0] sm:$0xff] }
 0xa7f   : > { %14886 = vmatpush2.bf16.msra.mxu0 %v17172_v62  ;;  %v5489_v27 = vld [vmem:[%s18840_s1 + $0x2590] sm:$0xff]  ;;  %v17397_v34 = vcombine.high %v5361_v13, %v5365_v9 }
 0xa80   : > { %14887 = vmatprep.subr.bf16.mxu0 %v17165_v6  ;;  %v5493_v32 = vld [vmem:[%s18840_s1 + $0x25b0] sm:$0xff]  ;;  %v17396_v6 = vcombine.low %v5361_v13, %v5365_v9 }
 0xa81   : > { %14927 = vmatpush2.bf16.msra.mxu1 %v17300_v61  ;;  %v17525_v25 = vcombine.high %v5489_v27, %v5493_v32  ;;  %v5353_v30 = vld [vmem:[%s18840_s1 + $0x2150] sm:$0xff]  ;;  %v17524_v29 = vcombine.low %v5489_v27, %v5493_v32 }
 0xa82   : > { %14928 = vmatprep.subr.bf16.mxu1 %v17293_v53  ;;  %v5357_v20 = vld [vmem:[%s18840_s1 + $0x2170] sm:$0xff] }
 0xa83   : > { %14888 = vmatpush2.bf16.msra.mxu0 %v17164_v11  ;;  %v5481_v60 = vld [vmem:[%s18840_s1 + $0x2550] sm:$0xff]  ;;  %v17389_v2 = vcombine.high %v5353_v30, %v5357_v20 }
 0xa84   : > { %14889 = vmatprep.subr.bf16.mxu0 %v17157_v56  ;;  %v5485_v44 = vld [vmem:[%s18840_s1 + $0x2570] sm:$0xff] }
 0xa85   : > { %14929 = vmatpush2.bf16.msra.mxu1 %v17292_v21  ;;  %v17517_v21 = vcombine.high %v5481_v60, %v5485_v44  ;;  %v5345_v56 = vld [vmem:[%s18840_s1 + $0x2110] sm:$0xff] }
 0xa86   : > { %14930 = vmatprep.subr.bf16.mxu1 %v17285_v36  ;;  %v5349_v36 = vld [vmem:[%s18840_s1 + $0x2130] sm:$0xff] }
 0xa87   : > { %14890 = vmatpush2.bf16.msra.mxu0 %v17156_v3  ;;  %v5473_v22 = vld [vmem:[%s18840_s1 + $0x2510] sm:$0xff]  ;;  %v17381_v13 = vcombine.high %v5345_v56, %v5349_v36 }
 0xa88   : > { %14941 = vmatprep.subr.bf16.mxu0 %v17405_v58  ;;  %v5477_v19 = vld [vmem:[%s18840_s1 + $0x2530] sm:$0xff] }
 0xa89   : > { %14931 = vmatpush2.bf16.msra.mxu1 %v17284_v12  ;;  %v17388_v12 = vcombine.low %v5353_v30, %v5357_v20  ;;  %v17509_v27 = vcombine.high %v5473_v22, %v5477_v19  ;;  %v5337_v32 = vld [vmem:[%s18840_s1 + $0x20d0] sm:$0xff] }
 0xa8a   : > { %14982 = vmatprep.subr.bf16.mxu1 %v17533_v23  ;;  %v14647_v40 = vpop.f32.mrf.mxu0  ;;  %14892 = vmatmul.mubr.bf16.vlgmr.msra.gmra.mxu0 %v20150_v54  ;;  %v17516_v23 = vcombine.low %v5481_v60, %v5485_v44  ;;  %v5341_v63 = vld [vmem:[%s18840_s1 + $0x20f0] sm:$0xff] }
 0xa8b   : > { %v14648_v62 = vadd.f32 %v14647_v40, %v5844_v46  ;;  %14942 = vmatpush1.bf16.msra.mxu0 %v17404_v4  ;;  %14973 = vmatprep.mubr.bf16.mxu0 %v20170_v52  ;;  %v5465_v46 = vld [vmem:[%s18840_s1 + $0x24d0] sm:$0xff]  ;;  %v17372_v44 = vcombine.low %v5337_v32, %v5341_v63 }
 0xa8c   : > { %v14688_v61 = vpop.f32.mrf.mxu1  ;;  %14933 = vmatmul.mubr.bf16.vlgmr.msra.gmra.mxu1 %v20160_v35  ;;  %v14649_v53 = vpop.f32.mrf.mxu0  ;;  %14943 = vmatprep.subr.bf16.mxu0 %v17397_v34  ;;  %v5469_v4 = vld [vmem:[%s18840_s1 + $0x24f0] sm:$0xff]  ;;  %v17508_v34 = vcombine.low %v5473_v22, %v5477_v19 }
 0xa8d   : > { %14983 = vmatpush1.bf16.msra.mxu1 %v17532_v55  ;;  %v21113_v18 = vadd.f32 %v14688_v61, %v14648_v62  ;;  %v14650_v7 = vadd.f32 %v14649_v53, %v5848_v15  ;;  %15014 = vmatprep.mubr.bf16.mxu1 %v20177_v57  ;;  %v17380_v55 = vcombine.low %v5345_v56, %v5349_v36  ;;  %v5329_v30 = vld [vmem:[%s18840_s1 + $0x2090] sm:$0xff] }
 0xa8e   : > { %v14690_v11 = vpop.f32.mrf.mxu1  ;;  %14984 = vmatprep.subr.bf16.mxu1 %v17525_v25  ;;  %v14651_v47 = vpop.f32.mrf.mxu0  ;;  %v17373_v15 = vcombine.high %v5337_v32, %v5341_v63  ;;  %v17501_v25 = vcombine.high %v5465_v46, %v5469_v4  ;;  %v5333_v20 = vld [vmem:[%s18840_s1 + $0x20b0] sm:$0xff]  ;;  %v17500_v62 = vcombine.low %v5465_v46, %v5469_v4 }
 0xa8f   : > { %v21121_v41 = vadd.f32 %v14690_v11, %v14650_v7  ;;  %14944 = vmatpush1.bf16.msra.mxu0 %v17396_v6  ;;  %v5457_v40 = vld [vmem:[%s18840_s1 + $0x2490] sm:$0xff]  ;;  %v17365_v61 = vcombine.high %v5329_v30, %v5333_v20  ;;  %v17364_v11 = vcombine.low %v5329_v30, %v5333_v20 }
 0xa90   : > { %v14692_v3 = vpop.f32.mrf.mxu1  ;;  %v14652_v58 = vpop.f32.mrf.mxu0  ;;  %14945 = vmatprep.subr.bf16.mxu0 %v17389_v2  ;;  %v5461_v60 = vld [vmem:[%s18840_s1 + $0x24b0] sm:$0xff] }
 0xa91   : > { %14985 = vmatpush1.bf16.msra.mxu1 %v17524_v29  ;;  %v17493_v6 = vcombine.high %v5457_v40, %v5461_v60  ;;  %v5321_v53 = vld [vmem:[%s18840_s1 + $0x2050] sm:$0xff] }
 0xa92   : > { %v14693_v9 = vpop.f32.mrf.mxu1  ;;  %14986 = vmatprep.subr.bf16.mxu1 %v17517_v21  ;;  %v5325_v29 = vld [vmem:[%s18840_s1 + $0x2070] sm:$0xff]  ;;  %v17492_v21 = vcombine.low %v5457_v40, %v5461_v60 }
 0xa93   : > { %14946 = vmatpush1.bf16.msra.mxu0 %v17388_v12  ;;  %v5449_v2 = vld [vmem:[%s18840_s1 + $0x2450] sm:$0xff]  ;;  %v17357_v56 = vcombine.high %v5321_v53, %v5325_v29  ;;  %v17356_v12 = vcombine.low %v5321_v53, %v5325_v29 }
 0xa94   : > { %14947 = vmatprep.subr.bf16.mxu0 %v17381_v13  ;;  %v5453_v7 = vld [vmem:[%s18840_s1 + $0x2470] sm:$0xff] }
 0xa95   : > { %14987 = vmatpush1.bf16.msra.mxu1 %v17516_v23  ;;  %v17485_v36 = vcombine.high %v5449_v2, %v5453_v7  ;;  %v5313_v47 = vld [vmem:[%s18840_s1 + $0x2010] sm:$0xff]  ;;  %v17484_v58 = vcombine.low %v5449_v2, %v5453_v7 }
 0xa96   : > { %14988 = vmatprep.subr.bf16.mxu1 %v17509_v27  ;;  %v5317_v22 = vld [vmem:[%s18840_s1 + $0x2030] sm:$0xff] }
 0xa97   : > { %14948 = vmatpush1.bf16.msra.mxu0 %v17380_v55  ;;  %v5441_v19 = vld [vmem:[%s18840_s1 + $0x2410] sm:$0xff]  ;;  %v17349_v23 = vcombine.high %v5313_v47, %v5317_v22  ;;  %v17348_v46 = vcombine.low %v5313_v47, %v5317_v22 }
 0xa98   : > { %14949 = vmatprep.subr.bf16.mxu0 %v17373_v15  ;;  %v5445_v3 = vld [vmem:[%s18840_s1 + $0x2430] sm:$0xff] }
 0xa99   : > { %14989 = vmatpush1.bf16.msra.mxu1 %v17508_v34  ;;  %v17477_v13 = vcombine.high %v5441_v19, %v5445_v3  ;;  %v5433_v9 = vld [vmem:[%s18840_s1 + $0x23d0] sm:$0xff]  ;;  %v17476_v4 = vcombine.low %v5441_v19, %v5445_v3 }
 0xa9a   : > { %14990 = vmatprep.subr.bf16.mxu1 %v17501_v25  ;;  %v5437_v27 = vld [vmem:[%s18840_s1 + $0x23f0] sm:$0xff] }
 0xa9b   : > { %14950 = vmatpush1.bf16.msra.mxu0 %v17372_v44  ;;  %v5561_v32 = vld [vmem:[%s18840_s1 + $0x27d0] sm:$0xff]  ;;  %v17469_v55 = vcombine.high %v5433_v9, %v5437_v27  ;;  %v17468_v40 = vcombine.low %v5433_v9, %v5437_v27 }
 0xa9c   : > { %14951 = vmatprep.subr.bf16.mxu0 %v17365_v61  ;;  %v5565_v63 = vld [vmem:[%s18840_s1 + $0x27f0] sm:$0xff] }
 0xa9d   : > { %14991 = vmatpush1.bf16.msra.mxu1 %v17500_v62  ;;  %v17597_v34 = vcombine.high %v5561_v32, %v5565_v63  ;;  %v5425_v15 = vld [vmem:[%s18840_s1 + $0x2390] sm:$0xff]  ;;  %v17596_v60 = vcombine.low %v5561_v32, %v5565_v63 }
 0xa9e   : > { %14992 = vmatprep.subr.bf16.mxu1 %v17493_v6  ;;  %v5429_v25 = vld [vmem:[%s18840_s1 + $0x23b0] sm:$0xff] }
 0xa9f   : > { %14952 = vmatpush1.bf16.msra.mxu0 %v17364_v11  ;;  %v5553_v30 = vld [vmem:[%s18840_s1 + $0x2790] sm:$0xff]  ;;  %v17461_v44 = vcombine.high %v5425_v15, %v5429_v25  ;;  %v17460_v2 = vcombine.low %v5425_v15, %v5429_v25 }
 0xaa0   : > { %14953 = vmatprep.subr.bf16.mxu0 %v17357_v56  ;;  %v5557_v20 = vld [vmem:[%s18840_s1 + $0x27b0] sm:$0xff] }
 0xaa1   : > { %14993 = vmatpush1.bf16.msra.mxu1 %v17492_v21  ;;  %v17589_v62 = vcombine.high %v5553_v30, %v5557_v20  ;;  %v5417_v61 = vld [vmem:[%s18840_s1 + $0x2350] sm:$0xff]  ;;  %v17588_v7 = vcombine.low %v5553_v30, %v5557_v20 }
 0xaa2   : > { %14994 = vmatprep.subr.bf16.mxu1 %v17485_v36  ;;  %v5421_v6 = vld [vmem:[%s18840_s1 + $0x2370] sm:$0xff] }
 0xaa3   : > { %14954 = vmatpush1.bf16.msra.mxu0 %v17356_v12  ;;  %v5545_v53 = vld [vmem:[%s18840_s1 + $0x2750] sm:$0xff]  ;;  %v17453_v11 = vcombine.high %v5417_v61, %v5421_v6  ;;  %v17452_v19 = vcombine.low %v5417_v61, %v5421_v6 }
 0xaa4   : > { %14955 = vmatprep.subr.bf16.mxu0 %v17349_v23  ;;  %v5549_v29 = vld [vmem:[%s18840_s1 + $0x2770] sm:$0xff] }
 0xaa5   : > { %14995 = vmatpush1.bf16.msra.mxu1 %v17484_v58  ;;  %v17581_v21 = vcombine.high %v5545_v53, %v5549_v29  ;;  %v5409_v56 = vld [vmem:[%s18840_s1 + $0x2310] sm:$0xff]  ;;  %v17580_v3 = vcombine.low %v5545_v53, %v5549_v29 }
 0xaa6   : > { %14996 = vmatprep.subr.bf16.mxu1 %v17477_v13  ;;  %v5413_v36 = vld [vmem:[%s18840_s1 + $0x2330] sm:$0xff] }
 0xaa7   : > { %14956 = vmatpush1.bf16.msra.mxu0 %v17348_v46  ;;  %v5537_v47 = vld [vmem:[%s18840_s1 + $0x2710] sm:$0xff]  ;;  %v17445_v12 = vcombine.high %v5409_v56, %v5413_v36  ;;  %v17444_v32 = vcombine.low %v5409_v56, %v5413_v36 }
 0xaa8   : > { %14957 = vmatprep.subr.bf16.mxu0 %v17469_v55  ;;  %v5541_v22 = vld [vmem:[%s18840_s1 + $0x2730] sm:$0xff] }
 0xaa9   : > { %14997 = vmatpush1.bf16.msra.mxu1 %v17476_v4  ;;  %v17573_v58 = vcombine.high %v5537_v47, %v5541_v22  ;;  %v5401_v23 = vld [vmem:[%s18840_s1 + $0x22d0] sm:$0xff]  ;;  %v17572_v63 = vcombine.low %v5537_v47, %v5541_v22 }
 0xaaa   : > { %14998 = vmatprep.subr.bf16.mxu1 %v17597_v34  ;;  %v5405_v13 = vld [vmem:[%s18840_s1 + $0x22f0] sm:$0xff] }
 0xaab   : > { %14958 = vmatpush2.bf16.msra.mxu0 %v17468_v40  ;;  %v5529_v9 = vld [vmem:[%s18840_s1 + $0x26d0] sm:$0xff]  ;;  %v17437_v46 = vcombine.high %v5401_v23, %v5405_v13  ;;  %v17436_v30 = vcombine.low %v5401_v23, %v5405_v13 }
 0xaac   : > { %14959 = vmatprep.subr.bf16.mxu0 %v17461_v44  ;;  %v5533_v27 = vld [vmem:[%s18840_s1 + $0x26f0] sm:$0xff] }
 0xaad   : > { %14999 = vmatpush2.bf16.msra.mxu1 %v17596_v60  ;;  %v17565_v4 = vcombine.high %v5529_v9, %v5533_v27  ;;  %v5393_v55 = vld [vmem:[%s18840_s1 + $0x2290] sm:$0xff]  ;;  %v17564_v20 = vcombine.low %v5529_v9, %v5533_v27 }
 0xaae   : > { %15000 = vmatprep.subr.bf16.mxu1 %v17589_v62  ;;  %v5397_v34 = vld [vmem:[%s18840_s1 + $0x22b0] sm:$0xff] }
 0xaaf   : > { %14960 = vmatpush2.bf16.msra.mxu0 %v17460_v2  ;;  %v5521_v15 = vld [vmem:[%s18840_s1 + $0x2690] sm:$0xff]  ;;  %v17429_v40 = vcombine.high %v5393_v55, %v5397_v34  ;;  %v17428_v53 = vcombine.low %v5393_v55, %v5397_v34 }
 0xab0   : > { %14961 = vmatprep.subr.bf16.mxu0 %v17453_v11  ;;  %v5525_v25 = vld [vmem:[%s18840_s1 + $0x26b0] sm:$0xff] }
 0xab1   : > { %15001 = vmatpush2.bf16.msra.mxu1 %v17588_v7  ;;  %v17557_v60 = vcombine.high %v5521_v15, %v5525_v25  ;;  %v5385_v44 = vld [vmem:[%s18840_s1 + $0x2250] sm:$0xff]  ;;  %v17556_v29 = vcombine.low %v5521_v15, %v5525_v25 }
 0xab2   : > { %15002 = vmatprep.subr.bf16.mxu1 %v17581_v21  ;;  %v5389_v62 = vld [vmem:[%s18840_s1 + $0x2270] sm:$0xff] }
 0xab3   : > { %14962 = vmatpush2.bf16.msra.mxu0 %v17452_v19  ;;  %v5513_v61 = vld [vmem:[%s18840_s1 + $0x2650] sm:$0xff]  ;;  %v17421_v2 = vcombine.high %v5385_v44, %v5389_v62  ;;  %v17420_v47 = vcombine.low %v5385_v44, %v5389_v62 }
 0xab4   : > { %14963 = vmatprep.subr.bf16.mxu0 %v17445_v12  ;;  %v5517_v6 = vld [vmem:[%s18840_s1 + $0x2670] sm:$0xff] }
 0xab5   : > { %15003 = vmatpush2.bf16.msra.mxu1 %v17580_v3  ;;  %v17549_v7 = vcombine.high %v5513_v61, %v5517_v6  ;;  %v5377_v11 = vld [vmem:[%s18840_s1 + $0x2210] sm:$0xff]  ;;  %v17548_v22 = vcombine.low %v5513_v61, %v5517_v6 }
 0xab6   : > { %15004 = vmatprep.subr.bf16.mxu1 %v17573_v58  ;;  %v5381_v21 = vld [vmem:[%s18840_s1 + $0x2230] sm:$0xff] }
 0xab7   : > { %14964 = vmatpush2.bf16.msra.mxu0 %v17444_v32  ;;  %v5505_v56 = vld [vmem:[%s18840_s1 + $0x2610] sm:$0xff]  ;;  %v17413_v19 = vcombine.high %v5377_v11, %v5381_v21  ;;  %v17412_v9 = vcombine.low %v5377_v11, %v5381_v21 }
 0xab8   : > { %14965 = vmatprep.subr.bf16.mxu0 %v17437_v46  ;;  %v5509_v36 = vld [vmem:[%s18840_s1 + $0x2630] sm:$0xff] }
 0xab9   : > { %15005 = vmatpush2.bf16.msra.mxu1 %v17572_v63  ;;  %v17541_v3 = vcombine.high %v5505_v56, %v5509_v36  ;;  %v5625_v12 = vld [vmem:[%s18840_s1 + $0x29d0] sm:$0xff]  ;;  %v17540_v27 = vcombine.low %v5505_v56, %v5509_v36 }
 0xaba   : > { %15006 = vmatprep.subr.bf16.mxu1 %v17565_v4  ;;  %v5629_v58 = vld [vmem:[%s18840_s1 + $0x29f0] sm:$0xff] }
 0xabb   : > { %14966 = vmatpush2.bf16.msra.mxu0 %v17436_v30  ;;  %v5753_v23 = vld [vmem:[%s18840_s1 + $0x2dd0] sm:$0xff]  ;;  %v17661_v32 = vcombine.high %v5625_v12, %v5629_v58  ;;  %v17660_v15 = vcombine.low %v5625_v12, %v5629_v58 }
 0xabc   : > { %14967 = vmatprep.subr.bf16.mxu0 %v17429_v40  ;;  %v5757_v13 = vld [vmem:[%s18840_s1 + $0x2df0] sm:$0xff] }
 0xabd   : > { %15007 = vmatpush2.bf16.msra.mxu1 %v17564_v20  ;;  %v17789_v63 = vcombine.high %v5753_v23, %v5757_v13  ;;  %v5617_v46 = vld [vmem:[%s18840_s1 + $0x2990] sm:$0xff]  ;;  %v17788_v25 = vcombine.low %v5753_v23, %v5757_v13 }
 0xabe   : > { %15008 = vmatprep.subr.bf16.mxu1 %v17557_v60  ;;  %v5621_v4 = vld [vmem:[%s18840_s1 + $0x29b0] sm:$0xff] }
 0xabf   : > { %14968 = vmatpush2.bf16.msra.mxu0 %v17428_v53  ;;  %v5745_v55 = vld [vmem:[%s18840_s1 + $0x2d90] sm:$0xff]  ;;  %v17653_v30 = vcombine.high %v5617_v46, %v5621_v4 }
 0xac0   : > { %14969 = vmatprep.subr.bf16.mxu0 %v17421_v2  ;;  %v5749_v34 = vld [vmem:[%s18840_s1 + $0x2db0] sm:$0xff] }
 0xac1   : > { %15009 = vmatpush2.bf16.msra.mxu1 %v17556_v29  ;;  %v17781_v20 = vcombine.high %v5745_v55, %v5749_v34  ;;  %v5609_v40 = vld [vmem:[%s18840_s1 + $0x2950] sm:$0xff]  ;;  %v17652_v29 = vcombine.low %v5617_v46, %v5621_v4 }
 0xac2   : > { %15010 = vmatprep.subr.bf16.mxu1 %v17549_v7  ;;  %v5613_v60 = vld [vmem:[%s18840_s1 + $0x2970] sm:$0xff]  ;;  %v17780_v7 = vcombine.low %v5745_v55, %v5749_v34 }
 0xac3   : > { %14970 = vmatpush2.bf16.msra.mxu0 %v17420_v47  ;;  %v5737_v62 = vld [vmem:[%s18840_s1 + $0x2d50] sm:$0xff]  ;;  %v17645_v11 = vcombine.high %v5609_v40, %v5613_v60 }
 0xac4   : > { %14971 = vmatprep.subr.bf16.mxu0 %v17413_v19  ;;  %v5741_v61 = vld [vmem:[%s18840_s1 + $0x2d70] sm:$0xff] }
 0xac5   : > { %15011 = vmatpush2.bf16.msra.mxu1 %v17548_v22  ;;  %v5601_v47 = vld [vmem:[%s18840_s1 + $0x2910] sm:$0xff] }
 0xac6   : > { %15012 = vmatprep.subr.bf16.mxu1 %v17541_v3  ;;  %v5605_v22 = vld [vmem:[%s18840_s1 + $0x2930] sm:$0xff] }
 0xac7   : > { %14972 = vmatpush2.bf16.msra.mxu0 %v17412_v9  ;;  %v5729_v3 = vld [vmem:[%s18840_s1 + $0x2d10] sm:$0xff]  ;;  %v17772_v9 = vcombine.low %v5737_v62, %v5741_v61 }
 0xac8   : > { %15023 = vmatprep.subr.bf16.mxu0 %v17661_v32  ;;  %v5733_v12 = vld [vmem:[%s18840_s1 + $0x2d30] sm:$0xff] }
 0xac9   : > { %15013 = vmatpush2.bf16.msra.mxu1 %v17540_v27  ;;  %v17637_v27 = vcombine.high %v5601_v47, %v5605_v22  ;;  %v5593_v46 = vld [vmem:[%s18840_s1 + $0x28d0] sm:$0xff] }
 0xaca   : > { %15064 = vmatprep.subr.bf16.mxu1 %v17789_v63  ;;  %v14729_v44 = vpop.f32.mrf.mxu0  ;;  %14974 = vmatmul.mubr.bf16.vlgmr.msra.gmra.mxu0 %v20246_v50  ;;  %v17765_v63 = vcombine.high %v5729_v3, %v5733_v12  ;;  %v5597_v4 = vld [vmem:[%s18840_s1 + $0x28f0] sm:$0xff] }
 0xacb   : > { %v14730_v6 = vadd.f32 %v14729_v44, %v21113_v18  ;;  %15024 = vmatpush1.bf16.msra.mxu0 %v17660_v15  ;;  %v17773_v18 = vcombine.high %v5737_v62, %v5741_v61  ;;  %15055 = vmatprep.mubr.bf16.mxu0 %v20262_v48  ;;  %v5721_v55 = vld [vmem:[%s18840_s1 + $0x2cd0] sm:$0xff]  ;;  %v17636_v15 = vcombine.low %v5601_v47, %v5605_v22 }
 0xacc   : > { %v14770_v53 = vpop.f32.mrf.mxu1  ;;  %15015 = vmatmul.mubr.bf16.vlgmr.msra.gmra.mxu1 %v20254_v24  ;;  %v14731_v2 = vpop.f32.mrf.mxu0  ;;  %15025 = vmatprep.subr.bf16.mxu0 %v17653_v30  ;;  %v5725_v34 = vld [vmem:[%s18840_s1 + $0x2cf0] sm:$0xff]  ;;  %v17629_v30 = vcombine.high %v5593_v46, %v5597_v4  ;;  %v17628_v61 = vcombine.low %v5593_v46, %v5597_v4 }
 0xacd   : > { %15065 = vmatpush1.bf16.msra.mxu1 %v17788_v25  ;;  %v21186_v21 = vadd.f32 %v14770_v53, %v14730_v6  ;;  %v14732_v56 = vadd.f32 %v14731_v2, %v21121_v41  ;;  %15096 = vmatprep.mubr.bf16.mxu1 %v20269_v39  ;;  %v17644_v41 = vcombine.low %v5609_v40, %v5613_v60  ;;  %v5585_v40 = vld [vmem:[%s18840_s1 + $0x2890] sm:$0xff] }
 0xace   : > { %v14772_v36 = vpop.f32.mrf.mxu1  ;;  %15066 = vmatprep.subr.bf16.mxu1 %v17781_v20  ;;  %v14733_v19 = vpop.f32.mrf.mxu0  ;;  %v17764_v25 = vcombine.low %v5729_v3, %v5733_v12  ;;  %v17757_v20 = vcombine.high %v5721_v55, %v5725_v34  ;;  %v5589_v60 = vld [vmem:[%s18840_s1 + $0x28b0] sm:$0xff]  ;;  %v17756_v6 = vcombine.low %v5721_v55, %v5725_v34 }
 0xacf   : > { %v21195_v58 = vadd.f32 %v14772_v36, %v14732_v56  ;;  %15026 = vmatpush1.bf16.msra.mxu0 %v17652_v29  ;;  %v5713_v44 = vld [vmem:[%s18840_s1 + $0x2c90] sm:$0xff]  ;;  %v17621_v53 = vcombine.high %v5585_v40, %v5589_v60  ;;  %v17620_v36 = vcombine.low %v5585_v40, %v5589_v60 }
 0xad0   : > { %v14774_v23 = vpop.f32.mrf.mxu1  ;;  %v14734_v13 = vpop.f32.mrf.mxu0  ;;  %15027 = vmatprep.subr.bf16.mxu0 %v17645_v11  ;;  %v5717_v62 = vld [vmem:[%s18840_s1 + $0x2cb0] sm:$0xff] }
 0xad1   : > { %15067 = vmatpush1.bf16.msra.mxu1 %v17780_v7  ;;  %v17749_v29 = vcombine.high %v5713_v44, %v5717_v62  ;;  %v5577_v2 = vld [vmem:[%s18840_s1 + $0x2850] sm:$0xff] }
 0xad2   : > { %v14775_v32 = vpop.f32.mrf.mxu1  ;;  %15068 = vmatprep.subr.bf16.mxu1 %v17773_v18  ;;  %v5581_v7 = vld [vmem:[%s18840_s1 + $0x2870] sm:$0xff]  ;;  %v17748_v18 = vcombine.low %v5713_v44, %v5717_v62 }
 0xad3   : > { %15028 = vmatpush1.bf16.msra.mxu0 %v17644_v41  ;;  %v5705_v11 = vld [vmem:[%s18840_s1 + $0x2c50] sm:$0xff]  ;;  %v17613_v47 = vcombine.high %v5577_v2, %v5581_v7  ;;  %v17612_v41 = vcombine.low %v5577_v2, %v5581_v7 }
 0xad4   : > { %15029 = vmatprep.subr.bf16.mxu0 %v17637_v27  ;;  %v5709_v56 = vld [vmem:[%s18840_s1 + $0x2c70] sm:$0xff] }
 0xad5   : > { %15069 = vmatpush1.bf16.msra.mxu1 %v17772_v9  ;;  %v17741_v22 = vcombine.high %v5705_v11, %v5709_v56  ;;  %v5569_v19 = vld [vmem:[%s18840_s1 + $0x2810] sm:$0xff]  ;;  %v17740_v13 = vcombine.low %v5705_v11, %v5709_v56 }
 0xad6   : > { %15070 = vmatprep.subr.bf16.mxu1 %v17765_v63  ;;  %v5573_v3 = vld [vmem:[%s18840_s1 + $0x2830] sm:$0xff] }
 0xad7   : > { %15030 = vmatpush1.bf16.msra.mxu0 %v17636_v15  ;;  %v5697_v12 = vld [vmem:[%s18840_s1 + $0x2c10] sm:$0xff]  ;;  %v17605_v9 = vcombine.high %v5569_v19, %v5573_v3  ;;  %v17604_v55 = vcombine.low %v5569_v19, %v5573_v3 }
 0xad8   : > { %15031 = vmatprep.subr.bf16.mxu0 %v17629_v30  ;;  %v5701_v23 = vld [vmem:[%s18840_s1 + $0x2c30] sm:$0xff] }
 0xad9   : > { %15071 = vmatpush1.bf16.msra.mxu1 %v17764_v25  ;;  %v17733_v27 = vcombine.high %v5697_v12, %v5701_v23  ;;  %v5689_v32 = vld [vmem:[%s18840_s1 + $0x2bd0] sm:$0xff]  ;;  %v17732_v34 = vcombine.low %v5697_v12, %v5701_v23 }
 0xada   : > { %15072 = vmatprep.subr.bf16.mxu1 %v17757_v20  ;;  %v5693_v63 = vld [vmem:[%s18840_s1 + $0x2bf0] sm:$0xff] }
 0xadb   : > { %15032 = vmatpush1.bf16.msra.mxu0 %v17628_v61  ;;  %v5817_v46 = vld [vmem:[%s18840_s1 + $0x2fd0] sm:$0xff]  ;;  %v17725_v15 = vcombine.high %v5689_v32, %v5693_v63  ;;  %v17724_v44 = vcombine.low %v5689_v32, %v5693_v63 }
 0xadc   : > { %15033 = vmatprep.subr.bf16.mxu0 %v17621_v53  ;;  %v5821_v4 = vld [vmem:[%s18840_s1 + $0x2ff0] sm:$0xff] }
 0xadd   : > { %15073 = vmatpush1.bf16.msra.mxu1 %v17756_v6  ;;  %v17853_v25 = vcombine.high %v5817_v46, %v5821_v4  ;;  %v5681_v30 = vld [vmem:[%s18840_s1 + $0x2b90] sm:$0xff]  ;;  %v17852_v62 = vcombine.low %v5817_v46, %v5821_v4 }
 0xade   : > { %15074 = vmatprep.subr.bf16.mxu1 %v17749_v29  ;;  %v5685_v20 = vld [vmem:[%s18840_s1 + $0x2bb0] sm:$0xff] }
 0xadf   : > { %15034 = vmatpush1.bf16.msra.mxu0 %v17620_v36  ;;  %v5809_v40 = vld [vmem:[%s18840_s1 + $0x2f90] sm:$0xff]  ;;  %v17717_v61 = vcombine.high %v5681_v30, %v5685_v20  ;;  %v17716_v11 = vcombine.low %v5681_v30, %v5685_v20 }
 0xae0   : > { %15035 = vmatprep.subr.bf16.mxu0 %v17613_v47  ;;  %v5813_v60 = vld [vmem:[%s18840_s1 + $0x2fb0] sm:$0xff] }
 0xae1   : > { %15075 = vmatpush1.bf16.msra.mxu1 %v17748_v18  ;;  %v17845_v6 = vcombine.high %v5809_v40, %v5813_v60  ;;  %v5673_v53 = vld [vmem:[%s18840_s1 + $0x2b50] sm:$0xff]  ;;  %v17844_v56 = vcombine.low %v5809_v40, %v5813_v60 }
 0xae2   : > { %15076 = vmatprep.subr.bf16.mxu1 %v17741_v22  ;;  %v5677_v29 = vld [vmem:[%s18840_s1 + $0x2b70] sm:$0xff] }
 0xae3   : > { %15036 = vmatpush1.bf16.msra.mxu0 %v17612_v41  ;;  %v5801_v2 = vld [vmem:[%s18840_s1 + $0x2f50] sm:$0xff]  ;;  %v17709_v36 = vcombine.high %v5673_v53, %v5677_v29  ;;  %v17708_v12 = vcombine.low %v5673_v53, %v5677_v29 }
 0xae4   : > { %15037 = vmatprep.subr.bf16.mxu0 %v17605_v9  ;;  %v5805_v7 = vld [vmem:[%s18840_s1 + $0x2f70] sm:$0xff] }
 0xae5   : > { %15077 = vmatpush1.bf16.msra.mxu1 %v17740_v13  ;;  %v17837_v18 = vcombine.high %v5801_v2, %v5805_v7  ;;  %v5665_v47 = vld [vmem:[%s18840_s1 + $0x2b10] sm:$0xff]  ;;  %v17836_v23 = vcombine.low %v5801_v2, %v5805_v7 }
 0xae6   : > { %15078 = vmatprep.subr.bf16.mxu1 %v17733_v27  ;;  %v5669_v22 = vld [vmem:[%s18840_s1 + $0x2b30] sm:$0xff] }
 0xae7   : > { %15038 = vmatpush1.bf16.msra.mxu0 %v17604_v55  ;;  %v5793_v19 = vld [vmem:[%s18840_s1 + $0x2f10] sm:$0xff]  ;;  %v17701_v41 = vcombine.high %v5665_v47, %v5669_v22  ;;  %v17700_v46 = vcombine.low %v5665_v47, %v5669_v22 }
 0xae8   : > { %15039 = vmatprep.subr.bf16.mxu0 %v17725_v15  ;;  %v5797_v3 = vld [vmem:[%s18840_s1 + $0x2f30] sm:$0xff] }
 0xae9   : > { %15079 = vmatpush1.bf16.msra.mxu1 %v17732_v34  ;;  %v17829_v13 = vcombine.high %v5793_v19, %v5797_v3  ;;  %v5657_v9 = vld [vmem:[%s18840_s1 + $0x2ad0] sm:$0xff]  ;;  %v17828_v4 = vcombine.low %v5793_v19, %v5797_v3 }
 0xaea   : > { %15080 = vmatprep.subr.bf16.mxu1 %v17853_v25  ;;  %v5661_v27 = vld [vmem:[%s18840_s1 + $0x2af0] sm:$0xff] }
 0xaeb   : > { %15040 = vmatpush2.bf16.msra.mxu0 %v17724_v44  ;;  %v5785_v32 = vld [vmem:[%s18840_s1 + $0x2ed0] sm:$0xff]  ;;  %v17693_v55 = vcombine.high %v5657_v9, %v5661_v27  ;;  %v17692_v40 = vcombine.low %v5657_v9, %v5661_v27  ;;  %v4474_v9 = vld [vmem:[%s18840_s1 + $0x5d8] sm:$0xff] }
 0xaec   : > { %15041 = vmatprep.subr.bf16.mxu0 %v17717_v61  ;;  %v5789_v63 = vld [vmem:[%s18840_s1 + $0x2ef0] sm:$0xff]  ;;  %v4478_v27 = vld [vmem:[%s18840_s1 + $0x5f8] sm:$0xff] }
 0xaed   : > { %15081 = vmatpush2.bf16.msra.mxu1 %v17852_v62  ;;  %v17821_v34 = vcombine.high %v5785_v32, %v5789_v63  ;;  %v5649_v15 = vld [vmem:[%s18840_s1 + $0x2a90] sm:$0xff]  ;;  %v17820_v60 = vcombine.low %v5785_v32, %v5789_v63 }
 0xaee   : > { %15082 = vmatprep.subr.bf16.mxu1 %v17845_v6  ;;  %v5653_v25 = vld [vmem:[%s18840_s1 + $0x2ab0] sm:$0xff] }
 0xaef   : > { %15042 = vmatpush2.bf16.msra.mxu0 %v17716_v11  ;;  %v5777_v30 = vld [vmem:[%s18840_s1 + $0x2e90] sm:$0xff]  ;;  %v17685_v44 = vcombine.high %v5649_v15, %v5653_v25  ;;  %v17684_v2 = vcombine.low %v5649_v15, %v5653_v25  ;;  %v4466_v15 = vld [vmem:[%s18840_s1 + $0x598] sm:$0xff] }
 0xaf0   : > { %15043 = vmatprep.subr.bf16.mxu0 %v17709_v36  ;;  %v5781_v20 = vld [vmem:[%s18840_s1 + $0x2eb0] sm:$0xff]  ;;  %v4470_v25 = vld [vmem:[%s18840_s1 + $0x5b8] sm:$0xff] }
 0xaf1   : > { %15083 = vmatpush2.bf16.msra.mxu1 %v17844_v56  ;;  %v17813_v62 = vcombine.high %v5777_v30, %v5781_v20  ;;  %v5641_v61 = vld [vmem:[%s18840_s1 + $0x2a50] sm:$0xff]  ;;  %v17812_v7 = vcombine.low %v5777_v30, %v5781_v20  ;;  %v16510_v20 = vcombine.low %v4474_v9, %v4478_v27 }
 0xaf2   : > { %15084 = vmatprep.subr.bf16.mxu1 %v17837_v18  ;;  %v5645_v6 = vld [vmem:[%s18840_s1 + $0x2a70] sm:$0xff] }
 0xaf3   : > { %15044 = vmatpush2.bf16.msra.mxu0 %v17708_v12  ;;  %v5769_v53 = vld [vmem:[%s18840_s1 + $0x2e50] sm:$0xff]  ;;  %v17677_v11 = vcombine.high %v5641_v61, %v5645_v6  ;;  %v17676_v19 = vcombine.low %v5641_v61, %v5645_v6  ;;  %v4458_v6 = vld [vmem:[%s18840_s1 + $0x558] sm:$0xff] }
 0xaf4   : > { %15045 = vmatprep.subr.bf16.mxu0 %v17701_v41  ;;  %v5773_v29 = vld [vmem:[%s18840_s1 + $0x2e70] sm:$0xff]  ;;  %v4346_v41 = vld [vmem:[%s18840_s1 + $0x1d8] sm:$0xff] }
 0xaf5   : > { %15085 = vmatpush2.bf16.msra.mxu1 %v17836_v23  ;;  %v17805_v56 = vcombine.high %v5769_v53, %v5773_v29  ;;  %v5633_v36 = vld [vmem:[%s18840_s1 + $0x2a10] sm:$0xff]  ;;  %v17804_v3 = vcombine.low %v5769_v53, %v5773_v29  ;;  %v4462_v53 = vld [vmem:[%s18840_s1 + $0x578] sm:$0xff] }
 0xaf6   : > { %15086 = vmatprep.subr.bf16.mxu1 %v17829_v13  ;;  %v5637_v18 = vld [vmem:[%s18840_s1 + $0x2a30] sm:$0xff]  ;;  %v4350_v13 = vld [vmem:[%s18840_s1 + $0x1f8] sm:$0xff] }
 0xaf7   : > { %15046 = vmatpush2.bf16.msra.mxu0 %v17700_v46  ;;  %v5761_v47 = vld [vmem:[%s18840_s1 + $0x2e10] sm:$0xff]  ;;  %v17669_v12 = vcombine.high %v5633_v36, %v5637_v18  ;;  %v17668_v32 = vcombine.low %v5633_v36, %v5637_v18  ;;  %v16383_v46 = vcombine.high %v4346_v41, %v4350_v13  ;;  %v16382_v30 = vcombine.low %v4346_v41, %v4350_v13  ;;  %v4454_v41 = vld [vmem:[%s18840_s1 + $0x538] sm:$0xff] }
 0xaf8   : > { %15047 = vmatprep.subr.bf16.mxu0 %v17693_v55  ;;  %v5765_v22 = vld [vmem:[%s18840_s1 + $0x2e30] sm:$0xff]  ;;  %v4338_v55 = vld [vmem:[%s18840_s1 + $0x198] sm:$0xff] }
 0xaf9   : > { %15087 = vmatpush2.bf16.msra.mxu1 %v17828_v4  ;;  %v17797_v23 = vcombine.high %v5761_v47, %v5765_v22  ;;  %v17796_v63 = vcombine.low %v5761_v47, %v5765_v22  ;;  %v16511_v4 = vcombine.high %v4474_v9, %v4478_v27 }
 0xafa   : > { %15088 = vmatprep.subr.bf16.mxu1 %v17821_v34  ;;  %v4342_v34 = vld [vmem:[%s18840_s1 + $0x1b8] sm:$0xff] }
 0xafb   : > { %15048 = vmatpush2.bf16.msra.mxu0 %v17692_v40  ;;  %v16375_v40 = vcombine.high %v4338_v55, %v4342_v34 }
 0xafc   : > { %15049 = vmatprep.subr.bf16.mxu0 %v17685_v44  ;;  %v4330_v44 = vld [vmem:[%s18840_s1 + $0x158] sm:$0xff] }
 0xafd   : > { %15089 = vmatpush2.bf16.msra.mxu1 %v17820_v60  ;;  %v16503_v60 = vcombine.high %v4466_v15, %v4470_v25 }
 0xafe   : > { %15090 = vmatprep.subr.bf16.mxu1 %v17813_v62  ;;  %v4334_v62 = vld [vmem:[%s18840_s1 + $0x178] sm:$0xff] }
 0xaff   : > { %15050 = vmatpush2.bf16.msra.mxu0 %v17684_v2  ;;  %v16367_v36 = vcombine.high %v4330_v44, %v4334_v62 }
 0xb00   : > { %15051 = vmatprep.subr.bf16.mxu0 %v17677_v11 }
 0xb01   : > { %15091 = vmatpush2.bf16.msra.mxu1 %v17812_v7  ;;  %v16374_v7 = vcombine.low %v4338_v55, %v4342_v34  ;;  %v4442_v55 = vld [vmem:[%s18840_s1 + $0x4d8] sm:$0xff] }
 0xb02   : > { %15092 = vmatprep.subr.bf16.mxu1 %v17805_v56  ;;  %v16502_v56 = vcombine.low %v4466_v15, %v4470_v25  ;;  %v4446_v34 = vld [vmem:[%s18840_s1 + $0x4f8] sm:$0xff] }
 0xb03   : > { %15052 = vmatpush2.bf16.msra.mxu0 %v17676_v19  ;;  %v4322_v19 = vld [vmem:[%s18840_s1 + $0x118] sm:$0xff] }
 0xb04   : > { %15053 = vmatprep.subr.bf16.mxu0 %v17669_v12 }
 0xb05   : > { %15093 = vmatpush2.bf16.msra.mxu1 %v17804_v3  ;;  %v4326_v3 = vld [vmem:[%s18840_s1 + $0x138] sm:$0xff] }
 0xb06   : > { %15094 = vmatprep.subr.bf16.mxu1 %v17797_v23  ;;  %v4450_v23 = vld [vmem:[%s18840_s1 + $0x518] sm:$0xff]  ;;  %v16358_v15 = vcombine.low %v4322_v19, %v4326_v3 }
 0xb07   : > { %15054 = vmatpush2.bf16.msra.mxu0 %v17668_v32  ;;  %v16494_v32 = vcombine.low %v4458_v6, %v4462_v53  ;;  %v16486_v25 = vcombine.low %v4450_v23, %v4454_v41 }
 0xb08   : > { %15105 = vmatprep.subr.bf16.mxu0 %v16383_v46  ;;  %v16487_v46 = vcombine.high %v4450_v23, %v4454_v41  ;;  %v4422_v23 = vld [vmem:[%s18840_s1 + $0x438] sm:$0xff] }
 0xb09   : > { %15095 = vmatpush2.bf16.msra.mxu1 %v17796_v63  ;;  %v16359_v63 = vcombine.high %v4322_v19, %v4326_v3  ;;  %v4290_v19 = vld [vmem:[%s18840_s1 + $0x18] sm:$0xff] }
 0xb0a   : > { %15146 = vmatprep.subr.bf16.mxu1 %v16511_v4  ;;  %v14811_v61 = vpop.f32.mrf.mxu0  ;;  %15056 = vmatmul.mubr.bf16.vlgmr.msra.gmra.mxu0 %v20340_v26  ;;  %v4314_v4 = vld [vmem:[%s18840_s1 + $0xd8] sm:$0xff] }
 0xb0b   : > { %v14812_v29 = vadd.f32 %v14811_v61, %v21186_v21  ;;  %15106 = vmatpush1.bf16.msra.mxu0 %v16382_v30  ;;  %v16495_v21 = vcombine.high %v4458_v6, %v4462_v53  ;;  %15137 = vmatprep.mubr.bf16.mxu0 %v19831_v14  ;;  %v16478_v6 = vcombine.low %v4442_v55, %v4446_v34  ;;  %v4294_v3 = vld [vmem:[%s18840_s1 + $0x38] sm:$0xff] }
 0xb0c   : > { %v14852_v2 = vpop.f32.mrf.mxu1  ;;  %15097 = vmatmul.mubr.bf16.vlgmr.msra.gmra.mxu1 %v20346_v49  ;;  %v14813_v11 = vpop.f32.mrf.mxu0  ;;  %15107 = vmatprep.subr.bf16.mxu0 %v16375_v40  ;;  %v4306_v40 = vld [vmem:[%s18840_s1 + $0x98] sm:$0xff] }
 0xb0d   : > { %15147 = vmatpush1.bf16.msra.mxu1 %v16510_v20  ;;  %v21260_v18 = vadd.f32 %v14852_v2, %v14812_v29  ;;  %v14814_v47 = vadd.f32 %v14813_v11, %v21195_v58  ;;  %15178 = vmatprep.mubr.bf16.mxu1 %v19835_v42  ;;  %v16366_v58 = vcombine.low %v4330_v44, %v4334_v62  ;;  %v4318_v42 = vld [vmem:[%s18840_s1 + $0xf8] sm:$0xff] }
 0xb0e   : > { %v14854_v22 = vpop.f32.mrf.mxu1  ;;  %15148 = vmatprep.subr.bf16.mxu1 %v16503_v60  ;;  %v14815_v12 = vpop.f32.mrf.mxu0  ;;  %v16351_v30 = vcombine.high %v4314_v4, %v4318_v42  ;;  %v16479_v20 = vcombine.high %v4442_v55, %v4446_v34  ;;  %v4310_v60 = vld [vmem:[%s18840_s1 + $0xb8] sm:$0xff]  ;;  %v16350_v61 = vcombine.low %v4314_v4, %v4318_v42  ;;  %v16326_v4 = vcombine.low %v4290_v19, %v4294_v3 }
 0xb0f   : > { %v21269_v13 = vadd.f32 %v14854_v22, %v14814_v47  ;;  %15108 = vmatpush1.bf16.msra.mxu0 %v16374_v7  ;;  %v4434_v44 = vld [vmem:[%s18840_s1 + $0x498] sm:$0xff]  ;;  %v16343_v53 = vcombine.high %v4306_v40, %v4310_v60 }
 0xb10   : > { %v14856_v9 = vpop.f32.mrf.mxu1  ;;  %v14816_v27 = vpop.f32.mrf.mxu0  ;;  %15109 = vmatprep.subr.bf16.mxu0 %v16367_v36  ;;  %v4438_v62 = vld [vmem:[%s18840_s1 + $0x4b8] sm:$0xff]  ;;  %v16342_v36 = vcombine.low %v4306_v40, %v4310_v60 }
 0xb11   : > { %15149 = vmatpush1.bf16.msra.mxu1 %v16502_v56  ;;  %v16471_v29 = vcombine.high %v4434_v44, %v4438_v62  ;;  %v4298_v2 = vld [vmem:[%s18840_s1 + $0x58] sm:$0xff]  ;;  %v16470_v47 = vcombine.low %v4434_v44, %v4438_v62 }
 0xb12   : > { %v14857_v14 = vpop.f32.mrf.mxu1  ;;  %15150 = vmatprep.subr.bf16.mxu1 %v16495_v21  ;;  %v4302_v7 = vld [vmem:[%s18840_s1 + $0x78] sm:$0xff] }
 0xb13   : > { %15110 = vmatpush1.bf16.msra.mxu0 %v16366_v58  ;;  %v4426_v11 = vld [vmem:[%s18840_s1 + $0x458] sm:$0xff]  ;;  %v16335_v22 = vcombine.high %v4298_v2, %v4302_v7  ;;  %v16334_v41 = vcombine.low %v4298_v2, %v4302_v7  ;;  %v16327_v58 = vcombine.high %v4290_v19, %v4294_v3 }
 0xb14   : > { %15111 = vmatprep.subr.bf16.mxu0 %v16359_v63  ;;  %v4430_v56 = vld [vmem:[%s18840_s1 + $0x478] sm:$0xff] }
 0xb15   : > { %15151 = vmatpush1.bf16.msra.mxu1 %v16494_v32  ;;  %v16463_v21 = vcombine.high %v4426_v11, %v4430_v56  ;;  %v4418_v12 = vld [vmem:[%s18840_s1 + $0x418] sm:$0xff]  ;;  %v16462_v9 = vcombine.low %v4426_v11, %v4430_v56 }
 0xb16   : > { %15152 = vmatprep.subr.bf16.mxu1 %v16487_v46  ;;  %v16455_v27 = vcombine.high %v4418_v12, %v4422_v23  ;;  %v4410_v32 = vld [vmem:[%s18840_s1 + $0x3d8] sm:$0xff]  ;;  %v16454_v42 = vcombine.low %v4418_v12, %v4422_v23 }
 0xb17   : > { %15112 = vmatpush1.bf16.msra.mxu0 %v16358_v15  ;;  %v4414_v63 = vld [vmem:[%s18840_s1 + $0x3f8] sm:$0xff] }
 0xb18   : > { %15113 = vmatprep.subr.bf16.mxu0 %v16351_v30  ;;  %v4538_v14 = vld [vmem:[%s18840_s1 + $0x7d8] sm:$0xff]  ;;  %v16447_v55 = vcombine.high %v4410_v32, %v4414_v63  ;;  %v16446_v40 = vcombine.low %v4410_v32, %v4414_v63 }
 0xb19   : > { %15153 = vmatpush1.bf16.msra.mxu1 %v16486_v25  ;;  %v4542_v46 = vld [vmem:[%s18840_s1 + $0x7f8] sm:$0xff] }
 0xb1a   : > { %15154 = vmatprep.subr.bf16.mxu1 %v16479_v20  ;;  %v16575_v34 = vcombine.high %v4538_v14, %v4542_v46  ;;  %v4402_v15 = vld [vmem:[%s18840_s1 + $0x398] sm:$0xff]  ;;  %v16574_v60 = vcombine.low %v4538_v14, %v4542_v46 }
 0xb1b   : > { %15114 = vmatpush1.bf16.msra.mxu0 %v16350_v61  ;;  %v4406_v25 = vld [vmem:[%s18840_s1 + $0x3b8] sm:$0xff] }
 0xb1c   : > { %15115 = vmatprep.subr.bf16.mxu0 %v16343_v53  ;;  %v4530_v30 = vld [vmem:[%s18840_s1 + $0x798] sm:$0xff]  ;;  %v16439_v44 = vcombine.high %v4402_v15, %v4406_v25  ;;  %v16438_v2 = vcombine.low %v4402_v15, %v4406_v25 }
 0xb1d   : > { %15155 = vmatpush1.bf16.msra.mxu1 %v16478_v6  ;;  %v4534_v20 = vld [vmem:[%s18840_s1 + $0x7b8] sm:$0xff] }
 0xb1e   : > { %15156 = vmatprep.subr.bf16.mxu1 %v16471_v29  ;;  %v16567_v62 = vcombine.high %v4530_v30, %v4534_v20  ;;  %v4394_v61 = vld [vmem:[%s18840_s1 + $0x358] sm:$0xff]  ;;  %v16566_v7 = vcombine.low %v4530_v30, %v4534_v20 }
 0xb1f   : > { %15116 = vmatpush1.bf16.msra.mxu0 %v16342_v36  ;;  %v4398_v6 = vld [vmem:[%s18840_s1 + $0x378] sm:$0xff] }
 0xb20   : > { %15117 = vmatprep.subr.bf16.mxu0 %v16335_v22  ;;  %v4522_v53 = vld [vmem:[%s18840_s1 + $0x758] sm:$0xff]  ;;  %v16431_v11 = vcombine.high %v4394_v61, %v4398_v6  ;;  %v16430_v19 = vcombine.low %v4394_v61, %v4398_v6 }
 0xb21   : > { %15157 = vmatpush1.bf16.msra.mxu1 %v16470_v47  ;;  %v4526_v29 = vld [vmem:[%s18840_s1 + $0x778] sm:$0xff] }
 0xb22   : > { %15158 = vmatprep.subr.bf16.mxu1 %v16463_v21  ;;  %v16559_v56 = vcombine.high %v4522_v53, %v4526_v29  ;;  %v4386_v36 = vld [vmem:[%s18840_s1 + $0x318] sm:$0xff]  ;;  %v16558_v3 = vcombine.low %v4522_v53, %v4526_v29 }
 0xb23   : > { %15118 = vmatpush1.bf16.msra.mxu0 %v16334_v41  ;;  %v4390_v47 = vld [vmem:[%s18840_s1 + $0x338] sm:$0xff] }
 0xb24   : > { %15119 = vmatprep.subr.bf16.mxu0 %v16327_v58  ;;  %v4514_v22 = vld [vmem:[%s18840_s1 + $0x718] sm:$0xff]  ;;  %v16423_v12 = vcombine.high %v4386_v36, %v4390_v47  ;;  %v16422_v32 = vcombine.low %v4386_v36, %v4390_v47 }
 0xb25   : > { %15159 = vmatpush1.bf16.msra.mxu1 %v16462_v9  ;;  %v4518_v21 = vld [vmem:[%s18840_s1 + $0x738] sm:$0xff] }
 0xb26   : > { %15160 = vmatprep.subr.bf16.mxu1 %v16455_v27  ;;  %v16551_v23 = vcombine.high %v4514_v22, %v4518_v21  ;;  %v4378_v41 = vld [vmem:[%s18840_s1 + $0x2d8] sm:$0xff]  ;;  %v16550_v63 = vcombine.low %v4514_v22, %v4518_v21 }
 0xb27   : > { %15120 = vmatpush1.bf16.msra.mxu0 %v16326_v4  ;;  %v4382_v9 = vld [vmem:[%s18840_s1 + $0x2f8] sm:$0xff] }
 0xb28   : > { %15121 = vmatprep.subr.bf16.mxu0 %v16447_v55  ;;  %v4506_v58 = vld [vmem:[%s18840_s1 + $0x6d8] sm:$0xff]  ;;  %v16415_v14 = vcombine.high %v4378_v41, %v4382_v9  ;;  %v16414_v15 = vcombine.low %v4378_v41, %v4382_v9 }
 0xb29   : > { %15161 = vmatpush1.bf16.msra.mxu1 %v16454_v42  ;;  %v4510_v27 = vld [vmem:[%s18840_s1 + $0x6f8] sm:$0xff] }
 0xb2a   : > { %15162 = vmatprep.subr.bf16.mxu1 %v16575_v34  ;;  %v16543_v46 = vcombine.high %v4506_v58, %v4510_v27  ;;  %v4370_v4 = vld [vmem:[%s18840_s1 + $0x298] sm:$0xff]  ;;  %v16542_v25 = vcombine.low %v4506_v58, %v4510_v27 }
 0xb2b   : > { %15122 = vmatpush2.bf16.msra.mxu0 %v16446_v40  ;;  %v4374_v42 = vld [vmem:[%s18840_s1 + $0x2b8] sm:$0xff] }
 0xb2c   : > { %15123 = vmatprep.subr.bf16.mxu0 %v16439_v44  ;;  %v4498_v55 = vld [vmem:[%s18840_s1 + $0x698] sm:$0xff]  ;;  %v16407_v30 = vcombine.high %v4370_v4, %v4374_v42  ;;  %v16406_v61 = vcombine.low %v4370_v4, %v4374_v42 }
 0xb2d   : > { %15163 = vmatpush2.bf16.msra.mxu1 %v16574_v60  ;;  %v4502_v34 = vld [vmem:[%s18840_s1 + $0x6b8] sm:$0xff] }
 0xb2e   : > { %15164 = vmatprep.subr.bf16.mxu1 %v16567_v62  ;;  %v16535_v20 = vcombine.high %v4498_v55, %v4502_v34  ;;  %v4362_v40 = vld [vmem:[%s18840_s1 + $0x258] sm:$0xff]  ;;  %v16534_v6 = vcombine.low %v4498_v55, %v4502_v34 }
 0xb2f   : > { %15124 = vmatpush2.bf16.msra.mxu0 %v16438_v2  ;;  %v4366_v60 = vld [vmem:[%s18840_s1 + $0x278] sm:$0xff] }
 0xb30   : > { %15125 = vmatprep.subr.bf16.mxu0 %v16431_v11  ;;  %v4490_v44 = vld [vmem:[%s18840_s1 + $0x658] sm:$0xff]  ;;  %v16399_v53 = vcombine.high %v4362_v40, %v4366_v60  ;;  %v16398_v36 = vcombine.low %v4362_v40, %v4366_v60 }
 0xb31   : > { %15165 = vmatpush2.bf16.msra.mxu1 %v16566_v7  ;;  %v4494_v62 = vld [vmem:[%s18840_s1 + $0x678] sm:$0xff] }
 0xb32   : > { %15166 = vmatprep.subr.bf16.mxu1 %v16559_v56  ;;  %v16527_v29 = vcombine.high %v4490_v44, %v4494_v62  ;;  %v4354_v2 = vld [vmem:[%s18840_s1 + $0x218] sm:$0xff]  ;;  %v16526_v47 = vcombine.low %v4490_v44, %v4494_v62 }
 0xb33   : > { %15126 = vmatpush2.bf16.msra.mxu0 %v16430_v19  ;;  %v4358_v7 = vld [vmem:[%s18840_s1 + $0x238] sm:$0xff] }
 0xb34   : > { %15127 = vmatprep.subr.bf16.mxu0 %v16423_v12  ;;  %v4482_v11 = vld [vmem:[%s18840_s1 + $0x618] sm:$0xff]  ;;  %v16391_v22 = vcombine.high %v4354_v2, %v4358_v7  ;;  %v16390_v41 = vcombine.low %v4354_v2, %v4358_v7 }
 0xb35   : > { %15167 = vmatpush2.bf16.msra.mxu1 %v16558_v3  ;;  %v4486_v56 = vld [vmem:[%s18840_s1 + $0x638] sm:$0xff] }
 0xb36   : > { %15168 = vmatprep.subr.bf16.mxu1 %v16551_v23  ;;  %v16519_v21 = vcombine.high %v4482_v11, %v4486_v56  ;;  %v4602_v19 = vld [vmem:[%s18840_s1 + $0x9d8] sm:$0xff]  ;;  %v16518_v9 = vcombine.low %v4482_v11, %v4486_v56 }
 0xb37   : > { %15128 = vmatpush2.bf16.msra.mxu0 %v16422_v32  ;;  %v4606_v3 = vld [vmem:[%s18840_s1 + $0x9f8] sm:$0xff] }
 0xb38   : > { %15129 = vmatprep.subr.bf16.mxu0 %v16415_v14  ;;  %v4730_v12 = vld [vmem:[%s18840_s1 + $0xdd8] sm:$0xff]  ;;  %v16639_v58 = vcombine.high %v4602_v19, %v4606_v3  ;;  %v16638_v4 = vcombine.low %v4602_v19, %v4606_v3 }
 0xb39   : > { %15169 = vmatpush2.bf16.msra.mxu1 %v16550_v63  ;;  %v4734_v23 = vld [vmem:[%s18840_s1 + $0xdf8] sm:$0xff] }
 0xb3a   : > { %15170 = vmatprep.subr.bf16.mxu1 %v16543_v46  ;;  %v16767_v27 = vcombine.high %v4730_v12, %v4734_v23  ;;  %v4594_v32 = vld [vmem:[%s18840_s1 + $0x998] sm:$0xff]  ;;  %v16766_v42 = vcombine.low %v4730_v12, %v4734_v23 }
 0xb3b   : > { %15130 = vmatpush2.bf16.msra.mxu0 %v16414_v15  ;;  %v4598_v63 = vld [vmem:[%s18840_s1 + $0x9b8] sm:$0xff] }
 0xb3c   : > { %15131 = vmatprep.subr.bf16.mxu0 %v16407_v30  ;;  %v4722_v14 = vld [vmem:[%s18840_s1 + $0xd98] sm:$0xff]  ;;  %v16631_v55 = vcombine.high %v4594_v32, %v4598_v63  ;;  %v16630_v62 = vcombine.low %v4594_v32, %v4598_v63 }
 0xb3d   : > { %15171 = vmatpush2.bf16.msra.mxu1 %v16542_v25  ;;  %v4726_v46 = vld [vmem:[%s18840_s1 + $0xdb8] sm:$0xff] }
 0xb3e   : > { %15172 = vmatprep.subr.bf16.mxu1 %v16535_v20  ;;  %v16759_v34 = vcombine.high %v4722_v14, %v4726_v46  ;;  %v4586_v15 = vld [vmem:[%s18840_s1 + $0x958] sm:$0xff] }
 0xb3f   : > { %15132 = vmatpush2.bf16.msra.mxu0 %v16406_v61  ;;  %v4590_v25 = vld [vmem:[%s18840_s1 + $0x978] sm:$0xff] }
 0xb40   : > { %15133 = vmatprep.subr.bf16.mxu0 %v16399_v53  ;;  %v4714_v20 = vld [vmem:[%s18840_s1 + $0xd58] sm:$0xff]  ;;  %v16623_v53 = vcombine.high %v4586_v15, %v4590_v25 }
 0xb41   : > { %15173 = vmatpush2.bf16.msra.mxu1 %v16534_v6  ;;  %v4718_v40 = vld [vmem:[%s18840_s1 + $0xd78] sm:$0xff]  ;;  %v16758_v6 = vcombine.low %v4722_v14, %v4726_v46 }
 0xb42   : > { %15174 = vmatprep.subr.bf16.mxu1 %v16527_v29  ;;  %v4578_v7 = vld [vmem:[%s18840_s1 + $0x918] sm:$0xff]  ;;  %v16750_v19 = vcombine.low %v4714_v20, %v4718_v40 }
 0xb43   : > { %15134 = vmatpush2.bf16.msra.mxu0 %v16398_v36  ;;  %v4582_v11 = vld [vmem:[%s18840_s1 + $0x938] sm:$0xff] }
 0xb44   : > { %15135 = vmatprep.subr.bf16.mxu0 %v16391_v22  ;;  %v4706_v56 = vld [vmem:[%s18840_s1 + $0xd18] sm:$0xff]  ;;  %v16615_v3 = vcombine.high %v4578_v7, %v4582_v11 }
 0xb45   : > { %15175 = vmatpush2.bf16.msra.mxu1 %v16526_v47  ;;  %v4710_v36 = vld [vmem:[%s18840_s1 + $0xd38] sm:$0xff] }
 0xb46   : > { %15176 = vmatprep.subr.bf16.mxu1 %v16519_v21  ;;  %v16743_v12 = vcombine.high %v4706_v56, %v4710_v36  ;;  %v4570_v23 = vld [vmem:[%s18840_s1 + $0x8d8] sm:$0xff] }
 0xb47   : > { %15136 = vmatpush2.bf16.msra.mxu0 %v16390_v41  ;;  %v4698_v41 = vld [vmem:[%s18840_s1 + $0xcd8] sm:$0xff] }
 0xb48   : > { %15187 = vmatprep.subr.bf16.mxu0 %v16639_v58  ;;  %v16614_v58 = vcombine.low %v4578_v7, %v4582_v11  ;;  %v4562_v14 = vld [vmem:[%s18840_s1 + $0x898] sm:$0xff] }
 0xb49   : > { %15177 = vmatpush2.bf16.msra.mxu1 %v16518_v9  ;;  %v4702_v9 = vld [vmem:[%s18840_s1 + $0xcf8] sm:$0xff] }
 0xb4a   : > { %15228 = vmatprep.subr.bf16.mxu1 %v16767_v27  ;;  %v14893_v30 = vpop.f32.mrf.mxu0  ;;  %15138 = vmatmul.mubr.bf16.vlgmr.msra.gmra.mxu0 %v19881_v1  ;;  %v16742_v27 = vcombine.low %v4706_v56, %v4710_v36  ;;  %v16735_v63 = vcombine.high %v4698_v41, %v4702_v9  ;;  %v4566_v46 = vld [vmem:[%s18840_s1 + $0x8b8] sm:$0xff] }
 0xb4b   : > { %v14894_v60 = vadd.f32 %v14893_v30, %v21260_v18  ;;  %15188 = vmatpush1.bf16.msra.mxu0 %v16638_v4  ;;  %v16751_v18 = vcombine.high %v4714_v20, %v4718_v40  ;;  %15219 = vmatprep.mubr.bf16.mxu0 %v19897_v28  ;;  %v4690_v4 = vld [vmem:[%s18840_s1 + $0xc98] sm:$0xff] }
 0xb4c   : > { %v14934_v44 = vpop.f32.mrf.mxu1  ;;  %15179 = vmatmul.mubr.bf16.vlgmr.msra.gmra.mxu1 %v19889_v10  ;;  %v14895_v61 = vpop.f32.mrf.mxu0  ;;  %15189 = vmatprep.subr.bf16.mxu0 %v16631_v55  ;;  %v4554_v30 = vld [vmem:[%s18840_s1 + $0x858] sm:$0xff] }
 0xb4d   : > { %15229 = vmatpush1.bf16.msra.mxu1 %v16766_v42  ;;  %v21334_v29 = vadd.f32 %v14934_v44, %v14894_v60  ;;  %v14896_v1 = vadd.f32 %v14895_v61, %v21269_v13  ;;  %15260 = vmatprep.mubr.bf16.mxu1 %v19904_v5  ;;  %v16622_v13 = vcombine.low %v4586_v15, %v4590_v25  ;;  %v4574_v5 = vld [vmem:[%s18840_s1 + $0x8f8] sm:$0xff] }
 0xb4e   : > { %v14936_v2 = vpop.f32.mrf.mxu1  ;;  %15230 = vmatprep.subr.bf16.mxu1 %v16759_v34  ;;  %v14897_v10 = vpop.f32.mrf.mxu0  ;;  %v16607_v32 = vcombine.high %v4570_v23, %v4574_v5  ;;  %v4694_v42 = vld [vmem:[%s18840_s1 + $0xcb8] sm:$0xff]  ;;  %v16606_v55 = vcombine.low %v4570_v23, %v4574_v5  ;;  %v16734_v34 = vcombine.low %v4698_v41, %v4702_v9  ;;  %v16599_v15 = vcombine.high %v4562_v14, %v4566_v46 }
 0xb4f   : > { %v21343_v47 = vadd.f32 %v14936_v2, %v14896_v1  ;;  %15190 = vmatpush1.bf16.msra.mxu0 %v16630_v62  ;;  %v16727_v25 = vcombine.high %v4690_v4, %v4694_v42  ;;  %v4558_v20 = vld [vmem:[%s18840_s1 + $0x878] sm:$0xff]  ;;  %v16598_v44 = vcombine.low %v4562_v14, %v4566_v46  ;;  %v16726_v62 = vcombine.low %v4690_v4, %v4694_v42 }
 0xb50   : > { %v14938_v22 = vpop.f32.mrf.mxu1  ;;  %v14898_v21 = vpop.f32.mrf.mxu0  ;;  %15191 = vmatprep.subr.bf16.mxu0 %v16623_v53  ;;  %v4682_v40 = vld [vmem:[%s18840_s1 + $0xc58] sm:$0xff]  ;;  %v16591_v61 = vcombine.high %v4554_v30, %v4558_v20  ;;  %v16590_v7 = vcombine.low %v4554_v30, %v4558_v20 }
 0xb51   : > { %15231 = vmatpush1.bf16.msra.mxu1 %v16758_v6  ;;  %v4686_v60 = vld [vmem:[%s18840_s1 + $0xc78] sm:$0xff] }
 0xb52   : > { %v14939_v28 = vpop.f32.mrf.mxu1  ;;  %15232 = vmatprep.subr.bf16.mxu1 %v16751_v18  ;;  %v16719_v6 = vcombine.high %v4682_v40, %v4686_v60  ;;  %v4546_v53 = vld [vmem:[%s18840_s1 + $0x818] sm:$0xff]  ;;  %v16718_v11 = vcombine.low %v4682_v40, %v4686_v60 }
 0xb53   : > { %15192 = vmatpush1.bf16.msra.mxu0 %v16622_v13  ;;  %v4550_v1 = vld [vmem:[%s18840_s1 + $0x838] sm:$0xff] }
 0xb54   : > { %15193 = vmatprep.subr.bf16.mxu0 %v16615_v3  ;;  %v4674_v2 = vld [vmem:[%s18840_s1 + $0xc18] sm:$0xff]  ;;  %v16583_v10 = vcombine.high %v4546_v53, %v4550_v1 }
 0xb55   : > { %15233 = vmatpush1.bf16.msra.mxu1 %v16750_v19  ;;  %v4678_v18 = vld [vmem:[%s18840_s1 + $0xc38] sm:$0xff]  ;;  %v16582_v19 = vcombine.low %v4546_v53, %v4550_v1 }
 0xb56   : > { %15234 = vmatprep.subr.bf16.mxu1 %v16743_v12  ;;  %v16711_v56 = vcombine.high %v4674_v2, %v4678_v18  ;;  %v4666_v36 = vld [vmem:[%s18840_s1 + $0xbd8] sm:$0xff]  ;;  %v16710_v3 = vcombine.low %v4674_v2, %v4678_v18 }
 0xb57   : > { %15194 = vmatpush1.bf16.msra.mxu0 %v16614_v58  ;;  %v4670_v22 = vld [vmem:[%s18840_s1 + $0xbf8] sm:$0xff] }
 0xb58   : > { %15195 = vmatprep.subr.bf16.mxu0 %v16607_v32  ;;  %v4794_v13 = vld [vmem:[%s18840_s1 + $0xfd8] sm:$0xff]  ;;  %v16703_v28 = vcombine.high %v4666_v36, %v4670_v22  ;;  %v16702_v58 = vcombine.low %v4666_v36, %v4670_v22 }
 0xb59   : > { %15235 = vmatpush1.bf16.msra.mxu1 %v16742_v27  ;;  %v4798_v21 = vld [vmem:[%s18840_s1 + $0xff8] sm:$0xff] }
 0xb5a   : > { %15236 = vmatprep.subr.bf16.mxu1 %v16735_v63  ;;  %v16831_v12 = vcombine.high %v4794_v13, %v4798_v21  ;;  %v4658_v23 = vld [vmem:[%s18840_s1 + $0xb98] sm:$0xff]  ;;  %v16830_v27 = vcombine.low %v4794_v13, %v4798_v21 }
 0xb5b   : > { %15196 = vmatpush1.bf16.msra.mxu0 %v16606_v55  ;;  %v4662_v5 = vld [vmem:[%s18840_s1 + $0xbb8] sm:$0xff] }
 0xb5c   : > { %15197 = vmatprep.subr.bf16.mxu0 %v16599_v15  ;;  %v4786_v41 = vld [vmem:[%s18840_s1 + $0xf98] sm:$0xff]  ;;  %v16695_v32 = vcombine.high %v4658_v23, %v4662_v5  ;;  %v16694_v55 = vcombine.low %v4658_v23, %v4662_v5 }
 0xb5d   : > { %15237 = vmatpush1.bf16.msra.mxu1 %v16734_v34  ;;  %v4790_v9 = vld [vmem:[%s18840_s1 + $0xfb8] sm:$0xff] }
 0xb5e   : > { %15238 = vmatprep.subr.bf16.mxu1 %v16727_v25  ;;  %v16823_v63 = vcombine.high %v4786_v41, %v4790_v9  ;;  %v4650_v14 = vld [vmem:[%s18840_s1 + $0xb58] sm:$0xff]  ;;  %v16822_v34 = vcombine.low %v4786_v41, %v4790_v9 }
 0xb5f   : > { %15198 = vmatpush1.bf16.msra.mxu0 %v16598_v44  ;;  %v4654_v46 = vld [vmem:[%s18840_s1 + $0xb78] sm:$0xff] }
 0xb60   : > { %15199 = vmatprep.subr.bf16.mxu0 %v16591_v61  ;;  %v4778_v4 = vld [vmem:[%s18840_s1 + $0xf58] sm:$0xff]  ;;  %v16687_v15 = vcombine.high %v4650_v14, %v4654_v46  ;;  %v16686_v44 = vcombine.low %v4650_v14, %v4654_v46 }
 0xb61   : > { %15239 = vmatpush1.bf16.msra.mxu1 %v16726_v62  ;;  %v4782_v42 = vld [vmem:[%s18840_s1 + $0xf78] sm:$0xff] }
 0xb62   : > { %15240 = vmatprep.subr.bf16.mxu1 %v16719_v6  ;;  %v16815_v25 = vcombine.high %v4778_v4, %v4782_v42  ;;  %v4642_v30 = vld [vmem:[%s18840_s1 + $0xb18] sm:$0xff]  ;;  %v16814_v62 = vcombine.low %v4778_v4, %v4782_v42 }
 0xb63   : > { %15200 = vmatpush1.bf16.msra.mxu0 %v16590_v7  ;;  %v4646_v20 = vld [vmem:[%s18840_s1 + $0xb38] sm:$0xff] }
 0xb64   : > { %15201 = vmatprep.subr.bf16.mxu0 %v16583_v10  ;;  %v4770_v40 = vld [vmem:[%s18840_s1 + $0xf18] sm:$0xff]  ;;  %v16679_v61 = vcombine.high %v4642_v30, %v4646_v20  ;;  %v16678_v7 = vcombine.low %v4642_v30, %v4646_v20 }
 0xb65   : > { %15241 = vmatpush1.bf16.msra.mxu1 %v16718_v11  ;;  %v4774_v60 = vld [vmem:[%s18840_s1 + $0xf38] sm:$0xff] }
 0xb66   : > { %15242 = vmatprep.subr.bf16.mxu1 %v16711_v56  ;;  %v16807_v6 = vcombine.high %v4770_v40, %v4774_v60  ;;  %v4634_v53 = vld [vmem:[%s18840_s1 + $0xad8] sm:$0xff]  ;;  %v16806_v11 = vcombine.low %v4770_v40, %v4774_v60 }
 0xb67   : > { %15202 = vmatpush1.bf16.msra.mxu0 %v16582_v19  ;;  %v4638_v1 = vld [vmem:[%s18840_s1 + $0xaf8] sm:$0xff] }
 0xb68   : > { %15203 = vmatprep.subr.bf16.mxu0 %v16703_v28  ;;  %v4762_v2 = vld [vmem:[%s18840_s1 + $0xed8] sm:$0xff]  ;;  %v16671_v10 = vcombine.high %v4634_v53, %v4638_v1  ;;  %v16670_v19 = vcombine.low %v4634_v53, %v4638_v1 }
 0xb69   : > { %15243 = vmatpush1.bf16.msra.mxu1 %v16710_v3  ;;  %v4766_v18 = vld [vmem:[%s18840_s1 + $0xef8] sm:$0xff] }
 0xb6a   : > { %15244 = vmatprep.subr.bf16.mxu1 %v16831_v12  ;;  %v16799_v56 = vcombine.high %v4762_v2, %v4766_v18  ;;  %v4626_v36 = vld [vmem:[%s18840_s1 + $0xa98] sm:$0xff]  ;;  %v16798_v3 = vcombine.low %v4762_v2, %v4766_v18 }
 0xb6b   : > { %15204 = vmatpush2.bf16.msra.mxu0 %v16702_v58  ;;  %v4630_v22 = vld [vmem:[%s18840_s1 + $0xab8] sm:$0xff] }
 0xb6c   : > { %15205 = vmatprep.subr.bf16.mxu0 %v16695_v32  ;;  %v4754_v13 = vld [vmem:[%s18840_s1 + $0xe98] sm:$0xff]  ;;  %v16663_v28 = vcombine.high %v4626_v36, %v4630_v22  ;;  %v16662_v58 = vcombine.low %v4626_v36, %v4630_v22 }
 0xb6d   : > { %15245 = vmatpush2.bf16.msra.mxu1 %v16830_v27  ;;  %v4758_v21 = vld [vmem:[%s18840_s1 + $0xeb8] sm:$0xff] }
 0xb6e   : > { %15246 = vmatprep.subr.bf16.mxu1 %v16823_v63  ;;  %v16791_v12 = vcombine.high %v4754_v13, %v4758_v21  ;;  %v4618_v23 = vld [vmem:[%s18840_s1 + $0xa58] sm:$0xff]  ;;  %v16790_v27 = vcombine.low %v4754_v13, %v4758_v21 }
 0xb6f   : > { %15206 = vmatpush2.bf16.msra.mxu0 %v16694_v55  ;;  %v4622_v5 = vld [vmem:[%s18840_s1 + $0xa78] sm:$0xff] }
 0xb70   : > { %15207 = vmatprep.subr.bf16.mxu0 %v16687_v15  ;;  %v4746_v41 = vld [vmem:[%s18840_s1 + $0xe58] sm:$0xff]  ;;  %v16655_v32 = vcombine.high %v4618_v23, %v4622_v5  ;;  %v16654_v55 = vcombine.low %v4618_v23, %v4622_v5 }
 0xb71   : > { %15247 = vmatpush2.bf16.msra.mxu1 %v16822_v34  ;;  %v4750_v9 = vld [vmem:[%s18840_s1 + $0xe78] sm:$0xff] }
 0xb72   : > { %15248 = vmatprep.subr.bf16.mxu1 %v16815_v25  ;;  %v16783_v63 = vcombine.high %v4746_v41, %v4750_v9  ;;  %v4610_v14 = vld [vmem:[%s18840_s1 + $0xa18] sm:$0xff]  ;;  %v16782_v34 = vcombine.low %v4746_v41, %v4750_v9 }
 0xb73   : > { %15208 = vmatpush2.bf16.msra.mxu0 %v16686_v44  ;;  %v4614_v46 = vld [vmem:[%s18840_s1 + $0xa38] sm:$0xff] }
 0xb74   : > { %15209 = vmatprep.subr.bf16.mxu0 %v16679_v61  ;;  %v4738_v4 = vld [vmem:[%s18840_s1 + $0xe18] sm:$0xff]  ;;  %v16647_v15 = vcombine.high %v4610_v14, %v4614_v46  ;;  %v16646_v44 = vcombine.low %v4610_v14, %v4614_v46 }
 0xb75   : > { %15249 = vmatpush2.bf16.msra.mxu1 %v16814_v62  ;;  %v4742_v42 = vld [vmem:[%s18840_s1 + $0xe38] sm:$0xff] }
 0xb76   : > { %15250 = vmatprep.subr.bf16.mxu1 %v16807_v6  ;;  %v16775_v25 = vcombine.high %v4738_v4, %v4742_v42  ;;  %v4858_v30 = vld [vmem:[%s18840_s1 + $0x11d8] sm:$0xff]  ;;  %v16774_v62 = vcombine.low %v4738_v4, %v4742_v42 }
 0xb77   : > { %15210 = vmatpush2.bf16.msra.mxu0 %v16678_v7  ;;  %v4862_v20 = vld [vmem:[%s18840_s1 + $0x11f8] sm:$0xff] }
 0xb78   : > { %15211 = vmatprep.subr.bf16.mxu0 %v16671_v10  ;;  %v4986_v40 = vld [vmem:[%s18840_s1 + $0x15d8] sm:$0xff]  ;;  %v16895_v61 = vcombine.high %v4858_v30, %v4862_v20  ;;  %v16894_v7 = vcombine.low %v4858_v30, %v4862_v20 }
 0xb79   : > { %15251 = vmatpush2.bf16.msra.mxu1 %v16806_v11  ;;  %v4990_v60 = vld [vmem:[%s18840_s1 + $0x15f8] sm:$0xff] }
 0xb7a   : > { %15252 = vmatprep.subr.bf16.mxu1 %v16799_v56  ;;  %v17023_v6 = vcombine.high %v4986_v40, %v4990_v60  ;;  %v4850_v53 = vld [vmem:[%s18840_s1 + $0x1198] sm:$0xff]  ;;  %v17022_v11 = vcombine.low %v4986_v40, %v4990_v60 }
 0xb7b   : > { %15212 = vmatpush2.bf16.msra.mxu0 %v16670_v19  ;;  %v4854_v1 = vld [vmem:[%s18840_s1 + $0x11b8] sm:$0xff] }
 0xb7c   : > { %15213 = vmatprep.subr.bf16.mxu0 %v16663_v28  ;;  %v4978_v2 = vld [vmem:[%s18840_s1 + $0x1598] sm:$0xff]  ;;  %v16887_v10 = vcombine.high %v4850_v53, %v4854_v1 }
 0xb7d   : > { %15253 = vmatpush2.bf16.msra.mxu1 %v16798_v3  ;;  %v4982_v18 = vld [vmem:[%s18840_s1 + $0x15b8] sm:$0xff] }
 0xb7e   : > { %15254 = vmatprep.subr.bf16.mxu1 %v16791_v12  ;;  %v17015_v56 = vcombine.high %v4978_v2, %v4982_v18  ;;  %v4842_v36 = vld [vmem:[%s18840_s1 + $0x1158] sm:$0xff]  ;;  %v16886_v12 = vcombine.low %v4850_v53, %v4854_v1  ;;  %v17014_v5 = vcombine.low %v4978_v2, %v4982_v18 }
 0xb7f   : > { %15214 = vmatpush2.bf16.msra.mxu0 %v16662_v58  ;;  %v4846_v22 = vld [vmem:[%s18840_s1 + $0x1178] sm:$0xff] }
 0xb80   : > { %15215 = vmatprep.subr.bf16.mxu0 %v16655_v32  ;;  %v4970_v21 = vld [vmem:[%s18840_s1 + $0x1558] sm:$0xff]  ;;  %v16879_v41 = vcombine.high %v4842_v36, %v4846_v22 }
 0xb81   : > { %15255 = vmatpush2.bf16.msra.mxu1 %v16790_v27  ;;  %v4974_v19 = vld [vmem:[%s18840_s1 + $0x1578] sm:$0xff] }
 0xb82   : > { %15256 = vmatprep.subr.bf16.mxu1 %v16783_v63  ;;  %v4834_v27 = vld [vmem:[%s18840_s1 + $0x1118] sm:$0xff] }
 0xb83   : > { %15216 = vmatpush2.bf16.msra.mxu0 %v16654_v55  ;;  %v4838_v32 = vld [vmem:[%s18840_s1 + $0x1138] sm:$0xff]  ;;  %v17006_v55 = vcombine.low %v4970_v21, %v4974_v19 }
 0xb84   : > { %15217 = vmatprep.subr.bf16.mxu0 %v16647_v15  ;;  %v4962_v63 = vld [vmem:[%s18840_s1 + $0x1518] sm:$0xff]  ;;  %v16870_v40 = vcombine.low %v4834_v27, %v4838_v32 }
 0xb85   : > { %15257 = vmatpush2.bf16.msra.mxu1 %v16782_v34  ;;  %v4966_v14 = vld [vmem:[%s18840_s1 + $0x1538] sm:$0xff]  ;;  %v16871_v34 = vcombine.high %v4834_v27, %v4838_v32 }
 0xb86   : > { %15258 = vmatprep.subr.bf16.mxu1 %v16775_v25  ;;  %v16999_v15 = vcombine.high %v4962_v63, %v4966_v14  ;;  %v4826_v25 = vld [vmem:[%s18840_s1 + $0x10d8] sm:$0xff]  ;;  %v16998_v60 = vcombine.low %v4962_v63, %v4966_v14 }
 0xb87   : > { %15218 = vmatpush2.bf16.msra.mxu0 %v16646_v44  ;;  %v4954_v30 = vld [vmem:[%s18840_s1 + $0x14d8] sm:$0xff] }
 0xb88   : > { %15269 = vmatprep.subr.bf16.mxu0 %v16895_v61  ;;  %v4958_v20 = vld [vmem:[%s18840_s1 + $0x14f8] sm:$0xff] }
 0xb89   : > { %15259 = vmatpush2.bf16.msra.mxu1 %v16774_v62  ;;  %v16991_v62 = vcombine.high %v4954_v30, %v4958_v20  ;;  %v4818_v61 = vld [vmem:[%s18840_s1 + $0x1098] sm:$0xff]  ;;  %v16990_v18 = vcombine.low %v4954_v30, %v4958_v20 }
 0xb8a   : > { %15310 = vmatprep.subr.bf16.mxu1 %v17023_v6  ;;  %v14975_v13 = vpop.f32.mrf.mxu0  ;;  %15220 = vmatmul.mubr.bf16.vlgmr.msra.gmra.mxu0 %v19969_v38  ;;  %v4822_v6 = vld [vmem:[%s18840_s1 + $0x10b8] sm:$0xff] }
 0xb8b   : > { %v14976_v3 = vadd.f32 %v14975_v13, %v21334_v29  ;;  %15270 = vmatpush1.bf16.msra.mxu0 %v16894_v7  ;;  %v17007_v29 = vcombine.high %v4970_v21, %v4974_v19  ;;  %15301 = vmatprep.mubr.bf16.mxu0 %v19985_v33  ;;  %v4946_v53 = vld [vmem:[%s18840_s1 + $0x1498] sm:$0xff]  ;;  %v16855_v7 = vcombine.high %v4818_v61, %v4822_v6 }
 0xb8c   : > { %v15016_v28 = vpop.f32.mrf.mxu1  ;;  %15261 = vmatmul.mubr.bf16.vlgmr.msra.gmra.mxu1 %v19977_v43  ;;  %v14977_v23 = vpop.f32.mrf.mxu0  ;;  %15271 = vmatprep.subr.bf16.mxu0 %v16887_v10  ;;  %v4950_v1 = vld [vmem:[%s18840_s1 + $0x14b8] sm:$0xff]  ;;  %v16854_v13 = vcombine.low %v4818_v61, %v4822_v6 }
 0xb8d   : > { %15311 = vmatpush1.bf16.msra.mxu1 %v17022_v11  ;;  %v21408_v9 = vadd.f32 %v15016_v28, %v14976_v3  ;;  %v14978_v38 = vadd.f32 %v14977_v23, %v21343_v47  ;;  %15342 = vmatprep.mubr.bf16.mxu1 %v19992_v37  ;;  %v16878_v47 = vcombine.low %v4842_v36, %v4846_v22  ;;  %v4830_v37 = vld [vmem:[%s18840_s1 + $0x10f8] sm:$0xff] }
 0xb8e   : > { %v15018_v58 = vpop.f32.mrf.mxu1  ;;  %15312 = vmatprep.subr.bf16.mxu1 %v17015_v56  ;;  %v14979_v43 = vpop.f32.mrf.mxu0  ;;  %v16863_v44 = vcombine.high %v4826_v25, %v4830_v37  ;;  %v16862_v2 = vcombine.low %v4826_v25, %v4830_v37  ;;  %v16983_v11 = vcombine.high %v4946_v53, %v4950_v1  ;;  %v4810_v10 = vld [vmem:[%s18840_s1 + $0x1058] sm:$0xff]  ;;  %v16982_v21 = vcombine.low %v4946_v53, %v4950_v1 }
 0xb8f   : > { %v21417_v46 = vadd.f32 %v15018_v58, %v14978_v38  ;;  %15272 = vmatpush1.bf16.msra.mxu0 %v16886_v12  ;;  %v4814_v56 = vld [vmem:[%s18840_s1 + $0x1078] sm:$0xff] }
 0xb90   : > { %v15020_v4 = vpop.f32.mrf.mxu1  ;;  %v14980_v42 = vpop.f32.mrf.mxu0  ;;  %15273 = vmatprep.subr.bf16.mxu0 %v16879_v41  ;;  %v4938_v36 = vld [vmem:[%s18840_s1 + $0x1458] sm:$0xff]  ;;  %v16847_v19 = vcombine.high %v4810_v10, %v4814_v56  ;;  %v16846_v41 = vcombine.low %v4810_v10, %v4814_v56 }
 0xb91   : > { %15313 = vmatpush1.bf16.msra.mxu1 %v17014_v5  ;;  %v4942_v22 = vld [vmem:[%s18840_s1 + $0x1478] sm:$0xff] }
 0xb92   : > { %v15021_v33 = vpop.f32.mrf.mxu1  ;;  %15314 = vmatprep.subr.bf16.mxu1 %v17007_v29  ;;  %v16975_v3 = vcombine.high %v4938_v36, %v4942_v22  ;;  %v4802_v28 = vld [vmem:[%s18840_s1 + $0x1018] sm:$0xff]  ;;  %v16974_v38 = vcombine.low %v4938_v36, %v4942_v22 }
 0xb93   : > { %15274 = vmatpush1.bf16.msra.mxu0 %v16878_v47  ;;  %v4806_v12 = vld [vmem:[%s18840_s1 + $0x1038] sm:$0xff] }
 0xb94   : > { %15275 = vmatprep.subr.bf16.mxu0 %v16871_v34  ;;  %v4930_v23 = vld [vmem:[%s18840_s1 + $0x1418] sm:$0xff]  ;;  %v16839_v58 = vcombine.high %v4802_v28, %v4806_v12  ;;  %v16838_v14 = vcombine.low %v4802_v28, %v4806_v12 }
 0xb95   : > { %15315 = vmatpush1.bf16.msra.mxu1 %v17006_v55  ;;  %v4934_v5 = vld [vmem:[%s18840_s1 + $0x1438] sm:$0xff] }
 0xb96   : > { %15316 = vmatprep.subr.bf16.mxu1 %v16999_v15  ;;  %v16967_v29 = vcombine.high %v4930_v23, %v4934_v5  ;;  %v4922_v27 = vld [vmem:[%s18840_s1 + $0x13d8] sm:$0xff]  ;;  %v16966_v4 = vcombine.low %v4930_v23, %v4934_v5 }
 0xb97   : > { %15276 = vmatpush1.bf16.msra.mxu0 %v16870_v40  ;;  %v4926_v32 = vld [vmem:[%s18840_s1 + $0x13f8] sm:$0xff] }
 0xb98   : > { %15277 = vmatprep.subr.bf16.mxu0 %v16863_v44  ;;  %v5050_v43 = vld [vmem:[%s18840_s1 + $0x17d8] sm:$0xff]  ;;  %v16959_v47 = vcombine.high %v4922_v27, %v4926_v32  ;;  %v16958_v25 = vcombine.low %v4922_v27, %v4926_v32 }
 0xb99   : > { %15317 = vmatpush1.bf16.msra.mxu1 %v16998_v60  ;;  %v5054_v63 = vld [vmem:[%s18840_s1 + $0x17f8] sm:$0xff] }
 0xb9a   : > { %15318 = vmatprep.subr.bf16.mxu1 %v16991_v62  ;;  %v17087_v42 = vcombine.high %v5050_v43, %v5054_v63  ;;  %v4914_v55 = vld [vmem:[%s18840_s1 + $0x1398] sm:$0xff]  ;;  %v17086_v37 = vcombine.low %v5050_v43, %v5054_v63 }
 0xb9b   : > { %15278 = vmatpush1.bf16.msra.mxu0 %v16862_v2  ;;  %v4918_v34 = vld [vmem:[%s18840_s1 + $0x13b8] sm:$0xff] }
 0xb9c   : > { %15279 = vmatprep.subr.bf16.mxu0 %v16855_v7  ;;  %v5042_v33 = vld [vmem:[%s18840_s1 + $0x1798] sm:$0xff]  ;;  %v16951_v30 = vcombine.high %v4914_v55, %v4918_v34  ;;  %v16950_v61 = vcombine.low %v4914_v55, %v4918_v34 }
 0xb9d   : > { %15319 = vmatpush1.bf16.msra.mxu1 %v16990_v18  ;;  %v5046_v15 = vld [vmem:[%s18840_s1 + $0x17b8] sm:$0xff] }
 0xb9e   : > { %15320 = vmatprep.subr.bf16.mxu1 %v16983_v11  ;;  %v17079_v20 = vcombine.high %v5042_v33, %v5046_v15  ;;  %v4906_v40 = vld [vmem:[%s18840_s1 + $0x1358] sm:$0xff]  ;;  %v17078_v6 = vcombine.low %v5042_v33, %v5046_v15 }
 0xb9f   : > { %15280 = vmatpush1.bf16.msra.mxu0 %v16854_v13  ;;  %v4910_v60 = vld [vmem:[%s18840_s1 + $0x1378] sm:$0xff] }
 0xba0   : > { %15281 = vmatprep.subr.bf16.mxu0 %v16847_v19  ;;  %v5034_v44 = vld [vmem:[%s18840_s1 + $0x1758] sm:$0xff]  ;;  %v16943_v53 = vcombine.high %v4906_v40, %v4910_v60  ;;  %v16942_v10 = vcombine.low %v4906_v40, %v4910_v60 }
 0xba1   : > { %15321 = vmatpush1.bf16.msra.mxu1 %v16982_v21  ;;  %v5038_v62 = vld [vmem:[%s18840_s1 + $0x1778] sm:$0xff] }
 0xba2   : > { %15322 = vmatprep.subr.bf16.mxu1 %v16975_v3  ;;  %v17071_v1 = vcombine.high %v5034_v44, %v5038_v62  ;;  %v4898_v2 = vld [vmem:[%s18840_s1 + $0x1318] sm:$0xff]  ;;  %v17070_v56 = vcombine.low %v5034_v44, %v5038_v62 }
 0xba3   : > { %15282 = vmatpush1.bf16.msra.mxu0 %v16846_v41  ;;  %v4902_v18 = vld [vmem:[%s18840_s1 + $0x1338] sm:$0xff] }
 0xba4   : > { %15283 = vmatprep.subr.bf16.mxu0 %v16839_v58  ;;  %v5026_v7 = vld [vmem:[%s18840_s1 + $0x1718] sm:$0xff]  ;;  %v16935_v36 = vcombine.high %v4898_v2, %v4902_v18  ;;  %v16934_v28 = vcombine.low %v4898_v2, %v4902_v18 }
 0xba5   : > { %15323 = vmatpush1.bf16.msra.mxu1 %v16974_v38  ;;  %v5030_v11 = vld [vmem:[%s18840_s1 + $0x1738] sm:$0xff] }
 0xba6   : > { %15324 = vmatprep.subr.bf16.mxu1 %v16967_v29  ;;  %v17063_v22 = vcombine.high %v5026_v7, %v5030_v11  ;;  %v4890_v13 = vld [vmem:[%s18840_s1 + $0x12d8] sm:$0xff]  ;;  %v17062_v12 = vcombine.low %v5026_v7, %v5030_v11 }
 0xba7   : > { %15284 = vmatpush1.bf16.msra.mxu0 %v16838_v14  ;;  %v4894_v21 = vld [vmem:[%s18840_s1 + $0x12f8] sm:$0xff] }
 0xba8   : > { %15285 = vmatprep.subr.bf16.mxu0 %v16959_v47  ;;  %v5018_v19 = vld [vmem:[%s18840_s1 + $0x16d8] sm:$0xff]  ;;  %v16927_v23 = vcombine.high %v4890_v13, %v4894_v21  ;;  %v16926_v27 = vcombine.low %v4890_v13, %v4894_v21 }
 0xba9   : > { %15325 = vmatpush1.bf16.msra.mxu1 %v16966_v4  ;;  %v5022_v3 = vld [vmem:[%s18840_s1 + $0x16f8] sm:$0xff] }
 0xbaa   : > { %15326 = vmatprep.subr.bf16.mxu1 %v17087_v42  ;;  %v17055_v5 = vcombine.high %v5018_v19, %v5022_v3  ;;  %v4882_v41 = vld [vmem:[%s18840_s1 + $0x1298] sm:$0xff]  ;;  %v17054_v32 = vcombine.low %v5018_v19, %v5022_v3 }
 0xbab   : > { %15286 = vmatpush2.bf16.msra.mxu0 %v16958_v25  ;;  %v4886_v38 = vld [vmem:[%s18840_s1 + $0x12b8] sm:$0xff] }
 0xbac   : > { %15287 = vmatprep.subr.bf16.mxu0 %v16951_v30  ;;  %v5010_v58 = vld [vmem:[%s18840_s1 + $0x1698] sm:$0xff]  ;;  %v16919_v43 = vcombine.high %v4882_v41, %v4886_v38  ;;  %v16918_v55 = vcombine.low %v4882_v41, %v4886_v38 }
 0xbad   : > { %15327 = vmatpush2.bf16.msra.mxu1 %v17086_v37  ;;  %v5014_v29 = vld [vmem:[%s18840_s1 + $0x16b8] sm:$0xff] }
 0xbae   : > { %15328 = vmatprep.subr.bf16.mxu1 %v17079_v20  ;;  %v17047_v63 = vcombine.high %v5010_v58, %v5014_v29  ;;  %v4874_v14 = vld [vmem:[%s18840_s1 + $0x1258] sm:$0xff]  ;;  %v17046_v34 = vcombine.low %v5010_v58, %v5014_v29 }
 0xbaf   : > { %15288 = vmatpush2.bf16.msra.mxu0 %v16950_v61  ;;  %v4878_v4 = vld [vmem:[%s18840_s1 + $0x1278] sm:$0xff] }
 0xbb0   : > { %15289 = vmatprep.subr.bf16.mxu0 %v16943_v53  ;;  %v5002_v47 = vld [vmem:[%s18840_s1 + $0x1658] sm:$0xff]  ;;  %v16911_v33 = vcombine.high %v4874_v14, %v4878_v4  ;;  %v16910_v40 = vcombine.low %v4874_v14, %v4878_v4 }
 0xbb1   : > { %15329 = vmatpush2.bf16.msra.mxu1 %v17078_v6  ;;  %v5006_v42 = vld [vmem:[%s18840_s1 + $0x1678] sm:$0xff] }
 0xbb2   : > { %15330 = vmatprep.subr.bf16.mxu1 %v17071_v1  ;;  %v17039_v15 = vcombine.high %v5002_v47, %v5006_v42  ;;  %v4866_v25 = vld [vmem:[%s18840_s1 + $0x1218] sm:$0xff]  ;;  %v17038_v60 = vcombine.low %v5002_v47, %v5006_v42 }
 0xbb3   : > { %15290 = vmatpush2.bf16.msra.mxu0 %v16942_v10  ;;  %v4870_v37 = vld [vmem:[%s18840_s1 + $0x1238] sm:$0xff] }
 0xbb4   : > { %15291 = vmatprep.subr.bf16.mxu0 %v16935_v36  ;;  %v4994_v30 = vld [vmem:[%s18840_s1 + $0x1618] sm:$0xff]  ;;  %v16903_v44 = vcombine.high %v4866_v25, %v4870_v37  ;;  %v16902_v2 = vcombine.low %v4866_v25, %v4870_v37 }
 0xbb5   : > { %15331 = vmatpush2.bf16.msra.mxu1 %v17070_v56  ;;  %v4998_v20 = vld [vmem:[%s18840_s1 + $0x1638] sm:$0xff] }
 0xbb6   : > { %15332 = vmatprep.subr.bf16.mxu1 %v17063_v22  ;;  %v17031_v62 = vcombine.high %v4994_v30, %v4998_v20  ;;  %v5114_v61 = vld [vmem:[%s18840_s1 + $0x19d8] sm:$0xff]  ;;  %v17030_v18 = vcombine.low %v4994_v30, %v4998_v20 }
 0xbb7   : > { %15292 = vmatpush2.bf16.msra.mxu0 %v16934_v28  ;;  %v5118_v6 = vld [vmem:[%s18840_s1 + $0x19f8] sm:$0xff] }
 0xbb8   : > { %15293 = vmatprep.subr.bf16.mxu0 %v16927_v23  ;;  %v5242_v53 = vld [vmem:[%s18840_s1 + $0x1dd8] sm:$0xff]  ;;  %v17151_v7 = vcombine.high %v5114_v61, %v5118_v6  ;;  %v17150_v13 = vcombine.low %v5114_v61, %v5118_v6 }
 0xbb9   : > { %15333 = vmatpush2.bf16.msra.mxu1 %v17062_v12  ;;  %v5246_v1 = vld [vmem:[%s18840_s1 + $0x1df8] sm:$0xff] }
 0xbba   : > { %15334 = vmatprep.subr.bf16.mxu1 %v17055_v5  ;;  %v17279_v11 = vcombine.high %v5242_v53, %v5246_v1  ;;  %v5106_v10 = vld [vmem:[%s18840_s1 + $0x1998] sm:$0xff]  ;;  %v17278_v21 = vcombine.low %v5242_v53, %v5246_v1 }
 0xbbb   : > { %15294 = vmatpush2.bf16.msra.mxu0 %v16926_v27  ;;  %v5110_v56 = vld [vmem:[%s18840_s1 + $0x19b8] sm:$0xff] }
 0xbbc   : > { %15295 = vmatprep.subr.bf16.mxu0 %v16919_v43  ;;  %v5234_v36 = vld [vmem:[%s18840_s1 + $0x1d98] sm:$0xff]  ;;  %v17143_v19 = vcombine.high %v5106_v10, %v5110_v56  ;;  %v17142_v29 = vcombine.low %v5106_v10, %v5110_v56 }
 0xbbd   : > { %15335 = vmatpush2.bf16.msra.mxu1 %v17054_v32  ;;  %v5238_v22 = vld [vmem:[%s18840_s1 + $0x1db8] sm:$0xff] }
 0xbbe   : > { %15336 = vmatprep.subr.bf16.mxu1 %v17047_v63  ;;  %v17271_v3 = vcombine.high %v5234_v36, %v5238_v22  ;;  %v5098_v28 = vld [vmem:[%s18840_s1 + $0x1958] sm:$0xff] }
 0xbbf   : > { %15296 = vmatpush2.bf16.msra.mxu0 %v16918_v55  ;;  %v5102_v12 = vld [vmem:[%s18840_s1 + $0x1978] sm:$0xff] }
 0xbc0   : > { %15297 = vmatprep.subr.bf16.mxu0 %v16911_v33  ;;  %v5226_v5 = vld [vmem:[%s18840_s1 + $0x1d58] sm:$0xff]  ;;  %v17135_v63 = vcombine.high %v5098_v28, %v5102_v12  ;;  %v17134_v37 = vcombine.low %v5098_v28, %v5102_v12 }
 0xbc1   : > { %15337 = vmatpush2.bf16.msra.mxu1 %v17046_v34  ;;  %v5230_v41 = vld [vmem:[%s18840_s1 + $0x1d78] sm:$0xff] }
 0xbc2   : > { %15338 = vmatprep.subr.bf16.mxu1 %v17039_v15  ;;  %v18057_v27 = vld [vmem:[%s18848_s5] sm:$0xff] }
 0xbc3   : > { %15298 = vmatpush2.bf16.msra.mxu0 %v16910_v40  ;;  %v15626_v32 = vrot.slane %v18057_v27, %v5843_v16  ;;  %v5090_v47 = vld [vmem:[%s18840_s1 + $0x1918] sm:$0xff]  ;;  %v15630_v25 = vrot.slane %v18057_v27, %v5847_v45 }
 0xbc4   : > { %15299 = vmatprep.subr.bf16.mxu0 %v16903_v44  ;;  %v5094_v42 = vld [vmem:[%s18840_s1 + $0x1938] sm:$0xff] }
 0xbc5   : > { %15339 = vmatpush2.bf16.msra.mxu1 %v17038_v60  ;;  %v5218_v34 = vld [vmem:[%s18840_s1 + $0x1d18] sm:$0xff]  ;;  %v17127_v20 = vcombine.high %v5090_v47, %v5094_v42 }
 0xbc6   : > { %15340 = vmatprep.subr.bf16.mxu1 %v17031_v62  ;;  %v5222_v33 = vld [vmem:[%s18840_s1 + $0x1d38] sm:$0xff] }
 0xbc7   : > { %15300 = vmatpush2.bf16.msra.mxu0 %v16902_v2  ;;  %v17255_v44 = vcombine.high %v5218_v34, %v5222_v33  ;;  %v5082_v62 = vld [vmem:[%s18840_s1 + $0x18d8] sm:$0xff]  ;;  %v17126_v2 = vcombine.low %v5090_v47, %v5094_v42 }
 0xbc8   : > { %15351 = vmatprep.subr.bf16.mxu0 %v17151_v7  ;;  %v5086_v61 = vld [vmem:[%s18840_s1 + $0x18f8] sm:$0xff] }
 0xbc9   : > { %15341 = vmatpush2.bf16.msra.mxu1 %v17030_v18  ;;  %v5210_v45 = vld [vmem:[%s18840_s1 + $0x1cd8] sm:$0xff]  ;;  %v17254_v18 = vcombine.low %v5218_v34, %v5222_v33  ;;  %v17119_v7 = vcombine.high %v5082_v62, %v5086_v61 }
 0xbca   : > { %15392 = vmatprep.subr.bf16.mxu1 %v17279_v11  ;;  %v15057_v23 = vpop.f32.mrf.mxu0  ;;  %15302 = vmatmul.mubr.bf16.vlgmr.msra.gmra.mxu0 %v20057_v0  ;;  %v17270_v0 = vcombine.low %v5234_v36, %v5238_v22  ;;  %v5214_v6 = vld [vmem:[%s18840_s1 + $0x1cf8] sm:$0xff] }
 0xbcb   : > { %v15058_v38 = vadd.f32 %v15057_v23, %v21408_v9  ;;  %15352 = vmatpush1.bf16.msra.mxu0 %v17150_v13  ;;  %15383 = vmatprep.mubr.bf16.mxu0 %v20073_v59  ;;  %v17262_v59 = vcombine.low %v5226_v5, %v5230_v41  ;;  %v17247_v11 = vcombine.high %v5210_v45, %v5214_v6  ;;  %v5074_v10 = vld [vmem:[%s18840_s1 + $0x1898] sm:$0xff] }
 0xbcc   : > { %v15098_v58 = vpop.f32.mrf.mxu1  ;;  %15343 = vmatmul.mubr.bf16.vlgmr.msra.gmra.mxu1 %v20065_v51  ;;  %v15059_v43 = vpop.f32.mrf.mxu0  ;;  %15353 = vmatprep.subr.bf16.mxu0 %v17143_v19  ;;  %v17263_v51 = vcombine.high %v5226_v5, %v5230_v41  ;;  %v5078_v56 = vld [vmem:[%s18840_s1 + $0x18b8] sm:$0xff] }
 0xbcd   : > { %15393 = vmatpush1.bf16.msra.mxu1 %v17278_v21  ;;  %v15099_v14 = vadd.f32 %v15098_v58, %v15058_v38  ;;  %v15060_v9 = vadd.f32 %v15059_v43, %v21417_v46  ;;  %15424 = vmatprep.mubr.bf16.mxu1 %v20080_v31  ;;  %v5202_v22 = vld [vmem:[%s18840_s1 + $0x1c98] sm:$0xff]  ;;  %v17246_v21 = vcombine.low %v5210_v45, %v5214_v6 }
 0xbce   : > { %v15100_v4 = vpop.f32.mrf.mxu1  ;;  %15394 = vmatprep.subr.bf16.mxu1 %v17271_v3  ;;  %v15061_v55 = vpop.f32.mrf.mxu0  ;;  %v5206_v13 = vld [vmem:[%s18840_s1 + $0x1cb8] sm:$0xff]  ;;  %v17111_v19 = vcombine.high %v5074_v10, %v5078_v56  ;;  %v17110_v41 = vcombine.low %v5074_v10, %v5078_v56 }
 0xbcf   : > { %v15601_v16 = vmax.f32 %v15099_v14, 0.0  ;;  %v15101_v15 = vadd.f32 %v15100_v4, %v15060_v9  ;;  %15354 = vmatpush1.bf16.msra.mxu0 %v17142_v29  ;;  %v17239_v3 = vcombine.high %v5202_v22, %v5206_v13  ;;  %v5066_v28 = vld [vmem:[%s18840_s1 + $0x1858] sm:$0xff]  ;;  %v17238_v38 = vcombine.low %v5202_v22, %v5206_v13 }
 0xbd0   : > { %v15102_v46 = vpop.f32.mrf.mxu1  ;;  %v15062_v30 = vpop.f32.mrf.mxu0  ;;  %15355 = vmatprep.subr.bf16.mxu0 %v17135_v63  ;;  %v5070_v12 = vld [vmem:[%s18840_s1 + $0x1878] sm:$0xff] }
 0xbd1   : > { %15395 = vmatpush1.bf16.msra.mxu1 %v17270_v0  ;;  %v15651_v40 = vmul.f32 %v15626_v32, %v15601_v16  ;;  %v15602_v60 = vmax.f32 %v15101_v15, 0.0  ;;  %v5194_v23 = vld [vmem:[%s18840_s1 + $0x1c58] sm:$0xff]  ;;  %v17103_v58 = vcombine.high %v5066_v28, %v5070_v12  ;;  %v17102_v63 = vcombine.low %v5066_v28, %v5070_v12 }
 0xbd2   : > { %v15103_v31 = vpop.f32.mrf.mxu1  ;;  %15396 = vmatprep.subr.bf16.mxu1 %v17263_v51  ;;  %v5198_v5 = vld [vmem:[%s18840_s1 + $0x1c78] sm:$0xff] }
 0xbd3   : > { %v15658_v53 = vadd.f32 %v21046_v8, %v15651_v40  ;;  %v15652_v1 = vmul.f32 %v15630_v25, %v15602_v60  ;;  %15356 = vmatpush1.bf16.msra.mxu0 %v17134_v37  ;;  %v17118_v8 = vcombine.low %v5082_v62, %v5086_v61  ;;  %v17231_v29 = vcombine.high %v5194_v23, %v5198_v5  ;;  %v5058_v27 = vld [vmem:[%s18840_s1 + $0x1818] sm:$0xff] }
 0xbd4   : > { %15357 = vmatprep.subr.bf16.mxu0 %v17127_v20  ;;  %v5062_v32 = vld [vmem:[%s18840_s1 + $0x1838] sm:$0xff]  ;;  %v17230_v14 = vcombine.low %v5194_v23, %v5198_v5 }
 0xbd5   : > { %15397 = vmatpush1.bf16.msra.mxu1 %v17262_v59  ;;  %v21501_v36 = vadd.f32 %v15658_v53, %v15652_v1  ;;  %v5186_v43 = vld [vmem:[%s18840_s1 + $0x1c18] sm:$0xff]  ;;  %v17095_v9 = vcombine.high %v5058_v27, %v5062_v32  ;;  %v17094_v34 = vcombine.low %v5058_v27, %v5062_v32 }
 0xbd6   : > { %15398 = vmatprep.subr.bf16.mxu1 %v17255_v44  ;;  %v5190_v0 = vld [vmem:[%s18840_s1 + $0x1c38] sm:$0xff] }
 0xbd7   : > { %15358 = vmatpush1.bf16.msra.mxu0 %v17126_v2  ;;  %v17223_v4 = vcombine.high %v5186_v43, %v5190_v0  ;;  %v5178_v51 = vld [vmem:[%s18840_s1 + $0x1bd8] sm:$0xff]  ;;  %v17222_v33 = vcombine.low %v5186_v43, %v5190_v0 }
 0xbd8   : > { %15359 = vmatprep.subr.bf16.mxu0 %v17119_v7  ;;  %v5182_v47 = vld [vmem:[%s18840_s1 + $0x1bf8] sm:$0xff] }
 0xbd9   : > { %15399 = vmatpush1.bf16.msra.mxu1 %v17254_v18  ;;  %v5306_v42 = vld [vmem:[%s18840_s1 + $0x1fd8] sm:$0xff]  ;;  %v17215_v16 = vcombine.high %v5178_v51, %v5182_v47  ;;  %v17214_v59 = vcombine.low %v5178_v51, %v5182_v47 }
 0xbda   : > { %15400 = vmatprep.subr.bf16.mxu1 %v17247_v11  ;;  %v5310_v55 = vld [vmem:[%s18840_s1 + $0x1ff8] sm:$0xff] }
 0xbdb   : > { %15360 = vmatpush1.bf16.msra.mxu0 %v17118_v8  ;;  %v17343_v15 = vcombine.high %v5306_v42, %v5310_v55  ;;  %v5170_v25 = vld [vmem:[%s18840_s1 + $0x1b98] sm:$0xff]  ;;  %v17342_v20 = vcombine.low %v5306_v42, %v5310_v55 }
 0xbdc   : > { %15361 = vmatprep.subr.bf16.mxu0 %v17111_v19  ;;  %v5174_v46 = vld [vmem:[%s18840_s1 + $0x1bb8] sm:$0xff] }
 0xbdd   : > { %15401 = vmatpush1.bf16.msra.mxu1 %v17246_v21  ;;  %v5298_v37 = vld [vmem:[%s18840_s1 + $0x1f98] sm:$0xff]  ;;  %v17207_v40 = vcombine.high %v5170_v25, %v5174_v46  ;;  %v17206_v45 = vcombine.low %v5170_v25, %v5174_v46 }
 0xbde   : > { %15402 = vmatprep.subr.bf16.mxu1 %v17239_v3  ;;  %v5302_v30 = vld [vmem:[%s18840_s1 + $0x1fb8] sm:$0xff] }
 0xbdf   : > { %15362 = vmatpush1.bf16.msra.mxu0 %v17110_v41  ;;  %v17335_v60 = vcombine.high %v5298_v37, %v5302_v30  ;;  %v5162_v31 = vld [vmem:[%s18840_s1 + $0x1b58] sm:$0xff]  ;;  %v17334_v6 = vcombine.low %v5298_v37, %v5302_v30 }
 0xbe0   : > { %15363 = vmatprep.subr.bf16.mxu0 %v17103_v58  ;;  %v5166_v44 = vld [vmem:[%s18840_s1 + $0x1b78] sm:$0xff] }
 0xbe1   : > { %15403 = vmatpush1.bf16.msra.mxu1 %v17238_v38  ;;  %v5290_v62 = vld [vmem:[%s18840_s1 + $0x1f58] sm:$0xff]  ;;  %v17199_v53 = vcombine.high %v5162_v31, %v5166_v44  ;;  %v17198_v10 = vcombine.low %v5162_v31, %v5166_v44  ;;  %v5851_v44 = vsub.s32 6, %v20137_v17 }
 0xbe2   : > { %15404 = vmatprep.subr.bf16.mxu1 %v17231_v29  ;;  %v5294_v61 = vld [vmem:[%s18840_s1 + $0x1f78] sm:$0xff] }
 0xbe3   : > { %15364 = vmatpush1.bf16.msra.mxu0 %v17102_v63  ;;  %v17327_v1 = vcombine.high %v5290_v62, %v5294_v61  ;;  %v5154_v2 = vld [vmem:[%s18840_s1 + $0x1b18] sm:$0xff]  ;;  %v17326_v56 = vcombine.low %v5290_v62, %v5294_v61 }
 0xbe4   : > { %15365 = vmatprep.subr.bf16.mxu0 %v17095_v9  ;;  %v5158_v18 = vld [vmem:[%s18840_s1 + $0x1b38] sm:$0xff] }
 0xbe5   : > { %15405 = vmatpush1.bf16.msra.mxu1 %v17230_v14  ;;  %v5282_v7 = vld [vmem:[%s18840_s1 + $0x1f18] sm:$0xff]  ;;  %v17191_v22 = vcombine.high %v5154_v2, %v5158_v18  ;;  %v17190_v28 = vcombine.low %v5154_v2, %v5158_v18 }
 0xbe6   : > { %15406 = vmatprep.subr.bf16.mxu1 %v17223_v4  ;;  %v5286_v11 = vld [vmem:[%s18840_s1 + $0x1f38] sm:$0xff] }
 0xbe7   : > { %15366 = vmatpush1.bf16.msra.mxu0 %v17094_v34  ;;  %v17319_v13 = vcombine.high %v5282_v7, %v5286_v11  ;;  %v5146_v8 = vld [vmem:[%s18840_s1 + $0x1ad8] sm:$0xff]  ;;  %v17318_v12 = vcombine.low %v5282_v7, %v5286_v11  ;;  %v18058_v7 = vld [vmem:[%s18846_s24] sm:$0xff] }
 0xbe8   : > { %15367 = vmatprep.subr.bf16.mxu0 %v17215_v16  ;;  %v5150_v21 = vld [vmem:[%s18840_s1 + $0x1af8] sm:$0xff]  ;;  %v5852_v11 = vrot.slane %v18058_v7, %v5851_v44 }
 0xbe9   : > { %15407 = vmatpush1.bf16.msra.mxu1 %v17222_v33  ;;  %v5274_v19 = vld [vmem:[%s18840_s1 + $0x1ed8] sm:$0xff]  ;;  %v17183_v23 = vcombine.high %v5146_v8, %v5150_v21  ;;  %v17182_v27 = vcombine.low %v5146_v8, %v5150_v21 }
 0xbea   : > { %15408 = vmatprep.subr.bf16.mxu1 %v17343_v15  ;;  %v5278_v3 = vld [vmem:[%s18840_s1 + $0x1ef8] sm:$0xff] }
 0xbeb   : > { %15368 = vmatpush2.bf16.msra.mxu0 %v17214_v59  ;;  %v17311_v5 = vcombine.high %v5274_v19, %v5278_v3  ;;  %v5138_v41 = vld [vmem:[%s18840_s1 + $0x1a98] sm:$0xff]  ;;  %v17310_v32 = vcombine.low %v5274_v19, %v5278_v3 }
 0xbec   : > { %15369 = vmatprep.subr.bf16.mxu0 %v17207_v40  ;;  %v5142_v38 = vld [vmem:[%s18840_s1 + $0x1ab8] sm:$0xff] }
 0xbed   : > { %15409 = vmatpush2.bf16.msra.mxu1 %v17342_v20  ;;  %v5266_v58 = vld [vmem:[%s18840_s1 + $0x1e98] sm:$0xff]  ;;  %v17175_v43 = vcombine.high %v5138_v41, %v5142_v38  ;;  %v17174_v51 = vcombine.low %v5138_v41, %v5142_v38 }
 0xbee   : > { %15410 = vmatprep.subr.bf16.mxu1 %v17335_v60  ;;  %v5270_v29 = vld [vmem:[%s18840_s1 + $0x1eb8] sm:$0xff] }
 0xbef   : > { %15370 = vmatpush2.bf16.msra.mxu0 %v17206_v45  ;;  %v17303_v0 = vcombine.high %v5266_v58, %v5270_v29  ;;  %v5130_v63 = vld [vmem:[%s18840_s1 + $0x1a58] sm:$0xff]  ;;  %v17302_v47 = vcombine.low %v5266_v58, %v5270_v29 }
 0xbf0   : > { %15371 = vmatprep.subr.bf16.mxu0 %v17199_v53  ;;  %v5134_v14 = vld [vmem:[%s18840_s1 + $0x1a78] sm:$0xff] }
 0xbf1   : > { %15411 = vmatpush2.bf16.msra.mxu1 %v17334_v6  ;;  %v5258_v9 = vld [vmem:[%s18840_s1 + $0x1e58] sm:$0xff]  ;;  %v17167_v42 = vcombine.high %v5130_v63, %v5134_v14  ;;  %v17166_v25 = vcombine.low %v5130_v63, %v5134_v14  ;;  %v5855_v6 = vsub.s32 7, %v20137_v17 }
 0xbf2   : > { %15412 = vmatprep.subr.bf16.mxu1 %v17327_v1  ;;  %v5262_v4 = vld [vmem:[%s18840_s1 + $0x1e78] sm:$0xff] }
 0xbf3   : > { %15372 = vmatpush2.bf16.msra.mxu0 %v17198_v10  ;;  %v17295_v55 = vcombine.high %v5258_v9, %v5262_v4  ;;  %v5122_v34 = vld [vmem:[%s18840_s1 + $0x1a18] sm:$0xff]  ;;  %v17294_v46 = vcombine.low %v5258_v9, %v5262_v4 }
 0xbf4   : > { %15373 = vmatprep.subr.bf16.mxu0 %v17191_v22  ;;  %v5126_v33 = vld [vmem:[%s18840_s1 + $0x1a38] sm:$0xff] }
 0xbf5   : > { %15413 = vmatpush2.bf16.msra.mxu1 %v17326_v56  ;;  %v5250_v16 = vld [vmem:[%s18840_s1 + $0x1e18] sm:$0xff]  ;;  %v17159_v37 = vcombine.high %v5122_v34, %v5126_v33  ;;  %v17158_v31 = vcombine.low %v5122_v34, %v5126_v33 }
 0xbf6   : > { %15414 = vmatprep.subr.bf16.mxu1 %v17319_v13  ;;  %v5254_v15 = vld [vmem:[%s18840_s1 + $0x1e38] sm:$0xff]  ;;  %v5856_v13 = vrot.slane %v18058_v7, %v5855_v6 }
 0xbf7   : > { %15374 = vmatpush2.bf16.msra.mxu0 %v17190_v28  ;;  %v17287_v30 = vcombine.high %v5250_v16, %v5254_v15  ;;  %v5370_v59 = vld [vmem:[%s18840_s1 + $0x21d8] sm:$0xff]  ;;  %v17286_v62 = vcombine.low %v5250_v16, %v5254_v15 }
 0xbf8   : > { %15375 = vmatprep.subr.bf16.mxu0 %v17183_v23  ;;  %v5374_v20 = vld [vmem:[%s18840_s1 + $0x21f8] sm:$0xff] }
 0xbf9   : > { %15415 = vmatpush2.bf16.msra.mxu1 %v17318_v12  ;;  %v5498_v40 = vld [vmem:[%s18840_s1 + $0x25d8] sm:$0xff]  ;;  %v17407_v61 = vcombine.high %v5370_v59, %v5374_v20  ;;  %v17406_v10 = vcombine.low %v5370_v59, %v5374_v20 }
 0xbfa   : > { %15416 = vmatprep.subr.bf16.mxu1 %v17311_v5  ;;  %v5502_v60 = vld [vmem:[%s18840_s1 + $0x25f8] sm:$0xff] }
 0xbfb   : > { %15376 = vmatpush2.bf16.msra.mxu0 %v17182_v27  ;;  %v17535_v45 = vcombine.high %v5498_v40, %v5502_v60  ;;  %v5362_v53 = vld [vmem:[%s18840_s1 + $0x2198] sm:$0xff]  ;;  %v17534_v56 = vcombine.low %v5498_v40, %v5502_v60 }
 0xbfc   : > { %15377 = vmatprep.subr.bf16.mxu0 %v17175_v43  ;;  %v5366_v1 = vld [vmem:[%s18840_s1 + $0x21b8] sm:$0xff] }
 0xbfd   : > { %15417 = vmatpush2.bf16.msra.mxu1 %v17310_v32  ;;  %v5490_v2 = vld [vmem:[%s18840_s1 + $0x2598] sm:$0xff]  ;;  %v17399_v22 = vcombine.high %v5362_v53, %v5366_v1  ;;  %v17398_v41 = vcombine.low %v5362_v53, %v5366_v1 }
 0xbfe   : > { %15418 = vmatprep.subr.bf16.mxu1 %v17303_v0  ;;  %v5494_v18 = vld [vmem:[%s18840_s1 + $0x25b8] sm:$0xff] }
 0xbff   : > { %15378 = vmatpush2.bf16.msra.mxu0 %v17174_v51  ;;  %v17527_v8 = vcombine.high %v5490_v2, %v5494_v18  ;;  %v5354_v21 = vld [vmem:[%s18840_s1 + $0x2158] sm:$0xff]  ;;  %v17526_v58 = vcombine.low %v5490_v2, %v5494_v18 }
 0xc00   : > { %15379 = vmatprep.subr.bf16.mxu0 %v17167_v42  ;;  %v5358_v19 = vld [vmem:[%s18840_s1 + $0x2178] sm:$0xff] }
 0xc01   : > { %15419 = vmatpush2.bf16.msra.mxu1 %v17302_v47  ;;  %v5482_v28 = vld [vmem:[%s18840_s1 + $0x2558] sm:$0xff]  ;;  %v17391_v29 = vcombine.high %v5354_v21, %v5358_v19  ;;  %v17390_v47 = vcombine.low %v5354_v21, %v5358_v19 }
 0xc02   : > { %15420 = vmatprep.subr.bf16.mxu1 %v17295_v55  ;;  %v5486_v12 = vld [vmem:[%s18840_s1 + $0x2578] sm:$0xff] }
 0xc03   : > { %15380 = vmatpush2.bf16.msra.mxu0 %v17166_v25  ;;  %v17519_v43 = vcombine.high %v5482_v28, %v5486_v12  ;;  %v5346_v0 = vld [vmem:[%s18840_s1 + $0x2118] sm:$0xff]  ;;  %v17518_v55 = vcombine.low %v5482_v28, %v5486_v12 }
 0xc04   : > { %15381 = vmatprep.subr.bf16.mxu0 %v17159_v37  ;;  %v5350_v63 = vld [vmem:[%s18840_s1 + $0x2138] sm:$0xff] }
 0xc05   : > { %15421 = vmatpush2.bf16.msra.mxu1 %v17294_v46  ;;  %v5474_v14 = vld [vmem:[%s18840_s1 + $0x2518] sm:$0xff]  ;;  %v17383_v34 = vcombine.high %v5346_v0, %v5350_v63  ;;  %v17382_v46 = vcombine.low %v5346_v0, %v5350_v63 }
 0xc06   : > { %15422 = vmatprep.subr.bf16.mxu1 %v17287_v30  ;;  %v5478_v9 = vld [vmem:[%s18840_s1 + $0x2538] sm:$0xff] }
 0xc07   : > { %15382 = vmatpush2.bf16.msra.mxu0 %v17158_v31  ;;  %v17511_v33 = vcombine.high %v5474_v14, %v5478_v9  ;;  %v5338_v16 = vld [vmem:[%s18840_s1 + $0x20d8] sm:$0xff]  ;;  %v17510_v37 = vcombine.low %v5474_v14, %v5478_v9 }
 0xc08   : > { %15433 = vmatprep.subr.bf16.mxu0 %v17407_v61  ;;  %v5466_v15 = vld [vmem:[%s18840_s1 + $0x24d8] sm:$0xff] }
 0xc09   : > { %15423 = vmatpush2.bf16.msra.mxu1 %v17286_v62  ;;  %v5470_v25 = vld [vmem:[%s18840_s1 + $0x24f8] sm:$0xff] }
 0xc0a   : > { %15474 = vmatprep.subr.bf16.mxu1 %v17535_v45  ;;  %v15139_v3 = vpop.f32.mrf.mxu0  ;;  %15384 = vmatmul.mubr.bf16.vlgmr.msra.gmra.mxu0 %v20150_v54  ;;  %v17503_v59 = vcombine.high %v5466_v15, %v5470_v25  ;;  %v5330_v20 = vld [vmem:[%s18840_s1 + $0x2098] sm:$0xff]  ;;  %v17502_v61 = vcombine.low %v5466_v15, %v5470_v25 }
 0xc0b   : > { %v15140_v23 = vadd.f32 %v15139_v3, %v5852_v11  ;;  %15434 = vmatpush1.bf16.msra.mxu0 %v17406_v10  ;;  %15465 = vmatprep.mubr.bf16.mxu0 %v20170_v52  ;;  %v5334_v40 = vld [vmem:[%s18840_s1 + $0x20b8] sm:$0xff] }
 0xc0c   : > { %v15180_v5 = vpop.f32.mrf.mxu1  ;;  %15425 = vmatmul.mubr.bf16.vlgmr.msra.gmra.mxu1 %v20160_v35  ;;  %v15141_v38 = vpop.f32.mrf.mxu0  ;;  %15435 = vmatprep.subr.bf16.mxu0 %v17399_v22  ;;  %v5458_v60 = vld [vmem:[%s18840_s1 + $0x2498] sm:$0xff]  ;;  %v17367_v45 = vcombine.high %v5330_v20, %v5334_v40  ;;  %v17366_v11 = vcombine.low %v5330_v20, %v5334_v40 }
 0xc0d   : > { %15475 = vmatpush1.bf16.msra.mxu1 %v17534_v56  ;;  %v21566_v27 = vadd.f32 %v15180_v5, %v15140_v23  ;;  %v15142_v54 = vadd.f32 %v15141_v38, %v5856_v13  ;;  %15506 = vmatprep.mubr.bf16.mxu1 %v20177_v57  ;;  %v5342_v57 = vld [vmem:[%s18840_s1 + $0x20f8] sm:$0xff] }
 0xc0e   : > { %v15182_v32 = vpop.f32.mrf.mxu1  ;;  %15476 = vmatprep.subr.bf16.mxu1 %v17527_v8  ;;  %v15143_v35 = vpop.f32.mrf.mxu0  ;;  %v17375_v30 = vcombine.high %v5338_v16, %v5342_v57  ;;  %v5462_v31 = vld [vmem:[%s18840_s1 + $0x24b8] sm:$0xff]  ;;  %v17374_v62 = vcombine.low %v5338_v16, %v5342_v57 }
 0xc0f   : > { %v21574_v4 = vadd.f32 %v15182_v32, %v15142_v54  ;;  %15436 = vmatpush1.bf16.msra.mxu0 %v17398_v41  ;;  %v17495_v53 = vcombine.high %v5458_v60, %v5462_v31  ;;  %v5322_v1 = vld [vmem:[%s18840_s1 + $0x2058] sm:$0xff]  ;;  %v17494_v10 = vcombine.low %v5458_v60, %v5462_v31 }
 0xc10   : > { %v15184_v51 = vpop.f32.mrf.mxu1  ;;  %v15144_v42 = vpop.f32.mrf.mxu0  ;;  %15437 = vmatprep.subr.bf16.mxu0 %v17391_v29  ;;  %v5326_v2 = vld [vmem:[%s18840_s1 + $0x2078] sm:$0xff] }
 0xc11   : > { %15477 = vmatpush1.bf16.msra.mxu1 %v17526_v58  ;;  %v5450_v18 = vld [vmem:[%s18840_s1 + $0x2458] sm:$0xff]  ;;  %v17359_v56 = vcombine.high %v5322_v1, %v5326_v2  ;;  %v17358_v3 = vcombine.low %v5322_v1, %v5326_v2 }
 0xc12   : > { %v15185_v52 = vpop.f32.mrf.mxu1  ;;  %15478 = vmatprep.subr.bf16.mxu1 %v17519_v43  ;;  %v5454_v7 = vld [vmem:[%s18840_s1 + $0x2478] sm:$0xff] }
 0xc13   : > { %15438 = vmatpush1.bf16.msra.mxu0 %v17390_v47  ;;  %v17487_v22 = vcombine.high %v5450_v18, %v5454_v7  ;;  %v5314_v13 = vld [vmem:[%s18840_s1 + $0x2018] sm:$0xff]  ;;  %v17486_v28 = vcombine.low %v5450_v18, %v5454_v7 }
 0xc14   : > { %15439 = vmatprep.subr.bf16.mxu0 %v17383_v34  ;;  %v5318_v8 = vld [vmem:[%s18840_s1 + $0x2038] sm:$0xff] }
 0xc15   : > { %15479 = vmatpush1.bf16.msra.mxu1 %v17518_v55  ;;  %v5442_v21 = vld [vmem:[%s18840_s1 + $0x2418] sm:$0xff]  ;;  %v17351_v12 = vcombine.high %v5314_v13, %v5318_v8  ;;  %v17350_v29 = vcombine.low %v5314_v13, %v5318_v8 }
 0xc16   : > { %15480 = vmatprep.subr.bf16.mxu1 %v17511_v33  ;;  %v5446_v19 = vld [vmem:[%s18840_s1 + $0x2438] sm:$0xff] }
 0xc17   : > { %15440 = vmatpush1.bf16.msra.mxu0 %v17382_v46  ;;  %v17479_v23 = vcombine.high %v5442_v21, %v5446_v19  ;;  %v5434_v5 = vld [vmem:[%s18840_s1 + $0x23d8] sm:$0xff]  ;;  %v17478_v54 = vcombine.low %v5442_v21, %v5446_v19 }
 0xc18   : > { %15441 = vmatprep.subr.bf16.mxu0 %v17375_v30  ;;  %v5438_v41 = vld [vmem:[%s18840_s1 + $0x23f8] sm:$0xff] }
 0xc19   : > { %15481 = vmatpush1.bf16.msra.mxu1 %v17510_v37  ;;  %v5562_v38 = vld [vmem:[%s18840_s1 + $0x27d8] sm:$0xff]  ;;  %v17471_v32 = vcombine.high %v5434_v5, %v5438_v41  ;;  %v17470_v9 = vcombine.low %v5434_v5, %v5438_v41 }
 0xc1a   : > { %15482 = vmatprep.subr.bf16.mxu1 %v17503_v59  ;;  %v5566_v58 = vld [vmem:[%s18840_s1 + $0x27f8] sm:$0xff] }
 0xc1b   : > { %15442 = vmatpush1.bf16.msra.mxu0 %v17374_v62  ;;  %v17599_v43 = vcombine.high %v5562_v38, %v5566_v58  ;;  %v5426_v0 = vld [vmem:[%s18840_s1 + $0x2398] sm:$0xff]  ;;  %v17598_v51 = vcombine.low %v5562_v38, %v5566_v58 }
 0xc1c   : > { %15443 = vmatprep.subr.bf16.mxu0 %v17367_v45  ;;  %v5430_v63 = vld [vmem:[%s18840_s1 + $0x23b8] sm:$0xff] }
 0xc1d   : > { %15483 = vmatpush1.bf16.msra.mxu1 %v17502_v61  ;;  %v5554_v35 = vld [vmem:[%s18840_s1 + $0x2798] sm:$0xff]  ;;  %v17463_v47 = vcombine.high %v5426_v0, %v5430_v63  ;;  %v17462_v16 = vcombine.low %v5426_v0, %v5430_v63 }
 0xc1e   : > { %15484 = vmatprep.subr.bf16.mxu1 %v17495_v53  ;;  %v5558_v14 = vld [vmem:[%s18840_s1 + $0x27b8] sm:$0xff] }
 0xc1f   : > { %15444 = vmatpush1.bf16.msra.mxu0 %v17366_v11  ;;  %v17591_v42 = vcombine.high %v5554_v35, %v5558_v14  ;;  %v5418_v55 = vld [vmem:[%s18840_s1 + $0x2358] sm:$0xff]  ;;  %v17590_v57 = vcombine.low %v5554_v35, %v5558_v14 }
 0xc20   : > { %15445 = vmatprep.subr.bf16.mxu0 %v17359_v56  ;;  %v5422_v34 = vld [vmem:[%s18840_s1 + $0x2378] sm:$0xff] }
 0xc21   : > { %15485 = vmatpush1.bf16.msra.mxu1 %v17494_v10  ;;  %v5546_v52 = vld [vmem:[%s18840_s1 + $0x2758] sm:$0xff]  ;;  %v17455_v15 = vcombine.high %v5418_v55, %v5422_v34  ;;  %v17454_v20 = vcombine.low %v5418_v55, %v5422_v34 }
 0xc22   : > { %15486 = vmatprep.subr.bf16.mxu1 %v17487_v22  ;;  %v5550_v33 = vld [vmem:[%s18840_s1 + $0x2778] sm:$0xff] }
 0xc23   : > { %15446 = vmatpush1.bf16.msra.mxu0 %v17358_v3  ;;  %v17583_v25 = vcombine.high %v5546_v52, %v5550_v33  ;;  %v5410_v46 = vld [vmem:[%s18840_s1 + $0x2318] sm:$0xff]  ;;  %v17582_v40 = vcombine.low %v5546_v52, %v5550_v33 }
 0xc24   : > { %15447 = vmatprep.subr.bf16.mxu0 %v17351_v12  ;;  %v5414_v37 = vld [vmem:[%s18840_s1 + $0x2338] sm:$0xff] }
 0xc25   : > { %15487 = vmatpush1.bf16.msra.mxu1 %v17486_v28  ;;  %v5538_v30 = vld [vmem:[%s18840_s1 + $0x2718] sm:$0xff]  ;;  %v17447_v60 = vcombine.high %v5410_v46, %v5414_v37  ;;  %v17446_v1 = vcombine.low %v5410_v46, %v5414_v37 }
 0xc26   : > { %15488 = vmatprep.subr.bf16.mxu1 %v17479_v23  ;;  %v5542_v59 = vld [vmem:[%s18840_s1 + $0x2738] sm:$0xff] }
 0xc27   : > { %15448 = vmatpush1.bf16.msra.mxu0 %v17350_v29  ;;  %v17575_v31 = vcombine.high %v5538_v30, %v5542_v59  ;;  %v5402_v62 = vld [vmem:[%s18840_s1 + $0x22d8] sm:$0xff]  ;;  %v17574_v2 = vcombine.low %v5538_v30, %v5542_v59 }
 0xc28   : > { %15449 = vmatprep.subr.bf16.mxu0 %v17471_v32  ;;  %v5406_v61 = vld [vmem:[%s18840_s1 + $0x22f8] sm:$0xff] }
 0xc29   : > { %15489 = vmatpush1.bf16.msra.mxu1 %v17478_v54  ;;  %v5530_v45 = vld [vmem:[%s18840_s1 + $0x26d8] sm:$0xff]  ;;  %v17439_v18 = vcombine.high %v5402_v62, %v5406_v61  ;;  %v17438_v13 = vcombine.low %v5402_v62, %v5406_v61 }
 0xc2a   : > { %15490 = vmatprep.subr.bf16.mxu1 %v17599_v43  ;;  %v5534_v53 = vld [vmem:[%s18840_s1 + $0x26f8] sm:$0xff] }
 0xc2b   : > { %15450 = vmatpush2.bf16.msra.mxu0 %v17470_v9  ;;  %v17567_v7 = vcombine.high %v5530_v45, %v5534_v53  ;;  %v5394_v11 = vld [vmem:[%s18840_s1 + $0x2298] sm:$0xff]  ;;  %v17566_v8 = vcombine.low %v5530_v45, %v5534_v53 }
 0xc2c   : > { %15451 = vmatprep.subr.bf16.mxu0 %v17463_v47  ;;  %v5398_v10 = vld [vmem:[%s18840_s1 + $0x22b8] sm:$0xff] }
 0xc2d   : > { %15491 = vmatpush2.bf16.msra.mxu1 %v17598_v51  ;;  %v5522_v56 = vld [vmem:[%s18840_s1 + $0x2698] sm:$0xff]  ;;  %v17431_v21 = vcombine.high %v5394_v11, %v5398_v10  ;;  %v17430_v5 = vcombine.low %v5394_v11, %v5398_v10 }
 0xc2e   : > { %15492 = vmatprep.subr.bf16.mxu1 %v17591_v42  ;;  %v5526_v22 = vld [vmem:[%s18840_s1 + $0x26b8] sm:$0xff] }
 0xc2f   : > { %15452 = vmatpush2.bf16.msra.mxu0 %v17462_v16  ;;  %v17559_v19 = vcombine.high %v5522_v56, %v5526_v22  ;;  %v5386_v3 = vld [vmem:[%s18840_s1 + $0x2258] sm:$0xff]  ;;  %v17558_v41 = vcombine.low %v5522_v56, %v5526_v22 }
 0xc30   : > { %15453 = vmatprep.subr.bf16.mxu0 %v17455_v15  ;;  %v5390_v28 = vld [vmem:[%s18840_s1 + $0x2278] sm:$0xff] }
 0xc31   : > { %15493 = vmatpush2.bf16.msra.mxu1 %v17590_v57  ;;  %v5514_v12 = vld [vmem:[%s18840_s1 + $0x2658] sm:$0xff]  ;;  %v17423_v38 = vcombine.high %v5386_v3, %v5390_v28  ;;  %v17422_v0 = vcombine.low %v5386_v3, %v5390_v28 }
 0xc32   : > { %15494 = vmatprep.subr.bf16.mxu1 %v17583_v25  ;;  %v5518_v23 = vld [vmem:[%s18840_s1 + $0x2678] sm:$0xff] }
 0xc33   : > { %15454 = vmatpush2.bf16.msra.mxu0 %v17454_v20  ;;  %v17551_v58 = vcombine.high %v5514_v12, %v5518_v23  ;;  %v5378_v29 = vld [vmem:[%s18840_s1 + $0x2218] sm:$0xff]  ;;  %v17550_v63 = vcombine.low %v5514_v12, %v5518_v23 }
 0xc34   : > { %15455 = vmatprep.subr.bf16.mxu0 %v17447_v60  ;;  %v5382_v54 = vld [vmem:[%s18840_s1 + $0x2238] sm:$0xff] }
 0xc35   : > { %15495 = vmatpush2.bf16.msra.mxu1 %v17582_v40  ;;  %v5506_v32 = vld [vmem:[%s18840_s1 + $0x2618] sm:$0xff]  ;;  %v17415_v35 = vcombine.high %v5378_v29, %v5382_v54  ;;  %v17414_v55 = vcombine.low %v5378_v29, %v5382_v54 }
 0xc36   : > { %15496 = vmatprep.subr.bf16.mxu1 %v17575_v31  ;;  %v5510_v43 = vld [vmem:[%s18840_s1 + $0x2638] sm:$0xff] }
 0xc37   : > { %15456 = vmatpush2.bf16.msra.mxu0 %v17446_v1  ;;  %v17543_v14 = vcombine.high %v5506_v32, %v5510_v43  ;;  %v5626_v9 = vld [vmem:[%s18840_s1 + $0x29d8] sm:$0xff]  ;;  %v17542_v34 = vcombine.low %v5506_v32, %v5510_v43 }
 0xc38   : > { %15457 = vmatprep.subr.bf16.mxu0 %v17439_v18  ;;  %v5630_v51 = vld [vmem:[%s18840_s1 + $0x29f8] sm:$0xff] }
 0xc39   : > { %15497 = vmatpush2.bf16.msra.mxu1 %v17574_v2  ;;  %v5754_v47 = vld [vmem:[%s18840_s1 + $0x2dd8] sm:$0xff]  ;;  %v17663_v52 = vcombine.high %v5626_v9, %v5630_v51  ;;  %v17662_v46 = vcombine.low %v5626_v9, %v5630_v51 }
 0xc3a   : > { %15498 = vmatprep.subr.bf16.mxu1 %v17567_v7  ;;  %v5758_v42 = vld [vmem:[%s18840_s1 + $0x2df8] sm:$0xff] }
 0xc3b   : > { %15458 = vmatpush2.bf16.msra.mxu0 %v17438_v13  ;;  %v17791_v33 = vcombine.high %v5754_v47, %v5758_v42  ;;  %v5618_v16 = vld [vmem:[%s18840_s1 + $0x2998] sm:$0xff]  ;;  %v17790_v37 = vcombine.low %v5754_v47, %v5758_v42 }
 0xc3c   : > { %15459 = vmatprep.subr.bf16.mxu0 %v17431_v21  ;;  %v5622_v57 = vld [vmem:[%s18840_s1 + $0x29b8] sm:$0xff] }
 0xc3d   : > { %15499 = vmatpush2.bf16.msra.mxu1 %v17566_v8  ;;  %v5746_v15 = vld [vmem:[%s18840_s1 + $0x2d98] sm:$0xff]  ;;  %v17655_v30 = vcombine.high %v5618_v16, %v5622_v57  ;;  %v17654_v53 = vcombine.low %v5618_v16, %v5622_v57 }
 0xc3e   : > { %15500 = vmatprep.subr.bf16.mxu1 %v17559_v19  ;;  %v5750_v25 = vld [vmem:[%s18840_s1 + $0x2db8] sm:$0xff] }
 0xc3f   : > { %15460 = vmatpush2.bf16.msra.mxu0 %v17430_v5  ;;  %v17783_v59 = vcombine.high %v5746_v15, %v5750_v25  ;;  %v5610_v20 = vld [vmem:[%s18840_s1 + $0x2958] sm:$0xff]  ;;  %v17782_v2 = vcombine.low %v5746_v15, %v5750_v25 }
 0xc40   : > { %15461 = vmatprep.subr.bf16.mxu0 %v17423_v38  ;;  %v5614_v40 = vld [vmem:[%s18840_s1 + $0x2978] sm:$0xff] }
 0xc41   : > { %15501 = vmatpush2.bf16.msra.mxu1 %v17558_v41  ;;  %v5738_v31 = vld [vmem:[%s18840_s1 + $0x2d58] sm:$0xff]  ;;  %v17647_v18 = vcombine.high %v5610_v20, %v5614_v40 }
 0xc42   : > { %15502 = vmatprep.subr.bf16.mxu1 %v17551_v58  ;;  %v5742_v62 = vld [vmem:[%s18840_s1 + $0x2d78] sm:$0xff] }
 0xc43   : > { %15462 = vmatpush2.bf16.msra.mxu0 %v17422_v0  ;;  %v5602_v10 = vld [vmem:[%s18840_s1 + $0x2918] sm:$0xff]  ;;  %v17774_v3 = vcombine.low %v5738_v31, %v5742_v62 }
 0xc44   : > { %15463 = vmatprep.subr.bf16.mxu0 %v17415_v35  ;;  %v5606_v56 = vld [vmem:[%s18840_s1 + $0x2938] sm:$0xff] }
 0xc45   : > { %15503 = vmatpush2.bf16.msra.mxu1 %v17550_v63  ;;  %v5730_v22 = vld [vmem:[%s18840_s1 + $0x2d18] sm:$0xff]  ;;  %v17639_v28 = vcombine.high %v5602_v10, %v5606_v56  ;;  %v17638_v38 = vcombine.low %v5602_v10, %v5606_v56 }
 0xc46   : > { %15504 = vmatprep.subr.bf16.mxu1 %v17543_v14  ;;  %v5734_v13 = vld [vmem:[%s18840_s1 + $0x2d38] sm:$0xff] }
 0xc47   : > { %15464 = vmatpush2.bf16.msra.mxu0 %v17414_v55  ;;  %v17767_v12 = vcombine.high %v5730_v22, %v5734_v13  ;;  %v5594_v23 = vld [vmem:[%s18840_s1 + $0x28d8] sm:$0xff]  ;;  %v17766_v58 = vcombine.low %v5730_v22, %v5734_v13 }
 0xc48   : > { %15515 = vmatprep.subr.bf16.mxu0 %v17663_v52  ;;  %v5722_v5 = vld [vmem:[%s18840_s1 + $0x2cd8] sm:$0xff] }
 0xc49   : > { %15505 = vmatpush2.bf16.msra.mxu1 %v17542_v34  ;;  %v5726_v41 = vld [vmem:[%s18840_s1 + $0x2cf8] sm:$0xff] }
 0xc4a   : > { %15556 = vmatprep.subr.bf16.mxu1 %v17791_v33  ;;  %v15221_v60 = vpop.f32.mrf.mxu0  ;;  %15466 = vmatmul.mubr.bf16.vlgmr.msra.gmra.mxu0 %v20246_v50  ;;  %v17759_v54 = vcombine.high %v5722_v5, %v5726_v41  ;;  %v5586_v32 = vld [vmem:[%s18840_s1 + $0x2898] sm:$0xff]  ;;  %v17758_v14 = vcombine.low %v5722_v5, %v5726_v41 }
 0xc4b   : > { %v15222_v61 = vadd.f32 %v15221_v60, %v21566_v27  ;;  %15516 = vmatpush1.bf16.msra.mxu0 %v17662_v46  ;;  %v17775_v27 = vcombine.high %v5738_v31, %v5742_v62  ;;  %15547 = vmatprep.mubr.bf16.mxu0 %v20262_v48  ;;  %v5590_v43 = vld [vmem:[%s18840_s1 + $0x28b8] sm:$0xff] }
 0xc4c   : > { %v15262_v45 = vpop.f32.mrf.mxu1  ;;  %15507 = vmatmul.mubr.bf16.vlgmr.msra.gmra.mxu1 %v20254_v24  ;;  %v15223_v1 = vpop.f32.mrf.mxu0  ;;  %15517 = vmatprep.subr.bf16.mxu0 %v17655_v30  ;;  %v5714_v0 = vld [vmem:[%s18840_s1 + $0x2c98] sm:$0xff]  ;;  %v17623_v9 = vcombine.high %v5586_v32, %v5590_v43  ;;  %v17622_v52 = vcombine.low %v5586_v32, %v5590_v43 }
 0xc4d   : > { %15557 = vmatpush1.bf16.msra.mxu1 %v17790_v37  ;;  %v21639_v7 = vadd.f32 %v15262_v45, %v15222_v61  ;;  %v15224_v50 = vadd.f32 %v15223_v1, %v21574_v4  ;;  %15588 = vmatprep.mubr.bf16.mxu1 %v20269_v39  ;;  %v17646_v4 = vcombine.low %v5610_v20, %v5614_v40  ;;  %v5598_v39 = vld [vmem:[%s18840_s1 + $0x28f8] sm:$0xff] }
 0xc4e   : > { %v15264_v11 = vpop.f32.mrf.mxu1  ;;  %15558 = vmatprep.subr.bf16.mxu1 %v17783_v59  ;;  %v15225_v24 = vpop.f32.mrf.mxu0  ;;  %v17631_v29 = vcombine.high %v5594_v23, %v5598_v39  ;;  %v5718_v63 = vld [vmem:[%s18840_s1 + $0x2cb8] sm:$0xff]  ;;  %v17630_v35 = vcombine.low %v5594_v23, %v5598_v39 }
 0xc4f   : > { %v21648_v8 = vadd.f32 %v15264_v11, %v15224_v50  ;;  %15518 = vmatpush1.bf16.msra.mxu0 %v17654_v53  ;;  %v17751_v51 = vcombine.high %v5714_v0, %v5718_v63  ;;  %v5578_v47 = vld [vmem:[%s18840_s1 + $0x2858] sm:$0xff]  ;;  %v17750_v33 = vcombine.low %v5714_v0, %v5718_v63 }
 0xc50   : > { %v15266_v21 = vpop.f32.mrf.mxu1  ;;  %v15226_v19 = vpop.f32.mrf.mxu0  ;;  %15519 = vmatprep.subr.bf16.mxu0 %v17647_v18  ;;  %v5582_v42 = vld [vmem:[%s18840_s1 + $0x2878] sm:$0xff] }
 0xc51   : > { %15559 = vmatpush1.bf16.msra.mxu1 %v17782_v2  ;;  %v5706_v55 = vld [vmem:[%s18840_s1 + $0x2c58] sm:$0xff]  ;;  %v17615_v16 = vcombine.high %v5578_v47, %v5582_v42  ;;  %v17614_v30 = vcombine.low %v5578_v47, %v5582_v42 }
 0xc52   : > { %v15267_v48 = vpop.f32.mrf.mxu1  ;;  %15560 = vmatprep.subr.bf16.mxu1 %v17775_v27  ;;  %v5710_v34 = vld [vmem:[%s18840_s1 + $0x2c78] sm:$0xff] }
 0xc53   : > { %15520 = vmatpush1.bf16.msra.mxu0 %v17646_v4  ;;  %v17743_v57 = vcombine.high %v5706_v55, %v5710_v34  ;;  %v5570_v15 = vld [vmem:[%s18840_s1 + $0x2818] sm:$0xff]  ;;  %v17742_v59 = vcombine.low %v5706_v55, %v5710_v34 }
 0xc54   : > { %15521 = vmatprep.subr.bf16.mxu0 %v17639_v28  ;;  %v5574_v25 = vld [vmem:[%s18840_s1 + $0x2838] sm:$0xff] }
 0xc55   : > { %15561 = vmatpush1.bf16.msra.mxu1 %v17774_v3  ;;  %v5698_v46 = vld [vmem:[%s18840_s1 + $0x2c18] sm:$0xff]  ;;  %v17607_v20 = vcombine.high %v5570_v15, %v5574_v25  ;;  %v17606_v45 = vcombine.low %v5570_v15, %v5574_v25 }
 0xc56   : > { %15562 = vmatprep.subr.bf16.mxu1 %v17767_v12  ;;  %v5702_v37 = vld [vmem:[%s18840_s1 + $0x2c38] sm:$0xff] }
 0xc57   : > { %15522 = vmatpush1.bf16.msra.mxu0 %v17638_v38  ;;  %v17735_v40 = vcombine.high %v5698_v46, %v5702_v37  ;;  %v5690_v60 = vld [vmem:[%s18840_s1 + $0x2bd8] sm:$0xff]  ;;  %v17734_v53 = vcombine.low %v5698_v46, %v5702_v37 }
 0xc58   : > { %15523 = vmatprep.subr.bf16.mxu0 %v17631_v29  ;;  %v5694_v31 = vld [vmem:[%s18840_s1 + $0x2bf8] sm:$0xff] }
 0xc59   : > { %15563 = vmatpush1.bf16.msra.mxu1 %v17766_v58  ;;  %v5818_v62 = vld [vmem:[%s18840_s1 + $0x2fd8] sm:$0xff]  ;;  %v17727_v1 = vcombine.high %v5690_v60, %v5694_v31  ;;  %v17726_v10 = vcombine.low %v5690_v60, %v5694_v31 }
 0xc5a   : > { %15564 = vmatprep.subr.bf16.mxu1 %v17759_v54  ;;  %v5822_v61 = vld [vmem:[%s18840_s1 + $0x2ff8] sm:$0xff] }
 0xc5b   : > { %15524 = vmatpush1.bf16.msra.mxu0 %v17630_v35  ;;  %v17855_v2 = vcombine.high %v5818_v62, %v5822_v61  ;;  %v5682_v18 = vld [vmem:[%s18840_s1 + $0x2b98] sm:$0xff]  ;;  %v17854_v56 = vcombine.low %v5818_v62, %v5822_v61 }
 0xc5c   : > { %15525 = vmatprep.subr.bf16.mxu0 %v17623_v9  ;;  %v5686_v50 = vld [vmem:[%s18840_s1 + $0x2bb8] sm:$0xff] }
 0xc5d   : > { %15565 = vmatpush1.bf16.msra.mxu1 %v17758_v14  ;;  %v5810_v11 = vld [vmem:[%s18840_s1 + $0x2f98] sm:$0xff]  ;;  %v17719_v24 = vcombine.high %v5682_v18, %v5686_v50  ;;  %v17718_v3 = vcombine.low %v5682_v18, %v5686_v50 }
 0xc5e   : > { %15566 = vmatprep.subr.bf16.mxu1 %v17751_v51  ;;  %v5814_v27 = vld [vmem:[%s18840_s1 + $0x2fb8] sm:$0xff] }
 0xc5f   : > { %15526 = vmatpush1.bf16.msra.mxu0 %v17622_v52  ;;  %v17847_v22 = vcombine.high %v5810_v11, %v5814_v27  ;;  %v5674_v13 = vld [vmem:[%s18840_s1 + $0x2b58] sm:$0xff]  ;;  %v17846_v28 = vcombine.low %v5810_v11, %v5814_v27 }
 0xc60   : > { %15527 = vmatprep.subr.bf16.mxu0 %v17615_v16  ;;  %v5678_v21 = vld [vmem:[%s18840_s1 + $0x2b78] sm:$0xff] }
 0xc61   : > { %15567 = vmatpush1.bf16.msra.mxu1 %v17750_v33  ;;  %v5802_v4 = vld [vmem:[%s18840_s1 + $0x2f58] sm:$0xff]  ;;  %v17711_v48 = vcombine.high %v5674_v13, %v5678_v21  ;;  %v17710_v38 = vcombine.low %v5674_v13, %v5678_v21 }
 0xc62   : > { %15568 = vmatprep.subr.bf16.mxu1 %v17743_v57  ;;  %v5806_v19 = vld [vmem:[%s18840_s1 + $0x2f78] sm:$0xff] }
 0xc63   : > { %15528 = vmatpush1.bf16.msra.mxu0 %v17614_v30  ;;  %v17839_v12 = vcombine.high %v5802_v4, %v5806_v19  ;;  %v5666_v23 = vld [vmem:[%s18840_s1 + $0x2b18] sm:$0xff]  ;;  %v17838_v58 = vcombine.low %v5802_v4, %v5806_v19 }
 0xc64   : > { %15529 = vmatprep.subr.bf16.mxu0 %v17607_v20  ;;  %v5670_v39 = vld [vmem:[%s18840_s1 + $0x2b38] sm:$0xff] }
 0xc65   : > { %15569 = vmatpush1.bf16.msra.mxu1 %v17742_v59  ;;  %v5794_v5 = vld [vmem:[%s18840_s1 + $0x2f18] sm:$0xff]  ;;  %v17703_v29 = vcombine.high %v5666_v23, %v5670_v39  ;;  %v17702_v35 = vcombine.low %v5666_v23, %v5670_v39 }
 0xc66   : > { %15570 = vmatprep.subr.bf16.mxu1 %v17735_v40  ;;  %v5798_v41 = vld [vmem:[%s18840_s1 + $0x2f38] sm:$0xff] }
 0xc67   : > { %15530 = vmatpush1.bf16.msra.mxu0 %v17606_v45  ;;  %v17831_v54 = vcombine.high %v5794_v5, %v5798_v41  ;;  %v5658_v32 = vld [vmem:[%s18840_s1 + $0x2ad8] sm:$0xff]  ;;  %v17830_v14 = vcombine.low %v5794_v5, %v5798_v41 }
 0xc68   : > { %15531 = vmatprep.subr.bf16.mxu0 %v17727_v1  ;;  %v5662_v43 = vld [vmem:[%s18840_s1 + $0x2af8] sm:$0xff] }
 0xc69   : > { %15571 = vmatpush1.bf16.msra.mxu1 %v17734_v53  ;;  %v5786_v0 = vld [vmem:[%s18840_s1 + $0x2ed8] sm:$0xff]  ;;  %v17695_v9 = vcombine.high %v5658_v32, %v5662_v43  ;;  %v17694_v52 = vcombine.low %v5658_v32, %v5662_v43 }
 0xc6a   : > { %15572 = vmatprep.subr.bf16.mxu1 %v17855_v2  ;;  %v5790_v63 = vld [vmem:[%s18840_s1 + $0x2ef8] sm:$0xff] }
 0xc6b   : > { %15532 = vmatpush2.bf16.msra.mxu0 %v17726_v10  ;;  %v17823_v51 = vcombine.high %v5786_v0, %v5790_v63  ;;  %v5650_v47 = vld [vmem:[%s18840_s1 + $0x2a98] sm:$0xff]  ;;  %v17822_v33 = vcombine.low %v5786_v0, %v5790_v63 }
 0xc6c   : > { %15533 = vmatprep.subr.bf16.mxu0 %v17719_v24  ;;  %v5654_v42 = vld [vmem:[%s18840_s1 + $0x2ab8] sm:$0xff] }
 0xc6d   : > { %15573 = vmatpush2.bf16.msra.mxu1 %v17854_v56  ;;  %v5778_v55 = vld [vmem:[%s18840_s1 + $0x2e98] sm:$0xff]  ;;  %v17687_v16 = vcombine.high %v5650_v47, %v5654_v42  ;;  %v17686_v30 = vcombine.low %v5650_v47, %v5654_v42 }
 0xc6e   : > { %15574 = vmatprep.subr.bf16.mxu1 %v17847_v22  ;;  %v5782_v34 = vld [vmem:[%s18840_s1 + $0x2eb8] sm:$0xff] }
 0xc6f   : > { %15534 = vmatpush2.bf16.msra.mxu0 %v17718_v3  ;;  %v17815_v57 = vcombine.high %v5778_v55, %v5782_v34  ;;  %v5642_v15 = vld [vmem:[%s18840_s1 + $0x2a58] sm:$0xff]  ;;  %v17814_v59 = vcombine.low %v5778_v55, %v5782_v34 }
 0xc70   : > { %15535 = vmatprep.subr.bf16.mxu0 %v17711_v48  ;;  %v5646_v25 = vld [vmem:[%s18840_s1 + $0x2a78] sm:$0xff] }
 0xc71   : > { %15575 = vmatpush2.bf16.msra.mxu1 %v17846_v28  ;;  %v5770_v46 = vld [vmem:[%s18840_s1 + $0x2e58] sm:$0xff]  ;;  %v17679_v20 = vcombine.high %v5642_v15, %v5646_v25  ;;  %v17678_v45 = vcombine.low %v5642_v15, %v5646_v25 }
 0xc72   : > { %15576 = vmatprep.subr.bf16.mxu1 %v17839_v12  ;;  %v5774_v37 = vld [vmem:[%s18840_s1 + $0x2e78] sm:$0xff] }
 0xc73   : > { %15536 = vmatpush2.bf16.msra.mxu0 %v17710_v38  ;;  %v17807_v40 = vcombine.high %v5770_v46, %v5774_v37  ;;  %v5634_v60 = vld [vmem:[%s18840_s1 + $0x2a18] sm:$0xff]  ;;  %v17806_v53 = vcombine.low %v5770_v46, %v5774_v37 }
 0xc74   : > { %15537 = vmatprep.subr.bf16.mxu0 %v17703_v29  ;;  %v5638_v31 = vld [vmem:[%s18840_s1 + $0x2a38] sm:$0xff] }
 0xc75   : > { %15577 = vmatpush2.bf16.msra.mxu1 %v17838_v58  ;;  %v5762_v62 = vld [vmem:[%s18840_s1 + $0x2e18] sm:$0xff]  ;;  %v17671_v1 = vcombine.high %v5634_v60, %v5638_v31  ;;  %v17670_v18 = vcombine.low %v5634_v60, %v5638_v31 }
 0xc76   : > { %15578 = vmatprep.subr.bf16.mxu1 %v17831_v54  ;;  %v5766_v61 = vld [vmem:[%s18840_s1 + $0x2e38] sm:$0xff] }
 0xc77   : > { %15538 = vmatpush2.bf16.msra.mxu0 %v17702_v35  ;;  %v17799_v2 = vcombine.high %v5762_v62, %v5766_v61  ;;  %v17798_v50 = vcombine.low %v5762_v62, %v5766_v61 }
 0xc78   : > { %15539 = vmatprep.subr.bf16.mxu0 %v17695_v9 }
 0xc79   : > { %15579 = vmatpush2.bf16.msra.mxu1 %v17830_v14 }
 0xc7a   : > { %15580 = vmatprep.subr.bf16.mxu1 %v17823_v51 }
 0xc7b   : > { %15540 = vmatpush2.bf16.msra.mxu0 %v17694_v52 }
 0xc7c   : > { %15541 = vmatprep.subr.bf16.mxu0 %v17687_v16 }
 0xc7d   : > { %15581 = vmatpush2.bf16.msra.mxu1 %v17822_v33 }
 0xc7e   : > { %15582 = vmatprep.subr.bf16.mxu1 %v17815_v57  ;;  %v18059_v57 = vld [vmem:[%s18848_s5] sm:$0xff] }
 0xc7f   : > { %15542 = vmatpush2.bf16.msra.mxu0 %v17686_v30  ;;  %v15634_v15 = vrot.slane %v18059_v57, %v5851_v44  ;;  %v15664_v44 = vld [vmem:[%s21867_s30] sm:$0xff] }
 0xc80   : > { %15543 = vmatprep.subr.bf16.mxu0 %v17679_v20 }
 0xc81   : > { %15583 = vmatpush2.bf16.msra.mxu1 %v17814_v59 }
 0xc82   : > { %15584 = vmatprep.subr.bf16.mxu1 %v17807_v40  ;;  %v15638_v40 = vrot.slane %v18059_v57, %v5855_v6 }
 0xc83   : > { %15544 = vmatpush2.bf16.msra.mxu0 %v17678_v45 }
 0xc84   : > { %15545 = vmatprep.subr.bf16.mxu0 %v17671_v1 }
 0xc85   : > { %15585 = vmatpush2.bf16.msra.mxu1 %v17806_v53 }
 0xc86   : > { %15586 = vmatprep.subr.bf16.mxu1 %v17799_v2 }
 0xc87   : > { %15546 = vmatpush2.bf16.msra.mxu0 %v17670_v18 }
 0xc89   : > { %15587 = vmatpush2.bf16.msra.mxu1 %v17798_v50 }
 0xc8a   : > { %v15303_v11 = vpop.f32.mrf.mxu0  ;;  %15548 = vmatmul.mubr.bf16.vlgmr.msra.gmra.mxu0 %v20340_v26 }
 0xc8b   : > { %v15304_v27 = vadd.f32 %v15303_v11, %v21639_v7 }
 0xc8c   : > { %v15344_v10 = vpop.f32.mrf.mxu1  ;;  %15589 = vmatmul.mubr.bf16.vlgmr.msra.gmra.mxu1 %v20346_v49  ;;  %v15305_v56 = vpop.f32.mrf.mxu0 }
 0xc8d   : > { %v15345_v24 = vadd.f32 %v15344_v10, %v15304_v27  ;;  %v15306_v22 = vadd.f32 %v15305_v56, %v21648_v8 }
 0xc8e   : > { %v15346_v13 = vpop.f32.mrf.mxu1  ;;  %v15307_v21 = vpop.f32.mrf.mxu0 }
 0xc8f   : > { %v15347_v4 = vadd.f32 %v15346_v13, %v15306_v22 }
 0xc90   : > { %v15348_v19 = vpop.f32.mrf.mxu1  ;;  %v15308_v3 = vpop.f32.mrf.mxu0 }
 0xc92   : > { %v15349_v28 = vpop.f32.mrf.mxu1 }
 0xcca   : > { %v15385_v48 = vpop.f32.mrf.mxu0 }
 0xccb   : > { %v15386_v12 = vadd.f32 %v15385_v48, %v15345_v24 }
 0xccc   : > { %v15426_v23 = vpop.f32.mrf.mxu1  ;;  %v15387_v39 = vpop.f32.mrf.mxu0 }
 0xccd   : > { %v15427_v26 = vadd.f32 %v15426_v23, %v15386_v12  ;;  %v15388_v5 = vadd.f32 %v15387_v39, %v15347_v4 }
 0xcce   : > { %v15428_v7 = vpop.f32.mrf.mxu1  ;;  %v15389_v41 = vpop.f32.mrf.mxu0 }
 0xccf   : > { %v15429_v38 = vadd.f32 %v15428_v7, %v15388_v5 }
 0xcd0   : > { %v15430_v49 = vpop.f32.mrf.mxu1  ;;  %v15390_v58 = vpop.f32.mrf.mxu0 }
 0xcd2   : > { %v15431_v29 = vpop.f32.mrf.mxu1 }
 0xd0a   : > { %v15467_v54 = vpop.f32.mrf.mxu0 }
 0xd0b   : > { %v15468_v9 = vadd.f32 %v15467_v54, %v15427_v26 }
 0xd0c   : > { %v15508_v8 = vpop.f32.mrf.mxu1  ;;  %v15469_v32 = vpop.f32.mrf.mxu0 }
 0xd0d   : > { %v15470_v51 = vadd.f32 %v15469_v32, %v15429_v38  ;;  %v15509_v47 = vadd.f32 %v15508_v8, %v15468_v9 }
 0xd0e   : > { %v15510_v43 = vpop.f32.mrf.mxu1  ;;  %v15471_v0 = vpop.f32.mrf.mxu0 }
 0xd0f   : > { %v15511_v55 = vadd.f32 %v15510_v43, %v15470_v51 }
 0xd10   : > { %v15512_v63 = vpop.f32.mrf.mxu1  ;;  %v15472_v35 = vpop.f32.mrf.mxu0 }
 0xd12   : > { %v15513_v14 = vpop.f32.mrf.mxu1 }
 0xd4a   : > { %v15549_v42 = vpop.f32.mrf.mxu0 }
 0xd4b   : > { %v15550_v34 = vadd.f32 %v15549_v42, %v15509_v47 }
 0xd4c   : > { %v15590_v52 = vpop.f32.mrf.mxu1  ;;  %v15551_v33 = vpop.f32.mrf.mxu0 }
 0xd4d   : > { %v15591_v16 = vadd.f32 %v15590_v52, %v15550_v34  ;;  %v15552_v25 = vadd.f32 %v15551_v33, %v15511_v55 }
 0xd4e   : > { %v15592_v46 = vpop.f32.mrf.mxu1  ;;  %v15553_v37 = vpop.f32.mrf.mxu0 }
 0xd4f   : > { %v15603_v30 = vmax.f32 %v15591_v16, 0.0  ;;  %v15593_v59 = vadd.f32 %v15592_v46, %v15552_v25 }
 0xd50   : > { %v15594_v20 = vpop.f32.mrf.mxu1  ;;  %v15554_v60 = vpop.f32.mrf.mxu0 }
 0xd51   : > { %v15653_v31 = vmul.f32 %v15634_v15, %v15603_v30  ;;  %v15604_v62 = vmax.f32 %v15593_v59, 0.0 }
 0xd52   : > { %v15595_v61 = vpop.f32.mrf.mxu1 }
 0xd53   : > { %v15654_v45 = vmul.f32 %v15638_v40, %v15604_v62  ;;  %v15660_v53 = vadd.f32 %v21501_v36, %v15653_v31 }
 0xd55   : > { %v15661_v1 = vadd.f32 %v15660_v53, %v15654_v45 }
 0xd57   : > { %15662 = vadd.xlane.f32.xlu0 %v15661_v1 }
 0xde0   : > { %v15663_v2 = vpop.xlane.xlu0 %15662 }
 0xde1   : > { %v15665_v18 = vadd.f32 %v15664_v44, %v15663_v2 }
 0xde3   : > { %15667 = vst.msk [vmem:[%s21867_s30] sm:$0xff] %vm15666_vm1, %v15665_v18 }
 0xde4 PF: > { %s21868_s24 = sld [smem:[#allocation31_spill]]  ;;  %s21874_s23 = smov %s18404_s10 }
 0xde5   : > { %s21869_s19 = sld [smem:[#allocation28_spill]] }
 0xde6   : > { %s21870_s20 = sld [smem:[#allocation29_spill]] }
 0xde7   : > { %s21871_s21 = sld [smem:[#allocation35_spill]] }
 0xde8   : > { %s21872_s22 = sld [smem:[#allocation30_spill]] }
 0xde9   : > { %s21873_s14 = sld [smem:[#allocation33_spill]] }
 0xdea   : > { %p32_p10 = scmp.ge.s32.totalorder %s21868_s24, 8  }
 0xdec   :  { %34 = sbr.rel (!%p32_p10) target bundleno = 17 (0x11), region = 188 }
 0xdef   : > { %s21875_s10 = smov %s21873_s14 }
 0xdf1   :  { %15679 = vsyncpa [#allocation7], 1 }
 0xdf2   :  { %15681 = vsyncpa [#allocation7 + $0x1], 1 }
 0xdf3   :  { %15682 = vsyncpa [#allocation9], 1 }
 0xdf4   :  { %15683 = vsyncpa [#allocation12], 1 }
 0xdf5   :  { %15685 = vsyncpa [#allocation12 + $0x1], 1 }
 0xdf6   :  { %15686 = vsyncpa [#allocation15], 1 }
 0xdf7   :  { %15687 = vsyncpa [#allocation18], 1 }
 0xdf8   :  { %15689 = vsyncpa [#allocation18 + $0x1], 1 }
 0xdf9   :  { %15690 = vsyncpa [#allocation21], 1 }
 0xdfa   :  { %15692 = vsyncpa [#allocation21 + $0x1], 1 }

</bundles_post_ra>
